<compile_context>
chip_gen: v7x
topology: tpu7x:2x2x1
jax: 0.10.0
libtpu: 0.0.40
codegen_flags: <defaults>
</compile_context>

<pallas_src>
import jax
import jax.numpy as jnp
from jax.experimental import pallas as pl
from jax.experimental.pallas import tpu as pltpu


# ------------------------- fused Pallas forward pass -------------------------

def dynamic_conv_net_forward(x_nchw, kernels, num_kernels, kernel_sizes,
                             bn_gammas, bn_betas):
    N, C0, H, W = x_nchw.shape
    L = len(num_kernels)
    assert all(k % 2 == 1 for k in kernel_sizes), "'same' padding assumes odd kernels"
    assert C0 == 1, "torch module views the first conv weight with Cin=1"

    pads = [(k - 1) // 2 for k in kernel_sizes]
    P = max(pads)                       # uniform halo used by every layer buffer
    Wp = W + 2 * P
    Hp = H + 2 * P
    span = H * Wp                       # accumulator length (stride Wp; cols >= W are junk)
    lflat = ((Hp * Wp + 2 * P + 127) // 128) * 128   # lane-aligned, covers max tap offset

    cins = [1] + list(num_kernels[:-1])
    couts = list(num_kernels)

    # flat-weight layer offsets -- identical slicing to the torch module
    w_off = [0]
    for i in range(L):
        w_off.append(w_off[-1] + couts[i] * cins[i] * kernel_sizes[i] ** 2)

    # gamma/beta offsets (BN is applied to layers 0..L-2 only)
    gb_off = [0]
    for i in range(max(L - 1, 0)):
        gb_off.append(gb_off[-1] + couts[i])
    if L > 1:
        g_flat = jnp.concatenate([bn_gammas[i].reshape(-1) for i in range(L - 1)]).astype(jnp.float32)
        b_flat = jnp.concatenate([bn_betas[i].reshape(-1) for i in range(L - 1)]).astype(jnp.float32)
    else:
        g_flat = jnp.ones((1,), jnp.float32)
        b_flat = jnp.zeros((1,), jnp.float32)

    w_flat = kernels.reshape(-1).astype(jnp.float32)
    x_flat = x_nchw.reshape(N, C0, H * W).astype(jnp.float32)   # lane-dense input
    cout_last = couts[-1]
    inv_count = 1.0 / float(N * H * W)

    def kernel(w_ref, g_ref, b_ref, x_ref, o_ref, *bufs):
        # Zero halo + slack once; interiors are fully overwritten each layer.
        for buf in bufs:
            buf[...] = jnp.zeros(buf.shape, jnp.float32)

        # Layer-0 input: copy each image row into the padded buffer interior
        # (stride W -> stride Wp).
        for ci in range(C0):
            for r in range(H):
                dst = (r + P) * Wp + P
                bufs[0][ci, :, dst:dst + W] = x_ref[:, ci, r * W:(r + 1) * W]

        # Valid-column mask: columns >= W of each Wp-stride row are halo/garbage.
        col = jax.lax.broadcasted_iota(jnp.int32, (1, span), 1)
        mask = ((col % Wp) < W).astype(jnp.float32)

        for li in range(L):
            k = kernel_sizes[li]
            pad = pads[li]
            cin, cout_n = cins[li], couts[li]
            last = li == L - 1
            src = bufs[li]

            # conv as scalar-broadcast FMAs on the VPU; each shifted patch is
            # loaded once (contiguous plane slice) and reused for every output
            # channel.
            accs = [jnp.zeros((N, span), jnp.float32) for _ in range(cout_n)]
            for ci in range(cin):
                for dy in range(k):
                    for dx in range(k):
                        off = (dy + P - pad) * Wp + (dx + P - pad)
                        patch = src[ci, :, off:off + span]
                        for co in range(cout_n):
                            widx = w_off[li] + ((co * cin + ci) * k + dy) * k + dx
                            accs[co] = accs[co] + w_ref[widx] * patch

            for co in range(cout_n):
                acc = accs[co]
                if not last:
                    # BatchNorm2d (training mode, biased var) + ReLU over valid pixels.
                    mean = jnp.sum(acc * mask) * inv_count
                    d = acc - mean
                    var = jnp.sum(d * d * mask) * inv_count
                    gamma = g_ref[gb_off[li] + co]
                    beta = b_ref[gb_off[li] + co]
                    scale = jax.lax.rsqrt(var + 1e-5) * gamma     # scalar*scalar fold
                    y = d * scale + beta
                    y = jnp.maximum(y, 0.0) * mask                # re-zero halo columns
                    start = P * (Wp + 1)                          # shift into next halo frame
                    bufs[li + 1][co, :, start:start + span] = y
                else:
                    # Gather the W valid columns of each row -> one lane-dense
                    # (N, H*W) store (unmasked vst) instead of masked partials.
                    rows = [acc[:, r * Wp:r * Wp + W] for r in range(H)]
                    o_ref[:, co, :] = jnp.tanh(jnp.concatenate(rows, axis=-1))

    smem = pl.BlockSpec(memory_space=pltpu.MemorySpace.SMEM)
    vmem = pl.BlockSpec(memory_space=pltpu.MemorySpace.VMEM)
    out = pl.pallas_call(
        kernel,
        out_shape=jax.ShapeDtypeStruct((N, cout_last, H * W), jnp.float32),
        in_specs=[smem, smem, smem, vmem],
        out_specs=vmem,
        scratch_shapes=[pltpu.VMEM((c, N, lflat), jnp.float32) for c in cins],
    )(w_flat, g_flat, b_flat, x_flat)
    # TODO(synk): at real batch/resolution, grid over spatial tiles with
    # dimension_semantics=("parallel", ...) plus two-pass BN statistics
    # (v7x has 2 TCs / 64 MiB VMEM, v5e has a 16 MiB scoped-VMEM default);
    # at these toy sizes a single gridless invocation is optimal.
    return out.reshape(N, cout_last, H, W)        # NCHW, free reshape


# ------------------------------ reference ----------------------------------

def _slice_weights(kernels, num_kernels, kernel_sizes):
    """Exactly mirrors the torch module's flat-vector slicing and .view calls."""
    idx_list = []
    for li in range(len(num_kernels)):
        if li == 0:
            idx_list.append(num_kernels[0] * kernel_sizes[0] * kernel_sizes[0])
        else:
            idx_list.append(idx_list[li - 1]
                            + num_kernels[li] * num_kernels[li - 1]
                            * kernel_sizes[li] * kernel_sizes[li])
    w_list = [kernels[:, :idx_list[0]].reshape(
        num_kernels[0], 1, kernel_sizes[0], kernel_sizes[0])]
    for i in range(1, len(num_kernels)):
        w_list.append(kernels[:, idx_list[i - 1]:idx_list[i]].reshape(
            num_kernels[i], num_kernels[i - 1], kernel_sizes[i], kernel_sizes[i]))
    return w_list


def _ref_forward(x_nchw, kernels, num_kernels, kernel_sizes):
    w_list = _slice_weights(kernels, num_kernels, kernel_sizes)

    def conv(x, w):
        return jax.lax.conv_general_dilated(
            x, w, (1, 1), 'SAME', dimension_numbers=('NCHW', 'OIHW', 'NCHW'))

    def bn_relu(x):
        mean = jnp.mean(x, axis=(0, 2, 3), keepdims=True)
        var = jnp.mean((x - mean) ** 2, axis=(0, 2, 3), keepdims=True)
        return jnp.maximum((x - mean) * jax.lax.rsqrt(var + 1e-5), 0.0)

    x = x_nchw
    for i in range(len(num_kernels) - 1):
        x = bn_relu(conv(x, w_list[i]))
    return jnp.tanh(conv(x, w_list[-1]))


# -------------------------------- main --------------------------------------

if __name__ == "__main__":
    key = jax.random.PRNGKey(0)
    k1, k2 = jax.random.split(key)

    in_channels = 1                  # first conv weight is viewed with Cin=1
    num_kernels = [4, 8, 1]
    kernel_sizes = [3, 3, 3]
    N, H, W = 2, 16, 16

    total = num_kernels[0] * 1 * kernel_sizes[0] ** 2
    for i in range(1, len(num_kernels)):
        total += num_kernels[i] * num_kernels[i - 1] * kernel_sizes[i] ** 2

    x = jax.random.normal(k1, (N, in_channels, H, W), jnp.float32)
    kernels = jax.random.normal(k2, (1, total), jnp.float32) * 0.1

    # BatchNorm2d default parameter init (gamma=1, beta=0), deterministic.
    bn_gammas = [jnp.ones((c,), jnp.float32) for c in num_kernels]
    bn_betas = [jnp.zeros((c,), jnp.float32) for c in num_kernels]

    out = dynamic_conv_net_forward(x, kernels, num_kernels, kernel_sizes,
                                   bn_gammas, bn_betas)
    out = jax.block_until_ready(out)

    ref = jax.block_until_ready(_ref_forward(x, kernels, num_kernels, kernel_sizes))
    assert out.shape == (N, num_kernels[-1], H, W), out.shape
    assert jnp.allclose(out, ref, atol=2e-4, rtol=2e-4), \
        float(jnp.max(jnp.abs(out - ref)))

    print("KERNEL_OK")
</pallas_src>

<mosaic_0001>
module attributes {stable_mosaic.version = 11 : i64} {
  func.func @kernel(%arg0: memref<396xf32, #tpu.memory_space<smem>>, %arg1: memref<12xf32, #tpu.memory_space<smem>>, %arg2: memref<12xf32, #tpu.memory_space<smem>>, %arg3: memref<2x1x256xf32, #tpu.memory_space<vmem>>, %arg4: memref<2x1x256xf32, #tpu.memory_space<vmem>>, %arg5: memref<1x2x384xf32, #tpu.memory_space<vmem>>, %arg6: memref<4x2x384xf32, #tpu.memory_space<vmem>>, %arg7: memref<8x2x384xf32, #tpu.memory_space<vmem>>) attributes {dimension_semantics = [], scalar_prefetch = 0 : i64, scratch_operands = 3 : i64, tpu.core_type = #tpu.core_type<tc>} {
    %cst = arith.constant 0.000000e+00 : f32
    %0 = vector.broadcast %cst : f32 to vector<1x2x384xf32>
    %c0 = arith.constant 0 : index
    %c0_0 = arith.constant 0 : index
    %c0_1 = arith.constant 0 : index
    %1 = vector.load %arg5[%c0, %c0_0, %c0_1] : memref<1x2x384xf32, #tpu.memory_space<vmem>>, vector<1x2x384xf32>
    tpu.vector_store %arg5[%c0, %c0_0, %c0_1], %0 {strides = array<i32>} : memref<1x2x384xf32, #tpu.memory_space<vmem>>, vector<1x2x384xf32>,
    %cst_2 = arith.constant 0.000000e+00 : f32
    %2 = vector.broadcast %cst_2 : f32 to vector<4x2x384xf32>
    %c0_3 = arith.constant 0 : index
    %c0_4 = arith.constant 0 : index
    %c0_5 = arith.constant 0 : index
    %3 = vector.load %arg6[%c0_3, %c0_4, %c0_5] : memref<4x2x384xf32, #tpu.memory_space<vmem>>, vector<4x2x384xf32>
    tpu.vector_store %arg6[%c0_3, %c0_4, %c0_5], %2 {strides = array<i32>} : memref<4x2x384xf32, #tpu.memory_space<vmem>>, vector<4x2x384xf32>,
    %cst_6 = arith.constant 0.000000e+00 : f32
    %4 = vector.broadcast %cst_6 : f32 to vector<8x2x384xf32>
    %c0_7 = arith.constant 0 : index
    %c0_8 = arith.constant 0 : index
    %c0_9 = arith.constant 0 : index
    %5 = vector.load %arg7[%c0_7, %c0_8, %c0_9] : memref<8x2x384xf32, #tpu.memory_space<vmem>>, vector<8x2x384xf32>
    tpu.vector_store %arg7[%c0_7, %c0_8, %c0_9], %4 {strides = array<i32>} : memref<8x2x384xf32, #tpu.memory_space<vmem>>, vector<8x2x384xf32>,
    %c0_10 = arith.constant 0 : index
    %c0_11 = arith.constant 0 : index
    %c0_12 = arith.constant 0 : index
    %6 = vector.load %arg3[%c0_10, %c0_11, %c0_12] : memref<2x1x256xf32, #tpu.memory_space<vmem>>, vector<2x1x16xf32>
    %7 = vector.shape_cast %6 : vector<2x1x16xf32> to vector<2x16xf32>
    %c0_13 = arith.constant 0 : index
    %c0_14 = arith.constant 0 : index
    %c19 = arith.constant 19 : index
    %8 = vector.load %arg5[%c0_13, %c0_14, %c19] : memref<1x2x384xf32, #tpu.memory_space<vmem>>, vector<1x2x16xf32>
    %9 = vector.shape_cast %8 : vector<1x2x16xf32> to vector<2x16xf32>
    %10 = vector.shape_cast %7 : vector<2x16xf32> to vector<1x2x16xf32>
    tpu.vector_store %arg5[%c0_13, %c0_14, %c19], %10 {strides = array<i32>} : memref<1x2x384xf32, #tpu.memory_space<vmem>>, vector<1x2x16xf32>,
    %c0_15 = arith.constant 0 : index
    %c0_16 = arith.constant 0 : index
    %c16 = arith.constant 16 : index
    %11 = vector.load %arg3[%c0_15, %c0_16, %c16] : memref<2x1x256xf32, #tpu.memory_space<vmem>>, vector<2x1x16xf32>
    %12 = vector.shape_cast %11 : vector<2x1x16xf32> to vector<2x16xf32>
    %c0_17 = arith.constant 0 : index
    %c0_18 = arith.constant 0 : index
    %c37 = arith.constant 37 : index
    %13 = vector.load %arg5[%c0_17, %c0_18, %c37] : memref<1x2x384xf32, #tpu.memory_space<vmem>>, vector<1x2x16xf32>
    %14 = vector.shape_cast %13 : vector<1x2x16xf32> to vector<2x16xf32>
    %15 = vector.shape_cast %12 : vector<2x16xf32> to vector<1x2x16xf32>
    tpu.vector_store %arg5[%c0_17, %c0_18, %c37], %15 {strides = array<i32>} : memref<1x2x384xf32, #tpu.memory_space<vmem>>, vector<1x2x16xf32>,
    %c0_19 = arith.constant 0 : index
    %c0_20 = arith.constant 0 : index
    %c32 = arith.constant 32 : index
    %16 = vector.load %arg3[%c0_19, %c0_20, %c32] : memref<2x1x256xf32, #tpu.memory_space<vmem>>, vector<2x1x16xf32>
    %17 = vector.shape_cast %16 : vector<2x1x16xf32> to vector<2x16xf32>
    %c0_21 = arith.constant 0 : index
    %c0_22 = arith.constant 0 : index
    %c55 = arith.constant 55 : index
    %18 = vector.load %arg5[%c0_21, %c0_22, %c55] : memref<1x2x384xf32, #tpu.memory_space<vmem>>, vector<1x2x16xf32>
    %19 = vector.shape_cast %18 : vector<1x2x16xf32> to vector<2x16xf32>
    %20 = vector.shape_cast %17 : vector<2x16xf32> to vector<1x2x16xf32>
    tpu.vector_store %arg5[%c0_21, %c0_22, %c55], %20 {strides = array<i32>} : memref<1x2x384xf32, #tpu.memory_space<vmem>>, vector<1x2x16xf32>,
    %c0_23 = arith.constant 0 : index
    %c0_24 = arith.constant 0 : index
    %c48 = arith.constant 48 : index
    %21 = vector.load %arg3[%c0_23, %c0_24, %c48] : memref<2x1x256xf32, #tpu.memory_space<vmem>>, vector<2x1x16xf32>
    %22 = vector.shape_cast %21 : vector<2x1x16xf32> to vector<2x16xf32>
    %c0_25 = arith.constant 0 : index
    %c0_26 = arith.constant 0 : index
    %c73 = arith.constant 73 : index
    %23 = vector.load %arg5[%c0_25, %c0_26, %c73] : memref<1x2x384xf32, #tpu.memory_space<vmem>>, vector<1x2x16xf32>
    %24 = vector.shape_cast %23 : vector<1x2x16xf32> to vector<2x16xf32>
    %25 = vector.shape_cast %22 : vector<2x16xf32> to vector<1x2x16xf32>
    tpu.vector_store %arg5[%c0_25, %c0_26, %c73], %25 {strides = array<i32>} : memref<1x2x384xf32, #tpu.memory_space<vmem>>, vector<1x2x16xf32>,
    %c0_27 = arith.constant 0 : index
    %c0_28 = arith.constant 0 : index
    %c64 = arith.constant 64 : index
    %26 = vector.load %arg3[%c0_27, %c0_28, %c64] : memref<2x1x256xf32, #tpu.memory_space<vmem>>, vector<2x1x16xf32>
    %27 = vector.shape_cast %26 : vector<2x1x16xf32> to vector<2x16xf32>
    %c0_29 = arith.constant 0 : index
    %c0_30 = arith.constant 0 : index
    %c91 = arith.constant 91 : index
    %28 = vector.load %arg5[%c0_29, %c0_30, %c91] : memref<1x2x384xf32, #tpu.memory_space<vmem>>, vector<1x2x16xf32>
    %29 = vector.shape_cast %28 : vector<1x2x16xf32> to vector<2x16xf32>
    %30 = vector.shape_cast %27 : vector<2x16xf32> to vector<1x2x16xf32>
    tpu.vector_store %arg5[%c0_29, %c0_30, %c91], %30 {strides = array<i32>} : memref<1x2x384xf32, #tpu.memory_space<vmem>>, vector<1x2x16xf32>,
    %c0_31 = arith.constant 0 : index
    %c0_32 = arith.constant 0 : index
    %c80 = arith.constant 80 : index
    %31 = vector.load %arg3[%c0_31, %c0_32, %c80] : memref<2x1x256xf32, #tpu.memory_space<vmem>>, vector<2x1x16xf32>
    %32 = vector.shape_cast %31 : vector<2x1x16xf32> to vector<2x16xf32>
    %c0_33 = arith.constant 0 : index
    %c0_34 = arith.constant 0 : index
    %c109 = arith.constant 109 : index
    %33 = vector.load %arg5[%c0_33, %c0_34, %c109] : memref<1x2x384xf32, #tpu.memory_space<vmem>>, vector<1x2x16xf32>
    %34 = vector.shape_cast %33 : vector<1x2x16xf32> to vector<2x16xf32>
    %35 = vector.shape_cast %32 : vector<2x16xf32> to vector<1x2x16xf32>
    tpu.vector_store %arg5[%c0_33, %c0_34, %c109], %35 {strides = array<i32>} : memref<1x2x384xf32, #tpu.memory_space<vmem>>, vector<1x2x16xf32>,
    %c0_35 = arith.constant 0 : index
    %c0_36 = arith.constant 0 : index
    %c96 = arith.constant 96 : index
    %36 = vector.load %arg3[%c0_35, %c0_36, %c96] : memref<2x1x256xf32, #tpu.memory_space<vmem>>, vector<2x1x16xf32>
    %37 = vector.shape_cast %36 : vector<2x1x16xf32> to vector<2x16xf32>
    %c0_37 = arith.constant 0 : index
    %c0_38 = arith.constant 0 : index
    %c127 = arith.constant 127 : index
    %38 = vector.load %arg5[%c0_37, %c0_38, %c127] : memref<1x2x384xf32, #tpu.memory_space<vmem>>, vector<1x2x16xf32>
    %39 = vector.shape_cast %38 : vector<1x2x16xf32> to vector<2x16xf32>
    %40 = vector.shape_cast %37 : vector<2x16xf32> to vector<1x2x16xf32>
    tpu.vector_store %arg5[%c0_37, %c0_38, %c127], %40 {strides = array<i32>} : memref<1x2x384xf32, #tpu.memory_space<vmem>>, vector<1x2x16xf32>,
    %c0_39 = arith.constant 0 : index
    %c0_40 = arith.constant 0 : index
    %c112 = arith.constant 112 : index
    %41 = vector.load %arg3[%c0_39, %c0_40, %c112] : memref<2x1x256xf32, #tpu.memory_space<vmem>>, vector<2x1x16xf32>
    %42 = vector.shape_cast %41 : vector<2x1x16xf32> to vector<2x16xf32>
    %c0_41 = arith.constant 0 : index
    %c0_42 = arith.constant 0 : index
    %c145 = arith.constant 145 : index
    %43 = vector.load %arg5[%c0_41, %c0_42, %c145] : memref<1x2x384xf32, #tpu.memory_space<vmem>>, vector<1x2x16xf32>
    %44 = vector.shape_cast %43 : vector<1x2x16xf32> to vector<2x16xf32>
    %45 = vector.shape_cast %42 : vector<2x16xf32> to vector<1x2x16xf32>
    tpu.vector_store %arg5[%c0_41, %c0_42, %c145], %45 {strides = array<i32>} : memref<1x2x384xf32, #tpu.memory_space<vmem>>, vector<1x2x16xf32>,
    %c0_43 = arith.constant 0 : index
    %c0_44 = arith.constant 0 : index
    %c128 = arith.constant 128 : index
    %46 = vector.load %arg3[%c0_43, %c0_44, %c128] : memref<2x1x256xf32, #tpu.memory_space<vmem>>, vector<2x1x16xf32>
    %47 = vector.shape_cast %46 : vector<2x1x16xf32> to vector<2x16xf32>
    %c0_45 = arith.constant 0 : index
    %c0_46 = arith.constant 0 : index
    %c163 = arith.constant 163 : index
    %48 = vector.load %arg5[%c0_45, %c0_46, %c163] : memref<1x2x384xf32, #tpu.memory_space<vmem>>, vector<1x2x16xf32>
    %49 = vector.shape_cast %48 : vector<1x2x16xf32> to vector<2x16xf32>
    %50 = vector.shape_cast %47 : vector<2x16xf32> to vector<1x2x16xf32>
    tpu.vector_store %arg5[%c0_45, %c0_46, %c163], %50 {strides = array<i32>} : memref<1x2x384xf32, #tpu.memory_space<vmem>>, vector<1x2x16xf32>,
    %c0_47 = arith.constant 0 : index
    %c0_48 = arith.constant 0 : index
    %c144 = arith.constant 144 : index
    %51 = vector.load %arg3[%c0_47, %c0_48, %c144] : memref<2x1x256xf32, #tpu.memory_space<vmem>>, vector<2x1x16xf32>
    %52 = vector.shape_cast %51 : vector<2x1x16xf32> to vector<2x16xf32>
    %c0_49 = arith.constant 0 : index
    %c0_50 = arith.constant 0 : index
    %c181 = arith.constant 181 : index
    %53 = vector.load %arg5[%c0_49, %c0_50, %c181] : memref<1x2x384xf32, #tpu.memory_space<vmem>>, vector<1x2x16xf32>
    %54 = vector.shape_cast %53 : vector<1x2x16xf32> to vector<2x16xf32>
    %55 = vector.shape_cast %52 : vector<2x16xf32> to vector<1x2x16xf32>
    tpu.vector_store %arg5[%c0_49, %c0_50, %c181], %55 {strides = array<i32>} : memref<1x2x384xf32, #tpu.memory_space<vmem>>, vector<1x2x16xf32>,
    %c0_51 = arith.constant 0 : index
    %c0_52 = arith.constant 0 : index
    %c160 = arith.constant 160 : index
    %56 = vector.load %arg3[%c0_51, %c0_52, %c160] : memref<2x1x256xf32, #tpu.memory_space<vmem>>, vector<2x1x16xf32>
    %57 = vector.shape_cast %56 : vector<2x1x16xf32> to vector<2x16xf32>
    %c0_53 = arith.constant 0 : index
    %c0_54 = arith.constant 0 : index
    %c199 = arith.constant 199 : index
    %58 = vector.load %arg5[%c0_53, %c0_54, %c199] : memref<1x2x384xf32, #tpu.memory_space<vmem>>, vector<1x2x16xf32>
    %59 = vector.shape_cast %58 : vector<1x2x16xf32> to vector<2x16xf32>
    %60 = vector.shape_cast %57 : vector<2x16xf32> to vector<1x2x16xf32>
    tpu.vector_store %arg5[%c0_53, %c0_54, %c199], %60 {strides = array<i32>} : memref<1x2x384xf32, #tpu.memory_space<vmem>>, vector<1x2x16xf32>,
    %c0_55 = arith.constant 0 : index
    %c0_56 = arith.constant 0 : index
    %c176 = arith.constant 176 : index
    %61 = vector.load %arg3[%c0_55, %c0_56, %c176] : memref<2x1x256xf32, #tpu.memory_space<vmem>>, vector<2x1x16xf32>
    %62 = vector.shape_cast %61 : vector<2x1x16xf32> to vector<2x16xf32>
    %c0_57 = arith.constant 0 : index
    %c0_58 = arith.constant 0 : index
    %c217 = arith.constant 217 : index
    %63 = vector.load %arg5[%c0_57, %c0_58, %c217] : memref<1x2x384xf32, #tpu.memory_space<vmem>>, vector<1x2x16xf32>
    %64 = vector.shape_cast %63 : vector<1x2x16xf32> to vector<2x16xf32>
    %65 = vector.shape_cast %62 : vector<2x16xf32> to vector<1x2x16xf32>
    tpu.vector_store %arg5[%c0_57, %c0_58, %c217], %65 {strides = array<i32>} : memref<1x2x384xf32, #tpu.memory_space<vmem>>, vector<1x2x16xf32>,
    %c0_59 = arith.constant 0 : index
    %c0_60 = arith.constant 0 : index
    %c192 = arith.constant 192 : index
    %66 = vector.load %arg3[%c0_59, %c0_60, %c192] : memref<2x1x256xf32, #tpu.memory_space<vmem>>, vector<2x1x16xf32>
    %67 = vector.shape_cast %66 : vector<2x1x16xf32> to vector<2x16xf32>
    %c0_61 = arith.constant 0 : index
    %c0_62 = arith.constant 0 : index
    %c235 = arith.constant 235 : index
    %68 = vector.load %arg5[%c0_61, %c0_62, %c235] : memref<1x2x384xf32, #tpu.memory_space<vmem>>, vector<1x2x16xf32>
    %69 = vector.shape_cast %68 : vector<1x2x16xf32> to vector<2x16xf32>
    %70 = vector.shape_cast %67 : vector<2x16xf32> to vector<1x2x16xf32>
    tpu.vector_store %arg5[%c0_61, %c0_62, %c235], %70 {strides = array<i32>} : memref<1x2x384xf32, #tpu.memory_space<vmem>>, vector<1x2x16xf32>,
    %c0_63 = arith.constant 0 : index
    %c0_64 = arith.constant 0 : index
    %c208 = arith.constant 208 : index
    %71 = vector.load %arg3[%c0_63, %c0_64, %c208] : memref<2x1x256xf32, #tpu.memory_space<vmem>>, vector<2x1x16xf32>
    %72 = vector.shape_cast %71 : vector<2x1x16xf32> to vector<2x16xf32>
    %c0_65 = arith.constant 0 : index
    %c0_66 = arith.constant 0 : index
    %c253 = arith.constant 253 : index
    %73 = vector.load %arg5[%c0_65, %c0_66, %c253] : memref<1x2x384xf32, #tpu.memory_space<vmem>>, vector<1x2x16xf32>
    %74 = vector.shape_cast %73 : vector<1x2x16xf32> to vector<2x16xf32>
    %75 = vector.shape_cast %72 : vector<2x16xf32> to vector<1x2x16xf32>
    tpu.vector_store %arg5[%c0_65, %c0_66, %c253], %75 {strides = array<i32>} : memref<1x2x384xf32, #tpu.memory_space<vmem>>, vector<1x2x16xf32>,
    %c0_67 = arith.constant 0 : index
    %c0_68 = arith.constant 0 : index
    %c224 = arith.constant 224 : index
    %76 = vector.load %arg3[%c0_67, %c0_68, %c224] : memref<2x1x256xf32, #tpu.memory_space<vmem>>, vector<2x1x16xf32>
    %77 = vector.shape_cast %76 : vector<2x1x16xf32> to vector<2x16xf32>
    %c0_69 = arith.constant 0 : index
    %c0_70 = arith.constant 0 : index
    %c271 = arith.constant 271 : index
    %78 = vector.load %arg5[%c0_69, %c0_70, %c271] : memref<1x2x384xf32, #tpu.memory_space<vmem>>, vector<1x2x16xf32>
    %79 = vector.shape_cast %78 : vector<1x2x16xf32> to vector<2x16xf32>
    %80 = vector.shape_cast %77 : vector<2x16xf32> to vector<1x2x16xf32>
    tpu.vector_store %arg5[%c0_69, %c0_70, %c271], %80 {strides = array<i32>} : memref<1x2x384xf32, #tpu.memory_space<vmem>>, vector<1x2x16xf32>,
    %c0_71 = arith.constant 0 : index
    %c0_72 = arith.constant 0 : index
    %c240 = arith.constant 240 : index
    %81 = vector.load %arg3[%c0_71, %c0_72, %c240] : memref<2x1x256xf32, #tpu.memory_space<vmem>>, vector<2x1x16xf32>
    %82 = vector.shape_cast %81 : vector<2x1x16xf32> to vector<2x16xf32>
    %c0_73 = arith.constant 0 : index
    %c0_74 = arith.constant 0 : index
    %c289 = arith.constant 289 : index
    %83 = vector.load %arg5[%c0_73, %c0_74, %c289] : memref<1x2x384xf32, #tpu.memory_space<vmem>>, vector<1x2x16xf32>
    %84 = vector.shape_cast %83 : vector<1x2x16xf32> to vector<2x16xf32>
    %85 = vector.shape_cast %82 : vector<2x16xf32> to vector<1x2x16xf32>
    tpu.vector_store %arg5[%c0_73, %c0_74, %c289], %85 {strides = array<i32>} : memref<1x2x384xf32, #tpu.memory_space<vmem>>, vector<1x2x16xf32>,
    %86 = tpu.iota {dimensions = array<i32: 1>} : vector<1x288xi32>
    %c18_i32 = arith.constant 18 : i32
    %c0_i32 = arith.constant 0 : i32
    %87 = arith.cmpi eq, %c18_i32, %c0_i32 : i32
    %c1_i32 = arith.constant 1 : i32
    %88 = arith.select %87, %c1_i32, %c18_i32 : i32
    %89 = vector.broadcast %88 : i32 to vector<1x288xi32>
    %90 = arith.remsi %86, %89 : vector<1x288xi32>
    %c0_i32_75 = arith.constant 0 : i32
    %91 = vector.broadcast %c0_i32_75 : i32 to vector<1x288xi32>
    %92 = arith.cmpi ne, %90, %91 : vector<1x288xi32>
    %c0_i32_76 = arith.constant 0 : i32
    %93 = vector.broadcast %c0_i32_76 : i32 to vector<1x288xi32>
    %94 = arith.cmpi slt, %90, %93 : vector<1x288xi32>
    %c0_i32_77 = arith.constant 0 : i32
    %95 = arith.cmpi slt, %88, %c0_i32_77 : i32
    %96 = vector.broadcast %95 : i1 to vector<1x288xi1>
    %97 = vector.broadcast %96 : vector<1x288xi1> to vector<1x288xi1>
    %98 = arith.xori %94, %97 : vector<1x288xi1>
    %99 = arith.andi %98, %92 : vector<1x288xi1>
    %100 = vector.broadcast %88 : i32 to vector<1x288xi32>
    %101 = arith.addi %90, %100 : vector<1x288xi32>
    %102 = arith.select %99, %101, %90 : vector<1x288xi1>, vector<1x288xi32>
    %c16_i32 = arith.constant 16 : i32
    %103 = vector.broadcast %c16_i32 : i32 to vector<1x288xi32>
    %104 = arith.cmpi slt, %102, %103 : vector<1x288xi32>
    %105 = arith.extui %104 : vector<1x288xi1> to vector<1x288xi32>
    %106 = arith.sitofp %105 : vector<1x288xi32> to vector<1x288xf32>
    %cst_78 = arith.constant 0.000000e+00 : f32
    %107 = vector.broadcast %cst_78 : f32 to vector<2x288xf32>
    %cst_79 = arith.constant 0.000000e+00 : f32
    %108 = vector.broadcast %cst_79 : f32 to vector<2x288xf32>
    %cst_80 = arith.constant 0.000000e+00 : f32
    %109 = vector.broadcast %cst_80 : f32 to vector<2x288xf32>
    %cst_81 = arith.constant 0.000000e+00 : f32
    %110 = vector.broadcast %cst_81 : f32 to vector<2x288xf32>
    %c0_82 = arith.constant 0 : index
    %c0_83 = arith.constant 0 : index
    %c0_84 = arith.constant 0 : index
    %111 = vector.load %arg5[%c0_82, %c0_83, %c0_84] : memref<1x2x384xf32, #tpu.memory_space<vmem>>, vector<1x2x288xf32>
    %112 = vector.shape_cast %111 : vector<1x2x288xf32> to vector<2x288xf32>
    %c0_85 = arith.constant 0 : index
    %113 = memref.load %arg0[%c0_85] : memref<396xf32, #tpu.memory_space<smem>>
    %114 = vector.broadcast %113 : f32 to vector<2x288xf32>
    %115 = arith.mulf %114, %112 : vector<2x288xf32>
    %116 = arith.addf %107, %115 : vector<2x288xf32>
    %c9 = arith.constant 9 : index
    %117 = memref.load %arg0[%c9] : memref<396xf32, #tpu.memory_space<smem>>
    %118 = vector.broadcast %117 : f32 to vector<2x288xf32>
    %119 = arith.mulf %118, %112 : vector<2x288xf32>
    %120 = arith.addf %108, %119 : vector<2x288xf32>
    %c18 = arith.constant 18 : index
    %121 = memref.load %arg0[%c18] : memref<396xf32, #tpu.memory_space<smem>>
    %122 = vector.broadcast %121 : f32 to vector<2x288xf32>
    %123 = arith.mulf %122, %112 : vector<2x288xf32>
    %124 = arith.addf %109, %123 : vector<2x288xf32>
    %c27 = arith.constant 27 : index
    %125 = memref.load %arg0[%c27] : memref<396xf32, #tpu.memory_space<smem>>
    %126 = vector.broadcast %125 : f32 to vector<2x288xf32>
    %127 = arith.mulf %126, %112 : vector<2x288xf32>
    %128 = arith.addf %110, %127 : vector<2x288xf32>
    %c0_86 = arith.constant 0 : index
    %c0_87 = arith.constant 0 : index
    %c1 = arith.constant 1 : index
    %129 = vector.load %arg5[%c0_86, %c0_87, %c1] : memref<1x2x384xf32, #tpu.memory_space<vmem>>, vector<1x2x288xf32>
    %130 = vector.shape_cast %129 : vector<1x2x288xf32> to vector<2x288xf32>
    %c1_88 = arith.constant 1 : index
    %131 = memref.load %arg0[%c1_88] : memref<396xf32, #tpu.memory_space<smem>>
    %132 = vector.broadcast %131 : f32 to vector<2x288xf32>
    %133 = arith.mulf %132, %130 : vector<2x288xf32>
    %134 = arith.addf %116, %133 : vector<2x288xf32>
    %c10 = arith.constant 10 : index
    %135 = memref.load %arg0[%c10] : memref<396xf32, #tpu.memory_space<smem>>
    %136 = vector.broadcast %135 : f32 to vector<2x288xf32>
    %137 = arith.mulf %136, %130 : vector<2x288xf32>
    %138 = arith.addf %120, %137 : vector<2x288xf32>
    %c19_89 = arith.constant 19 : index
    %139 = memref.load %arg0[%c19_89] : memref<396xf32, #tpu.memory_space<smem>>
    %140 = vector.broadcast %139 : f32 to vector<2x288xf32>
    %141 = arith.mulf %140, %130 : vector<2x288xf32>
    %142 = arith.addf %124, %141 : vector<2x288xf32>
    %c28 = arith.constant 28 : index
    %143 = memref.load %arg0[%c28] : memref<396xf32, #tpu.memory_space<smem>>
    %144 = vector.broadcast %143 : f32 to vector<2x288xf32>
    %145 = arith.mulf %144, %130 : vector<2x288xf32>
    %146 = arith.addf %128, %145 : vector<2x288xf32>
    %c0_90 = arith.constant 0 : index
    %c0_91 = arith.constant 0 : index
    %c2 = arith.constant 2 : index
    %147 = vector.load %arg5[%c0_90, %c0_91, %c2] : memref<1x2x384xf32, #tpu.memory_space<vmem>>, vector<1x2x288xf32>
    %148 = vector.shape_cast %147 : vector<1x2x288xf32> to vector<2x288xf32>
    %c2_92 = arith.constant 2 : index
    %149 = memref.load %arg0[%c2_92] : memref<396xf32, #tpu.memory_space<smem>>
    %150 = vector.broadcast %149 : f32 to vector<2x288xf32>
    %151 = arith.mulf %150, %148 : vector<2x288xf32>
    %152 = arith.addf %134, %151 : vector<2x288xf32>
    %c11 = arith.constant 11 : index
    %153 = memref.load %arg0[%c11] : memref<396xf32, #tpu.memory_space<smem>>
    %154 = vector.broadcast %153 : f32 to vector<2x288xf32>
    %155 = arith.mulf %154, %148 : vector<2x288xf32>
    %156 = arith.addf %138, %155 : vector<2x288xf32>
    %c20 = arith.constant 20 : index
    %157 = memref.load %arg0[%c20] : memref<396xf32, #tpu.memory_space<smem>>
    %158 = vector.broadcast %157 : f32 to vector<2x288xf32>
    %159 = arith.mulf %158, %148 : vector<2x288xf32>
    %160 = arith.addf %142, %159 : vector<2x288xf32>
    %c29 = arith.constant 29 : index
    %161 = memref.load %arg0[%c29] : memref<396xf32, #tpu.memory_space<smem>>
    %162 = vector.broadcast %161 : f32 to vector<2x288xf32>
    %163 = arith.mulf %162, %148 : vector<2x288xf32>
    %164 = arith.addf %146, %163 : vector<2x288xf32>
    %c0_93 = arith.constant 0 : index
    %c0_94 = arith.constant 0 : index
    %c18_95 = arith.constant 18 : index
    %165 = vector.load %arg5[%c0_93, %c0_94, %c18_95] : memref<1x2x384xf32, #tpu.memory_space<vmem>>, vector<1x2x288xf32>
    %166 = vector.shape_cast %165 : vector<1x2x288xf32> to vector<2x288xf32>
    %c3 = arith.constant 3 : index
    %167 = memref.load %arg0[%c3] : memref<396xf32, #tpu.memory_space<smem>>
    %168 = vector.broadcast %167 : f32 to vector<2x288xf32>
    %169 = arith.mulf %168, %166 : vector<2x288xf32>
    %170 = arith.addf %152, %169 : vector<2x288xf32>
    %c12 = arith.constant 12 : index
    %171 = memref.load %arg0[%c12] : memref<396xf32, #tpu.memory_space<smem>>
    %172 = vector.broadcast %171 : f32 to vector<2x288xf32>
    %173 = arith.mulf %172, %166 : vector<2x288xf32>
    %174 = arith.addf %156, %173 : vector<2x288xf32>
    %c21 = arith.constant 21 : index
    %175 = memref.load %arg0[%c21] : memref<396xf32, #tpu.memory_space<smem>>
    %176 = vector.broadcast %175 : f32 to vector<2x288xf32>
    %177 = arith.mulf %176, %166 : vector<2x288xf32>
    %178 = arith.addf %160, %177 : vector<2x288xf32>
    %c30 = arith.constant 30 : index
    %179 = memref.load %arg0[%c30] : memref<396xf32, #tpu.memory_space<smem>>
    %180 = vector.broadcast %179 : f32 to vector<2x288xf32>
    %181 = arith.mulf %180, %166 : vector<2x288xf32>
    %182 = arith.addf %164, %181 : vector<2x288xf32>
    %c0_96 = arith.constant 0 : index
    %c0_97 = arith.constant 0 : index
    %c19_98 = arith.constant 19 : index
    %183 = vector.load %arg5[%c0_96, %c0_97, %c19_98] : memref<1x2x384xf32, #tpu.memory_space<vmem>>, vector<1x2x288xf32>
    %184 = vector.shape_cast %183 : vector<1x2x288xf32> to vector<2x288xf32>
    %c4 = arith.constant 4 : index
    %185 = memref.load %arg0[%c4] : memref<396xf32, #tpu.memory_space<smem>>
    %186 = vector.broadcast %185 : f32 to vector<2x288xf32>
    %187 = arith.mulf %186, %184 : vector<2x288xf32>
    %188 = arith.addf %170, %187 : vector<2x288xf32>
    %c13 = arith.constant 13 : index
    %189 = memref.load %arg0[%c13] : memref<396xf32, #tpu.memory_space<smem>>
    %190 = vector.broadcast %189 : f32 to vector<2x288xf32>
    %191 = arith.mulf %190, %184 : vector<2x288xf32>
    %192 = arith.addf %174, %191 : vector<2x288xf32>
    %c22 = arith.constant 22 : index
    %193 = memref.load %arg0[%c22] : memref<396xf32, #tpu.memory_space<smem>>
    %194 = vector.broadcast %193 : f32 to vector<2x288xf32>
    %195 = arith.mulf %194, %184 : vector<2x288xf32>
    %196 = arith.addf %178, %195 : vector<2x288xf32>
    %c31 = arith.constant 31 : index
    %197 = memref.load %arg0[%c31] : memref<396xf32, #tpu.memory_space<smem>>
    %198 = vector.broadcast %197 : f32 to vector<2x288xf32>
    %199 = arith.mulf %198, %184 : vector<2x288xf32>
    %200 = arith.addf %182, %199 : vector<2x288xf32>
    %c0_99 = arith.constant 0 : index
    %c0_100 = arith.constant 0 : index
    %c20_101 = arith.constant 20 : index
    %201 = vector.load %arg5[%c0_99, %c0_100, %c20_101] : memref<1x2x384xf32, #tpu.memory_space<vmem>>, vector<1x2x288xf32>
    %202 = vector.shape_cast %201 : vector<1x2x288xf32> to vector<2x288xf32>
    %c5 = arith.constant 5 : index
    %203 = memref.load %arg0[%c5] : memref<396xf32, #tpu.memory_space<smem>>
    %204 = vector.broadcast %203 : f32 to vector<2x288xf32>
    %205 = arith.mulf %204, %202 : vector<2x288xf32>
    %206 = arith.addf %188, %205 : vector<2x288xf32>
    %c14 = arith.constant 14 : index
    %207 = memref.load %arg0[%c14] : memref<396xf32, #tpu.memory_space<smem>>
    %208 = vector.broadcast %207 : f32 to vector<2x288xf32>
    %209 = arith.mulf %208, %202 : vector<2x288xf32>
    %210 = arith.addf %192, %209 : vector<2x288xf32>
    %c23 = arith.constant 23 : index
    %211 = memref.load %arg0[%c23] : memref<396xf32, #tpu.memory_space<smem>>
    %212 = vector.broadcast %211 : f32 to vector<2x288xf32>
    %213 = arith.mulf %212, %202 : vector<2x288xf32>
    %214 = arith.addf %196, %213 : vector<2x288xf32>
    %c32_102 = arith.constant 32 : index
    %215 = memref.load %arg0[%c32_102] : memref<396xf32, #tpu.memory_space<smem>>
    %216 = vector.broadcast %215 : f32 to vector<2x288xf32>
    %217 = arith.mulf %216, %202 : vector<2x288xf32>
    %218 = arith.addf %200, %217 : vector<2x288xf32>
    %c0_103 = arith.constant 0 : index
    %c0_104 = arith.constant 0 : index
    %c36 = arith.constant 36 : index
    %219 = vector.load %arg5[%c0_103, %c0_104, %c36] : memref<1x2x384xf32, #tpu.memory_space<vmem>>, vector<1x2x288xf32>
    %220 = vector.shape_cast %219 : vector<1x2x288xf32> to vector<2x288xf32>
    %c6 = arith.constant 6 : index
    %221 = memref.load %arg0[%c6] : memref<396xf32, #tpu.memory_space<smem>>
    %222 = vector.broadcast %221 : f32 to vector<2x288xf32>
    %223 = arith.mulf %222, %220 : vector<2x288xf32>
    %224 = arith.addf %206, %223 : vector<2x288xf32>
    %c15 = arith.constant 15 : index
    %225 = memref.load %arg0[%c15] : memref<396xf32, #tpu.memory_space<smem>>
    %226 = vector.broadcast %225 : f32 to vector<2x288xf32>
    %227 = arith.mulf %226, %220 : vector<2x288xf32>
    %228 = arith.addf %210, %227 : vector<2x288xf32>
    %c24 = arith.constant 24 : index
    %229 = memref.load %arg0[%c24] : memref<396xf32, #tpu.memory_space<smem>>
    %230 = vector.broadcast %229 : f32 to vector<2x288xf32>
    %231 = arith.mulf %230, %220 : vector<2x288xf32>
    %232 = arith.addf %214, %231 : vector<2x288xf32>
    %c33 = arith.constant 33 : index
    %233 = memref.load %arg0[%c33] : memref<396xf32, #tpu.memory_space<smem>>
    %234 = vector.broadcast %233 : f32 to vector<2x288xf32>
    %235 = arith.mulf %234, %220 : vector<2x288xf32>
    %236 = arith.addf %218, %235 : vector<2x288xf32>
    %c0_105 = arith.constant 0 : index
    %c0_106 = arith.constant 0 : index
    %c37_107 = arith.constant 37 : index
    %237 = vector.load %arg5[%c0_105, %c0_106, %c37_107] : memref<1x2x384xf32, #tpu.memory_space<vmem>>, vector<1x2x288xf32>
    %238 = vector.shape_cast %237 : vector<1x2x288xf32> to vector<2x288xf32>
    %c7 = arith.constant 7 : index
    %239 = memref.load %arg0[%c7] : memref<396xf32, #tpu.memory_space<smem>>
    %240 = vector.broadcast %239 : f32 to vector<2x288xf32>
    %241 = arith.mulf %240, %238 : vector<2x288xf32>
    %242 = arith.addf %224, %241 : vector<2x288xf32>
    %c16_108 = arith.constant 16 : index
    %243 = memref.load %arg0[%c16_108] : memref<396xf32, #tpu.memory_space<smem>>
    %244 = vector.broadcast %243 : f32 to vector<2x288xf32>
    %245 = arith.mulf %244, %238 : vector<2x288xf32>
    %246 = arith.addf %228, %245 : vector<2x288xf32>
    %c25 = arith.constant 25 : index
    %247 = memref.load %arg0[%c25] : memref<396xf32, #tpu.memory_space<smem>>
    %248 = vector.broadcast %247 : f32 to vector<2x288xf32>
    %249 = arith.mulf %248, %238 : vector<2x288xf32>
    %250 = arith.addf %232, %249 : vector<2x288xf32>
    %c34 = arith.constant 34 : index
    %251 = memref.load %arg0[%c34] : memref<396xf32, #tpu.memory_space<smem>>
    %252 = vector.broadcast %251 : f32 to vector<2x288xf32>
    %253 = arith.mulf %252, %238 : vector<2x288xf32>
    %254 = arith.addf %236, %253 : vector<2x288xf32>
    %c0_109 = arith.constant 0 : index
    %c0_110 = arith.constant 0 : index
    %c38 = arith.constant 38 : index
    %255 = vector.load %arg5[%c0_109, %c0_110, %c38] : memref<1x2x384xf32, #tpu.memory_space<vmem>>, vector<1x2x288xf32>
    %256 = vector.shape_cast %255 : vector<1x2x288xf32> to vector<2x288xf32>
    %c8 = arith.constant 8 : index
    %257 = memref.load %arg0[%c8] : memref<396xf32, #tpu.memory_space<smem>>
    %258 = vector.broadcast %257 : f32 to vector<2x288xf32>
    %259 = arith.mulf %258, %256 : vector<2x288xf32>
    %260 = arith.addf %242, %259 : vector<2x288xf32>
    %c17 = arith.constant 17 : index
    %261 = memref.load %arg0[%c17] : memref<396xf32, #tpu.memory_space<smem>>
    %262 = vector.broadcast %261 : f32 to vector<2x288xf32>
    %263 = arith.mulf %262, %256 : vector<2x288xf32>
    %264 = arith.addf %246, %263 : vector<2x288xf32>
    %c26 = arith.constant 26 : index
    %265 = memref.load %arg0[%c26] : memref<396xf32, #tpu.memory_space<smem>>
    %266 = vector.broadcast %265 : f32 to vector<2x288xf32>
    %267 = arith.mulf %266, %256 : vector<2x288xf32>
    %268 = arith.addf %250, %267 : vector<2x288xf32>
    %c35 = arith.constant 35 : index
    %269 = memref.load %arg0[%c35] : memref<396xf32, #tpu.memory_space<smem>>
    %270 = vector.broadcast %269 : f32 to vector<2x288xf32>
    %271 = arith.mulf %270, %256 : vector<2x288xf32>
    %272 = arith.addf %254, %271 : vector<2x288xf32>
    %273 = vector.broadcast %106 : vector<1x288xf32> to vector<2x288xf32>
    %274 = arith.mulf %260, %273 : vector<2x288xf32>
    %275 = vector.shape_cast %274 : vector<2x288xf32> to vector<1x2x288xf32>
    %cst_111 = arith.constant dense<0.000000e+00> : vector<1xf32>
    %276 = vector.multi_reduction <add>, %275, %cst_111 [1, 2] : vector<1x2x288xf32> to vector<1xf32>
    %277 = vector.shape_cast %276 : vector<1xf32> to vector<1x1x1xf32>
    %278 = vector.extract %277[0, 0, 0] : f32 from vector<1x1x1xf32>
    %cst_112 = arith.constant 0.001953125 : f32
    %279 = arith.mulf %278, %cst_112 : f32
    %280 = vector.broadcast %279 : f32 to vector<2x288xf32>
    %281 = arith.subf %260, %280 : vector<2x288xf32>
    %282 = arith.mulf %281, %281 : vector<2x288xf32>
    %283 = vector.broadcast %106 : vector<1x288xf32> to vector<2x288xf32>
    %284 = arith.mulf %282, %283 : vector<2x288xf32>
    %285 = vector.shape_cast %284 : vector<2x288xf32> to vector<1x2x288xf32>
    %cst_113 = arith.constant dense<0.000000e+00> : vector<1xf32>
    %286 = vector.multi_reduction <add>, %285, %cst_113 [1, 2] : vector<1x2x288xf32> to vector<1xf32>
    %287 = vector.shape_cast %286 : vector<1xf32> to vector<1x1x1xf32>
    %288 = vector.extract %287[0, 0, 0] : f32 from vector<1x1x1xf32>
    %cst_114 = arith.constant 0.001953125 : f32
    %289 = arith.mulf %288, %cst_114 : f32
    %c0_115 = arith.constant 0 : index
    %290 = memref.load %arg1[%c0_115] : memref<12xf32, #tpu.memory_space<smem>>
    %c0_116 = arith.constant 0 : index
    %291 = memref.load %arg2[%c0_116] : memref<12xf32, #tpu.memory_space<smem>>
    %cst_117 = arith.constant 9.99999974E-6 : f32
    %292 = arith.addf %289, %cst_117 : f32
    %293 = math.rsqrt %292 : f32
    %294 = arith.mulf %293, %290 : f32
    %295 = vector.broadcast %294 : f32 to vector<2x288xf32>
    %296 = arith.mulf %281, %295 : vector<2x288xf32>
    %297 = vector.broadcast %291 : f32 to vector<2x288xf32>
    %298 = arith.addf %296, %297 : vector<2x288xf32>
    %cst_118 = arith.constant 0.000000e+00 : f32
    %299 = vector.broadcast %cst_118 : f32 to vector<2x288xf32>
    %300 = arith.maximumf %298, %299 : vector<2x288xf32>
    %301 = vector.broadcast %106 : vector<1x288xf32> to vector<2x288xf32>
    %302 = arith.mulf %300, %301 : vector<2x288xf32>
    %c0_119 = arith.constant 0 : index
    %c0_120 = arith.constant 0 : index
    %c19_121 = arith.constant 19 : index
    %303 = vector.load %arg6[%c0_119, %c0_120, %c19_121] : memref<4x2x384xf32, #tpu.memory_space<vmem>>, vector<1x2x288xf32>
    %304 = vector.shape_cast %303 : vector<1x2x288xf32> to vector<2x288xf32>
    %305 = vector.shape_cast %302 : vector<2x288xf32> to vector<1x2x288xf32>
    tpu.vector_store %arg6[%c0_119, %c0_120, %c19_121], %305 {strides = array<i32>} : memref<4x2x384xf32, #tpu.memory_space<vmem>>, vector<1x2x288xf32>,
    %306 = vector.broadcast %106 : vector<1x288xf32> to vector<2x288xf32>
    %307 = arith.mulf %264, %306 : vector<2x288xf32>
    %308 = vector.shape_cast %307 : vector<2x288xf32> to vector<1x2x288xf32>
    %cst_122 = arith.constant dense<0.000000e+00> : vector<1xf32>
    %309 = vector.multi_reduction <add>, %308, %cst_122 [1, 2] : vector<1x2x288xf32> to vector<1xf32>
    %310 = vector.shape_cast %309 : vector<1xf32> to vector<1x1x1xf32>
    %311 = vector.extract %310[0, 0, 0] : f32 from vector<1x1x1xf32>
    %cst_123 = arith.constant 0.001953125 : f32
    %312 = arith.mulf %311, %cst_123 : f32
    %313 = vector.broadcast %312 : f32 to vector<2x288xf32>
    %314 = arith.subf %264, %313 : vector<2x288xf32>
    %315 = arith.mulf %314, %314 : vector<2x288xf32>
    %316 = vector.broadcast %106 : vector<1x288xf32> to vector<2x288xf32>
    %317 = arith.mulf %315, %316 : vector<2x288xf32>
    %318 = vector.shape_cast %317 : vector<2x288xf32> to vector<1x2x288xf32>
    %cst_124 = arith.constant dense<0.000000e+00> : vector<1xf32>
    %319 = vector.multi_reduction <add>, %318, %cst_124 [1, 2] : vector<1x2x288xf32> to vector<1xf32>
    %320 = vector.shape_cast %319 : vector<1xf32> to vector<1x1x1xf32>
    %321 = vector.extract %320[0, 0, 0] : f32 from vector<1x1x1xf32>
    %cst_125 = arith.constant 0.001953125 : f32
    %322 = arith.mulf %321, %cst_125 : f32
    %c1_126 = arith.constant 1 : index
    %323 = memref.load %arg1[%c1_126] : memref<12xf32, #tpu.memory_space<smem>>
    %c1_127 = arith.constant 1 : index
    %324 = memref.load %arg2[%c1_127] : memref<12xf32, #tpu.memory_space<smem>>
    %cst_128 = arith.constant 9.99999974E-6 : f32
    %325 = arith.addf %322, %cst_128 : f32
    %326 = math.rsqrt %325 : f32
    %327 = arith.mulf %326, %323 : f32
    %328 = vector.broadcast %327 : f32 to vector<2x288xf32>
    %329 = arith.mulf %314, %328 : vector<2x288xf32>
    %330 = vector.broadcast %324 : f32 to vector<2x288xf32>
    %331 = arith.addf %329, %330 : vector<2x288xf32>
    %cst_129 = arith.constant 0.000000e+00 : f32
    %332 = vector.broadcast %cst_129 : f32 to vector<2x288xf32>
    %333 = arith.maximumf %331, %332 : vector<2x288xf32>
    %334 = vector.broadcast %106 : vector<1x288xf32> to vector<2x288xf32>
    %335 = arith.mulf %333, %334 : vector<2x288xf32>
    %c1_130 = arith.constant 1 : index
    %c0_131 = arith.constant 0 : index
    %c19_132 = arith.constant 19 : index
    %336 = vector.load %arg6[%c1_130, %c0_131, %c19_132] : memref<4x2x384xf32, #tpu.memory_space<vmem>>, vector<1x2x288xf32>
    %337 = vector.shape_cast %336 : vector<1x2x288xf32> to vector<2x288xf32>
    %338 = vector.shape_cast %335 : vector<2x288xf32> to vector<1x2x288xf32>
    tpu.vector_store %arg6[%c1_130, %c0_131, %c19_132], %338 {strides = array<i32>} : memref<4x2x384xf32, #tpu.memory_space<vmem>>, vector<1x2x288xf32>,
    %339 = vector.broadcast %106 : vector<1x288xf32> to vector<2x288xf32>
    %340 = arith.mulf %268, %339 : vector<2x288xf32>
    %341 = vector.shape_cast %340 : vector<2x288xf32> to vector<1x2x288xf32>
    %cst_133 = arith.constant dense<0.000000e+00> : vector<1xf32>
    %342 = vector.multi_reduction <add>, %341, %cst_133 [1, 2] : vector<1x2x288xf32> to vector<1xf32>
    %343 = vector.shape_cast %342 : vector<1xf32> to vector<1x1x1xf32>
    %344 = vector.extract %343[0, 0, 0] : f32 from vector<1x1x1xf32>
    %cst_134 = arith.constant 0.001953125 : f32
    %345 = arith.mulf %344, %cst_134 : f32
    %346 = vector.broadcast %345 : f32 to vector<2x288xf32>
    %347 = arith.subf %268, %346 : vector<2x288xf32>
    %348 = arith.mulf %347, %347 : vector<2x288xf32>
    %349 = vector.broadcast %106 : vector<1x288xf32> to vector<2x288xf32>
    %350 = arith.mulf %348, %349 : vector<2x288xf32>
    %351 = vector.shape_cast %350 : vector<2x288xf32> to vector<1x2x288xf32>
    %cst_135 = arith.constant dense<0.000000e+00> : vector<1xf32>
    %352 = vector.multi_reduction <add>, %351, %cst_135 [1, 2] : vector<1x2x288xf32> to vector<1xf32>
    %353 = vector.shape_cast %352 : vector<1xf32> to vector<1x1x1xf32>
    %354 = vector.extract %353[0, 0, 0] : f32 from vector<1x1x1xf32>
    %cst_136 = arith.constant 0.001953125 : f32
    %355 = arith.mulf %354, %cst_136 : f32
    %c2_137 = arith.constant 2 : index
    %356 = memref.load %arg1[%c2_137] : memref<12xf32, #tpu.memory_space<smem>>
    %c2_138 = arith.constant 2 : index
    %357 = memref.load %arg2[%c2_138] : memref<12xf32, #tpu.memory_space<smem>>
    %cst_139 = arith.constant 9.99999974E-6 : f32
    %358 = arith.addf %355, %cst_139 : f32
    %359 = math.rsqrt %358 : f32
    %360 = arith.mulf %359, %356 : f32
    %361 = vector.broadcast %360 : f32 to vector<2x288xf32>
    %362 = arith.mulf %347, %361 : vector<2x288xf32>
    %363 = vector.broadcast %357 : f32 to vector<2x288xf32>
    %364 = arith.addf %362, %363 : vector<2x288xf32>
    %cst_140 = arith.constant 0.000000e+00 : f32
    %365 = vector.broadcast %cst_140 : f32 to vector<2x288xf32>
    %366 = arith.maximumf %364, %365 : vector<2x288xf32>
    %367 = vector.broadcast %106 : vector<1x288xf32> to vector<2x288xf32>
    %368 = arith.mulf %366, %367 : vector<2x288xf32>
    %c2_141 = arith.constant 2 : index
    %c0_142 = arith.constant 0 : index
    %c19_143 = arith.constant 19 : index
    %369 = vector.load %arg6[%c2_141, %c0_142, %c19_143] : memref<4x2x384xf32, #tpu.memory_space<vmem>>, vector<1x2x288xf32>
    %370 = vector.shape_cast %369 : vector<1x2x288xf32> to vector<2x288xf32>
    %371 = vector.shape_cast %368 : vector<2x288xf32> to vector<1x2x288xf32>
    tpu.vector_store %arg6[%c2_141, %c0_142, %c19_143], %371 {strides = array<i32>} : memref<4x2x384xf32, #tpu.memory_space<vmem>>, vector<1x2x288xf32>,
    %372 = vector.broadcast %106 : vector<1x288xf32> to vector<2x288xf32>
    %373 = arith.mulf %272, %372 : vector<2x288xf32>
    %374 = vector.shape_cast %373 : vector<2x288xf32> to vector<1x2x288xf32>
    %cst_144 = arith.constant dense<0.000000e+00> : vector<1xf32>
    %375 = vector.multi_reduction <add>, %374, %cst_144 [1, 2] : vector<1x2x288xf32> to vector<1xf32>
    %376 = vector.shape_cast %375 : vector<1xf32> to vector<1x1x1xf32>
    %377 = vector.extract %376[0, 0, 0] : f32 from vector<1x1x1xf32>
    %cst_145 = arith.constant 0.001953125 : f32
    %378 = arith.mulf %377, %cst_145 : f32
    %379 = vector.broadcast %378 : f32 to vector<2x288xf32>
    %380 = arith.subf %272, %379 : vector<2x288xf32>
    %381 = arith.mulf %380, %380 : vector<2x288xf32>
    %382 = vector.broadcast %106 : vector<1x288xf32> to vector<2x288xf32>
    %383 = arith.mulf %381, %382 : vector<2x288xf32>
    %384 = vector.shape_cast %383 : vector<2x288xf32> to vector<1x2x288xf32>
    %cst_146 = arith.constant dense<0.000000e+00> : vector<1xf32>
    %385 = vector.multi_reduction <add>, %384, %cst_146 [1, 2] : vector<1x2x288xf32> to vector<1xf32>
    %386 = vector.shape_cast %385 : vector<1xf32> to vector<1x1x1xf32>
    %387 = vector.extract %386[0, 0, 0] : f32 from vector<1x1x1xf32>
    %cst_147 = arith.constant 0.001953125 : f32
    %388 = arith.mulf %387, %cst_147 : f32
    %c3_148 = arith.constant 3 : index
    %389 = memref.load %arg1[%c3_148] : memref<12xf32, #tpu.memory_space<smem>>
    %c3_149 = arith.constant 3 : index
    %390 = memref.load %arg2[%c3_149] : memref<12xf32, #tpu.memory_space<smem>>
    %cst_150 = arith.constant 9.99999974E-6 : f32
    %391 = arith.addf %388, %cst_150 : f32
    %392 = math.rsqrt %391 : f32
    %393 = arith.mulf %392, %389 : f32
    %394 = vector.broadcast %393 : f32 to vector<2x288xf32>
    %395 = arith.mulf %380, %394 : vector<2x288xf32>
    %396 = vector.broadcast %390 : f32 to vector<2x288xf32>
    %397 = arith.addf %395, %396 : vector<2x288xf32>
    %cst_151 = arith.constant 0.000000e+00 : f32
    %398 = vector.broadcast %cst_151 : f32 to vector<2x288xf32>
    %399 = arith.maximumf %397, %398 : vector<2x288xf32>
    %400 = vector.broadcast %106 : vector<1x288xf32> to vector<2x288xf32>
    %401 = arith.mulf %399, %400 : vector<2x288xf32>
    %c3_152 = arith.constant 3 : index
    %c0_153 = arith.constant 0 : index
    %c19_154 = arith.constant 19 : index
    %402 = vector.load %arg6[%c3_152, %c0_153, %c19_154] : memref<4x2x384xf32, #tpu.memory_space<vmem>>, vector<1x2x288xf32>
    %403 = vector.shape_cast %402 : vector<1x2x288xf32> to vector<2x288xf32>
    %404 = vector.shape_cast %401 : vector<2x288xf32> to vector<1x2x288xf32>
    tpu.vector_store %arg6[%c3_152, %c0_153, %c19_154], %404 {strides = array<i32>} : memref<4x2x384xf32, #tpu.memory_space<vmem>>, vector<1x2x288xf32>,
    %cst_155 = arith.constant 0.000000e+00 : f32
    %405 = vector.broadcast %cst_155 : f32 to vector<2x288xf32>
    %cst_156 = arith.constant 0.000000e+00 : f32
    %406 = vector.broadcast %cst_156 : f32 to vector<2x288xf32>
    %cst_157 = arith.constant 0.000000e+00 : f32
    %407 = vector.broadcast %cst_157 : f32 to vector<2x288xf32>
    %cst_158 = arith.constant 0.000000e+00 : f32
    %408 = vector.broadcast %cst_158 : f32 to vector<2x288xf32>
    %cst_159 = arith.constant 0.000000e+00 : f32
    %409 = vector.broadcast %cst_159 : f32 to vector<2x288xf32>
    %cst_160 = arith.constant 0.000000e+00 : f32
    %410 = vector.broadcast %cst_160 : f32 to vector<2x288xf32>
    %cst_161 = arith.constant 0.000000e+00 : f32
    %411 = vector.broadcast %cst_161 : f32 to vector<2x288xf32>
    %cst_162 = arith.constant 0.000000e+00 : f32
    %412 = vector.broadcast %cst_162 : f32 to vector<2x288xf32>
    %c0_163 = arith.constant 0 : index
    %c0_164 = arith.constant 0 : index
    %c0_165 = arith.constant 0 : index
    %413 = vector.load %arg6[%c0_163, %c0_164, %c0_165] : memref<4x2x384xf32, #tpu.memory_space<vmem>>, vector<1x2x288xf32>
    %414 = vector.shape_cast %413 : vector<1x2x288xf32> to vector<2x288xf32>
    %c36_166 = arith.constant 36 : index
    %415 = memref.load %arg0[%c36_166] : memref<396xf32, #tpu.memory_space<smem>>
    %416 = vector.broadcast %415 : f32 to vector<2x288xf32>
    %417 = arith.mulf %416, %414 : vector<2x288xf32>
    %418 = arith.addf %405, %417 : vector<2x288xf32>
    %c72 = arith.constant 72 : index
    %419 = memref.load %arg0[%c72] : memref<396xf32, #tpu.memory_space<smem>>
    %420 = vector.broadcast %419 : f32 to vector<2x288xf32>
    %421 = arith.mulf %420, %414 : vector<2x288xf32>
    %422 = arith.addf %406, %421 : vector<2x288xf32>
    %c108 = arith.constant 108 : index
    %423 = memref.load %arg0[%c108] : memref<396xf32, #tpu.memory_space<smem>>
    %424 = vector.broadcast %423 : f32 to vector<2x288xf32>
    %425 = arith.mulf %424, %414 : vector<2x288xf32>
    %426 = arith.addf %407, %425 : vector<2x288xf32>
    %c144_167 = arith.constant 144 : index
    %427 = memref.load %arg0[%c144_167] : memref<396xf32, #tpu.memory_space<smem>>
    %428 = vector.broadcast %427 : f32 to vector<2x288xf32>
    %429 = arith.mulf %428, %414 : vector<2x288xf32>
    %430 = arith.addf %408, %429 : vector<2x288xf32>
    %c180 = arith.constant 180 : index
    %431 = memref.load %arg0[%c180] : memref<396xf32, #tpu.memory_space<smem>>
    %432 = vector.broadcast %431 : f32 to vector<2x288xf32>
    %433 = arith.mulf %432, %414 : vector<2x288xf32>
    %434 = arith.addf %409, %433 : vector<2x288xf32>
    %c216 = arith.constant 216 : index
    %435 = memref.load %arg0[%c216] : memref<396xf32, #tpu.memory_space<smem>>
    %436 = vector.broadcast %435 : f32 to vector<2x288xf32>
    %437 = arith.mulf %436, %414 : vector<2x288xf32>
    %438 = arith.addf %410, %437 : vector<2x288xf32>
    %c252 = arith.constant 252 : index
    %439 = memref.load %arg0[%c252] : memref<396xf32, #tpu.memory_space<smem>>
    %440 = vector.broadcast %439 : f32 to vector<2x288xf32>
    %441 = arith.mulf %440, %414 : vector<2x288xf32>
    %442 = arith.addf %411, %441 : vector<2x288xf32>
    %c288 = arith.constant 288 : index
    %443 = memref.load %arg0[%c288] : memref<396xf32, #tpu.memory_space<smem>>
    %444 = vector.broadcast %443 : f32 to vector<2x288xf32>
    %445 = arith.mulf %444, %414 : vector<2x288xf32>
    %446 = arith.addf %412, %445 : vector<2x288xf32>
    %c0_168 = arith.constant 0 : index
    %c0_169 = arith.constant 0 : index
    %c1_170 = arith.constant 1 : index
    %447 = vector.load %arg6[%c0_168, %c0_169, %c1_170] : memref<4x2x384xf32, #tpu.memory_space<vmem>>, vector<1x2x288xf32>
    %448 = vector.shape_cast %447 : vector<1x2x288xf32> to vector<2x288xf32>
    %c37_171 = arith.constant 37 : index
    %449 = memref.load %arg0[%c37_171] : memref<396xf32, #tpu.memory_space<smem>>
    %450 = vector.broadcast %449 : f32 to vector<2x288xf32>
    %451 = arith.mulf %450, %448 : vector<2x288xf32>
    %452 = arith.addf %418, %451 : vector<2x288xf32>
    %c73_172 = arith.constant 73 : index
    %453 = memref.load %arg0[%c73_172] : memref<396xf32, #tpu.memory_space<smem>>
    %454 = vector.broadcast %453 : f32 to vector<2x288xf32>
    %455 = arith.mulf %454, %448 : vector<2x288xf32>
    %456 = arith.addf %422, %455 : vector<2x288xf32>
    %c109_173 = arith.constant 109 : index
    %457 = memref.load %arg0[%c109_173] : memref<396xf32, #tpu.memory_space<smem>>
    %458 = vector.broadcast %457 : f32 to vector<2x288xf32>
    %459 = arith.mulf %458, %448 : vector<2x288xf32>
    %460 = arith.addf %426, %459 : vector<2x288xf32>
    %c145_174 = arith.constant 145 : index
    %461 = memref.load %arg0[%c145_174] : memref<396xf32, #tpu.memory_space<smem>>
    %462 = vector.broadcast %461 : f32 to vector<2x288xf32>
    %463 = arith.mulf %462, %448 : vector<2x288xf32>
    %464 = arith.addf %430, %463 : vector<2x288xf32>
    %c181_175 = arith.constant 181 : index
    %465 = memref.load %arg0[%c181_175] : memref<396xf32, #tpu.memory_space<smem>>
    %466 = vector.broadcast %465 : f32 to vector<2x288xf32>
    %467 = arith.mulf %466, %448 : vector<2x288xf32>
    %468 = arith.addf %434, %467 : vector<2x288xf32>
    %c217_176 = arith.constant 217 : index
    %469 = memref.load %arg0[%c217_176] : memref<396xf32, #tpu.memory_space<smem>>
    %470 = vector.broadcast %469 : f32 to vector<2x288xf32>
    %471 = arith.mulf %470, %448 : vector<2x288xf32>
    %472 = arith.addf %438, %471 : vector<2x288xf32>
    %c253_177 = arith.constant 253 : index
    %473 = memref.load %arg0[%c253_177] : memref<396xf32, #tpu.memory_space<smem>>
    %474 = vector.broadcast %473 : f32 to vector<2x288xf32>
    %475 = arith.mulf %474, %448 : vector<2x288xf32>
    %476 = arith.addf %442, %475 : vector<2x288xf32>
    %c289_178 = arith.constant 289 : index
    %477 = memref.load %arg0[%c289_178] : memref<396xf32, #tpu.memory_space<smem>>
    %478 = vector.broadcast %477 : f32 to vector<2x288xf32>
    %479 = arith.mulf %478, %448 : vector<2x288xf32>
    %480 = arith.addf %446, %479 : vector<2x288xf32>
    %c0_179 = arith.constant 0 : index
    %c0_180 = arith.constant 0 : index
    %c2_181 = arith.constant 2 : index
    %481 = vector.load %arg6[%c0_179, %c0_180, %c2_181] : memref<4x2x384xf32, #tpu.memory_space<vmem>>, vector<1x2x288xf32>
    %482 = vector.shape_cast %481 : vector<1x2x288xf32> to vector<2x288xf32>
    %c38_182 = arith.constant 38 : index
    %483 = memref.load %arg0[%c38_182] : memref<396xf32, #tpu.memory_space<smem>>
    %484 = vector.broadcast %483 : f32 to vector<2x288xf32>
    %485 = arith.mulf %484, %482 : vector<2x288xf32>
    %486 = arith.addf %452, %485 : vector<2x288xf32>
    %c74 = arith.constant 74 : index
    %487 = memref.load %arg0[%c74] : memref<396xf32, #tpu.memory_space<smem>>
    %488 = vector.broadcast %487 : f32 to vector<2x288xf32>
    %489 = arith.mulf %488, %482 : vector<2x288xf32>
    %490 = arith.addf %456, %489 : vector<2x288xf32>
    %c110 = arith.constant 110 : index
    %491 = memref.load %arg0[%c110] : memref<396xf32, #tpu.memory_space<smem>>
    %492 = vector.broadcast %491 : f32 to vector<2x288xf32>
    %493 = arith.mulf %492, %482 : vector<2x288xf32>
    %494 = arith.addf %460, %493 : vector<2x288xf32>
    %c146 = arith.constant 146 : index
    %495 = memref.load %arg0[%c146] : memref<396xf32, #tpu.memory_space<smem>>
    %496 = vector.broadcast %495 : f32 to vector<2x288xf32>
    %497 = arith.mulf %496, %482 : vector<2x288xf32>
    %498 = arith.addf %464, %497 : vector<2x288xf32>
    %c182 = arith.constant 182 : index
    %499 = memref.load %arg0[%c182] : memref<396xf32, #tpu.memory_space<smem>>
    %500 = vector.broadcast %499 : f32 to vector<2x288xf32>
    %501 = arith.mulf %500, %482 : vector<2x288xf32>
    %502 = arith.addf %468, %501 : vector<2x288xf32>
    %c218 = arith.constant 218 : index
    %503 = memref.load %arg0[%c218] : memref<396xf32, #tpu.memory_space<smem>>
    %504 = vector.broadcast %503 : f32 to vector<2x288xf32>
    %505 = arith.mulf %504, %482 : vector<2x288xf32>
    %506 = arith.addf %472, %505 : vector<2x288xf32>
    %c254 = arith.constant 254 : index
    %507 = memref.load %arg0[%c254] : memref<396xf32, #tpu.memory_space<smem>>
    %508 = vector.broadcast %507 : f32 to vector<2x288xf32>
    %509 = arith.mulf %508, %482 : vector<2x288xf32>
    %510 = arith.addf %476, %509 : vector<2x288xf32>
    %c290 = arith.constant 290 : index
    %511 = memref.load %arg0[%c290] : memref<396xf32, #tpu.memory_space<smem>>
    %512 = vector.broadcast %511 : f32 to vector<2x288xf32>
    %513 = arith.mulf %512, %482 : vector<2x288xf32>
    %514 = arith.addf %480, %513 : vector<2x288xf32>
    %c0_183 = arith.constant 0 : index
    %c0_184 = arith.constant 0 : index
    %c18_185 = arith.constant 18 : index
    %515 = vector.load %arg6[%c0_183, %c0_184, %c18_185] : memref<4x2x384xf32, #tpu.memory_space<vmem>>, vector<1x2x288xf32>
    %516 = vector.shape_cast %515 : vector<1x2x288xf32> to vector<2x288xf32>
    %c39 = arith.constant 39 : index
    %517 = memref.load %arg0[%c39] : memref<396xf32, #tpu.memory_space<smem>>
    %518 = vector.broadcast %517 : f32 to vector<2x288xf32>
    %519 = arith.mulf %518, %516 : vector<2x288xf32>
    %520 = arith.addf %486, %519 : vector<2x288xf32>
    %c75 = arith.constant 75 : index
    %521 = memref.load %arg0[%c75] : memref<396xf32, #tpu.memory_space<smem>>
    %522 = vector.broadcast %521 : f32 to vector<2x288xf32>
    %523 = arith.mulf %522, %516 : vector<2x288xf32>
    %524 = arith.addf %490, %523 : vector<2x288xf32>
    %c111 = arith.constant 111 : index
    %525 = memref.load %arg0[%c111] : memref<396xf32, #tpu.memory_space<smem>>
    %526 = vector.broadcast %525 : f32 to vector<2x288xf32>
    %527 = arith.mulf %526, %516 : vector<2x288xf32>
    %528 = arith.addf %494, %527 : vector<2x288xf32>
    %c147 = arith.constant 147 : index
    %529 = memref.load %arg0[%c147] : memref<396xf32, #tpu.memory_space<smem>>
    %530 = vector.broadcast %529 : f32 to vector<2x288xf32>
    %531 = arith.mulf %530, %516 : vector<2x288xf32>
    %532 = arith.addf %498, %531 : vector<2x288xf32>
    %c183 = arith.constant 183 : index
    %533 = memref.load %arg0[%c183] : memref<396xf32, #tpu.memory_space<smem>>
    %534 = vector.broadcast %533 : f32 to vector<2x288xf32>
    %535 = arith.mulf %534, %516 : vector<2x288xf32>
    %536 = arith.addf %502, %535 : vector<2x288xf32>
    %c219 = arith.constant 219 : index
    %537 = memref.load %arg0[%c219] : memref<396xf32, #tpu.memory_space<smem>>
    %538 = vector.broadcast %537 : f32 to vector<2x288xf32>
    %539 = arith.mulf %538, %516 : vector<2x288xf32>
    %540 = arith.addf %506, %539 : vector<2x288xf32>
    %c255 = arith.constant 255 : index
    %541 = memref.load %arg0[%c255] : memref<396xf32, #tpu.memory_space<smem>>
    %542 = vector.broadcast %541 : f32 to vector<2x288xf32>
    %543 = arith.mulf %542, %516 : vector<2x288xf32>
    %544 = arith.addf %510, %543 : vector<2x288xf32>
    %c291 = arith.constant 291 : index
    %545 = memref.load %arg0[%c291] : memref<396xf32, #tpu.memory_space<smem>>
    %546 = vector.broadcast %545 : f32 to vector<2x288xf32>
    %547 = arith.mulf %546, %516 : vector<2x288xf32>
    %548 = arith.addf %514, %547 : vector<2x288xf32>
    %c0_186 = arith.constant 0 : index
    %c0_187 = arith.constant 0 : index
    %c19_188 = arith.constant 19 : index
    %549 = vector.load %arg6[%c0_186, %c0_187, %c19_188] : memref<4x2x384xf32, #tpu.memory_space<vmem>>, vector<1x2x288xf32>
    %550 = vector.shape_cast %549 : vector<1x2x288xf32> to vector<2x288xf32>
    %c40 = arith.constant 40 : index
    %551 = memref.load %arg0[%c40] : memref<396xf32, #tpu.memory_space<smem>>
    %552 = vector.broadcast %551 : f32 to vector<2x288xf32>
    %553 = arith.mulf %552, %550 : vector<2x288xf32>
    %554 = arith.addf %520, %553 : vector<2x288xf32>
    %c76 = arith.constant 76 : index
    %555 = memref.load %arg0[%c76] : memref<396xf32, #tpu.memory_space<smem>>
    %556 = vector.broadcast %555 : f32 to vector<2x288xf32>
    %557 = arith.mulf %556, %550 : vector<2x288xf32>
    %558 = arith.addf %524, %557 : vector<2x288xf32>
    %c112_189 = arith.constant 112 : index
    %559 = memref.load %arg0[%c112_189] : memref<396xf32, #tpu.memory_space<smem>>
    %560 = vector.broadcast %559 : f32 to vector<2x288xf32>
    %561 = arith.mulf %560, %550 : vector<2x288xf32>
    %562 = arith.addf %528, %561 : vector<2x288xf32>
    %c148 = arith.constant 148 : index
    %563 = memref.load %arg0[%c148] : memref<396xf32, #tpu.memory_space<smem>>
    %564 = vector.broadcast %563 : f32 to vector<2x288xf32>
    %565 = arith.mulf %564, %550 : vector<2x288xf32>
    %566 = arith.addf %532, %565 : vector<2x288xf32>
    %c184 = arith.constant 184 : index
    %567 = memref.load %arg0[%c184] : memref<396xf32, #tpu.memory_space<smem>>
    %568 = vector.broadcast %567 : f32 to vector<2x288xf32>
    %569 = arith.mulf %568, %550 : vector<2x288xf32>
    %570 = arith.addf %536, %569 : vector<2x288xf32>
    %c220 = arith.constant 220 : index
    %571 = memref.load %arg0[%c220] : memref<396xf32, #tpu.memory_space<smem>>
    %572 = vector.broadcast %571 : f32 to vector<2x288xf32>
    %573 = arith.mulf %572, %550 : vector<2x288xf32>
    %574 = arith.addf %540, %573 : vector<2x288xf32>
    %c256 = arith.constant 256 : index
    %575 = memref.load %arg0[%c256] : memref<396xf32, #tpu.memory_space<smem>>
    %576 = vector.broadcast %575 : f32 to vector<2x288xf32>
    %577 = arith.mulf %576, %550 : vector<2x288xf32>
    %578 = arith.addf %544, %577 : vector<2x288xf32>
    %c292 = arith.constant 292 : index
    %579 = memref.load %arg0[%c292] : memref<396xf32, #tpu.memory_space<smem>>
    %580 = vector.broadcast %579 : f32 to vector<2x288xf32>
    %581 = arith.mulf %580, %550 : vector<2x288xf32>
    %582 = arith.addf %548, %581 : vector<2x288xf32>
    %c0_190 = arith.constant 0 : index
    %c0_191 = arith.constant 0 : index
    %c20_192 = arith.constant 20 : index
    %583 = vector.load %arg6[%c0_190, %c0_191, %c20_192] : memref<4x2x384xf32, #tpu.memory_space<vmem>>, vector<1x2x288xf32>
    %584 = vector.shape_cast %583 : vector<1x2x288xf32> to vector<2x288xf32>
    %c41 = arith.constant 41 : index
    %585 = memref.load %arg0[%c41] : memref<396xf32, #tpu.memory_space<smem>>
    %586 = vector.broadcast %585 : f32 to vector<2x288xf32>
    %587 = arith.mulf %586, %584 : vector<2x288xf32>
    %588 = arith.addf %554, %587 : vector<2x288xf32>
    %c77 = arith.constant 77 : index
    %589 = memref.load %arg0[%c77] : memref<396xf32, #tpu.memory_space<smem>>
    %590 = vector.broadcast %589 : f32 to vector<2x288xf32>
    %591 = arith.mulf %590, %584 : vector<2x288xf32>
    %592 = arith.addf %558, %591 : vector<2x288xf32>
    %c113 = arith.constant 113 : index
    %593 = memref.load %arg0[%c113] : memref<396xf32, #tpu.memory_space<smem>>
    %594 = vector.broadcast %593 : f32 to vector<2x288xf32>
    %595 = arith.mulf %594, %584 : vector<2x288xf32>
    %596 = arith.addf %562, %595 : vector<2x288xf32>
    %c149 = arith.constant 149 : index
    %597 = memref.load %arg0[%c149] : memref<396xf32, #tpu.memory_space<smem>>
    %598 = vector.broadcast %597 : f32 to vector<2x288xf32>
    %599 = arith.mulf %598, %584 : vector<2x288xf32>
    %600 = arith.addf %566, %599 : vector<2x288xf32>
    %c185 = arith.constant 185 : index
    %601 = memref.load %arg0[%c185] : memref<396xf32, #tpu.memory_space<smem>>
    %602 = vector.broadcast %601 : f32 to vector<2x288xf32>
    %603 = arith.mulf %602, %584 : vector<2x288xf32>
    %604 = arith.addf %570, %603 : vector<2x288xf32>
    %c221 = arith.constant 221 : index
    %605 = memref.load %arg0[%c221] : memref<396xf32, #tpu.memory_space<smem>>
    %606 = vector.broadcast %605 : f32 to vector<2x288xf32>
    %607 = arith.mulf %606, %584 : vector<2x288xf32>
    %608 = arith.addf %574, %607 : vector<2x288xf32>
    %c257 = arith.constant 257 : index
    %609 = memref.load %arg0[%c257] : memref<396xf32, #tpu.memory_space<smem>>
    %610 = vector.broadcast %609 : f32 to vector<2x288xf32>
    %611 = arith.mulf %610, %584 : vector<2x288xf32>
    %612 = arith.addf %578, %611 : vector<2x288xf32>
    %c293 = arith.constant 293 : index
    %613 = memref.load %arg0[%c293] : memref<396xf32, #tpu.memory_space<smem>>
    %614 = vector.broadcast %613 : f32 to vector<2x288xf32>
    %615 = arith.mulf %614, %584 : vector<2x288xf32>
    %616 = arith.addf %582, %615 : vector<2x288xf32>
    %c0_193 = arith.constant 0 : index
    %c0_194 = arith.constant 0 : index
    %c36_195 = arith.constant 36 : index
    %617 = vector.load %arg6[%c0_193, %c0_194, %c36_195] : memref<4x2x384xf32, #tpu.memory_space<vmem>>, vector<1x2x288xf32>
    %618 = vector.shape_cast %617 : vector<1x2x288xf32> to vector<2x288xf32>
    %c42 = arith.constant 42 : index
    %619 = memref.load %arg0[%c42] : memref<396xf32, #tpu.memory_space<smem>>
    %620 = vector.broadcast %619 : f32 to vector<2x288xf32>
    %621 = arith.mulf %620, %618 : vector<2x288xf32>
    %622 = arith.addf %588, %621 : vector<2x288xf32>
    %c78 = arith.constant 78 : index
    %623 = memref.load %arg0[%c78] : memref<396xf32, #tpu.memory_space<smem>>
    %624 = vector.broadcast %623 : f32 to vector<2x288xf32>
    %625 = arith.mulf %624, %618 : vector<2x288xf32>
    %626 = arith.addf %592, %625 : vector<2x288xf32>
    %c114 = arith.constant 114 : index
    %627 = memref.load %arg0[%c114] : memref<396xf32, #tpu.memory_space<smem>>
    %628 = vector.broadcast %627 : f32 to vector<2x288xf32>
    %629 = arith.mulf %628, %618 : vector<2x288xf32>
    %630 = arith.addf %596, %629 : vector<2x288xf32>
    %c150 = arith.constant 150 : index
    %631 = memref.load %arg0[%c150] : memref<396xf32, #tpu.memory_space<smem>>
    %632 = vector.broadcast %631 : f32 to vector<2x288xf32>
    %633 = arith.mulf %632, %618 : vector<2x288xf32>
    %634 = arith.addf %600, %633 : vector<2x288xf32>
    %c186 = arith.constant 186 : index
    %635 = memref.load %arg0[%c186] : memref<396xf32, #tpu.memory_space<smem>>
    %636 = vector.broadcast %635 : f32 to vector<2x288xf32>
    %637 = arith.mulf %636, %618 : vector<2x288xf32>
    %638 = arith.addf %604, %637 : vector<2x288xf32>
    %c222 = arith.constant 222 : index
    %639 = memref.load %arg0[%c222] : memref<396xf32, #tpu.memory_space<smem>>
    %640 = vector.broadcast %639 : f32 to vector<2x288xf32>
    %641 = arith.mulf %640, %618 : vector<2x288xf32>
    %642 = arith.addf %608, %641 : vector<2x288xf32>
    %c258 = arith.constant 258 : index
    %643 = memref.load %arg0[%c258] : memref<396xf32, #tpu.memory_space<smem>>
    %644 = vector.broadcast %643 : f32 to vector<2x288xf32>
    %645 = arith.mulf %644, %618 : vector<2x288xf32>
    %646 = arith.addf %612, %645 : vector<2x288xf32>
    %c294 = arith.constant 294 : index
    %647 = memref.load %arg0[%c294] : memref<396xf32, #tpu.memory_space<smem>>
    %648 = vector.broadcast %647 : f32 to vector<2x288xf32>
    %649 = arith.mulf %648, %618 : vector<2x288xf32>
    %650 = arith.addf %616, %649 : vector<2x288xf32>
    %c0_196 = arith.constant 0 : index
    %c0_197 = arith.constant 0 : index
    %c37_198 = arith.constant 37 : index
    %651 = vector.load %arg6[%c0_196, %c0_197, %c37_198] : memref<4x2x384xf32, #tpu.memory_space<vmem>>, vector<1x2x288xf32>
    %652 = vector.shape_cast %651 : vector<1x2x288xf32> to vector<2x288xf32>
    %c43 = arith.constant 43 : index
    %653 = memref.load %arg0[%c43] : memref<396xf32, #tpu.memory_space<smem>>
    %654 = vector.broadcast %653 : f32 to vector<2x288xf32>
    %655 = arith.mulf %654, %652 : vector<2x288xf32>
    %656 = arith.addf %622, %655 : vector<2x288xf32>
    %c79 = arith.constant 79 : index
    %657 = memref.load %arg0[%c79] : memref<396xf32, #tpu.memory_space<smem>>
    %658 = vector.broadcast %657 : f32 to vector<2x288xf32>
    %659 = arith.mulf %658, %652 : vector<2x288xf32>
    %660 = arith.addf %626, %659 : vector<2x288xf32>
    %c115 = arith.constant 115 : index
    %661 = memref.load %arg0[%c115] : memref<396xf32, #tpu.memory_space<smem>>
    %662 = vector.broadcast %661 : f32 to vector<2x288xf32>
    %663 = arith.mulf %662, %652 : vector<2x288xf32>
    %664 = arith.addf %630, %663 : vector<2x288xf32>
    %c151 = arith.constant 151 : index
    %665 = memref.load %arg0[%c151] : memref<396xf32, #tpu.memory_space<smem>>
    %666 = vector.broadcast %665 : f32 to vector<2x288xf32>
    %667 = arith.mulf %666, %652 : vector<2x288xf32>
    %668 = arith.addf %634, %667 : vector<2x288xf32>
    %c187 = arith.constant 187 : index
    %669 = memref.load %arg0[%c187] : memref<396xf32, #tpu.memory_space<smem>>
    %670 = vector.broadcast %669 : f32 to vector<2x288xf32>
    %671 = arith.mulf %670, %652 : vector<2x288xf32>
    %672 = arith.addf %638, %671 : vector<2x288xf32>
    %c223 = arith.constant 223 : index
    %673 = memref.load %arg0[%c223] : memref<396xf32, #tpu.memory_space<smem>>
    %674 = vector.broadcast %673 : f32 to vector<2x288xf32>
    %675 = arith.mulf %674, %652 : vector<2x288xf32>
    %676 = arith.addf %642, %675 : vector<2x288xf32>
    %c259 = arith.constant 259 : index
    %677 = memref.load %arg0[%c259] : memref<396xf32, #tpu.memory_space<smem>>
    %678 = vector.broadcast %677 : f32 to vector<2x288xf32>
    %679 = arith.mulf %678, %652 : vector<2x288xf32>
    %680 = arith.addf %646, %679 : vector<2x288xf32>
    %c295 = arith.constant 295 : index
    %681 = memref.load %arg0[%c295] : memref<396xf32, #tpu.memory_space<smem>>
    %682 = vector.broadcast %681 : f32 to vector<2x288xf32>
    %683 = arith.mulf %682, %652 : vector<2x288xf32>
    %684 = arith.addf %650, %683 : vector<2x288xf32>
    %c0_199 = arith.constant 0 : index
    %c0_200 = arith.constant 0 : index
    %c38_201 = arith.constant 38 : index
    %685 = vector.load %arg6[%c0_199, %c0_200, %c38_201] : memref<4x2x384xf32, #tpu.memory_space<vmem>>, vector<1x2x288xf32>
    %686 = vector.shape_cast %685 : vector<1x2x288xf32> to vector<2x288xf32>
    %c44 = arith.constant 44 : index
    %687 = memref.load %arg0[%c44] : memref<396xf32, #tpu.memory_space<smem>>
    %688 = vector.broadcast %687 : f32 to vector<2x288xf32>
    %689 = arith.mulf %688, %686 : vector<2x288xf32>
    %690 = arith.addf %656, %689 : vector<2x288xf32>
    %c80_202 = arith.constant 80 : index
    %691 = memref.load %arg0[%c80_202] : memref<396xf32, #tpu.memory_space<smem>>
    %692 = vector.broadcast %691 : f32 to vector<2x288xf32>
    %693 = arith.mulf %692, %686 : vector<2x288xf32>
    %694 = arith.addf %660, %693 : vector<2x288xf32>
    %c116 = arith.constant 116 : index
    %695 = memref.load %arg0[%c116] : memref<396xf32, #tpu.memory_space<smem>>
    %696 = vector.broadcast %695 : f32 to vector<2x288xf32>
    %697 = arith.mulf %696, %686 : vector<2x288xf32>
    %698 = arith.addf %664, %697 : vector<2x288xf32>
    %c152 = arith.constant 152 : index
    %699 = memref.load %arg0[%c152] : memref<396xf32, #tpu.memory_space<smem>>
    %700 = vector.broadcast %699 : f32 to vector<2x288xf32>
    %701 = arith.mulf %700, %686 : vector<2x288xf32>
    %702 = arith.addf %668, %701 : vector<2x288xf32>
    %c188 = arith.constant 188 : index
    %703 = memref.load %arg0[%c188] : memref<396xf32, #tpu.memory_space<smem>>
    %704 = vector.broadcast %703 : f32 to vector<2x288xf32>
    %705 = arith.mulf %704, %686 : vector<2x288xf32>
    %706 = arith.addf %672, %705 : vector<2x288xf32>
    %c224_203 = arith.constant 224 : index
    %707 = memref.load %arg0[%c224_203] : memref<396xf32, #tpu.memory_space<smem>>
    %708 = vector.broadcast %707 : f32 to vector<2x288xf32>
    %709 = arith.mulf %708, %686 : vector<2x288xf32>
    %710 = arith.addf %676, %709 : vector<2x288xf32>
    %c260 = arith.constant 260 : index
    %711 = memref.load %arg0[%c260] : memref<396xf32, #tpu.memory_space<smem>>
    %712 = vector.broadcast %711 : f32 to vector<2x288xf32>
    %713 = arith.mulf %712, %686 : vector<2x288xf32>
    %714 = arith.addf %680, %713 : vector<2x288xf32>
    %c296 = arith.constant 296 : index
    %715 = memref.load %arg0[%c296] : memref<396xf32, #tpu.memory_space<smem>>
    %716 = vector.broadcast %715 : f32 to vector<2x288xf32>
    %717 = arith.mulf %716, %686 : vector<2x288xf32>
    %718 = arith.addf %684, %717 : vector<2x288xf32>
    %c1_204 = arith.constant 1 : index
    %c0_205 = arith.constant 0 : index
    %c0_206 = arith.constant 0 : index
    %719 = vector.load %arg6[%c1_204, %c0_205, %c0_206] : memref<4x2x384xf32, #tpu.memory_space<vmem>>, vector<1x2x288xf32>
    %720 = vector.shape_cast %719 : vector<1x2x288xf32> to vector<2x288xf32>
    %c45 = arith.constant 45 : index
    %721 = memref.load %arg0[%c45] : memref<396xf32, #tpu.memory_space<smem>>
    %722 = vector.broadcast %721 : f32 to vector<2x288xf32>
    %723 = arith.mulf %722, %720 : vector<2x288xf32>
    %724 = arith.addf %690, %723 : vector<2x288xf32>
    %c81 = arith.constant 81 : index
    %725 = memref.load %arg0[%c81] : memref<396xf32, #tpu.memory_space<smem>>
    %726 = vector.broadcast %725 : f32 to vector<2x288xf32>
    %727 = arith.mulf %726, %720 : vector<2x288xf32>
    %728 = arith.addf %694, %727 : vector<2x288xf32>
    %c117 = arith.constant 117 : index
    %729 = memref.load %arg0[%c117] : memref<396xf32, #tpu.memory_space<smem>>
    %730 = vector.broadcast %729 : f32 to vector<2x288xf32>
    %731 = arith.mulf %730, %720 : vector<2x288xf32>
    %732 = arith.addf %698, %731 : vector<2x288xf32>
    %c153 = arith.constant 153 : index
    %733 = memref.load %arg0[%c153] : memref<396xf32, #tpu.memory_space<smem>>
    %734 = vector.broadcast %733 : f32 to vector<2x288xf32>
    %735 = arith.mulf %734, %720 : vector<2x288xf32>
    %736 = arith.addf %702, %735 : vector<2x288xf32>
    %c189 = arith.constant 189 : index
    %737 = memref.load %arg0[%c189] : memref<396xf32, #tpu.memory_space<smem>>
    %738 = vector.broadcast %737 : f32 to vector<2x288xf32>
    %739 = arith.mulf %738, %720 : vector<2x288xf32>
    %740 = arith.addf %706, %739 : vector<2x288xf32>
    %c225 = arith.constant 225 : index
    %741 = memref.load %arg0[%c225] : memref<396xf32, #tpu.memory_space<smem>>
    %742 = vector.broadcast %741 : f32 to vector<2x288xf32>
    %743 = arith.mulf %742, %720 : vector<2x288xf32>
    %744 = arith.addf %710, %743 : vector<2x288xf32>
    %c261 = arith.constant 261 : index
    %745 = memref.load %arg0[%c261] : memref<396xf32, #tpu.memory_space<smem>>
    %746 = vector.broadcast %745 : f32 to vector<2x288xf32>
    %747 = arith.mulf %746, %720 : vector<2x288xf32>
    %748 = arith.addf %714, %747 : vector<2x288xf32>
    %c297 = arith.constant 297 : index
    %749 = memref.load %arg0[%c297] : memref<396xf32, #tpu.memory_space<smem>>
    %750 = vector.broadcast %749 : f32 to vector<2x288xf32>
    %751 = arith.mulf %750, %720 : vector<2x288xf32>
    %752 = arith.addf %718, %751 : vector<2x288xf32>
    %c1_207 = arith.constant 1 : index
    %c0_208 = arith.constant 0 : index
    %c1_209 = arith.constant 1 : index
    %753 = vector.load %arg6[%c1_207, %c0_208, %c1_209] : memref<4x2x384xf32, #tpu.memory_space<vmem>>, vector<1x2x288xf32>
    %754 = vector.shape_cast %753 : vector<1x2x288xf32> to vector<2x288xf32>
    %c46 = arith.constant 46 : index
    %755 = memref.load %arg0[%c46] : memref<396xf32, #tpu.memory_space<smem>>
    %756 = vector.broadcast %755 : f32 to vector<2x288xf32>
    %757 = arith.mulf %756, %754 : vector<2x288xf32>
    %758 = arith.addf %724, %757 : vector<2x288xf32>
    %c82 = arith.constant 82 : index
    %759 = memref.load %arg0[%c82] : memref<396xf32, #tpu.memory_space<smem>>
    %760 = vector.broadcast %759 : f32 to vector<2x288xf32>
    %761 = arith.mulf %760, %754 : vector<2x288xf32>
    %762 = arith.addf %728, %761 : vector<2x288xf32>
    %c118 = arith.constant 118 : index
    %763 = memref.load %arg0[%c118] : memref<396xf32, #tpu.memory_space<smem>>
    %764 = vector.broadcast %763 : f32 to vector<2x288xf32>
    %765 = arith.mulf %764, %754 : vector<2x288xf32>
    %766 = arith.addf %732, %765 : vector<2x288xf32>
    %c154 = arith.constant 154 : index
    %767 = memref.load %arg0[%c154] : memref<396xf32, #tpu.memory_space<smem>>
    %768 = vector.broadcast %767 : f32 to vector<2x288xf32>
    %769 = arith.mulf %768, %754 : vector<2x288xf32>
    %770 = arith.addf %736, %769 : vector<2x288xf32>
    %c190 = arith.constant 190 : index
    %771 = memref.load %arg0[%c190] : memref<396xf32, #tpu.memory_space<smem>>
    %772 = vector.broadcast %771 : f32 to vector<2x288xf32>
    %773 = arith.mulf %772, %754 : vector<2x288xf32>
    %774 = arith.addf %740, %773 : vector<2x288xf32>
    %c226 = arith.constant 226 : index
    %775 = memref.load %arg0[%c226] : memref<396xf32, #tpu.memory_space<smem>>
    %776 = vector.broadcast %775 : f32 to vector<2x288xf32>
    %777 = arith.mulf %776, %754 : vector<2x288xf32>
    %778 = arith.addf %744, %777 : vector<2x288xf32>
    %c262 = arith.constant 262 : index
    %779 = memref.load %arg0[%c262] : memref<396xf32, #tpu.memory_space<smem>>
    %780 = vector.broadcast %779 : f32 to vector<2x288xf32>
    %781 = arith.mulf %780, %754 : vector<2x288xf32>
    %782 = arith.addf %748, %781 : vector<2x288xf32>
    %c298 = arith.constant 298 : index
    %783 = memref.load %arg0[%c298] : memref<396xf32, #tpu.memory_space<smem>>
    %784 = vector.broadcast %783 : f32 to vector<2x288xf32>
    %785 = arith.mulf %784, %754 : vector<2x288xf32>
    %786 = arith.addf %752, %785 : vector<2x288xf32>
    %c1_210 = arith.constant 1 : index
    %c0_211 = arith.constant 0 : index
    %c2_212 = arith.constant 2 : index
    %787 = vector.load %arg6[%c1_210, %c0_211, %c2_212] : memref<4x2x384xf32, #tpu.memory_space<vmem>>, vector<1x2x288xf32>
    %788 = vector.shape_cast %787 : vector<1x2x288xf32> to vector<2x288xf32>
    %c47 = arith.constant 47 : index
    %789 = memref.load %arg0[%c47] : memref<396xf32, #tpu.memory_space<smem>>
    %790 = vector.broadcast %789 : f32 to vector<2x288xf32>
    %791 = arith.mulf %790, %788 : vector<2x288xf32>
    %792 = arith.addf %758, %791 : vector<2x288xf32>
    %c83 = arith.constant 83 : index
    %793 = memref.load %arg0[%c83] : memref<396xf32, #tpu.memory_space<smem>>
    %794 = vector.broadcast %793 : f32 to vector<2x288xf32>
    %795 = arith.mulf %794, %788 : vector<2x288xf32>
    %796 = arith.addf %762, %795 : vector<2x288xf32>
    %c119 = arith.constant 119 : index
    %797 = memref.load %arg0[%c119] : memref<396xf32, #tpu.memory_space<smem>>
    %798 = vector.broadcast %797 : f32 to vector<2x288xf32>
    %799 = arith.mulf %798, %788 : vector<2x288xf32>
    %800 = arith.addf %766, %799 : vector<2x288xf32>
    %c155 = arith.constant 155 : index
    %801 = memref.load %arg0[%c155] : memref<396xf32, #tpu.memory_space<smem>>
    %802 = vector.broadcast %801 : f32 to vector<2x288xf32>
    %803 = arith.mulf %802, %788 : vector<2x288xf32>
    %804 = arith.addf %770, %803 : vector<2x288xf32>
    %c191 = arith.constant 191 : index
    %805 = memref.load %arg0[%c191] : memref<396xf32, #tpu.memory_space<smem>>
    %806 = vector.broadcast %805 : f32 to vector<2x288xf32>
    %807 = arith.mulf %806, %788 : vector<2x288xf32>
    %808 = arith.addf %774, %807 : vector<2x288xf32>
    %c227 = arith.constant 227 : index
    %809 = memref.load %arg0[%c227] : memref<396xf32, #tpu.memory_space<smem>>
    %810 = vector.broadcast %809 : f32 to vector<2x288xf32>
    %811 = arith.mulf %810, %788 : vector<2x288xf32>
    %812 = arith.addf %778, %811 : vector<2x288xf32>
    %c263 = arith.constant 263 : index
    %813 = memref.load %arg0[%c263] : memref<396xf32, #tpu.memory_space<smem>>
    %814 = vector.broadcast %813 : f32 to vector<2x288xf32>
    %815 = arith.mulf %814, %788 : vector<2x288xf32>
    %816 = arith.addf %782, %815 : vector<2x288xf32>
    %c299 = arith.constant 299 : index
    %817 = memref.load %arg0[%c299] : memref<396xf32, #tpu.memory_space<smem>>
    %818 = vector.broadcast %817 : f32 to vector<2x288xf32>
    %819 = arith.mulf %818, %788 : vector<2x288xf32>
    %820 = arith.addf %786, %819 : vector<2x288xf32>
    %c1_213 = arith.constant 1 : index
    %c0_214 = arith.constant 0 : index
    %c18_215 = arith.constant 18 : index
    %821 = vector.load %arg6[%c1_213, %c0_214, %c18_215] : memref<4x2x384xf32, #tpu.memory_space<vmem>>, vector<1x2x288xf32>
    %822 = vector.shape_cast %821 : vector<1x2x288xf32> to vector<2x288xf32>
    %c48_216 = arith.constant 48 : index
    %823 = memref.load %arg0[%c48_216] : memref<396xf32, #tpu.memory_space<smem>>
    %824 = vector.broadcast %823 : f32 to vector<2x288xf32>
    %825 = arith.mulf %824, %822 : vector<2x288xf32>
    %826 = arith.addf %792, %825 : vector<2x288xf32>
    %c84 = arith.constant 84 : index
    %827 = memref.load %arg0[%c84] : memref<396xf32, #tpu.memory_space<smem>>
    %828 = vector.broadcast %827 : f32 to vector<2x288xf32>
    %829 = arith.mulf %828, %822 : vector<2x288xf32>
    %830 = arith.addf %796, %829 : vector<2x288xf32>
    %c120 = arith.constant 120 : index
    %831 = memref.load %arg0[%c120] : memref<396xf32, #tpu.memory_space<smem>>
    %832 = vector.broadcast %831 : f32 to vector<2x288xf32>
    %833 = arith.mulf %832, %822 : vector<2x288xf32>
    %834 = arith.addf %800, %833 : vector<2x288xf32>
    %c156 = arith.constant 156 : index
    %835 = memref.load %arg0[%c156] : memref<396xf32, #tpu.memory_space<smem>>
    %836 = vector.broadcast %835 : f32 to vector<2x288xf32>
    %837 = arith.mulf %836, %822 : vector<2x288xf32>
    %838 = arith.addf %804, %837 : vector<2x288xf32>
    %c192_217 = arith.constant 192 : index
    %839 = memref.load %arg0[%c192_217] : memref<396xf32, #tpu.memory_space<smem>>
    %840 = vector.broadcast %839 : f32 to vector<2x288xf32>
    %841 = arith.mulf %840, %822 : vector<2x288xf32>
    %842 = arith.addf %808, %841 : vector<2x288xf32>
    %c228 = arith.constant 228 : index
    %843 = memref.load %arg0[%c228] : memref<396xf32, #tpu.memory_space<smem>>
    %844 = vector.broadcast %843 : f32 to vector<2x288xf32>
    %845 = arith.mulf %844, %822 : vector<2x288xf32>
    %846 = arith.addf %812, %845 : vector<2x288xf32>
    %c264 = arith.constant 264 : index
    %847 = memref.load %arg0[%c264] : memref<396xf32, #tpu.memory_space<smem>>
    %848 = vector.broadcast %847 : f32 to vector<2x288xf32>
    %849 = arith.mulf %848, %822 : vector<2x288xf32>
    %850 = arith.addf %816, %849 : vector<2x288xf32>
    %c300 = arith.constant 300 : index
    %851 = memref.load %arg0[%c300] : memref<396xf32, #tpu.memory_space<smem>>
    %852 = vector.broadcast %851 : f32 to vector<2x288xf32>
    %853 = arith.mulf %852, %822 : vector<2x288xf32>
    %854 = arith.addf %820, %853 : vector<2x288xf32>
    %c1_218 = arith.constant 1 : index
    %c0_219 = arith.constant 0 : index
    %c19_220 = arith.constant 19 : index
    %855 = vector.load %arg6[%c1_218, %c0_219, %c19_220] : memref<4x2x384xf32, #tpu.memory_space<vmem>>, vector<1x2x288xf32>
    %856 = vector.shape_cast %855 : vector<1x2x288xf32> to vector<2x288xf32>
    %c49 = arith.constant 49 : index
    %857 = memref.load %arg0[%c49] : memref<396xf32, #tpu.memory_space<smem>>
    %858 = vector.broadcast %857 : f32 to vector<2x288xf32>
    %859 = arith.mulf %858, %856 : vector<2x288xf32>
    %860 = arith.addf %826, %859 : vector<2x288xf32>
    %c85 = arith.constant 85 : index
    %861 = memref.load %arg0[%c85] : memref<396xf32, #tpu.memory_space<smem>>
    %862 = vector.broadcast %861 : f32 to vector<2x288xf32>
    %863 = arith.mulf %862, %856 : vector<2x288xf32>
    %864 = arith.addf %830, %863 : vector<2x288xf32>
    %c121 = arith.constant 121 : index
    %865 = memref.load %arg0[%c121] : memref<396xf32, #tpu.memory_space<smem>>
    %866 = vector.broadcast %865 : f32 to vector<2x288xf32>
    %867 = arith.mulf %866, %856 : vector<2x288xf32>
    %868 = arith.addf %834, %867 : vector<2x288xf32>
    %c157 = arith.constant 157 : index
    %869 = memref.load %arg0[%c157] : memref<396xf32, #tpu.memory_space<smem>>
    %870 = vector.broadcast %869 : f32 to vector<2x288xf32>
    %871 = arith.mulf %870, %856 : vector<2x288xf32>
    %872 = arith.addf %838, %871 : vector<2x288xf32>
    %c193 = arith.constant 193 : index
    %873 = memref.load %arg0[%c193] : memref<396xf32, #tpu.memory_space<smem>>
    %874 = vector.broadcast %873 : f32 to vector<2x288xf32>
    %875 = arith.mulf %874, %856 : vector<2x288xf32>
    %876 = arith.addf %842, %875 : vector<2x288xf32>
    %c229 = arith.constant 229 : index
    %877 = memref.load %arg0[%c229] : memref<396xf32, #tpu.memory_space<smem>>
    %878 = vector.broadcast %877 : f32 to vector<2x288xf32>
    %879 = arith.mulf %878, %856 : vector<2x288xf32>
    %880 = arith.addf %846, %879 : vector<2x288xf32>
    %c265 = arith.constant 265 : index
    %881 = memref.load %arg0[%c265] : memref<396xf32, #tpu.memory_space<smem>>
    %882 = vector.broadcast %881 : f32 to vector<2x288xf32>
    %883 = arith.mulf %882, %856 : vector<2x288xf32>
    %884 = arith.addf %850, %883 : vector<2x288xf32>
    %c301 = arith.constant 301 : index
    %885 = memref.load %arg0[%c301] : memref<396xf32, #tpu.memory_space<smem>>
    %886 = vector.broadcast %885 : f32 to vector<2x288xf32>
    %887 = arith.mulf %886, %856 : vector<2x288xf32>
    %888 = arith.addf %854, %887 : vector<2x288xf32>
    %c1_221 = arith.constant 1 : index
    %c0_222 = arith.constant 0 : index
    %c20_223 = arith.constant 20 : index
    %889 = vector.load %arg6[%c1_221, %c0_222, %c20_223] : memref<4x2x384xf32, #tpu.memory_space<vmem>>, vector<1x2x288xf32>
    %890 = vector.shape_cast %889 : vector<1x2x288xf32> to vector<2x288xf32>
    %c50 = arith.constant 50 : index
    %891 = memref.load %arg0[%c50] : memref<396xf32, #tpu.memory_space<smem>>
    %892 = vector.broadcast %891 : f32 to vector<2x288xf32>
    %893 = arith.mulf %892, %890 : vector<2x288xf32>
    %894 = arith.addf %860, %893 : vector<2x288xf32>
    %c86 = arith.constant 86 : index
    %895 = memref.load %arg0[%c86] : memref<396xf32, #tpu.memory_space<smem>>
    %896 = vector.broadcast %895 : f32 to vector<2x288xf32>
    %897 = arith.mulf %896, %890 : vector<2x288xf32>
    %898 = arith.addf %864, %897 : vector<2x288xf32>
    %c122 = arith.constant 122 : index
    %899 = memref.load %arg0[%c122] : memref<396xf32, #tpu.memory_space<smem>>
    %900 = vector.broadcast %899 : f32 to vector<2x288xf32>
    %901 = arith.mulf %900, %890 : vector<2x288xf32>
    %902 = arith.addf %868, %901 : vector<2x288xf32>
    %c158 = arith.constant 158 : index
    %903 = memref.load %arg0[%c158] : memref<396xf32, #tpu.memory_space<smem>>
    %904 = vector.broadcast %903 : f32 to vector<2x288xf32>
    %905 = arith.mulf %904, %890 : vector<2x288xf32>
    %906 = arith.addf %872, %905 : vector<2x288xf32>
    %c194 = arith.constant 194 : index
    %907 = memref.load %arg0[%c194] : memref<396xf32, #tpu.memory_space<smem>>
    %908 = vector.broadcast %907 : f32 to vector<2x288xf32>
    %909 = arith.mulf %908, %890 : vector<2x288xf32>
    %910 = arith.addf %876, %909 : vector<2x288xf32>
    %c230 = arith.constant 230 : index
    %911 = memref.load %arg0[%c230] : memref<396xf32, #tpu.memory_space<smem>>
    %912 = vector.broadcast %911 : f32 to vector<2x288xf32>
    %913 = arith.mulf %912, %890 : vector<2x288xf32>
    %914 = arith.addf %880, %913 : vector<2x288xf32>
    %c266 = arith.constant 266 : index
    %915 = memref.load %arg0[%c266] : memref<396xf32, #tpu.memory_space<smem>>
    %916 = vector.broadcast %915 : f32 to vector<2x288xf32>
    %917 = arith.mulf %916, %890 : vector<2x288xf32>
    %918 = arith.addf %884, %917 : vector<2x288xf32>
    %c302 = arith.constant 302 : index
    %919 = memref.load %arg0[%c302] : memref<396xf32, #tpu.memory_space<smem>>
    %920 = vector.broadcast %919 : f32 to vector<2x288xf32>
    %921 = arith.mulf %920, %890 : vector<2x288xf32>
    %922 = arith.addf %888, %921 : vector<2x288xf32>
    %c1_224 = arith.constant 1 : index
    %c0_225 = arith.constant 0 : index
    %c36_226 = arith.constant 36 : index
    %923 = vector.load %arg6[%c1_224, %c0_225, %c36_226] : memref<4x2x384xf32, #tpu.memory_space<vmem>>, vector<1x2x288xf32>
    %924 = vector.shape_cast %923 : vector<1x2x288xf32> to vector<2x288xf32>
    %c51 = arith.constant 51 : index
    %925 = memref.load %arg0[%c51] : memref<396xf32, #tpu.memory_space<smem>>
    %926 = vector.broadcast %925 : f32 to vector<2x288xf32>
    %927 = arith.mulf %926, %924 : vector<2x288xf32>
    %928 = arith.addf %894, %927 : vector<2x288xf32>
    %c87 = arith.constant 87 : index
    %929 = memref.load %arg0[%c87] : memref<396xf32, #tpu.memory_space<smem>>
    %930 = vector.broadcast %929 : f32 to vector<2x288xf32>
    %931 = arith.mulf %930, %924 : vector<2x288xf32>
    %932 = arith.addf %898, %931 : vector<2x288xf32>
    %c123 = arith.constant 123 : index
    %933 = memref.load %arg0[%c123] : memref<396xf32, #tpu.memory_space<smem>>
    %934 = vector.broadcast %933 : f32 to vector<2x288xf32>
    %935 = arith.mulf %934, %924 : vector<2x288xf32>
    %936 = arith.addf %902, %935 : vector<2x288xf32>
    %c159 = arith.constant 159 : index
    %937 = memref.load %arg0[%c159] : memref<396xf32, #tpu.memory_space<smem>>
    %938 = vector.broadcast %937 : f32 to vector<2x288xf32>
    %939 = arith.mulf %938, %924 : vector<2x288xf32>
    %940 = arith.addf %906, %939 : vector<2x288xf32>
    %c195 = arith.constant 195 : index
    %941 = memref.load %arg0[%c195] : memref<396xf32, #tpu.memory_space<smem>>
    %942 = vector.broadcast %941 : f32 to vector<2x288xf32>
    %943 = arith.mulf %942, %924 : vector<2x288xf32>
    %944 = arith.addf %910, %943 : vector<2x288xf32>
    %c231 = arith.constant 231 : index
    %945 = memref.load %arg0[%c231] : memref<396xf32, #tpu.memory_space<smem>>
    %946 = vector.broadcast %945 : f32 to vector<2x288xf32>
    %947 = arith.mulf %946, %924 : vector<2x288xf32>
    %948 = arith.addf %914, %947 : vector<2x288xf32>
    %c267 = arith.constant 267 : index
    %949 = memref.load %arg0[%c267] : memref<396xf32, #tpu.memory_space<smem>>
    %950 = vector.broadcast %949 : f32 to vector<2x288xf32>
    %951 = arith.mulf %950, %924 : vector<2x288xf32>
    %952 = arith.addf %918, %951 : vector<2x288xf32>
    %c303 = arith.constant 303 : index
    %953 = memref.load %arg0[%c303] : memref<396xf32, #tpu.memory_space<smem>>
    %954 = vector.broadcast %953 : f32 to vector<2x288xf32>
    %955 = arith.mulf %954, %924 : vector<2x288xf32>
    %956 = arith.addf %922, %955 : vector<2x288xf32>
    %c1_227 = arith.constant 1 : index
    %c0_228 = arith.constant 0 : index
    %c37_229 = arith.constant 37 : index
    %957 = vector.load %arg6[%c1_227, %c0_228, %c37_229] : memref<4x2x384xf32, #tpu.memory_space<vmem>>, vector<1x2x288xf32>
    %958 = vector.shape_cast %957 : vector<1x2x288xf32> to vector<2x288xf32>
    %c52 = arith.constant 52 : index
    %959 = memref.load %arg0[%c52] : memref<396xf32, #tpu.memory_space<smem>>
    %960 = vector.broadcast %959 : f32 to vector<2x288xf32>
    %961 = arith.mulf %960, %958 : vector<2x288xf32>
    %962 = arith.addf %928, %961 : vector<2x288xf32>
    %c88 = arith.constant 88 : index
    %963 = memref.load %arg0[%c88] : memref<396xf32, #tpu.memory_space<smem>>
    %964 = vector.broadcast %963 : f32 to vector<2x288xf32>
    %965 = arith.mulf %964, %958 : vector<2x288xf32>
    %966 = arith.addf %932, %965 : vector<2x288xf32>
    %c124 = arith.constant 124 : index
    %967 = memref.load %arg0[%c124] : memref<396xf32, #tpu.memory_space<smem>>
    %968 = vector.broadcast %967 : f32 to vector<2x288xf32>
    %969 = arith.mulf %968, %958 : vector<2x288xf32>
    %970 = arith.addf %936, %969 : vector<2x288xf32>
    %c160_230 = arith.constant 160 : index
    %971 = memref.load %arg0[%c160_230] : memref<396xf32, #tpu.memory_space<smem>>
    %972 = vector.broadcast %971 : f32 to vector<2x288xf32>
    %973 = arith.mulf %972, %958 : vector<2x288xf32>
    %974 = arith.addf %940, %973 : vector<2x288xf32>
    %c196 = arith.constant 196 : index
    %975 = memref.load %arg0[%c196] : memref<396xf32, #tpu.memory_space<smem>>
    %976 = vector.broadcast %975 : f32 to vector<2x288xf32>
    %977 = arith.mulf %976, %958 : vector<2x288xf32>
    %978 = arith.addf %944, %977 : vector<2x288xf32>
    %c232 = arith.constant 232 : index
    %979 = memref.load %arg0[%c232] : memref<396xf32, #tpu.memory_space<smem>>
    %980 = vector.broadcast %979 : f32 to vector<2x288xf32>
    %981 = arith.mulf %980, %958 : vector<2x288xf32>
    %982 = arith.addf %948, %981 : vector<2x288xf32>
    %c268 = arith.constant 268 : index
    %983 = memref.load %arg0[%c268] : memref<396xf32, #tpu.memory_space<smem>>
    %984 = vector.broadcast %983 : f32 to vector<2x288xf32>
    %985 = arith.mulf %984, %958 : vector<2x288xf32>
    %986 = arith.addf %952, %985 : vector<2x288xf32>
    %c304 = arith.constant 304 : index
    %987 = memref.load %arg0[%c304] : memref<396xf32, #tpu.memory_space<smem>>
    %988 = vector.broadcast %987 : f32 to vector<2x288xf32>
    %989 = arith.mulf %988, %958 : vector<2x288xf32>
    %990 = arith.addf %956, %989 : vector<2x288xf32>
    %c1_231 = arith.constant 1 : index
    %c0_232 = arith.constant 0 : index
    %c38_233 = arith.constant 38 : index
    %991 = vector.load %arg6[%c1_231, %c0_232, %c38_233] : memref<4x2x384xf32, #tpu.memory_space<vmem>>, vector<1x2x288xf32>
    %992 = vector.shape_cast %991 : vector<1x2x288xf32> to vector<2x288xf32>
    %c53 = arith.constant 53 : index
    %993 = memref.load %arg0[%c53] : memref<396xf32, #tpu.memory_space<smem>>
    %994 = vector.broadcast %993 : f32 to vector<2x288xf32>
    %995 = arith.mulf %994, %992 : vector<2x288xf32>
    %996 = arith.addf %962, %995 : vector<2x288xf32>
    %c89 = arith.constant 89 : index
    %997 = memref.load %arg0[%c89] : memref<396xf32, #tpu.memory_space<smem>>
    %998 = vector.broadcast %997 : f32 to vector<2x288xf32>
    %999 = arith.mulf %998, %992 : vector<2x288xf32>
    %1000 = arith.addf %966, %999 : vector<2x288xf32>
    %c125 = arith.constant 125 : index
    %1001 = memref.load %arg0[%c125] : memref<396xf32, #tpu.memory_space<smem>>
    %1002 = vector.broadcast %1001 : f32 to vector<2x288xf32>
    %1003 = arith.mulf %1002, %992 : vector<2x288xf32>
    %1004 = arith.addf %970, %1003 : vector<2x288xf32>
    %c161 = arith.constant 161 : index
    %1005 = memref.load %arg0[%c161] : memref<396xf32, #tpu.memory_space<smem>>
    %1006 = vector.broadcast %1005 : f32 to vector<2x288xf32>
    %1007 = arith.mulf %1006, %992 : vector<2x288xf32>
    %1008 = arith.addf %974, %1007 : vector<2x288xf32>
    %c197 = arith.constant 197 : index
    %1009 = memref.load %arg0[%c197] : memref<396xf32, #tpu.memory_space<smem>>
    %1010 = vector.broadcast %1009 : f32 to vector<2x288xf32>
    %1011 = arith.mulf %1010, %992 : vector<2x288xf32>
    %1012 = arith.addf %978, %1011 : vector<2x288xf32>
    %c233 = arith.constant 233 : index
    %1013 = memref.load %arg0[%c233] : memref<396xf32, #tpu.memory_space<smem>>
    %1014 = vector.broadcast %1013 : f32 to vector<2x288xf32>
    %1015 = arith.mulf %1014, %992 : vector<2x288xf32>
    %1016 = arith.addf %982, %1015 : vector<2x288xf32>
    %c269 = arith.constant 269 : index
    %1017 = memref.load %arg0[%c269] : memref<396xf32, #tpu.memory_space<smem>>
    %1018 = vector.broadcast %1017 : f32 to vector<2x288xf32>
    %1019 = arith.mulf %1018, %992 : vector<2x288xf32>
    %1020 = arith.addf %986, %1019 : vector<2x288xf32>
    %c305 = arith.constant 305 : index
    %1021 = memref.load %arg0[%c305] : memref<396xf32, #tpu.memory_space<smem>>
    %1022 = vector.broadcast %1021 : f32 to vector<2x288xf32>
    %1023 = arith.mulf %1022, %992 : vector<2x288xf32>
    %1024 = arith.addf %990, %1023 : vector<2x288xf32>
    %c2_234 = arith.constant 2 : index
    %c0_235 = arith.constant 0 : index
    %c0_236 = arith.constant 0 : index
    %1025 = vector.load %arg6[%c2_234, %c0_235, %c0_236] : memref<4x2x384xf32, #tpu.memory_space<vmem>>, vector<1x2x288xf32>
    %1026 = vector.shape_cast %1025 : vector<1x2x288xf32> to vector<2x288xf32>
    %c54 = arith.constant 54 : index
    %1027 = memref.load %arg0[%c54] : memref<396xf32, #tpu.memory_space<smem>>
    %1028 = vector.broadcast %1027 : f32 to vector<2x288xf32>
    %1029 = arith.mulf %1028, %1026 : vector<2x288xf32>
    %1030 = arith.addf %996, %1029 : vector<2x288xf32>
    %c90 = arith.constant 90 : index
    %1031 = memref.load %arg0[%c90] : memref<396xf32, #tpu.memory_space<smem>>
    %1032 = vector.broadcast %1031 : f32 to vector<2x288xf32>
    %1033 = arith.mulf %1032, %1026 : vector<2x288xf32>
    %1034 = arith.addf %1000, %1033 : vector<2x288xf32>
    %c126 = arith.constant 126 : index
    %1035 = memref.load %arg0[%c126] : memref<396xf32, #tpu.memory_space<smem>>
    %1036 = vector.broadcast %1035 : f32 to vector<2x288xf32>
    %1037 = arith.mulf %1036, %1026 : vector<2x288xf32>
    %1038 = arith.addf %1004, %1037 : vector<2x288xf32>
    %c162 = arith.constant 162 : index
    %1039 = memref.load %arg0[%c162] : memref<396xf32, #tpu.memory_space<smem>>
    %1040 = vector.broadcast %1039 : f32 to vector<2x288xf32>
    %1041 = arith.mulf %1040, %1026 : vector<2x288xf32>
    %1042 = arith.addf %1008, %1041 : vector<2x288xf32>
    %c198 = arith.constant 198 : index
    %1043 = memref.load %arg0[%c198] : memref<396xf32, #tpu.memory_space<smem>>
    %1044 = vector.broadcast %1043 : f32 to vector<2x288xf32>
    %1045 = arith.mulf %1044, %1026 : vector<2x288xf32>
    %1046 = arith.addf %1012, %1045 : vector<2x288xf32>
    %c234 = arith.constant 234 : index
    %1047 = memref.load %arg0[%c234] : memref<396xf32, #tpu.memory_space<smem>>
    %1048 = vector.broadcast %1047 : f32 to vector<2x288xf32>
    %1049 = arith.mulf %1048, %1026 : vector<2x288xf32>
    %1050 = arith.addf %1016, %1049 : vector<2x288xf32>
    %c270 = arith.constant 270 : index
    %1051 = memref.load %arg0[%c270] : memref<396xf32, #tpu.memory_space<smem>>
    %1052 = vector.broadcast %1051 : f32 to vector<2x288xf32>
    %1053 = arith.mulf %1052, %1026 : vector<2x288xf32>
    %1054 = arith.addf %1020, %1053 : vector<2x288xf32>
    %c306 = arith.constant 306 : index
    %1055 = memref.load %arg0[%c306] : memref<396xf32, #tpu.memory_space<smem>>
    %1056 = vector.broadcast %1055 : f32 to vector<2x288xf32>
    %1057 = arith.mulf %1056, %1026 : vector<2x288xf32>
    %1058 = arith.addf %1024, %1057 : vector<2x288xf32>
    %c2_237 = arith.constant 2 : index
    %c0_238 = arith.constant 0 : index
    %c1_239 = arith.constant 1 : index
    %1059 = vector.load %arg6[%c2_237, %c0_238, %c1_239] : memref<4x2x384xf32, #tpu.memory_space<vmem>>, vector<1x2x288xf32>
    %1060 = vector.shape_cast %1059 : vector<1x2x288xf32> to vector<2x288xf32>
    %c55_240 = arith.constant 55 : index
    %1061 = memref.load %arg0[%c55_240] : memref<396xf32, #tpu.memory_space<smem>>
    %1062 = vector.broadcast %1061 : f32 to vector<2x288xf32>
    %1063 = arith.mulf %1062, %1060 : vector<2x288xf32>
    %1064 = arith.addf %1030, %1063 : vector<2x288xf32>
    %c91_241 = arith.constant 91 : index
    %1065 = memref.load %arg0[%c91_241] : memref<396xf32, #tpu.memory_space<smem>>
    %1066 = vector.broadcast %1065 : f32 to vector<2x288xf32>
    %1067 = arith.mulf %1066, %1060 : vector<2x288xf32>
    %1068 = arith.addf %1034, %1067 : vector<2x288xf32>
    %c127_242 = arith.constant 127 : index
    %1069 = memref.load %arg0[%c127_242] : memref<396xf32, #tpu.memory_space<smem>>
    %1070 = vector.broadcast %1069 : f32 to vector<2x288xf32>
    %1071 = arith.mulf %1070, %1060 : vector<2x288xf32>
    %1072 = arith.addf %1038, %1071 : vector<2x288xf32>
    %c163_243 = arith.constant 163 : index
    %1073 = memref.load %arg0[%c163_243] : memref<396xf32, #tpu.memory_space<smem>>
    %1074 = vector.broadcast %1073 : f32 to vector<2x288xf32>
    %1075 = arith.mulf %1074, %1060 : vector<2x288xf32>
    %1076 = arith.addf %1042, %1075 : vector<2x288xf32>
    %c199_244 = arith.constant 199 : index
    %1077 = memref.load %arg0[%c199_244] : memref<396xf32, #tpu.memory_space<smem>>
    %1078 = vector.broadcast %1077 : f32 to vector<2x288xf32>
    %1079 = arith.mulf %1078, %1060 : vector<2x288xf32>
    %1080 = arith.addf %1046, %1079 : vector<2x288xf32>
    %c235_245 = arith.constant 235 : index
    %1081 = memref.load %arg0[%c235_245] : memref<396xf32, #tpu.memory_space<smem>>
    %1082 = vector.broadcast %1081 : f32 to vector<2x288xf32>
    %1083 = arith.mulf %1082, %1060 : vector<2x288xf32>
    %1084 = arith.addf %1050, %1083 : vector<2x288xf32>
    %c271_246 = arith.constant 271 : index
    %1085 = memref.load %arg0[%c271_246] : memref<396xf32, #tpu.memory_space<smem>>
    %1086 = vector.broadcast %1085 : f32 to vector<2x288xf32>
    %1087 = arith.mulf %1086, %1060 : vector<2x288xf32>
    %1088 = arith.addf %1054, %1087 : vector<2x288xf32>
    %c307 = arith.constant 307 : index
    %1089 = memref.load %arg0[%c307] : memref<396xf32, #tpu.memory_space<smem>>
    %1090 = vector.broadcast %1089 : f32 to vector<2x288xf32>
    %1091 = arith.mulf %1090, %1060 : vector<2x288xf32>
    %1092 = arith.addf %1058, %1091 : vector<2x288xf32>
    %c2_247 = arith.constant 2 : index
    %c0_248 = arith.constant 0 : index
    %c2_249 = arith.constant 2 : index
    %1093 = vector.load %arg6[%c2_247, %c0_248, %c2_249] : memref<4x2x384xf32, #tpu.memory_space<vmem>>, vector<1x2x288xf32>
    %1094 = vector.shape_cast %1093 : vector<1x2x288xf32> to vector<2x288xf32>
    %c56 = arith.constant 56 : index
    %1095 = memref.load %arg0[%c56] : memref<396xf32, #tpu.memory_space<smem>>
    %1096 = vector.broadcast %1095 : f32 to vector<2x288xf32>
    %1097 = arith.mulf %1096, %1094 : vector<2x288xf32>
    %1098 = arith.addf %1064, %1097 : vector<2x288xf32>
    %c92 = arith.constant 92 : index
    %1099 = memref.load %arg0[%c92] : memref<396xf32, #tpu.memory_space<smem>>
    %1100 = vector.broadcast %1099 : f32 to vector<2x288xf32>
    %1101 = arith.mulf %1100, %1094 : vector<2x288xf32>
    %1102 = arith.addf %1068, %1101 : vector<2x288xf32>
    %c128_250 = arith.constant 128 : index
    %1103 = memref.load %arg0[%c128_250] : memref<396xf32, #tpu.memory_space<smem>>
    %1104 = vector.broadcast %1103 : f32 to vector<2x288xf32>
    %1105 = arith.mulf %1104, %1094 : vector<2x288xf32>
    %1106 = arith.addf %1072, %1105 : vector<2x288xf32>
    %c164 = arith.constant 164 : index
    %1107 = memref.load %arg0[%c164] : memref<396xf32, #tpu.memory_space<smem>>
    %1108 = vector.broadcast %1107 : f32 to vector<2x288xf32>
    %1109 = arith.mulf %1108, %1094 : vector<2x288xf32>
    %1110 = arith.addf %1076, %1109 : vector<2x288xf32>
    %c200 = arith.constant 200 : index
    %1111 = memref.load %arg0[%c200] : memref<396xf32, #tpu.memory_space<smem>>
    %1112 = vector.broadcast %1111 : f32 to vector<2x288xf32>
    %1113 = arith.mulf %1112, %1094 : vector<2x288xf32>
    %1114 = arith.addf %1080, %1113 : vector<2x288xf32>
    %c236 = arith.constant 236 : index
    %1115 = memref.load %arg0[%c236] : memref<396xf32, #tpu.memory_space<smem>>
    %1116 = vector.broadcast %1115 : f32 to vector<2x288xf32>
    %1117 = arith.mulf %1116, %1094 : vector<2x288xf32>
    %1118 = arith.addf %1084, %1117 : vector<2x288xf32>
    %c272 = arith.constant 272 : index
    %1119 = memref.load %arg0[%c272] : memref<396xf32, #tpu.memory_space<smem>>
    %1120 = vector.broadcast %1119 : f32 to vector<2x288xf32>
    %1121 = arith.mulf %1120, %1094 : vector<2x288xf32>
    %1122 = arith.addf %1088, %1121 : vector<2x288xf32>
    %c308 = arith.constant 308 : index
    %1123 = memref.load %arg0[%c308] : memref<396xf32, #tpu.memory_space<smem>>
    %1124 = vector.broadcast %1123 : f32 to vector<2x288xf32>
    %1125 = arith.mulf %1124, %1094 : vector<2x288xf32>
    %1126 = arith.addf %1092, %1125 : vector<2x288xf32>
    %c2_251 = arith.constant 2 : index
    %c0_252 = arith.constant 0 : index
    %c18_253 = arith.constant 18 : index
    %1127 = vector.load %arg6[%c2_251, %c0_252, %c18_253] : memref<4x2x384xf32, #tpu.memory_space<vmem>>, vector<1x2x288xf32>
    %1128 = vector.shape_cast %1127 : vector<1x2x288xf32> to vector<2x288xf32>
    %c57 = arith.constant 57 : index
    %1129 = memref.load %arg0[%c57] : memref<396xf32, #tpu.memory_space<smem>>
    %1130 = vector.broadcast %1129 : f32 to vector<2x288xf32>
    %1131 = arith.mulf %1130, %1128 : vector<2x288xf32>
    %1132 = arith.addf %1098, %1131 : vector<2x288xf32>
    %c93 = arith.constant 93 : index
    %1133 = memref.load %arg0[%c93] : memref<396xf32, #tpu.memory_space<smem>>
    %1134 = vector.broadcast %1133 : f32 to vector<2x288xf32>
    %1135 = arith.mulf %1134, %1128 : vector<2x288xf32>
    %1136 = arith.addf %1102, %1135 : vector<2x288xf32>
    %c129 = arith.constant 129 : index
    %1137 = memref.load %arg0[%c129] : memref<396xf32, #tpu.memory_space<smem>>
    %1138 = vector.broadcast %1137 : f32 to vector<2x288xf32>
    %1139 = arith.mulf %1138, %1128 : vector<2x288xf32>
    %1140 = arith.addf %1106, %1139 : vector<2x288xf32>
    %c165 = arith.constant 165 : index
    %1141 = memref.load %arg0[%c165] : memref<396xf32, #tpu.memory_space<smem>>
    %1142 = vector.broadcast %1141 : f32 to vector<2x288xf32>
    %1143 = arith.mulf %1142, %1128 : vector<2x288xf32>
    %1144 = arith.addf %1110, %1143 : vector<2x288xf32>
    %c201 = arith.constant 201 : index
    %1145 = memref.load %arg0[%c201] : memref<396xf32, #tpu.memory_space<smem>>
    %1146 = vector.broadcast %1145 : f32 to vector<2x288xf32>
    %1147 = arith.mulf %1146, %1128 : vector<2x288xf32>
    %1148 = arith.addf %1114, %1147 : vector<2x288xf32>
    %c237 = arith.constant 237 : index
    %1149 = memref.load %arg0[%c237] : memref<396xf32, #tpu.memory_space<smem>>
    %1150 = vector.broadcast %1149 : f32 to vector<2x288xf32>
    %1151 = arith.mulf %1150, %1128 : vector<2x288xf32>
    %1152 = arith.addf %1118, %1151 : vector<2x288xf32>
    %c273 = arith.constant 273 : index
    %1153 = memref.load %arg0[%c273] : memref<396xf32, #tpu.memory_space<smem>>
    %1154 = vector.broadcast %1153 : f32 to vector<2x288xf32>
    %1155 = arith.mulf %1154, %1128 : vector<2x288xf32>
    %1156 = arith.addf %1122, %1155 : vector<2x288xf32>
    %c309 = arith.constant 309 : index
    %1157 = memref.load %arg0[%c309] : memref<396xf32, #tpu.memory_space<smem>>
    %1158 = vector.broadcast %1157 : f32 to vector<2x288xf32>
    %1159 = arith.mulf %1158, %1128 : vector<2x288xf32>
    %1160 = arith.addf %1126, %1159 : vector<2x288xf32>
    %c2_254 = arith.constant 2 : index
    %c0_255 = arith.constant 0 : index
    %c19_256 = arith.constant 19 : index
    %1161 = vector.load %arg6[%c2_254, %c0_255, %c19_256] : memref<4x2x384xf32, #tpu.memory_space<vmem>>, vector<1x2x288xf32>
    %1162 = vector.shape_cast %1161 : vector<1x2x288xf32> to vector<2x288xf32>
    %c58 = arith.constant 58 : index
    %1163 = memref.load %arg0[%c58] : memref<396xf32, #tpu.memory_space<smem>>
    %1164 = vector.broadcast %1163 : f32 to vector<2x288xf32>
    %1165 = arith.mulf %1164, %1162 : vector<2x288xf32>
    %1166 = arith.addf %1132, %1165 : vector<2x288xf32>
    %c94 = arith.constant 94 : index
    %1167 = memref.load %arg0[%c94] : memref<396xf32, #tpu.memory_space<smem>>
    %1168 = vector.broadcast %1167 : f32 to vector<2x288xf32>
    %1169 = arith.mulf %1168, %1162 : vector<2x288xf32>
    %1170 = arith.addf %1136, %1169 : vector<2x288xf32>
    %c130 = arith.constant 130 : index
    %1171 = memref.load %arg0[%c130] : memref<396xf32, #tpu.memory_space<smem>>
    %1172 = vector.broadcast %1171 : f32 to vector<2x288xf32>
    %1173 = arith.mulf %1172, %1162 : vector<2x288xf32>
    %1174 = arith.addf %1140, %1173 : vector<2x288xf32>
    %c166 = arith.constant 166 : index
    %1175 = memref.load %arg0[%c166] : memref<396xf32, #tpu.memory_space<smem>>
    %1176 = vector.broadcast %1175 : f32 to vector<2x288xf32>
    %1177 = arith.mulf %1176, %1162 : vector<2x288xf32>
    %1178 = arith.addf %1144, %1177 : vector<2x288xf32>
    %c202 = arith.constant 202 : index
    %1179 = memref.load %arg0[%c202] : memref<396xf32, #tpu.memory_space<smem>>
    %1180 = vector.broadcast %1179 : f32 to vector<2x288xf32>
    %1181 = arith.mulf %1180, %1162 : vector<2x288xf32>
    %1182 = arith.addf %1148, %1181 : vector<2x288xf32>
    %c238 = arith.constant 238 : index
    %1183 = memref.load %arg0[%c238] : memref<396xf32, #tpu.memory_space<smem>>
    %1184 = vector.broadcast %1183 : f32 to vector<2x288xf32>
    %1185 = arith.mulf %1184, %1162 : vector<2x288xf32>
    %1186 = arith.addf %1152, %1185 : vector<2x288xf32>
    %c274 = arith.constant 274 : index
    %1187 = memref.load %arg0[%c274] : memref<396xf32, #tpu.memory_space<smem>>
    %1188 = vector.broadcast %1187 : f32 to vector<2x288xf32>
    %1189 = arith.mulf %1188, %1162 : vector<2x288xf32>
    %1190 = arith.addf %1156, %1189 : vector<2x288xf32>
    %c310 = arith.constant 310 : index
    %1191 = memref.load %arg0[%c310] : memref<396xf32, #tpu.memory_space<smem>>
    %1192 = vector.broadcast %1191 : f32 to vector<2x288xf32>
    %1193 = arith.mulf %1192, %1162 : vector<2x288xf32>
    %1194 = arith.addf %1160, %1193 : vector<2x288xf32>
    %c2_257 = arith.constant 2 : index
    %c0_258 = arith.constant 0 : index
    %c20_259 = arith.constant 20 : index
    %1195 = vector.load %arg6[%c2_257, %c0_258, %c20_259] : memref<4x2x384xf32, #tpu.memory_space<vmem>>, vector<1x2x288xf32>
    %1196 = vector.shape_cast %1195 : vector<1x2x288xf32> to vector<2x288xf32>
    %c59 = arith.constant 59 : index
    %1197 = memref.load %arg0[%c59] : memref<396xf32, #tpu.memory_space<smem>>
    %1198 = vector.broadcast %1197 : f32 to vector<2x288xf32>
    %1199 = arith.mulf %1198, %1196 : vector<2x288xf32>
    %1200 = arith.addf %1166, %1199 : vector<2x288xf32>
    %c95 = arith.constant 95 : index
    %1201 = memref.load %arg0[%c95] : memref<396xf32, #tpu.memory_space<smem>>
    %1202 = vector.broadcast %1201 : f32 to vector<2x288xf32>
    %1203 = arith.mulf %1202, %1196 : vector<2x288xf32>
    %1204 = arith.addf %1170, %1203 : vector<2x288xf32>
    %c131 = arith.constant 131 : index
    %1205 = memref.load %arg0[%c131] : memref<396xf32, #tpu.memory_space<smem>>
    %1206 = vector.broadcast %1205 : f32 to vector<2x288xf32>
    %1207 = arith.mulf %1206, %1196 : vector<2x288xf32>
    %1208 = arith.addf %1174, %1207 : vector<2x288xf32>
    %c167 = arith.constant 167 : index
    %1209 = memref.load %arg0[%c167] : memref<396xf32, #tpu.memory_space<smem>>
    %1210 = vector.broadcast %1209 : f32 to vector<2x288xf32>
    %1211 = arith.mulf %1210, %1196 : vector<2x288xf32>
    %1212 = arith.addf %1178, %1211 : vector<2x288xf32>
    %c203 = arith.constant 203 : index
    %1213 = memref.load %arg0[%c203] : memref<396xf32, #tpu.memory_space<smem>>
    %1214 = vector.broadcast %1213 : f32 to vector<2x288xf32>
    %1215 = arith.mulf %1214, %1196 : vector<2x288xf32>
    %1216 = arith.addf %1182, %1215 : vector<2x288xf32>
    %c239 = arith.constant 239 : index
    %1217 = memref.load %arg0[%c239] : memref<396xf32, #tpu.memory_space<smem>>
    %1218 = vector.broadcast %1217 : f32 to vector<2x288xf32>
    %1219 = arith.mulf %1218, %1196 : vector<2x288xf32>
    %1220 = arith.addf %1186, %1219 : vector<2x288xf32>
    %c275 = arith.constant 275 : index
    %1221 = memref.load %arg0[%c275] : memref<396xf32, #tpu.memory_space<smem>>
    %1222 = vector.broadcast %1221 : f32 to vector<2x288xf32>
    %1223 = arith.mulf %1222, %1196 : vector<2x288xf32>
    %1224 = arith.addf %1190, %1223 : vector<2x288xf32>
    %c311 = arith.constant 311 : index
    %1225 = memref.load %arg0[%c311] : memref<396xf32, #tpu.memory_space<smem>>
    %1226 = vector.broadcast %1225 : f32 to vector<2x288xf32>
    %1227 = arith.mulf %1226, %1196 : vector<2x288xf32>
    %1228 = arith.addf %1194, %1227 : vector<2x288xf32>
    %c2_260 = arith.constant 2 : index
    %c0_261 = arith.constant 0 : index
    %c36_262 = arith.constant 36 : index
    %1229 = vector.load %arg6[%c2_260, %c0_261, %c36_262] : memref<4x2x384xf32, #tpu.memory_space<vmem>>, vector<1x2x288xf32>
    %1230 = vector.shape_cast %1229 : vector<1x2x288xf32> to vector<2x288xf32>
    %c60 = arith.constant 60 : index
    %1231 = memref.load %arg0[%c60] : memref<396xf32, #tpu.memory_space<smem>>
    %1232 = vector.broadcast %1231 : f32 to vector<2x288xf32>
    %1233 = arith.mulf %1232, %1230 : vector<2x288xf32>
    %1234 = arith.addf %1200, %1233 : vector<2x288xf32>
    %c96_263 = arith.constant 96 : index
    %1235 = memref.load %arg0[%c96_263] : memref<396xf32, #tpu.memory_space<smem>>
    %1236 = vector.broadcast %1235 : f32 to vector<2x288xf32>
    %1237 = arith.mulf %1236, %1230 : vector<2x288xf32>
    %1238 = arith.addf %1204, %1237 : vector<2x288xf32>
    %c132 = arith.constant 132 : index
    %1239 = memref.load %arg0[%c132] : memref<396xf32, #tpu.memory_space<smem>>
    %1240 = vector.broadcast %1239 : f32 to vector<2x288xf32>
    %1241 = arith.mulf %1240, %1230 : vector<2x288xf32>
    %1242 = arith.addf %1208, %1241 : vector<2x288xf32>
    %c168 = arith.constant 168 : index
    %1243 = memref.load %arg0[%c168] : memref<396xf32, #tpu.memory_space<smem>>
    %1244 = vector.broadcast %1243 : f32 to vector<2x288xf32>
    %1245 = arith.mulf %1244, %1230 : vector<2x288xf32>
    %1246 = arith.addf %1212, %1245 : vector<2x288xf32>
    %c204 = arith.constant 204 : index
    %1247 = memref.load %arg0[%c204] : memref<396xf32, #tpu.memory_space<smem>>
    %1248 = vector.broadcast %1247 : f32 to vector<2x288xf32>
    %1249 = arith.mulf %1248, %1230 : vector<2x288xf32>
    %1250 = arith.addf %1216, %1249 : vector<2x288xf32>
    %c240_264 = arith.constant 240 : index
    %1251 = memref.load %arg0[%c240_264] : memref<396xf32, #tpu.memory_space<smem>>
    %1252 = vector.broadcast %1251 : f32 to vector<2x288xf32>
    %1253 = arith.mulf %1252, %1230 : vector<2x288xf32>
    %1254 = arith.addf %1220, %1253 : vector<2x288xf32>
    %c276 = arith.constant 276 : index
    %1255 = memref.load %arg0[%c276] : memref<396xf32, #tpu.memory_space<smem>>
    %1256 = vector.broadcast %1255 : f32 to vector<2x288xf32>
    %1257 = arith.mulf %1256, %1230 : vector<2x288xf32>
    %1258 = arith.addf %1224, %1257 : vector<2x288xf32>
    %c312 = arith.constant 312 : index
    %1259 = memref.load %arg0[%c312] : memref<396xf32, #tpu.memory_space<smem>>
    %1260 = vector.broadcast %1259 : f32 to vector<2x288xf32>
    %1261 = arith.mulf %1260, %1230 : vector<2x288xf32>
    %1262 = arith.addf %1228, %1261 : vector<2x288xf32>
    %c2_265 = arith.constant 2 : index
    %c0_266 = arith.constant 0 : index
    %c37_267 = arith.constant 37 : index
    %1263 = vector.load %arg6[%c2_265, %c0_266, %c37_267] : memref<4x2x384xf32, #tpu.memory_space<vmem>>, vector<1x2x288xf32>
    %1264 = vector.shape_cast %1263 : vector<1x2x288xf32> to vector<2x288xf32>
    %c61 = arith.constant 61 : index
    %1265 = memref.load %arg0[%c61] : memref<396xf32, #tpu.memory_space<smem>>
    %1266 = vector.broadcast %1265 : f32 to vector<2x288xf32>
    %1267 = arith.mulf %1266, %1264 : vector<2x288xf32>
    %1268 = arith.addf %1234, %1267 : vector<2x288xf32>
    %c97 = arith.constant 97 : index
    %1269 = memref.load %arg0[%c97] : memref<396xf32, #tpu.memory_space<smem>>
    %1270 = vector.broadcast %1269 : f32 to vector<2x288xf32>
    %1271 = arith.mulf %1270, %1264 : vector<2x288xf32>
    %1272 = arith.addf %1238, %1271 : vector<2x288xf32>
    %c133 = arith.constant 133 : index
    %1273 = memref.load %arg0[%c133] : memref<396xf32, #tpu.memory_space<smem>>
    %1274 = vector.broadcast %1273 : f32 to vector<2x288xf32>
    %1275 = arith.mulf %1274, %1264 : vector<2x288xf32>
    %1276 = arith.addf %1242, %1275 : vector<2x288xf32>
    %c169 = arith.constant 169 : index
    %1277 = memref.load %arg0[%c169] : memref<396xf32, #tpu.memory_space<smem>>
    %1278 = vector.broadcast %1277 : f32 to vector<2x288xf32>
    %1279 = arith.mulf %1278, %1264 : vector<2x288xf32>
    %1280 = arith.addf %1246, %1279 : vector<2x288xf32>
    %c205 = arith.constant 205 : index
    %1281 = memref.load %arg0[%c205] : memref<396xf32, #tpu.memory_space<smem>>
    %1282 = vector.broadcast %1281 : f32 to vector<2x288xf32>
    %1283 = arith.mulf %1282, %1264 : vector<2x288xf32>
    %1284 = arith.addf %1250, %1283 : vector<2x288xf32>
    %c241 = arith.constant 241 : index
    %1285 = memref.load %arg0[%c241] : memref<396xf32, #tpu.memory_space<smem>>
    %1286 = vector.broadcast %1285 : f32 to vector<2x288xf32>
    %1287 = arith.mulf %1286, %1264 : vector<2x288xf32>
    %1288 = arith.addf %1254, %1287 : vector<2x288xf32>
    %c277 = arith.constant 277 : index
    %1289 = memref.load %arg0[%c277] : memref<396xf32, #tpu.memory_space<smem>>
    %1290 = vector.broadcast %1289 : f32 to vector<2x288xf32>
    %1291 = arith.mulf %1290, %1264 : vector<2x288xf32>
    %1292 = arith.addf %1258, %1291 : vector<2x288xf32>
    %c313 = arith.constant 313 : index
    %1293 = memref.load %arg0[%c313] : memref<396xf32, #tpu.memory_space<smem>>
    %1294 = vector.broadcast %1293 : f32 to vector<2x288xf32>
    %1295 = arith.mulf %1294, %1264 : vector<2x288xf32>
    %1296 = arith.addf %1262, %1295 : vector<2x288xf32>
    %c2_268 = arith.constant 2 : index
    %c0_269 = arith.constant 0 : index
    %c38_270 = arith.constant 38 : index
    %1297 = vector.load %arg6[%c2_268, %c0_269, %c38_270] : memref<4x2x384xf32, #tpu.memory_space<vmem>>, vector<1x2x288xf32>
    %1298 = vector.shape_cast %1297 : vector<1x2x288xf32> to vector<2x288xf32>
    %c62 = arith.constant 62 : index
    %1299 = memref.load %arg0[%c62] : memref<396xf32, #tpu.memory_space<smem>>
    %1300 = vector.broadcast %1299 : f32 to vector<2x288xf32>
    %1301 = arith.mulf %1300, %1298 : vector<2x288xf32>
    %1302 = arith.addf %1268, %1301 : vector<2x288xf32>
    %c98 = arith.constant 98 : index
    %1303 = memref.load %arg0[%c98] : memref<396xf32, #tpu.memory_space<smem>>
    %1304 = vector.broadcast %1303 : f32 to vector<2x288xf32>
    %1305 = arith.mulf %1304, %1298 : vector<2x288xf32>
    %1306 = arith.addf %1272, %1305 : vector<2x288xf32>
    %c134 = arith.constant 134 : index
    %1307 = memref.load %arg0[%c134] : memref<396xf32, #tpu.memory_space<smem>>
    %1308 = vector.broadcast %1307 : f32 to vector<2x288xf32>
    %1309 = arith.mulf %1308, %1298 : vector<2x288xf32>
    %1310 = arith.addf %1276, %1309 : vector<2x288xf32>
    %c170 = arith.constant 170 : index
    %1311 = memref.load %arg0[%c170] : memref<396xf32, #tpu.memory_space<smem>>
    %1312 = vector.broadcast %1311 : f32 to vector<2x288xf32>
    %1313 = arith.mulf %1312, %1298 : vector<2x288xf32>
    %1314 = arith.addf %1280, %1313 : vector<2x288xf32>
    %c206 = arith.constant 206 : index
    %1315 = memref.load %arg0[%c206] : memref<396xf32, #tpu.memory_space<smem>>
    %1316 = vector.broadcast %1315 : f32 to vector<2x288xf32>
    %1317 = arith.mulf %1316, %1298 : vector<2x288xf32>
    %1318 = arith.addf %1284, %1317 : vector<2x288xf32>
    %c242 = arith.constant 242 : index
    %1319 = memref.load %arg0[%c242] : memref<396xf32, #tpu.memory_space<smem>>
    %1320 = vector.broadcast %1319 : f32 to vector<2x288xf32>
    %1321 = arith.mulf %1320, %1298 : vector<2x288xf32>
    %1322 = arith.addf %1288, %1321 : vector<2x288xf32>
    %c278 = arith.constant 278 : index
    %1323 = memref.load %arg0[%c278] : memref<396xf32, #tpu.memory_space<smem>>
    %1324 = vector.broadcast %1323 : f32 to vector<2x288xf32>
    %1325 = arith.mulf %1324, %1298 : vector<2x288xf32>
    %1326 = arith.addf %1292, %1325 : vector<2x288xf32>
    %c314 = arith.constant 314 : index
    %1327 = memref.load %arg0[%c314] : memref<396xf32, #tpu.memory_space<smem>>
    %1328 = vector.broadcast %1327 : f32 to vector<2x288xf32>
    %1329 = arith.mulf %1328, %1298 : vector<2x288xf32>
    %1330 = arith.addf %1296, %1329 : vector<2x288xf32>
    %c3_271 = arith.constant 3 : index
    %c0_272 = arith.constant 0 : index
    %c0_273 = arith.constant 0 : index
    %1331 = vector.load %arg6[%c3_271, %c0_272, %c0_273] : memref<4x2x384xf32, #tpu.memory_space<vmem>>, vector<1x2x288xf32>
    %1332 = vector.shape_cast %1331 : vector<1x2x288xf32> to vector<2x288xf32>
    %c63 = arith.constant 63 : index
    %1333 = memref.load %arg0[%c63] : memref<396xf32, #tpu.memory_space<smem>>
    %1334 = vector.broadcast %1333 : f32 to vector<2x288xf32>
    %1335 = arith.mulf %1334, %1332 : vector<2x288xf32>
    %1336 = arith.addf %1302, %1335 : vector<2x288xf32>
    %c99 = arith.constant 99 : index
    %1337 = memref.load %arg0[%c99] : memref<396xf32, #tpu.memory_space<smem>>
    %1338 = vector.broadcast %1337 : f32 to vector<2x288xf32>
    %1339 = arith.mulf %1338, %1332 : vector<2x288xf32>
    %1340 = arith.addf %1306, %1339 : vector<2x288xf32>
    %c135 = arith.constant 135 : index
    %1341 = memref.load %arg0[%c135] : memref<396xf32, #tpu.memory_space<smem>>
    %1342 = vector.broadcast %1341 : f32 to vector<2x288xf32>
    %1343 = arith.mulf %1342, %1332 : vector<2x288xf32>
    %1344 = arith.addf %1310, %1343 : vector<2x288xf32>
    %c171 = arith.constant 171 : index
    %1345 = memref.load %arg0[%c171] : memref<396xf32, #tpu.memory_space<smem>>
    %1346 = vector.broadcast %1345 : f32 to vector<2x288xf32>
    %1347 = arith.mulf %1346, %1332 : vector<2x288xf32>
    %1348 = arith.addf %1314, %1347 : vector<2x288xf32>
    %c207 = arith.constant 207 : index
    %1349 = memref.load %arg0[%c207] : memref<396xf32, #tpu.memory_space<smem>>
    %1350 = vector.broadcast %1349 : f32 to vector<2x288xf32>
    %1351 = arith.mulf %1350, %1332 : vector<2x288xf32>
    %1352 = arith.addf %1318, %1351 : vector<2x288xf32>
    %c243 = arith.constant 243 : index
    %1353 = memref.load %arg0[%c243] : memref<396xf32, #tpu.memory_space<smem>>
    %1354 = vector.broadcast %1353 : f32 to vector<2x288xf32>
    %1355 = arith.mulf %1354, %1332 : vector<2x288xf32>
    %1356 = arith.addf %1322, %1355 : vector<2x288xf32>
    %c279 = arith.constant 279 : index
    %1357 = memref.load %arg0[%c279] : memref<396xf32, #tpu.memory_space<smem>>
    %1358 = vector.broadcast %1357 : f32 to vector<2x288xf32>
    %1359 = arith.mulf %1358, %1332 : vector<2x288xf32>
    %1360 = arith.addf %1326, %1359 : vector<2x288xf32>
    %c315 = arith.constant 315 : index
    %1361 = memref.load %arg0[%c315] : memref<396xf32, #tpu.memory_space<smem>>
    %1362 = vector.broadcast %1361 : f32 to vector<2x288xf32>
    %1363 = arith.mulf %1362, %1332 : vector<2x288xf32>
    %1364 = arith.addf %1330, %1363 : vector<2x288xf32>
    %c3_274 = arith.constant 3 : index
    %c0_275 = arith.constant 0 : index
    %c1_276 = arith.constant 1 : index
    %1365 = vector.load %arg6[%c3_274, %c0_275, %c1_276] : memref<4x2x384xf32, #tpu.memory_space<vmem>>, vector<1x2x288xf32>
    %1366 = vector.shape_cast %1365 : vector<1x2x288xf32> to vector<2x288xf32>
    %c64_277 = arith.constant 64 : index
    %1367 = memref.load %arg0[%c64_277] : memref<396xf32, #tpu.memory_space<smem>>
    %1368 = vector.broadcast %1367 : f32 to vector<2x288xf32>
    %1369 = arith.mulf %1368, %1366 : vector<2x288xf32>
    %1370 = arith.addf %1336, %1369 : vector<2x288xf32>
    %c100 = arith.constant 100 : index
    %1371 = memref.load %arg0[%c100] : memref<396xf32, #tpu.memory_space<smem>>
    %1372 = vector.broadcast %1371 : f32 to vector<2x288xf32>
    %1373 = arith.mulf %1372, %1366 : vector<2x288xf32>
    %1374 = arith.addf %1340, %1373 : vector<2x288xf32>
    %c136 = arith.constant 136 : index
    %1375 = memref.load %arg0[%c136] : memref<396xf32, #tpu.memory_space<smem>>
    %1376 = vector.broadcast %1375 : f32 to vector<2x288xf32>
    %1377 = arith.mulf %1376, %1366 : vector<2x288xf32>
    %1378 = arith.addf %1344, %1377 : vector<2x288xf32>
    %c172 = arith.constant 172 : index
    %1379 = memref.load %arg0[%c172] : memref<396xf32, #tpu.memory_space<smem>>
    %1380 = vector.broadcast %1379 : f32 to vector<2x288xf32>
    %1381 = arith.mulf %1380, %1366 : vector<2x288xf32>
    %1382 = arith.addf %1348, %1381 : vector<2x288xf32>
    %c208_278 = arith.constant 208 : index
    %1383 = memref.load %arg0[%c208_278] : memref<396xf32, #tpu.memory_space<smem>>
    %1384 = vector.broadcast %1383 : f32 to vector<2x288xf32>
    %1385 = arith.mulf %1384, %1366 : vector<2x288xf32>
    %1386 = arith.addf %1352, %1385 : vector<2x288xf32>
    %c244 = arith.constant 244 : index
    %1387 = memref.load %arg0[%c244] : memref<396xf32, #tpu.memory_space<smem>>
    %1388 = vector.broadcast %1387 : f32 to vector<2x288xf32>
    %1389 = arith.mulf %1388, %1366 : vector<2x288xf32>
    %1390 = arith.addf %1356, %1389 : vector<2x288xf32>
    %c280 = arith.constant 280 : index
    %1391 = memref.load %arg0[%c280] : memref<396xf32, #tpu.memory_space<smem>>
    %1392 = vector.broadcast %1391 : f32 to vector<2x288xf32>
    %1393 = arith.mulf %1392, %1366 : vector<2x288xf32>
    %1394 = arith.addf %1360, %1393 : vector<2x288xf32>
    %c316 = arith.constant 316 : index
    %1395 = memref.load %arg0[%c316] : memref<396xf32, #tpu.memory_space<smem>>
    %1396 = vector.broadcast %1395 : f32 to vector<2x288xf32>
    %1397 = arith.mulf %1396, %1366 : vector<2x288xf32>
    %1398 = arith.addf %1364, %1397 : vector<2x288xf32>
    %c3_279 = arith.constant 3 : index
    %c0_280 = arith.constant 0 : index
    %c2_281 = arith.constant 2 : index
    %1399 = vector.load %arg6[%c3_279, %c0_280, %c2_281] : memref<4x2x384xf32, #tpu.memory_space<vmem>>, vector<1x2x288xf32>
    %1400 = vector.shape_cast %1399 : vector<1x2x288xf32> to vector<2x288xf32>
    %c65 = arith.constant 65 : index
    %1401 = memref.load %arg0[%c65] : memref<396xf32, #tpu.memory_space<smem>>
    %1402 = vector.broadcast %1401 : f32 to vector<2x288xf32>
    %1403 = arith.mulf %1402, %1400 : vector<2x288xf32>
    %1404 = arith.addf %1370, %1403 : vector<2x288xf32>
    %c101 = arith.constant 101 : index
    %1405 = memref.load %arg0[%c101] : memref<396xf32, #tpu.memory_space<smem>>
    %1406 = vector.broadcast %1405 : f32 to vector<2x288xf32>
    %1407 = arith.mulf %1406, %1400 : vector<2x288xf32>
    %1408 = arith.addf %1374, %1407 : vector<2x288xf32>
    %c137 = arith.constant 137 : index
    %1409 = memref.load %arg0[%c137] : memref<396xf32, #tpu.memory_space<smem>>
    %1410 = vector.broadcast %1409 : f32 to vector<2x288xf32>
    %1411 = arith.mulf %1410, %1400 : vector<2x288xf32>
    %1412 = arith.addf %1378, %1411 : vector<2x288xf32>
    %c173 = arith.constant 173 : index
    %1413 = memref.load %arg0[%c173] : memref<396xf32, #tpu.memory_space<smem>>
    %1414 = vector.broadcast %1413 : f32 to vector<2x288xf32>
    %1415 = arith.mulf %1414, %1400 : vector<2x288xf32>
    %1416 = arith.addf %1382, %1415 : vector<2x288xf32>
    %c209 = arith.constant 209 : index
    %1417 = memref.load %arg0[%c209] : memref<396xf32, #tpu.memory_space<smem>>
    %1418 = vector.broadcast %1417 : f32 to vector<2x288xf32>
    %1419 = arith.mulf %1418, %1400 : vector<2x288xf32>
    %1420 = arith.addf %1386, %1419 : vector<2x288xf32>
    %c245 = arith.constant 245 : index
    %1421 = memref.load %arg0[%c245] : memref<396xf32, #tpu.memory_space<smem>>
    %1422 = vector.broadcast %1421 : f32 to vector<2x288xf32>
    %1423 = arith.mulf %1422, %1400 : vector<2x288xf32>
    %1424 = arith.addf %1390, %1423 : vector<2x288xf32>
    %c281 = arith.constant 281 : index
    %1425 = memref.load %arg0[%c281] : memref<396xf32, #tpu.memory_space<smem>>
    %1426 = vector.broadcast %1425 : f32 to vector<2x288xf32>
    %1427 = arith.mulf %1426, %1400 : vector<2x288xf32>
    %1428 = arith.addf %1394, %1427 : vector<2x288xf32>
    %c317 = arith.constant 317 : index
    %1429 = memref.load %arg0[%c317] : memref<396xf32, #tpu.memory_space<smem>>
    %1430 = vector.broadcast %1429 : f32 to vector<2x288xf32>
    %1431 = arith.mulf %1430, %1400 : vector<2x288xf32>
    %1432 = arith.addf %1398, %1431 : vector<2x288xf32>
    %c3_282 = arith.constant 3 : index
    %c0_283 = arith.constant 0 : index
    %c18_284 = arith.constant 18 : index
    %1433 = vector.load %arg6[%c3_282, %c0_283, %c18_284] : memref<4x2x384xf32, #tpu.memory_space<vmem>>, vector<1x2x288xf32>
    %1434 = vector.shape_cast %1433 : vector<1x2x288xf32> to vector<2x288xf32>
    %c66 = arith.constant 66 : index
    %1435 = memref.load %arg0[%c66] : memref<396xf32, #tpu.memory_space<smem>>
    %1436 = vector.broadcast %1435 : f32 to vector<2x288xf32>
    %1437 = arith.mulf %1436, %1434 : vector<2x288xf32>
    %1438 = arith.addf %1404, %1437 : vector<2x288xf32>
    %c102 = arith.constant 102 : index
    %1439 = memref.load %arg0[%c102] : memref<396xf32, #tpu.memory_space<smem>>
    %1440 = vector.broadcast %1439 : f32 to vector<2x288xf32>
    %1441 = arith.mulf %1440, %1434 : vector<2x288xf32>
    %1442 = arith.addf %1408, %1441 : vector<2x288xf32>
    %c138 = arith.constant 138 : index
    %1443 = memref.load %arg0[%c138] : memref<396xf32, #tpu.memory_space<smem>>
    %1444 = vector.broadcast %1443 : f32 to vector<2x288xf32>
    %1445 = arith.mulf %1444, %1434 : vector<2x288xf32>
    %1446 = arith.addf %1412, %1445 : vector<2x288xf32>
    %c174 = arith.constant 174 : index
    %1447 = memref.load %arg0[%c174] : memref<396xf32, #tpu.memory_space<smem>>
    %1448 = vector.broadcast %1447 : f32 to vector<2x288xf32>
    %1449 = arith.mulf %1448, %1434 : vector<2x288xf32>
    %1450 = arith.addf %1416, %1449 : vector<2x288xf32>
    %c210 = arith.constant 210 : index
    %1451 = memref.load %arg0[%c210] : memref<396xf32, #tpu.memory_space<smem>>
    %1452 = vector.broadcast %1451 : f32 to vector<2x288xf32>
    %1453 = arith.mulf %1452, %1434 : vector<2x288xf32>
    %1454 = arith.addf %1420, %1453 : vector<2x288xf32>
    %c246 = arith.constant 246 : index
    %1455 = memref.load %arg0[%c246] : memref<396xf32, #tpu.memory_space<smem>>
    %1456 = vector.broadcast %1455 : f32 to vector<2x288xf32>
    %1457 = arith.mulf %1456, %1434 : vector<2x288xf32>
    %1458 = arith.addf %1424, %1457 : vector<2x288xf32>
    %c282 = arith.constant 282 : index
    %1459 = memref.load %arg0[%c282] : memref<396xf32, #tpu.memory_space<smem>>
    %1460 = vector.broadcast %1459 : f32 to vector<2x288xf32>
    %1461 = arith.mulf %1460, %1434 : vector<2x288xf32>
    %1462 = arith.addf %1428, %1461 : vector<2x288xf32>
    %c318 = arith.constant 318 : index
    %1463 = memref.load %arg0[%c318] : memref<396xf32, #tpu.memory_space<smem>>
    %1464 = vector.broadcast %1463 : f32 to vector<2x288xf32>
    %1465 = arith.mulf %1464, %1434 : vector<2x288xf32>
    %1466 = arith.addf %1432, %1465 : vector<2x288xf32>
    %c3_285 = arith.constant 3 : index
    %c0_286 = arith.constant 0 : index
    %c19_287 = arith.constant 19 : index
    %1467 = vector.load %arg6[%c3_285, %c0_286, %c19_287] : memref<4x2x384xf32, #tpu.memory_space<vmem>>, vector<1x2x288xf32>
    %1468 = vector.shape_cast %1467 : vector<1x2x288xf32> to vector<2x288xf32>
    %c67 = arith.constant 67 : index
    %1469 = memref.load %arg0[%c67] : memref<396xf32, #tpu.memory_space<smem>>
    %1470 = vector.broadcast %1469 : f32 to vector<2x288xf32>
    %1471 = arith.mulf %1470, %1468 : vector<2x288xf32>
    %1472 = arith.addf %1438, %1471 : vector<2x288xf32>
    %c103 = arith.constant 103 : index
    %1473 = memref.load %arg0[%c103] : memref<396xf32, #tpu.memory_space<smem>>
    %1474 = vector.broadcast %1473 : f32 to vector<2x288xf32>
    %1475 = arith.mulf %1474, %1468 : vector<2x288xf32>
    %1476 = arith.addf %1442, %1475 : vector<2x288xf32>
    %c139 = arith.constant 139 : index
    %1477 = memref.load %arg0[%c139] : memref<396xf32, #tpu.memory_space<smem>>
    %1478 = vector.broadcast %1477 : f32 to vector<2x288xf32>
    %1479 = arith.mulf %1478, %1468 : vector<2x288xf32>
    %1480 = arith.addf %1446, %1479 : vector<2x288xf32>
    %c175 = arith.constant 175 : index
    %1481 = memref.load %arg0[%c175] : memref<396xf32, #tpu.memory_space<smem>>
    %1482 = vector.broadcast %1481 : f32 to vector<2x288xf32>
    %1483 = arith.mulf %1482, %1468 : vector<2x288xf32>
    %1484 = arith.addf %1450, %1483 : vector<2x288xf32>
    %c211 = arith.constant 211 : index
    %1485 = memref.load %arg0[%c211] : memref<396xf32, #tpu.memory_space<smem>>
    %1486 = vector.broadcast %1485 : f32 to vector<2x288xf32>
    %1487 = arith.mulf %1486, %1468 : vector<2x288xf32>
    %1488 = arith.addf %1454, %1487 : vector<2x288xf32>
    %c247 = arith.constant 247 : index
    %1489 = memref.load %arg0[%c247] : memref<396xf32, #tpu.memory_space<smem>>
    %1490 = vector.broadcast %1489 : f32 to vector<2x288xf32>
    %1491 = arith.mulf %1490, %1468 : vector<2x288xf32>
    %1492 = arith.addf %1458, %1491 : vector<2x288xf32>
    %c283 = arith.constant 283 : index
    %1493 = memref.load %arg0[%c283] : memref<396xf32, #tpu.memory_space<smem>>
    %1494 = vector.broadcast %1493 : f32 to vector<2x288xf32>
    %1495 = arith.mulf %1494, %1468 : vector<2x288xf32>
    %1496 = arith.addf %1462, %1495 : vector<2x288xf32>
    %c319 = arith.constant 319 : index
    %1497 = memref.load %arg0[%c319] : memref<396xf32, #tpu.memory_space<smem>>
    %1498 = vector.broadcast %1497 : f32 to vector<2x288xf32>
    %1499 = arith.mulf %1498, %1468 : vector<2x288xf32>
    %1500 = arith.addf %1466, %1499 : vector<2x288xf32>
    %c3_288 = arith.constant 3 : index
    %c0_289 = arith.constant 0 : index
    %c20_290 = arith.constant 20 : index
    %1501 = vector.load %arg6[%c3_288, %c0_289, %c20_290] : memref<4x2x384xf32, #tpu.memory_space<vmem>>, vector<1x2x288xf32>
    %1502 = vector.shape_cast %1501 : vector<1x2x288xf32> to vector<2x288xf32>
    %c68 = arith.constant 68 : index
    %1503 = memref.load %arg0[%c68] : memref<396xf32, #tpu.memory_space<smem>>
    %1504 = vector.broadcast %1503 : f32 to vector<2x288xf32>
    %1505 = arith.mulf %1504, %1502 : vector<2x288xf32>
    %1506 = arith.addf %1472, %1505 : vector<2x288xf32>
    %c104 = arith.constant 104 : index
    %1507 = memref.load %arg0[%c104] : memref<396xf32, #tpu.memory_space<smem>>
    %1508 = vector.broadcast %1507 : f32 to vector<2x288xf32>
    %1509 = arith.mulf %1508, %1502 : vector<2x288xf32>
    %1510 = arith.addf %1476, %1509 : vector<2x288xf32>
    %c140 = arith.constant 140 : index
    %1511 = memref.load %arg0[%c140] : memref<396xf32, #tpu.memory_space<smem>>
    %1512 = vector.broadcast %1511 : f32 to vector<2x288xf32>
    %1513 = arith.mulf %1512, %1502 : vector<2x288xf32>
    %1514 = arith.addf %1480, %1513 : vector<2x288xf32>
    %c176_291 = arith.constant 176 : index
    %1515 = memref.load %arg0[%c176_291] : memref<396xf32, #tpu.memory_space<smem>>
    %1516 = vector.broadcast %1515 : f32 to vector<2x288xf32>
    %1517 = arith.mulf %1516, %1502 : vector<2x288xf32>
    %1518 = arith.addf %1484, %1517 : vector<2x288xf32>
    %c212 = arith.constant 212 : index
    %1519 = memref.load %arg0[%c212] : memref<396xf32, #tpu.memory_space<smem>>
    %1520 = vector.broadcast %1519 : f32 to vector<2x288xf32>
    %1521 = arith.mulf %1520, %1502 : vector<2x288xf32>
    %1522 = arith.addf %1488, %1521 : vector<2x288xf32>
    %c248 = arith.constant 248 : index
    %1523 = memref.load %arg0[%c248] : memref<396xf32, #tpu.memory_space<smem>>
    %1524 = vector.broadcast %1523 : f32 to vector<2x288xf32>
    %1525 = arith.mulf %1524, %1502 : vector<2x288xf32>
    %1526 = arith.addf %1492, %1525 : vector<2x288xf32>
    %c284 = arith.constant 284 : index
    %1527 = memref.load %arg0[%c284] : memref<396xf32, #tpu.memory_space<smem>>
    %1528 = vector.broadcast %1527 : f32 to vector<2x288xf32>
    %1529 = arith.mulf %1528, %1502 : vector<2x288xf32>
    %1530 = arith.addf %1496, %1529 : vector<2x288xf32>
    %c320 = arith.constant 320 : index
    %1531 = memref.load %arg0[%c320] : memref<396xf32, #tpu.memory_space<smem>>
    %1532 = vector.broadcast %1531 : f32 to vector<2x288xf32>
    %1533 = arith.mulf %1532, %1502 : vector<2x288xf32>
    %1534 = arith.addf %1500, %1533 : vector<2x288xf32>
    %c3_292 = arith.constant 3 : index
    %c0_293 = arith.constant 0 : index
    %c36_294 = arith.constant 36 : index
    %1535 = vector.load %arg6[%c3_292, %c0_293, %c36_294] : memref<4x2x384xf32, #tpu.memory_space<vmem>>, vector<1x2x288xf32>
    %1536 = vector.shape_cast %1535 : vector<1x2x288xf32> to vector<2x288xf32>
    %c69 = arith.constant 69 : index
    %1537 = memref.load %arg0[%c69] : memref<396xf32, #tpu.memory_space<smem>>
    %1538 = vector.broadcast %1537 : f32 to vector<2x288xf32>
    %1539 = arith.mulf %1538, %1536 : vector<2x288xf32>
    %1540 = arith.addf %1506, %1539 : vector<2x288xf32>
    %c105 = arith.constant 105 : index
    %1541 = memref.load %arg0[%c105] : memref<396xf32, #tpu.memory_space<smem>>
    %1542 = vector.broadcast %1541 : f32 to vector<2x288xf32>
    %1543 = arith.mulf %1542, %1536 : vector<2x288xf32>
    %1544 = arith.addf %1510, %1543 : vector<2x288xf32>
    %c141 = arith.constant 141 : index
    %1545 = memref.load %arg0[%c141] : memref<396xf32, #tpu.memory_space<smem>>
    %1546 = vector.broadcast %1545 : f32 to vector<2x288xf32>
    %1547 = arith.mulf %1546, %1536 : vector<2x288xf32>
    %1548 = arith.addf %1514, %1547 : vector<2x288xf32>
    %c177 = arith.constant 177 : index
    %1549 = memref.load %arg0[%c177] : memref<396xf32, #tpu.memory_space<smem>>
    %1550 = vector.broadcast %1549 : f32 to vector<2x288xf32>
    %1551 = arith.mulf %1550, %1536 : vector<2x288xf32>
    %1552 = arith.addf %1518, %1551 : vector<2x288xf32>
    %c213 = arith.constant 213 : index
    %1553 = memref.load %arg0[%c213] : memref<396xf32, #tpu.memory_space<smem>>
    %1554 = vector.broadcast %1553 : f32 to vector<2x288xf32>
    %1555 = arith.mulf %1554, %1536 : vector<2x288xf32>
    %1556 = arith.addf %1522, %1555 : vector<2x288xf32>
    %c249 = arith.constant 249 : index
    %1557 = memref.load %arg0[%c249] : memref<396xf32, #tpu.memory_space<smem>>
    %1558 = vector.broadcast %1557 : f32 to vector<2x288xf32>
    %1559 = arith.mulf %1558, %1536 : vector<2x288xf32>
    %1560 = arith.addf %1526, %1559 : vector<2x288xf32>
    %c285 = arith.constant 285 : index
    %1561 = memref.load %arg0[%c285] : memref<396xf32, #tpu.memory_space<smem>>
    %1562 = vector.broadcast %1561 : f32 to vector<2x288xf32>
    %1563 = arith.mulf %1562, %1536 : vector<2x288xf32>
    %1564 = arith.addf %1530, %1563 : vector<2x288xf32>
    %c321 = arith.constant 321 : index
    %1565 = memref.load %arg0[%c321] : memref<396xf32, #tpu.memory_space<smem>>
    %1566 = vector.broadcast %1565 : f32 to vector<2x288xf32>
    %1567 = arith.mulf %1566, %1536 : vector<2x288xf32>
    %1568 = arith.addf %1534, %1567 : vector<2x288xf32>
    %c3_295 = arith.constant 3 : index
    %c0_296 = arith.constant 0 : index
    %c37_297 = arith.constant 37 : index
    %1569 = vector.load %arg6[%c3_295, %c0_296, %c37_297] : memref<4x2x384xf32, #tpu.memory_space<vmem>>, vector<1x2x288xf32>
    %1570 = vector.shape_cast %1569 : vector<1x2x288xf32> to vector<2x288xf32>
    %c70 = arith.constant 70 : index
    %1571 = memref.load %arg0[%c70] : memref<396xf32, #tpu.memory_space<smem>>
    %1572 = vector.broadcast %1571 : f32 to vector<2x288xf32>
    %1573 = arith.mulf %1572, %1570 : vector<2x288xf32>
    %1574 = arith.addf %1540, %1573 : vector<2x288xf32>
    %c106 = arith.constant 106 : index
    %1575 = memref.load %arg0[%c106] : memref<396xf32, #tpu.memory_space<smem>>
    %1576 = vector.broadcast %1575 : f32 to vector<2x288xf32>
    %1577 = arith.mulf %1576, %1570 : vector<2x288xf32>
    %1578 = arith.addf %1544, %1577 : vector<2x288xf32>
    %c142 = arith.constant 142 : index
    %1579 = memref.load %arg0[%c142] : memref<396xf32, #tpu.memory_space<smem>>
    %1580 = vector.broadcast %1579 : f32 to vector<2x288xf32>
    %1581 = arith.mulf %1580, %1570 : vector<2x288xf32>
    %1582 = arith.addf %1548, %1581 : vector<2x288xf32>
    %c178 = arith.constant 178 : index
    %1583 = memref.load %arg0[%c178] : memref<396xf32, #tpu.memory_space<smem>>
    %1584 = vector.broadcast %1583 : f32 to vector<2x288xf32>
    %1585 = arith.mulf %1584, %1570 : vector<2x288xf32>
    %1586 = arith.addf %1552, %1585 : vector<2x288xf32>
    %c214 = arith.constant 214 : index
    %1587 = memref.load %arg0[%c214] : memref<396xf32, #tpu.memory_space<smem>>
    %1588 = vector.broadcast %1587 : f32 to vector<2x288xf32>
    %1589 = arith.mulf %1588, %1570 : vector<2x288xf32>
    %1590 = arith.addf %1556, %1589 : vector<2x288xf32>
    %c250 = arith.constant 250 : index
    %1591 = memref.load %arg0[%c250] : memref<396xf32, #tpu.memory_space<smem>>
    %1592 = vector.broadcast %1591 : f32 to vector<2x288xf32>
    %1593 = arith.mulf %1592, %1570 : vector<2x288xf32>
    %1594 = arith.addf %1560, %1593 : vector<2x288xf32>
    %c286 = arith.constant 286 : index
    %1595 = memref.load %arg0[%c286] : memref<396xf32, #tpu.memory_space<smem>>
    %1596 = vector.broadcast %1595 : f32 to vector<2x288xf32>
    %1597 = arith.mulf %1596, %1570 : vector<2x288xf32>
    %1598 = arith.addf %1564, %1597 : vector<2x288xf32>
    %c322 = arith.constant 322 : index
    %1599 = memref.load %arg0[%c322] : memref<396xf32, #tpu.memory_space<smem>>
    %1600 = vector.broadcast %1599 : f32 to vector<2x288xf32>
    %1601 = arith.mulf %1600, %1570 : vector<2x288xf32>
    %1602 = arith.addf %1568, %1601 : vector<2x288xf32>
    %c3_298 = arith.constant 3 : index
    %c0_299 = arith.constant 0 : index
    %c38_300 = arith.constant 38 : index
    %1603 = vector.load %arg6[%c3_298, %c0_299, %c38_300] : memref<4x2x384xf32, #tpu.memory_space<vmem>>, vector<1x2x288xf32>
    %1604 = vector.shape_cast %1603 : vector<1x2x288xf32> to vector<2x288xf32>
    %c71 = arith.constant 71 : index
    %1605 = memref.load %arg0[%c71] : memref<396xf32, #tpu.memory_space<smem>>
    %1606 = vector.broadcast %1605 : f32 to vector<2x288xf32>
    %1607 = arith.mulf %1606, %1604 : vector<2x288xf32>
    %1608 = arith.addf %1574, %1607 : vector<2x288xf32>
    %c107 = arith.constant 107 : index
    %1609 = memref.load %arg0[%c107] : memref<396xf32, #tpu.memory_space<smem>>
    %1610 = vector.broadcast %1609 : f32 to vector<2x288xf32>
    %1611 = arith.mulf %1610, %1604 : vector<2x288xf32>
    %1612 = arith.addf %1578, %1611 : vector<2x288xf32>
    %c143 = arith.constant 143 : index
    %1613 = memref.load %arg0[%c143] : memref<396xf32, #tpu.memory_space<smem>>
    %1614 = vector.broadcast %1613 : f32 to vector<2x288xf32>
    %1615 = arith.mulf %1614, %1604 : vector<2x288xf32>
    %1616 = arith.addf %1582, %1615 : vector<2x288xf32>
    %c179 = arith.constant 179 : index
    %1617 = memref.load %arg0[%c179] : memref<396xf32, #tpu.memory_space<smem>>
    %1618 = vector.broadcast %1617 : f32 to vector<2x288xf32>
    %1619 = arith.mulf %1618, %1604 : vector<2x288xf32>
    %1620 = arith.addf %1586, %1619 : vector<2x288xf32>
    %c215 = arith.constant 215 : index
    %1621 = memref.load %arg0[%c215] : memref<396xf32, #tpu.memory_space<smem>>
    %1622 = vector.broadcast %1621 : f32 to vector<2x288xf32>
    %1623 = arith.mulf %1622, %1604 : vector<2x288xf32>
    %1624 = arith.addf %1590, %1623 : vector<2x288xf32>
    %c251 = arith.constant 251 : index
    %1625 = memref.load %arg0[%c251] : memref<396xf32, #tpu.memory_space<smem>>
    %1626 = vector.broadcast %1625 : f32 to vector<2x288xf32>
    %1627 = arith.mulf %1626, %1604 : vector<2x288xf32>
    %1628 = arith.addf %1594, %1627 : vector<2x288xf32>
    %c287 = arith.constant 287 : index
    %1629 = memref.load %arg0[%c287] : memref<396xf32, #tpu.memory_space<smem>>
    %1630 = vector.broadcast %1629 : f32 to vector<2x288xf32>
    %1631 = arith.mulf %1630, %1604 : vector<2x288xf32>
    %1632 = arith.addf %1598, %1631 : vector<2x288xf32>
    %c323 = arith.constant 323 : index
    %1633 = memref.load %arg0[%c323] : memref<396xf32, #tpu.memory_space<smem>>
    %1634 = vector.broadcast %1633 : f32 to vector<2x288xf32>
    %1635 = arith.mulf %1634, %1604 : vector<2x288xf32>
    %1636 = arith.addf %1602, %1635 : vector<2x288xf32>
    %1637 = vector.broadcast %106 : vector<1x288xf32> to vector<2x288xf32>
    %1638 = arith.mulf %1608, %1637 : vector<2x288xf32>
    %1639 = vector.shape_cast %1638 : vector<2x288xf32> to vector<1x2x288xf32>
    %cst_301 = arith.constant dense<0.000000e+00> : vector<1xf32>
    %1640 = vector.multi_reduction <add>, %1639, %cst_301 [1, 2] : vector<1x2x288xf32> to vector<1xf32>
    %1641 = vector.shape_cast %1640 : vector<1xf32> to vector<1x1x1xf32>
    %1642 = vector.extract %1641[0, 0, 0] : f32 from vector<1x1x1xf32>
    %cst_302 = arith.constant 0.001953125 : f32
    %1643 = arith.mulf %1642, %cst_302 : f32
    %1644 = vector.broadcast %1643 : f32 to vector<2x288xf32>
    %1645 = arith.subf %1608, %1644 : vector<2x288xf32>
    %1646 = arith.mulf %1645, %1645 : vector<2x288xf32>
    %1647 = vector.broadcast %106 : vector<1x288xf32> to vector<2x288xf32>
    %1648 = arith.mulf %1646, %1647 : vector<2x288xf32>
    %1649 = vector.shape_cast %1648 : vector<2x288xf32> to vector<1x2x288xf32>
    %cst_303 = arith.constant dense<0.000000e+00> : vector<1xf32>
    %1650 = vector.multi_reduction <add>, %1649, %cst_303 [1, 2] : vector<1x2x288xf32> to vector<1xf32>
    %1651 = vector.shape_cast %1650 : vector<1xf32> to vector<1x1x1xf32>
    %1652 = vector.extract %1651[0, 0, 0] : f32 from vector<1x1x1xf32>
    %cst_304 = arith.constant 0.001953125 : f32
    %1653 = arith.mulf %1652, %cst_304 : f32
    %c4_305 = arith.constant 4 : index
    %1654 = memref.load %arg1[%c4_305] : memref<12xf32, #tpu.memory_space<smem>>
    %c4_306 = arith.constant 4 : index
    %1655 = memref.load %arg2[%c4_306] : memref<12xf32, #tpu.memory_space<smem>>
    %cst_307 = arith.constant 9.99999974E-6 : f32
    %1656 = arith.addf %1653, %cst_307 : f32
    %1657 = math.rsqrt %1656 : f32
    %1658 = arith.mulf %1657, %1654 : f32
    %1659 = vector.broadcast %1658 : f32 to vector<2x288xf32>
    %1660 = arith.mulf %1645, %1659 : vector<2x288xf32>
    %1661 = vector.broadcast %1655 : f32 to vector<2x288xf32>
    %1662 = arith.addf %1660, %1661 : vector<2x288xf32>
    %cst_308 = arith.constant 0.000000e+00 : f32
    %1663 = vector.broadcast %cst_308 : f32 to vector<2x288xf32>
    %1664 = arith.maximumf %1662, %1663 : vector<2x288xf32>
    %1665 = vector.broadcast %106 : vector<1x288xf32> to vector<2x288xf32>
    %1666 = arith.mulf %1664, %1665 : vector<2x288xf32>
    %c0_309 = arith.constant 0 : index
    %c0_310 = arith.constant 0 : index
    %c19_311 = arith.constant 19 : index
    %1667 = vector.load %arg7[%c0_309, %c0_310, %c19_311] : memref<8x2x384xf32, #tpu.memory_space<vmem>>, vector<1x2x288xf32>
    %1668 = vector.shape_cast %1667 : vector<1x2x288xf32> to vector<2x288xf32>
    %1669 = vector.shape_cast %1666 : vector<2x288xf32> to vector<1x2x288xf32>
    tpu.vector_store %arg7[%c0_309, %c0_310, %c19_311], %1669 {strides = array<i32>} : memref<8x2x384xf32, #tpu.memory_space<vmem>>, vector<1x2x288xf32>,
    %1670 = vector.broadcast %106 : vector<1x288xf32> to vector<2x288xf32>
    %1671 = arith.mulf %1612, %1670 : vector<2x288xf32>
    %1672 = vector.shape_cast %1671 : vector<2x288xf32> to vector<1x2x288xf32>
    %cst_312 = arith.constant dense<0.000000e+00> : vector<1xf32>
    %1673 = vector.multi_reduction <add>, %1672, %cst_312 [1, 2] : vector<1x2x288xf32> to vector<1xf32>
    %1674 = vector.shape_cast %1673 : vector<1xf32> to vector<1x1x1xf32>
    %1675 = vector.extract %1674[0, 0, 0] : f32 from vector<1x1x1xf32>
    %cst_313 = arith.constant 0.001953125 : f32
    %1676 = arith.mulf %1675, %cst_313 : f32
    %1677 = vector.broadcast %1676 : f32 to vector<2x288xf32>
    %1678 = arith.subf %1612, %1677 : vector<2x288xf32>
    %1679 = arith.mulf %1678, %1678 : vector<2x288xf32>
    %1680 = vector.broadcast %106 : vector<1x288xf32> to vector<2x288xf32>
    %1681 = arith.mulf %1679, %1680 : vector<2x288xf32>
    %1682 = vector.shape_cast %1681 : vector<2x288xf32> to vector<1x2x288xf32>
    %cst_314 = arith.constant dense<0.000000e+00> : vector<1xf32>
    %1683 = vector.multi_reduction <add>, %1682, %cst_314 [1, 2] : vector<1x2x288xf32> to vector<1xf32>
    %1684 = vector.shape_cast %1683 : vector<1xf32> to vector<1x1x1xf32>
    %1685 = vector.extract %1684[0, 0, 0] : f32 from vector<1x1x1xf32>
    %cst_315 = arith.constant 0.001953125 : f32
    %1686 = arith.mulf %1685, %cst_315 : f32
    %c5_316 = arith.constant 5 : index
    %1687 = memref.load %arg1[%c5_316] : memref<12xf32, #tpu.memory_space<smem>>
    %c5_317 = arith.constant 5 : index
    %1688 = memref.load %arg2[%c5_317] : memref<12xf32, #tpu.memory_space<smem>>
    %cst_318 = arith.constant 9.99999974E-6 : f32
    %1689 = arith.addf %1686, %cst_318 : f32
    %1690 = math.rsqrt %1689 : f32
    %1691 = arith.mulf %1690, %1687 : f32
    %1692 = vector.broadcast %1691 : f32 to vector<2x288xf32>
    %1693 = arith.mulf %1678, %1692 : vector<2x288xf32>
    %1694 = vector.broadcast %1688 : f32 to vector<2x288xf32>
    %1695 = arith.addf %1693, %1694 : vector<2x288xf32>
    %cst_319 = arith.constant 0.000000e+00 : f32
    %1696 = vector.broadcast %cst_319 : f32 to vector<2x288xf32>
    %1697 = arith.maximumf %1695, %1696 : vector<2x288xf32>
    %1698 = vector.broadcast %106 : vector<1x288xf32> to vector<2x288xf32>
    %1699 = arith.mulf %1697, %1698 : vector<2x288xf32>
    %c1_320 = arith.constant 1 : index
    %c0_321 = arith.constant 0 : index
    %c19_322 = arith.constant 19 : index
    %1700 = vector.load %arg7[%c1_320, %c0_321, %c19_322] : memref<8x2x384xf32, #tpu.memory_space<vmem>>, vector<1x2x288xf32>
    %1701 = vector.shape_cast %1700 : vector<1x2x288xf32> to vector<2x288xf32>
    %1702 = vector.shape_cast %1699 : vector<2x288xf32> to vector<1x2x288xf32>
    tpu.vector_store %arg7[%c1_320, %c0_321, %c19_322], %1702 {strides = array<i32>} : memref<8x2x384xf32, #tpu.memory_space<vmem>>, vector<1x2x288xf32>,
    %1703 = vector.broadcast %106 : vector<1x288xf32> to vector<2x288xf32>
    %1704 = arith.mulf %1616, %1703 : vector<2x288xf32>
    %1705 = vector.shape_cast %1704 : vector<2x288xf32> to vector<1x2x288xf32>
    %cst_323 = arith.constant dense<0.000000e+00> : vector<1xf32>
    %1706 = vector.multi_reduction <add>, %1705, %cst_323 [1, 2] : vector<1x2x288xf32> to vector<1xf32>
    %1707 = vector.shape_cast %1706 : vector<1xf32> to vector<1x1x1xf32>
    %1708 = vector.extract %1707[0, 0, 0] : f32 from vector<1x1x1xf32>
    %cst_324 = arith.constant 0.001953125 : f32
    %1709 = arith.mulf %1708, %cst_324 : f32
    %1710 = vector.broadcast %1709 : f32 to vector<2x288xf32>
    %1711 = arith.subf %1616, %1710 : vector<2x288xf32>
    %1712 = arith.mulf %1711, %1711 : vector<2x288xf32>
    %1713 = vector.broadcast %106 : vector<1x288xf32> to vector<2x288xf32>
    %1714 = arith.mulf %1712, %1713 : vector<2x288xf32>
    %1715 = vector.shape_cast %1714 : vector<2x288xf32> to vector<1x2x288xf32>
    %cst_325 = arith.constant dense<0.000000e+00> : vector<1xf32>
    %1716 = vector.multi_reduction <add>, %1715, %cst_325 [1, 2] : vector<1x2x288xf32> to vector<1xf32>
    %1717 = vector.shape_cast %1716 : vector<1xf32> to vector<1x1x1xf32>
    %1718 = vector.extract %1717[0, 0, 0] : f32 from vector<1x1x1xf32>
    %cst_326 = arith.constant 0.001953125 : f32
    %1719 = arith.mulf %1718, %cst_326 : f32
    %c6_327 = arith.constant 6 : index
    %1720 = memref.load %arg1[%c6_327] : memref<12xf32, #tpu.memory_space<smem>>
    %c6_328 = arith.constant 6 : index
    %1721 = memref.load %arg2[%c6_328] : memref<12xf32, #tpu.memory_space<smem>>
    %cst_329 = arith.constant 9.99999974E-6 : f32
    %1722 = arith.addf %1719, %cst_329 : f32
    %1723 = math.rsqrt %1722 : f32
    %1724 = arith.mulf %1723, %1720 : f32
    %1725 = vector.broadcast %1724 : f32 to vector<2x288xf32>
    %1726 = arith.mulf %1711, %1725 : vector<2x288xf32>
    %1727 = vector.broadcast %1721 : f32 to vector<2x288xf32>
    %1728 = arith.addf %1726, %1727 : vector<2x288xf32>
    %cst_330 = arith.constant 0.000000e+00 : f32
    %1729 = vector.broadcast %cst_330 : f32 to vector<2x288xf32>
    %1730 = arith.maximumf %1728, %1729 : vector<2x288xf32>
    %1731 = vector.broadcast %106 : vector<1x288xf32> to vector<2x288xf32>
    %1732 = arith.mulf %1730, %1731 : vector<2x288xf32>
    %c2_331 = arith.constant 2 : index
    %c0_332 = arith.constant 0 : index
    %c19_333 = arith.constant 19 : index
    %1733 = vector.load %arg7[%c2_331, %c0_332, %c19_333] : memref<8x2x384xf32, #tpu.memory_space<vmem>>, vector<1x2x288xf32>
    %1734 = vector.shape_cast %1733 : vector<1x2x288xf32> to vector<2x288xf32>
    %1735 = vector.shape_cast %1732 : vector<2x288xf32> to vector<1x2x288xf32>
    tpu.vector_store %arg7[%c2_331, %c0_332, %c19_333], %1735 {strides = array<i32>} : memref<8x2x384xf32, #tpu.memory_space<vmem>>, vector<1x2x288xf32>,
    %1736 = vector.broadcast %106 : vector<1x288xf32> to vector<2x288xf32>
    %1737 = arith.mulf %1620, %1736 : vector<2x288xf32>
    %1738 = vector.shape_cast %1737 : vector<2x288xf32> to vector<1x2x288xf32>
    %cst_334 = arith.constant dense<0.000000e+00> : vector<1xf32>
    %1739 = vector.multi_reduction <add>, %1738, %cst_334 [1, 2] : vector<1x2x288xf32> to vector<1xf32>
    %1740 = vector.shape_cast %1739 : vector<1xf32> to vector<1x1x1xf32>
    %1741 = vector.extract %1740[0, 0, 0] : f32 from vector<1x1x1xf32>
    %cst_335 = arith.constant 0.001953125 : f32
    %1742 = arith.mulf %1741, %cst_335 : f32
    %1743 = vector.broadcast %1742 : f32 to vector<2x288xf32>
    %1744 = arith.subf %1620, %1743 : vector<2x288xf32>
    %1745 = arith.mulf %1744, %1744 : vector<2x288xf32>
    %1746 = vector.broadcast %106 : vector<1x288xf32> to vector<2x288xf32>
    %1747 = arith.mulf %1745, %1746 : vector<2x288xf32>
    %1748 = vector.shape_cast %1747 : vector<2x288xf32> to vector<1x2x288xf32>
    %cst_336 = arith.constant dense<0.000000e+00> : vector<1xf32>
    %1749 = vector.multi_reduction <add>, %1748, %cst_336 [1, 2] : vector<1x2x288xf32> to vector<1xf32>
    %1750 = vector.shape_cast %1749 : vector<1xf32> to vector<1x1x1xf32>
    %1751 = vector.extract %1750[0, 0, 0] : f32 from vector<1x1x1xf32>
    %cst_337 = arith.constant 0.001953125 : f32
    %1752 = arith.mulf %1751, %cst_337 : f32
    %c7_338 = arith.constant 7 : index
    %1753 = memref.load %arg1[%c7_338] : memref<12xf32, #tpu.memory_space<smem>>
    %c7_339 = arith.constant 7 : index
    %1754 = memref.load %arg2[%c7_339] : memref<12xf32, #tpu.memory_space<smem>>
    %cst_340 = arith.constant 9.99999974E-6 : f32
    %1755 = arith.addf %1752, %cst_340 : f32
    %1756 = math.rsqrt %1755 : f32
    %1757 = arith.mulf %1756, %1753 : f32
    %1758 = vector.broadcast %1757 : f32 to vector<2x288xf32>
    %1759 = arith.mulf %1744, %1758 : vector<2x288xf32>
    %1760 = vector.broadcast %1754 : f32 to vector<2x288xf32>
    %1761 = arith.addf %1759, %1760 : vector<2x288xf32>
    %cst_341 = arith.constant 0.000000e+00 : f32
    %1762 = vector.broadcast %cst_341 : f32 to vector<2x288xf32>
    %1763 = arith.maximumf %1761, %1762 : vector<2x288xf32>
    %1764 = vector.broadcast %106 : vector<1x288xf32> to vector<2x288xf32>
    %1765 = arith.mulf %1763, %1764 : vector<2x288xf32>
    %c3_342 = arith.constant 3 : index
    %c0_343 = arith.constant 0 : index
    %c19_344 = arith.constant 19 : index
    %1766 = vector.load %arg7[%c3_342, %c0_343, %c19_344] : memref<8x2x384xf32, #tpu.memory_space<vmem>>, vector<1x2x288xf32>
    %1767 = vector.shape_cast %1766 : vector<1x2x288xf32> to vector<2x288xf32>
    %1768 = vector.shape_cast %1765 : vector<2x288xf32> to vector<1x2x288xf32>
    tpu.vector_store %arg7[%c3_342, %c0_343, %c19_344], %1768 {strides = array<i32>} : memref<8x2x384xf32, #tpu.memory_space<vmem>>, vector<1x2x288xf32>,
    %1769 = vector.broadcast %106 : vector<1x288xf32> to vector<2x288xf32>
    %1770 = arith.mulf %1624, %1769 : vector<2x288xf32>
    %1771 = vector.shape_cast %1770 : vector<2x288xf32> to vector<1x2x288xf32>
    %cst_345 = arith.constant dense<0.000000e+00> : vector<1xf32>
    %1772 = vector.multi_reduction <add>, %1771, %cst_345 [1, 2] : vector<1x2x288xf32> to vector<1xf32>
    %1773 = vector.shape_cast %1772 : vector<1xf32> to vector<1x1x1xf32>
    %1774 = vector.extract %1773[0, 0, 0] : f32 from vector<1x1x1xf32>
    %cst_346 = arith.constant 0.001953125 : f32
    %1775 = arith.mulf %1774, %cst_346 : f32
    %1776 = vector.broadcast %1775 : f32 to vector<2x288xf32>
    %1777 = arith.subf %1624, %1776 : vector<2x288xf32>
    %1778 = arith.mulf %1777, %1777 : vector<2x288xf32>
    %1779 = vector.broadcast %106 : vector<1x288xf32> to vector<2x288xf32>
    %1780 = arith.mulf %1778, %1779 : vector<2x288xf32>
    %1781 = vector.shape_cast %1780 : vector<2x288xf32> to vector<1x2x288xf32>
    %cst_347 = arith.constant dense<0.000000e+00> : vector<1xf32>
    %1782 = vector.multi_reduction <add>, %1781, %cst_347 [1, 2] : vector<1x2x288xf32> to vector<1xf32>
    %1783 = vector.shape_cast %1782 : vector<1xf32> to vector<1x1x1xf32>
    %1784 = vector.extract %1783[0, 0, 0] : f32 from vector<1x1x1xf32>
    %cst_348 = arith.constant 0.001953125 : f32
    %1785 = arith.mulf %1784, %cst_348 : f32
    %c8_349 = arith.constant 8 : index
    %1786 = memref.load %arg1[%c8_349] : memref<12xf32, #tpu.memory_space<smem>>
    %c8_350 = arith.constant 8 : index
    %1787 = memref.load %arg2[%c8_350] : memref<12xf32, #tpu.memory_space<smem>>
    %cst_351 = arith.constant 9.99999974E-6 : f32
    %1788 = arith.addf %1785, %cst_351 : f32
    %1789 = math.rsqrt %1788 : f32
    %1790 = arith.mulf %1789, %1786 : f32
    %1791 = vector.broadcast %1790 : f32 to vector<2x288xf32>
    %1792 = arith.mulf %1777, %1791 : vector<2x288xf32>
    %1793 = vector.broadcast %1787 : f32 to vector<2x288xf32>
    %1794 = arith.addf %1792, %1793 : vector<2x288xf32>
    %cst_352 = arith.constant 0.000000e+00 : f32
    %1795 = vector.broadcast %cst_352 : f32 to vector<2x288xf32>
    %1796 = arith.maximumf %1794, %1795 : vector<2x288xf32>
    %1797 = vector.broadcast %106 : vector<1x288xf32> to vector<2x288xf32>
    %1798 = arith.mulf %1796, %1797 : vector<2x288xf32>
    %c4_353 = arith.constant 4 : index
    %c0_354 = arith.constant 0 : index
    %c19_355 = arith.constant 19 : index
    %1799 = vector.load %arg7[%c4_353, %c0_354, %c19_355] : memref<8x2x384xf32, #tpu.memory_space<vmem>>, vector<1x2x288xf32>
    %1800 = vector.shape_cast %1799 : vector<1x2x288xf32> to vector<2x288xf32>
    %1801 = vector.shape_cast %1798 : vector<2x288xf32> to vector<1x2x288xf32>
    tpu.vector_store %arg7[%c4_353, %c0_354, %c19_355], %1801 {strides = array<i32>} : memref<8x2x384xf32, #tpu.memory_space<vmem>>, vector<1x2x288xf32>,
    %1802 = vector.broadcast %106 : vector<1x288xf32> to vector<2x288xf32>
    %1803 = arith.mulf %1628, %1802 : vector<2x288xf32>
    %1804 = vector.shape_cast %1803 : vector<2x288xf32> to vector<1x2x288xf32>
    %cst_356 = arith.constant dense<0.000000e+00> : vector<1xf32>
    %1805 = vector.multi_reduction <add>, %1804, %cst_356 [1, 2] : vector<1x2x288xf32> to vector<1xf32>
    %1806 = vector.shape_cast %1805 : vector<1xf32> to vector<1x1x1xf32>
    %1807 = vector.extract %1806[0, 0, 0] : f32 from vector<1x1x1xf32>
    %cst_357 = arith.constant 0.001953125 : f32
    %1808 = arith.mulf %1807, %cst_357 : f32
    %1809 = vector.broadcast %1808 : f32 to vector<2x288xf32>
    %1810 = arith.subf %1628, %1809 : vector<2x288xf32>
    %1811 = arith.mulf %1810, %1810 : vector<2x288xf32>
    %1812 = vector.broadcast %106 : vector<1x288xf32> to vector<2x288xf32>
    %1813 = arith.mulf %1811, %1812 : vector<2x288xf32>
    %1814 = vector.shape_cast %1813 : vector<2x288xf32> to vector<1x2x288xf32>
    %cst_358 = arith.constant dense<0.000000e+00> : vector<1xf32>
    %1815 = vector.multi_reduction <add>, %1814, %cst_358 [1, 2] : vector<1x2x288xf32> to vector<1xf32>
    %1816 = vector.shape_cast %1815 : vector<1xf32> to vector<1x1x1xf32>
    %1817 = vector.extract %1816[0, 0, 0] : f32 from vector<1x1x1xf32>
    %cst_359 = arith.constant 0.001953125 : f32
    %1818 = arith.mulf %1817, %cst_359 : f32
    %c9_360 = arith.constant 9 : index
    %1819 = memref.load %arg1[%c9_360] : memref<12xf32, #tpu.memory_space<smem>>
    %c9_361 = arith.constant 9 : index
    %1820 = memref.load %arg2[%c9_361] : memref<12xf32, #tpu.memory_space<smem>>
    %cst_362 = arith.constant 9.99999974E-6 : f32
    %1821 = arith.addf %1818, %cst_362 : f32
    %1822 = math.rsqrt %1821 : f32
    %1823 = arith.mulf %1822, %1819 : f32
    %1824 = vector.broadcast %1823 : f32 to vector<2x288xf32>
    %1825 = arith.mulf %1810, %1824 : vector<2x288xf32>
    %1826 = vector.broadcast %1820 : f32 to vector<2x288xf32>
    %1827 = arith.addf %1825, %1826 : vector<2x288xf32>
    %cst_363 = arith.constant 0.000000e+00 : f32
    %1828 = vector.broadcast %cst_363 : f32 to vector<2x288xf32>
    %1829 = arith.maximumf %1827, %1828 : vector<2x288xf32>
    %1830 = vector.broadcast %106 : vector<1x288xf32> to vector<2x288xf32>
    %1831 = arith.mulf %1829, %1830 : vector<2x288xf32>
    %c5_364 = arith.constant 5 : index
    %c0_365 = arith.constant 0 : index
    %c19_366 = arith.constant 19 : index
    %1832 = vector.load %arg7[%c5_364, %c0_365, %c19_366] : memref<8x2x384xf32, #tpu.memory_space<vmem>>, vector<1x2x288xf32>
    %1833 = vector.shape_cast %1832 : vector<1x2x288xf32> to vector<2x288xf32>
    %1834 = vector.shape_cast %1831 : vector<2x288xf32> to vector<1x2x288xf32>
    tpu.vector_store %arg7[%c5_364, %c0_365, %c19_366], %1834 {strides = array<i32>} : memref<8x2x384xf32, #tpu.memory_space<vmem>>, vector<1x2x288xf32>,
    %1835 = vector.broadcast %106 : vector<1x288xf32> to vector<2x288xf32>
    %1836 = arith.mulf %1632, %1835 : vector<2x288xf32>
    %1837 = vector.shape_cast %1836 : vector<2x288xf32> to vector<1x2x288xf32>
    %cst_367 = arith.constant dense<0.000000e+00> : vector<1xf32>
    %1838 = vector.multi_reduction <add>, %1837, %cst_367 [1, 2] : vector<1x2x288xf32> to vector<1xf32>
    %1839 = vector.shape_cast %1838 : vector<1xf32> to vector<1x1x1xf32>
    %1840 = vector.extract %1839[0, 0, 0] : f32 from vector<1x1x1xf32>
    %cst_368 = arith.constant 0.001953125 : f32
    %1841 = arith.mulf %1840, %cst_368 : f32
    %1842 = vector.broadcast %1841 : f32 to vector<2x288xf32>
    %1843 = arith.subf %1632, %1842 : vector<2x288xf32>
    %1844 = arith.mulf %1843, %1843 : vector<2x288xf32>
    %1845 = vector.broadcast %106 : vector<1x288xf32> to vector<2x288xf32>
    %1846 = arith.mulf %1844, %1845 : vector<2x288xf32>
    %1847 = vector.shape_cast %1846 : vector<2x288xf32> to vector<1x2x288xf32>
    %cst_369 = arith.constant dense<0.000000e+00> : vector<1xf32>
    %1848 = vector.multi_reduction <add>, %1847, %cst_369 [1, 2] : vector<1x2x288xf32> to vector<1xf32>
    %1849 = vector.shape_cast %1848 : vector<1xf32> to vector<1x1x1xf32>
    %1850 = vector.extract %1849[0, 0, 0] : f32 from vector<1x1x1xf32>
    %cst_370 = arith.constant 0.001953125 : f32
    %1851 = arith.mulf %1850, %cst_370 : f32
    %c10_371 = arith.constant 10 : index
    %1852 = memref.load %arg1[%c10_371] : memref<12xf32, #tpu.memory_space<smem>>
    %c10_372 = arith.constant 10 : index
    %1853 = memref.load %arg2[%c10_372] : memref<12xf32, #tpu.memory_space<smem>>
    %cst_373 = arith.constant 9.99999974E-6 : f32
    %1854 = arith.addf %1851, %cst_373 : f32
    %1855 = math.rsqrt %1854 : f32
    %1856 = arith.mulf %1855, %1852 : f32
    %1857 = vector.broadcast %1856 : f32 to vector<2x288xf32>
    %1858 = arith.mulf %1843, %1857 : vector<2x288xf32>
    %1859 = vector.broadcast %1853 : f32 to vector<2x288xf32>
    %1860 = arith.addf %1858, %1859 : vector<2x288xf32>
    %cst_374 = arith.constant 0.000000e+00 : f32
    %1861 = vector.broadcast %cst_374 : f32 to vector<2x288xf32>
    %1862 = arith.maximumf %1860, %1861 : vector<2x288xf32>
    %1863 = vector.broadcast %106 : vector<1x288xf32> to vector<2x288xf32>
    %1864 = arith.mulf %1862, %1863 : vector<2x288xf32>
    %c6_375 = arith.constant 6 : index
    %c0_376 = arith.constant 0 : index
    %c19_377 = arith.constant 19 : index
    %1865 = vector.load %arg7[%c6_375, %c0_376, %c19_377] : memref<8x2x384xf32, #tpu.memory_space<vmem>>, vector<1x2x288xf32>
    %1866 = vector.shape_cast %1865 : vector<1x2x288xf32> to vector<2x288xf32>
    %1867 = vector.shape_cast %1864 : vector<2x288xf32> to vector<1x2x288xf32>
    tpu.vector_store %arg7[%c6_375, %c0_376, %c19_377], %1867 {strides = array<i32>} : memref<8x2x384xf32, #tpu.memory_space<vmem>>, vector<1x2x288xf32>,
    %1868 = vector.broadcast %106 : vector<1x288xf32> to vector<2x288xf32>
    %1869 = arith.mulf %1636, %1868 : vector<2x288xf32>
    %1870 = vector.shape_cast %1869 : vector<2x288xf32> to vector<1x2x288xf32>
    %cst_378 = arith.constant dense<0.000000e+00> : vector<1xf32>
    %1871 = vector.multi_reduction <add>, %1870, %cst_378 [1, 2] : vector<1x2x288xf32> to vector<1xf32>
    %1872 = vector.shape_cast %1871 : vector<1xf32> to vector<1x1x1xf32>
    %1873 = vector.extract %1872[0, 0, 0] : f32 from vector<1x1x1xf32>
    %cst_379 = arith.constant 0.001953125 : f32
    %1874 = arith.mulf %1873, %cst_379 : f32
    %1875 = vector.broadcast %1874 : f32 to vector<2x288xf32>
    %1876 = arith.subf %1636, %1875 : vector<2x288xf32>
    %1877 = arith.mulf %1876, %1876 : vector<2x288xf32>
    %1878 = vector.broadcast %106 : vector<1x288xf32> to vector<2x288xf32>
    %1879 = arith.mulf %1877, %1878 : vector<2x288xf32>
    %1880 = vector.shape_cast %1879 : vector<2x288xf32> to vector<1x2x288xf32>
    %cst_380 = arith.constant dense<0.000000e+00> : vector<1xf32>
    %1881 = vector.multi_reduction <add>, %1880, %cst_380 [1, 2] : vector<1x2x288xf32> to vector<1xf32>
    %1882 = vector.shape_cast %1881 : vector<1xf32> to vector<1x1x1xf32>
    %1883 = vector.extract %1882[0, 0, 0] : f32 from vector<1x1x1xf32>
    %cst_381 = arith.constant 0.001953125 : f32
    %1884 = arith.mulf %1883, %cst_381 : f32
    %c11_382 = arith.constant 11 : index
    %1885 = memref.load %arg1[%c11_382] : memref<12xf32, #tpu.memory_space<smem>>
    %c11_383 = arith.constant 11 : index
    %1886 = memref.load %arg2[%c11_383] : memref<12xf32, #tpu.memory_space<smem>>
    %cst_384 = arith.constant 9.99999974E-6 : f32
    %1887 = arith.addf %1884, %cst_384 : f32
    %1888 = math.rsqrt %1887 : f32
    %1889 = arith.mulf %1888, %1885 : f32
    %1890 = vector.broadcast %1889 : f32 to vector<2x288xf32>
    %1891 = arith.mulf %1876, %1890 : vector<2x288xf32>
    %1892 = vector.broadcast %1886 : f32 to vector<2x288xf32>
    %1893 = arith.addf %1891, %1892 : vector<2x288xf32>
    %cst_385 = arith.constant 0.000000e+00 : f32
    %1894 = vector.broadcast %cst_385 : f32 to vector<2x288xf32>
    %1895 = arith.maximumf %1893, %1894 : vector<2x288xf32>
    %1896 = vector.broadcast %106 : vector<1x288xf32> to vector<2x288xf32>
    %1897 = arith.mulf %1895, %1896 : vector<2x288xf32>
    %c7_386 = arith.constant 7 : index
    %c0_387 = arith.constant 0 : index
    %c19_388 = arith.constant 19 : index
    %1898 = vector.load %arg7[%c7_386, %c0_387, %c19_388] : memref<8x2x384xf32, #tpu.memory_space<vmem>>, vector<1x2x288xf32>
    %1899 = vector.shape_cast %1898 : vector<1x2x288xf32> to vector<2x288xf32>
    %1900 = vector.shape_cast %1897 : vector<2x288xf32> to vector<1x2x288xf32>
    tpu.vector_store %arg7[%c7_386, %c0_387, %c19_388], %1900 {strides = array<i32>} : memref<8x2x384xf32, #tpu.memory_space<vmem>>, vector<1x2x288xf32>,
    %cst_389 = arith.constant 0.000000e+00 : f32
    %1901 = vector.broadcast %cst_389 : f32 to vector<2x288xf32>
    %c0_390 = arith.constant 0 : index
    %c0_391 = arith.constant 0 : index
    %c0_392 = arith.constant 0 : index
    %1902 = vector.load %arg7[%c0_390, %c0_391, %c0_392] : memref<8x2x384xf32, #tpu.memory_space<vmem>>, vector<1x2x288xf32>
    %1903 = vector.shape_cast %1902 : vector<1x2x288xf32> to vector<2x288xf32>
    %c324 = arith.constant 324 : index
    %1904 = memref.load %arg0[%c324] : memref<396xf32, #tpu.memory_space<smem>>
    %1905 = vector.broadcast %1904 : f32 to vector<2x288xf32>
    %1906 = arith.mulf %1905, %1903 : vector<2x288xf32>
    %1907 = arith.addf %1901, %1906 : vector<2x288xf32>
    %c0_393 = arith.constant 0 : index
    %c0_394 = arith.constant 0 : index
    %c1_395 = arith.constant 1 : index
    %1908 = vector.load %arg7[%c0_393, %c0_394, %c1_395] : memref<8x2x384xf32, #tpu.memory_space<vmem>>, vector<1x2x288xf32>
    %1909 = vector.shape_cast %1908 : vector<1x2x288xf32> to vector<2x288xf32>
    %c325 = arith.constant 325 : index
    %1910 = memref.load %arg0[%c325] : memref<396xf32, #tpu.memory_space<smem>>
    %1911 = vector.broadcast %1910 : f32 to vector<2x288xf32>
    %1912 = arith.mulf %1911, %1909 : vector<2x288xf32>
    %1913 = arith.addf %1907, %1912 : vector<2x288xf32>
    %c0_396 = arith.constant 0 : index
    %c0_397 = arith.constant 0 : index
    %c2_398 = arith.constant 2 : index
    %1914 = vector.load %arg7[%c0_396, %c0_397, %c2_398] : memref<8x2x384xf32, #tpu.memory_space<vmem>>, vector<1x2x288xf32>
    %1915 = vector.shape_cast %1914 : vector<1x2x288xf32> to vector<2x288xf32>
    %c326 = arith.constant 326 : index
    %1916 = memref.load %arg0[%c326] : memref<396xf32, #tpu.memory_space<smem>>
    %1917 = vector.broadcast %1916 : f32 to vector<2x288xf32>
    %1918 = arith.mulf %1917, %1915 : vector<2x288xf32>
    %1919 = arith.addf %1913, %1918 : vector<2x288xf32>
    %c0_399 = arith.constant 0 : index
    %c0_400 = arith.constant 0 : index
    %c18_401 = arith.constant 18 : index
    %1920 = vector.load %arg7[%c0_399, %c0_400, %c18_401] : memref<8x2x384xf32, #tpu.memory_space<vmem>>, vector<1x2x288xf32>
    %1921 = vector.shape_cast %1920 : vector<1x2x288xf32> to vector<2x288xf32>
    %c327 = arith.constant 327 : index
    %1922 = memref.load %arg0[%c327] : memref<396xf32, #tpu.memory_space<smem>>
    %1923 = vector.broadcast %1922 : f32 to vector<2x288xf32>
    %1924 = arith.mulf %1923, %1921 : vector<2x288xf32>
    %1925 = arith.addf %1919, %1924 : vector<2x288xf32>
    %c0_402 = arith.constant 0 : index
    %c0_403 = arith.constant 0 : index
    %c19_404 = arith.constant 19 : index
    %1926 = vector.load %arg7[%c0_402, %c0_403, %c19_404] : memref<8x2x384xf32, #tpu.memory_space<vmem>>, vector<1x2x288xf32>
    %1927 = vector.shape_cast %1926 : vector<1x2x288xf32> to vector<2x288xf32>
    %c328 = arith.constant 328 : index
    %1928 = memref.load %arg0[%c328] : memref<396xf32, #tpu.memory_space<smem>>
    %1929 = vector.broadcast %1928 : f32 to vector<2x288xf32>
    %1930 = arith.mulf %1929, %1927 : vector<2x288xf32>
    %1931 = arith.addf %1925, %1930 : vector<2x288xf32>
    %c0_405 = arith.constant 0 : index
    %c0_406 = arith.constant 0 : index
    %c20_407 = arith.constant 20 : index
    %1932 = vector.load %arg7[%c0_405, %c0_406, %c20_407] : memref<8x2x384xf32, #tpu.memory_space<vmem>>, vector<1x2x288xf32>
    %1933 = vector.shape_cast %1932 : vector<1x2x288xf32> to vector<2x288xf32>
    %c329 = arith.constant 329 : index
    %1934 = memref.load %arg0[%c329] : memref<396xf32, #tpu.memory_space<smem>>
    %1935 = vector.broadcast %1934 : f32 to vector<2x288xf32>
    %1936 = arith.mulf %1935, %1933 : vector<2x288xf32>
    %1937 = arith.addf %1931, %1936 : vector<2x288xf32>
    %c0_408 = arith.constant 0 : index
    %c0_409 = arith.constant 0 : index
    %c36_410 = arith.constant 36 : index
    %1938 = vector.load %arg7[%c0_408, %c0_409, %c36_410] : memref<8x2x384xf32, #tpu.memory_space<vmem>>, vector<1x2x288xf32>
    %1939 = vector.shape_cast %1938 : vector<1x2x288xf32> to vector<2x288xf32>
    %c330 = arith.constant 330 : index
    %1940 = memref.load %arg0[%c330] : memref<396xf32, #tpu.memory_space<smem>>
    %1941 = vector.broadcast %1940 : f32 to vector<2x288xf32>
    %1942 = arith.mulf %1941, %1939 : vector<2x288xf32>
    %1943 = arith.addf %1937, %1942 : vector<2x288xf32>
    %c0_411 = arith.constant 0 : index
    %c0_412 = arith.constant 0 : index
    %c37_413 = arith.constant 37 : index
    %1944 = vector.load %arg7[%c0_411, %c0_412, %c37_413] : memref<8x2x384xf32, #tpu.memory_space<vmem>>, vector<1x2x288xf32>
    %1945 = vector.shape_cast %1944 : vector<1x2x288xf32> to vector<2x288xf32>
    %c331 = arith.constant 331 : index
    %1946 = memref.load %arg0[%c331] : memref<396xf32, #tpu.memory_space<smem>>
    %1947 = vector.broadcast %1946 : f32 to vector<2x288xf32>
    %1948 = arith.mulf %1947, %1945 : vector<2x288xf32>
    %1949 = arith.addf %1943, %1948 : vector<2x288xf32>
    %c0_414 = arith.constant 0 : index
    %c0_415 = arith.constant 0 : index
    %c38_416 = arith.constant 38 : index
    %1950 = vector.load %arg7[%c0_414, %c0_415, %c38_416] : memref<8x2x384xf32, #tpu.memory_space<vmem>>, vector<1x2x288xf32>
    %1951 = vector.shape_cast %1950 : vector<1x2x288xf32> to vector<2x288xf32>
    %c332 = arith.constant 332 : index
    %1952 = memref.load %arg0[%c332] : memref<396xf32, #tpu.memory_space<smem>>
    %1953 = vector.broadcast %1952 : f32 to vector<2x288xf32>
    %1954 = arith.mulf %1953, %1951 : vector<2x288xf32>
    %1955 = arith.addf %1949, %1954 : vector<2x288xf32>
    %c1_417 = arith.constant 1 : index
    %c0_418 = arith.constant 0 : index
    %c0_419 = arith.constant 0 : index
    %1956 = vector.load %arg7[%c1_417, %c0_418, %c0_419] : memref<8x2x384xf32, #tpu.memory_space<vmem>>, vector<1x2x288xf32>
    %1957 = vector.shape_cast %1956 : vector<1x2x288xf32> to vector<2x288xf32>
    %c333 = arith.constant 333 : index
    %1958 = memref.load %arg0[%c333] : memref<396xf32, #tpu.memory_space<smem>>
    %1959 = vector.broadcast %1958 : f32 to vector<2x288xf32>
    %1960 = arith.mulf %1959, %1957 : vector<2x288xf32>
    %1961 = arith.addf %1955, %1960 : vector<2x288xf32>
    %c1_420 = arith.constant 1 : index
    %c0_421 = arith.constant 0 : index
    %c1_422 = arith.constant 1 : index
    %1962 = vector.load %arg7[%c1_420, %c0_421, %c1_422] : memref<8x2x384xf32, #tpu.memory_space<vmem>>, vector<1x2x288xf32>
    %1963 = vector.shape_cast %1962 : vector<1x2x288xf32> to vector<2x288xf32>
    %c334 = arith.constant 334 : index
    %1964 = memref.load %arg0[%c334] : memref<396xf32, #tpu.memory_space<smem>>
    %1965 = vector.broadcast %1964 : f32 to vector<2x288xf32>
    %1966 = arith.mulf %1965, %1963 : vector<2x288xf32>
    %1967 = arith.addf %1961, %1966 : vector<2x288xf32>
    %c1_423 = arith.constant 1 : index
    %c0_424 = arith.constant 0 : index
    %c2_425 = arith.constant 2 : index
    %1968 = vector.load %arg7[%c1_423, %c0_424, %c2_425] : memref<8x2x384xf32, #tpu.memory_space<vmem>>, vector<1x2x288xf32>
    %1969 = vector.shape_cast %1968 : vector<1x2x288xf32> to vector<2x288xf32>
    %c335 = arith.constant 335 : index
    %1970 = memref.load %arg0[%c335] : memref<396xf32, #tpu.memory_space<smem>>
    %1971 = vector.broadcast %1970 : f32 to vector<2x288xf32>
    %1972 = arith.mulf %1971, %1969 : vector<2x288xf32>
    %1973 = arith.addf %1967, %1972 : vector<2x288xf32>
    %c1_426 = arith.constant 1 : index
    %c0_427 = arith.constant 0 : index
    %c18_428 = arith.constant 18 : index
    %1974 = vector.load %arg7[%c1_426, %c0_427, %c18_428] : memref<8x2x384xf32, #tpu.memory_space<vmem>>, vector<1x2x288xf32>
    %1975 = vector.shape_cast %1974 : vector<1x2x288xf32> to vector<2x288xf32>
    %c336 = arith.constant 336 : index
    %1976 = memref.load %arg0[%c336] : memref<396xf32, #tpu.memory_space<smem>>
    %1977 = vector.broadcast %1976 : f32 to vector<2x288xf32>
    %1978 = arith.mulf %1977, %1975 : vector<2x288xf32>
    %1979 = arith.addf %1973, %1978 : vector<2x288xf32>
    %c1_429 = arith.constant 1 : index
    %c0_430 = arith.constant 0 : index
    %c19_431 = arith.constant 19 : index
    %1980 = vector.load %arg7[%c1_429, %c0_430, %c19_431] : memref<8x2x384xf32, #tpu.memory_space<vmem>>, vector<1x2x288xf32>
    %1981 = vector.shape_cast %1980 : vector<1x2x288xf32> to vector<2x288xf32>
    %c337 = arith.constant 337 : index
    %1982 = memref.load %arg0[%c337] : memref<396xf32, #tpu.memory_space<smem>>
    %1983 = vector.broadcast %1982 : f32 to vector<2x288xf32>
    %1984 = arith.mulf %1983, %1981 : vector<2x288xf32>
    %1985 = arith.addf %1979, %1984 : vector<2x288xf32>
    %c1_432 = arith.constant 1 : index
    %c0_433 = arith.constant 0 : index
    %c20_434 = arith.constant 20 : index
    %1986 = vector.load %arg7[%c1_432, %c0_433, %c20_434] : memref<8x2x384xf32, #tpu.memory_space<vmem>>, vector<1x2x288xf32>
    %1987 = vector.shape_cast %1986 : vector<1x2x288xf32> to vector<2x288xf32>
    %c338 = arith.constant 338 : index
    %1988 = memref.load %arg0[%c338] : memref<396xf32, #tpu.memory_space<smem>>
    %1989 = vector.broadcast %1988 : f32 to vector<2x288xf32>
    %1990 = arith.mulf %1989, %1987 : vector<2x288xf32>
    %1991 = arith.addf %1985, %1990 : vector<2x288xf32>
    %c1_435 = arith.constant 1 : index
    %c0_436 = arith.constant 0 : index
    %c36_437 = arith.constant 36 : index
    %1992 = vector.load %arg7[%c1_435, %c0_436, %c36_437] : memref<8x2x384xf32, #tpu.memory_space<vmem>>, vector<1x2x288xf32>
    %1993 = vector.shape_cast %1992 : vector<1x2x288xf32> to vector<2x288xf32>
    %c339 = arith.constant 339 : index
    %1994 = memref.load %arg0[%c339] : memref<396xf32, #tpu.memory_space<smem>>
    %1995 = vector.broadcast %1994 : f32 to vector<2x288xf32>
    %1996 = arith.mulf %1995, %1993 : vector<2x288xf32>
    %1997 = arith.addf %1991, %1996 : vector<2x288xf32>
    %c1_438 = arith.constant 1 : index
    %c0_439 = arith.constant 0 : index
    %c37_440 = arith.constant 37 : index
    %1998 = vector.load %arg7[%c1_438, %c0_439, %c37_440] : memref<8x2x384xf32, #tpu.memory_space<vmem>>, vector<1x2x288xf32>
    %1999 = vector.shape_cast %1998 : vector<1x2x288xf32> to vector<2x288xf32>
    %c340 = arith.constant 340 : index
    %2000 = memref.load %arg0[%c340] : memref<396xf32, #tpu.memory_space<smem>>
    %2001 = vector.broadcast %2000 : f32 to vector<2x288xf32>
    %2002 = arith.mulf %2001, %1999 : vector<2x288xf32>
    %2003 = arith.addf %1997, %2002 : vector<2x288xf32>
    %c1_441 = arith.constant 1 : index
    %c0_442 = arith.constant 0 : index
    %c38_443 = arith.constant 38 : index
    %2004 = vector.load %arg7[%c1_441, %c0_442, %c38_443] : memref<8x2x384xf32, #tpu.memory_space<vmem>>, vector<1x2x288xf32>
    %2005 = vector.shape_cast %2004 : vector<1x2x288xf32> to vector<2x288xf32>
    %c341 = arith.constant 341 : index
    %2006 = memref.load %arg0[%c341] : memref<396xf32, #tpu.memory_space<smem>>
    %2007 = vector.broadcast %2006 : f32 to vector<2x288xf32>
    %2008 = arith.mulf %2007, %2005 : vector<2x288xf32>
    %2009 = arith.addf %2003, %2008 : vector<2x288xf32>
    %c2_444 = arith.constant 2 : index
    %c0_445 = arith.constant 0 : index
    %c0_446 = arith.constant 0 : index
    %2010 = vector.load %arg7[%c2_444, %c0_445, %c0_446] : memref<8x2x384xf32, #tpu.memory_space<vmem>>, vector<1x2x288xf32>
    %2011 = vector.shape_cast %2010 : vector<1x2x288xf32> to vector<2x288xf32>
    %c342 = arith.constant 342 : index
    %2012 = memref.load %arg0[%c342] : memref<396xf32, #tpu.memory_space<smem>>
    %2013 = vector.broadcast %2012 : f32 to vector<2x288xf32>
    %2014 = arith.mulf %2013, %2011 : vector<2x288xf32>
    %2015 = arith.addf %2009, %2014 : vector<2x288xf32>
    %c2_447 = arith.constant 2 : index
    %c0_448 = arith.constant 0 : index
    %c1_449 = arith.constant 1 : index
    %2016 = vector.load %arg7[%c2_447, %c0_448, %c1_449] : memref<8x2x384xf32, #tpu.memory_space<vmem>>, vector<1x2x288xf32>
    %2017 = vector.shape_cast %2016 : vector<1x2x288xf32> to vector<2x288xf32>
    %c343 = arith.constant 343 : index
    %2018 = memref.load %arg0[%c343] : memref<396xf32, #tpu.memory_space<smem>>
    %2019 = vector.broadcast %2018 : f32 to vector<2x288xf32>
    %2020 = arith.mulf %2019, %2017 : vector<2x288xf32>
    %2021 = arith.addf %2015, %2020 : vector<2x288xf32>
    %c2_450 = arith.constant 2 : index
    %c0_451 = arith.constant 0 : index
    %c2_452 = arith.constant 2 : index
    %2022 = vector.load %arg7[%c2_450, %c0_451, %c2_452] : memref<8x2x384xf32, #tpu.memory_space<vmem>>, vector<1x2x288xf32>
    %2023 = vector.shape_cast %2022 : vector<1x2x288xf32> to vector<2x288xf32>
    %c344 = arith.constant 344 : index
    %2024 = memref.load %arg0[%c344] : memref<396xf32, #tpu.memory_space<smem>>
    %2025 = vector.broadcast %2024 : f32 to vector<2x288xf32>
    %2026 = arith.mulf %2025, %2023 : vector<2x288xf32>
    %2027 = arith.addf %2021, %2026 : vector<2x288xf32>
    %c2_453 = arith.constant 2 : index
    %c0_454 = arith.constant 0 : index
    %c18_455 = arith.constant 18 : index
    %2028 = vector.load %arg7[%c2_453, %c0_454, %c18_455] : memref<8x2x384xf32, #tpu.memory_space<vmem>>, vector<1x2x288xf32>
    %2029 = vector.shape_cast %2028 : vector<1x2x288xf32> to vector<2x288xf32>
    %c345 = arith.constant 345 : index
    %2030 = memref.load %arg0[%c345] : memref<396xf32, #tpu.memory_space<smem>>
    %2031 = vector.broadcast %2030 : f32 to vector<2x288xf32>
    %2032 = arith.mulf %2031, %2029 : vector<2x288xf32>
    %2033 = arith.addf %2027, %2032 : vector<2x288xf32>
    %c2_456 = arith.constant 2 : index
    %c0_457 = arith.constant 0 : index
    %c19_458 = arith.constant 19 : index
    %2034 = vector.load %arg7[%c2_456, %c0_457, %c19_458] : memref<8x2x384xf32, #tpu.memory_space<vmem>>, vector<1x2x288xf32>
    %2035 = vector.shape_cast %2034 : vector<1x2x288xf32> to vector<2x288xf32>
    %c346 = arith.constant 346 : index
    %2036 = memref.load %arg0[%c346] : memref<396xf32, #tpu.memory_space<smem>>
    %2037 = vector.broadcast %2036 : f32 to vector<2x288xf32>
    %2038 = arith.mulf %2037, %2035 : vector<2x288xf32>
    %2039 = arith.addf %2033, %2038 : vector<2x288xf32>
    %c2_459 = arith.constant 2 : index
    %c0_460 = arith.constant 0 : index
    %c20_461 = arith.constant 20 : index
    %2040 = vector.load %arg7[%c2_459, %c0_460, %c20_461] : memref<8x2x384xf32, #tpu.memory_space<vmem>>, vector<1x2x288xf32>
    %2041 = vector.shape_cast %2040 : vector<1x2x288xf32> to vector<2x288xf32>
    %c347 = arith.constant 347 : index
    %2042 = memref.load %arg0[%c347] : memref<396xf32, #tpu.memory_space<smem>>
    %2043 = vector.broadcast %2042 : f32 to vector<2x288xf32>
    %2044 = arith.mulf %2043, %2041 : vector<2x288xf32>
    %2045 = arith.addf %2039, %2044 : vector<2x288xf32>
    %c2_462 = arith.constant 2 : index
    %c0_463 = arith.constant 0 : index
    %c36_464 = arith.constant 36 : index
    %2046 = vector.load %arg7[%c2_462, %c0_463, %c36_464] : memref<8x2x384xf32, #tpu.memory_space<vmem>>, vector<1x2x288xf32>
    %2047 = vector.shape_cast %2046 : vector<1x2x288xf32> to vector<2x288xf32>
    %c348 = arith.constant 348 : index
    %2048 = memref.load %arg0[%c348] : memref<396xf32, #tpu.memory_space<smem>>
    %2049 = vector.broadcast %2048 : f32 to vector<2x288xf32>
    %2050 = arith.mulf %2049, %2047 : vector<2x288xf32>
    %2051 = arith.addf %2045, %2050 : vector<2x288xf32>
    %c2_465 = arith.constant 2 : index
    %c0_466 = arith.constant 0 : index
    %c37_467 = arith.constant 37 : index
    %2052 = vector.load %arg7[%c2_465, %c0_466, %c37_467] : memref<8x2x384xf32, #tpu.memory_space<vmem>>, vector<1x2x288xf32>
    %2053 = vector.shape_cast %2052 : vector<1x2x288xf32> to vector<2x288xf32>
    %c349 = arith.constant 349 : index
    %2054 = memref.load %arg0[%c349] : memref<396xf32, #tpu.memory_space<smem>>
    %2055 = vector.broadcast %2054 : f32 to vector<2x288xf32>
    %2056 = arith.mulf %2055, %2053 : vector<2x288xf32>
    %2057 = arith.addf %2051, %2056 : vector<2x288xf32>
    %c2_468 = arith.constant 2 : index
    %c0_469 = arith.constant 0 : index
    %c38_470 = arith.constant 38 : index
    %2058 = vector.load %arg7[%c2_468, %c0_469, %c38_470] : memref<8x2x384xf32, #tpu.memory_space<vmem>>, vector<1x2x288xf32>
    %2059 = vector.shape_cast %2058 : vector<1x2x288xf32> to vector<2x288xf32>
    %c350 = arith.constant 350 : index
    %2060 = memref.load %arg0[%c350] : memref<396xf32, #tpu.memory_space<smem>>
    %2061 = vector.broadcast %2060 : f32 to vector<2x288xf32>
    %2062 = arith.mulf %2061, %2059 : vector<2x288xf32>
    %2063 = arith.addf %2057, %2062 : vector<2x288xf32>
    %c3_471 = arith.constant 3 : index
    %c0_472 = arith.constant 0 : index
    %c0_473 = arith.constant 0 : index
    %2064 = vector.load %arg7[%c3_471, %c0_472, %c0_473] : memref<8x2x384xf32, #tpu.memory_space<vmem>>, vector<1x2x288xf32>
    %2065 = vector.shape_cast %2064 : vector<1x2x288xf32> to vector<2x288xf32>
    %c351 = arith.constant 351 : index
    %2066 = memref.load %arg0[%c351] : memref<396xf32, #tpu.memory_space<smem>>
    %2067 = vector.broadcast %2066 : f32 to vector<2x288xf32>
    %2068 = arith.mulf %2067, %2065 : vector<2x288xf32>
    %2069 = arith.addf %2063, %2068 : vector<2x288xf32>
    %c3_474 = arith.constant 3 : index
    %c0_475 = arith.constant 0 : index
    %c1_476 = arith.constant 1 : index
    %2070 = vector.load %arg7[%c3_474, %c0_475, %c1_476] : memref<8x2x384xf32, #tpu.memory_space<vmem>>, vector<1x2x288xf32>
    %2071 = vector.shape_cast %2070 : vector<1x2x288xf32> to vector<2x288xf32>
    %c352 = arith.constant 352 : index
    %2072 = memref.load %arg0[%c352] : memref<396xf32, #tpu.memory_space<smem>>
    %2073 = vector.broadcast %2072 : f32 to vector<2x288xf32>
    %2074 = arith.mulf %2073, %2071 : vector<2x288xf32>
    %2075 = arith.addf %2069, %2074 : vector<2x288xf32>
    %c3_477 = arith.constant 3 : index
    %c0_478 = arith.constant 0 : index
    %c2_479 = arith.constant 2 : index
    %2076 = vector.load %arg7[%c3_477, %c0_478, %c2_479] : memref<8x2x384xf32, #tpu.memory_space<vmem>>, vector<1x2x288xf32>
    %2077 = vector.shape_cast %2076 : vector<1x2x288xf32> to vector<2x288xf32>
    %c353 = arith.constant 353 : index
    %2078 = memref.load %arg0[%c353] : memref<396xf32, #tpu.memory_space<smem>>
    %2079 = vector.broadcast %2078 : f32 to vector<2x288xf32>
    %2080 = arith.mulf %2079, %2077 : vector<2x288xf32>
    %2081 = arith.addf %2075, %2080 : vector<2x288xf32>
    %c3_480 = arith.constant 3 : index
    %c0_481 = arith.constant 0 : index
    %c18_482 = arith.constant 18 : index
    %2082 = vector.load %arg7[%c3_480, %c0_481, %c18_482] : memref<8x2x384xf32, #tpu.memory_space<vmem>>, vector<1x2x288xf32>
    %2083 = vector.shape_cast %2082 : vector<1x2x288xf32> to vector<2x288xf32>
    %c354 = arith.constant 354 : index
    %2084 = memref.load %arg0[%c354] : memref<396xf32, #tpu.memory_space<smem>>
    %2085 = vector.broadcast %2084 : f32 to vector<2x288xf32>
    %2086 = arith.mulf %2085, %2083 : vector<2x288xf32>
    %2087 = arith.addf %2081, %2086 : vector<2x288xf32>
    %c3_483 = arith.constant 3 : index
    %c0_484 = arith.constant 0 : index
    %c19_485 = arith.constant 19 : index
    %2088 = vector.load %arg7[%c3_483, %c0_484, %c19_485] : memref<8x2x384xf32, #tpu.memory_space<vmem>>, vector<1x2x288xf32>
    %2089 = vector.shape_cast %2088 : vector<1x2x288xf32> to vector<2x288xf32>
    %c355 = arith.constant 355 : index
    %2090 = memref.load %arg0[%c355] : memref<396xf32, #tpu.memory_space<smem>>
    %2091 = vector.broadcast %2090 : f32 to vector<2x288xf32>
    %2092 = arith.mulf %2091, %2089 : vector<2x288xf32>
    %2093 = arith.addf %2087, %2092 : vector<2x288xf32>
    %c3_486 = arith.constant 3 : index
    %c0_487 = arith.constant 0 : index
    %c20_488 = arith.constant 20 : index
    %2094 = vector.load %arg7[%c3_486, %c0_487, %c20_488] : memref<8x2x384xf32, #tpu.memory_space<vmem>>, vector<1x2x288xf32>
    %2095 = vector.shape_cast %2094 : vector<1x2x288xf32> to vector<2x288xf32>
    %c356 = arith.constant 356 : index
    %2096 = memref.load %arg0[%c356] : memref<396xf32, #tpu.memory_space<smem>>
    %2097 = vector.broadcast %2096 : f32 to vector<2x288xf32>
    %2098 = arith.mulf %2097, %2095 : vector<2x288xf32>
    %2099 = arith.addf %2093, %2098 : vector<2x288xf32>
    %c3_489 = arith.constant 3 : index
    %c0_490 = arith.constant 0 : index
    %c36_491 = arith.constant 36 : index
    %2100 = vector.load %arg7[%c3_489, %c0_490, %c36_491] : memref<8x2x384xf32, #tpu.memory_space<vmem>>, vector<1x2x288xf32>
    %2101 = vector.shape_cast %2100 : vector<1x2x288xf32> to vector<2x288xf32>
    %c357 = arith.constant 357 : index
    %2102 = memref.load %arg0[%c357] : memref<396xf32, #tpu.memory_space<smem>>
    %2103 = vector.broadcast %2102 : f32 to vector<2x288xf32>
    %2104 = arith.mulf %2103, %2101 : vector<2x288xf32>
    %2105 = arith.addf %2099, %2104 : vector<2x288xf32>
    %c3_492 = arith.constant 3 : index
    %c0_493 = arith.constant 0 : index
    %c37_494 = arith.constant 37 : index
    %2106 = vector.load %arg7[%c3_492, %c0_493, %c37_494] : memref<8x2x384xf32, #tpu.memory_space<vmem>>, vector<1x2x288xf32>
    %2107 = vector.shape_cast %2106 : vector<1x2x288xf32> to vector<2x288xf32>
    %c358 = arith.constant 358 : index
    %2108 = memref.load %arg0[%c358] : memref<396xf32, #tpu.memory_space<smem>>
    %2109 = vector.broadcast %2108 : f32 to vector<2x288xf32>
    %2110 = arith.mulf %2109, %2107 : vector<2x288xf32>
    %2111 = arith.addf %2105, %2110 : vector<2x288xf32>
    %c3_495 = arith.constant 3 : index
    %c0_496 = arith.constant 0 : index
    %c38_497 = arith.constant 38 : index
    %2112 = vector.load %arg7[%c3_495, %c0_496, %c38_497] : memref<8x2x384xf32, #tpu.memory_space<vmem>>, vector<1x2x288xf32>
    %2113 = vector.shape_cast %2112 : vector<1x2x288xf32> to vector<2x288xf32>
    %c359 = arith.constant 359 : index
    %2114 = memref.load %arg0[%c359] : memref<396xf32, #tpu.memory_space<smem>>
    %2115 = vector.broadcast %2114 : f32 to vector<2x288xf32>
    %2116 = arith.mulf %2115, %2113 : vector<2x288xf32>
    %2117 = arith.addf %2111, %2116 : vector<2x288xf32>
    %c4_498 = arith.constant 4 : index
    %c0_499 = arith.constant 0 : index
    %c0_500 = arith.constant 0 : index
    %2118 = vector.load %arg7[%c4_498, %c0_499, %c0_500] : memref<8x2x384xf32, #tpu.memory_space<vmem>>, vector<1x2x288xf32>
    %2119 = vector.shape_cast %2118 : vector<1x2x288xf32> to vector<2x288xf32>
    %c360 = arith.constant 360 : index
    %2120 = memref.load %arg0[%c360] : memref<396xf32, #tpu.memory_space<smem>>
    %2121 = vector.broadcast %2120 : f32 to vector<2x288xf32>
    %2122 = arith.mulf %2121, %2119 : vector<2x288xf32>
    %2123 = arith.addf %2117, %2122 : vector<2x288xf32>
    %c4_501 = arith.constant 4 : index
    %c0_502 = arith.constant 0 : index
    %c1_503 = arith.constant 1 : index
    %2124 = vector.load %arg7[%c4_501, %c0_502, %c1_503] : memref<8x2x384xf32, #tpu.memory_space<vmem>>, vector<1x2x288xf32>
    %2125 = vector.shape_cast %2124 : vector<1x2x288xf32> to vector<2x288xf32>
    %c361 = arith.constant 361 : index
    %2126 = memref.load %arg0[%c361] : memref<396xf32, #tpu.memory_space<smem>>
    %2127 = vector.broadcast %2126 : f32 to vector<2x288xf32>
    %2128 = arith.mulf %2127, %2125 : vector<2x288xf32>
    %2129 = arith.addf %2123, %2128 : vector<2x288xf32>
    %c4_504 = arith.constant 4 : index
    %c0_505 = arith.constant 0 : index
    %c2_506 = arith.constant 2 : index
    %2130 = vector.load %arg7[%c4_504, %c0_505, %c2_506] : memref<8x2x384xf32, #tpu.memory_space<vmem>>, vector<1x2x288xf32>
    %2131 = vector.shape_cast %2130 : vector<1x2x288xf32> to vector<2x288xf32>
    %c362 = arith.constant 362 : index
    %2132 = memref.load %arg0[%c362] : memref<396xf32, #tpu.memory_space<smem>>
    %2133 = vector.broadcast %2132 : f32 to vector<2x288xf32>
    %2134 = arith.mulf %2133, %2131 : vector<2x288xf32>
    %2135 = arith.addf %2129, %2134 : vector<2x288xf32>
    %c4_507 = arith.constant 4 : index
    %c0_508 = arith.constant 0 : index
    %c18_509 = arith.constant 18 : index
    %2136 = vector.load %arg7[%c4_507, %c0_508, %c18_509] : memref<8x2x384xf32, #tpu.memory_space<vmem>>, vector<1x2x288xf32>
    %2137 = vector.shape_cast %2136 : vector<1x2x288xf32> to vector<2x288xf32>
    %c363 = arith.constant 363 : index
    %2138 = memref.load %arg0[%c363] : memref<396xf32, #tpu.memory_space<smem>>
    %2139 = vector.broadcast %2138 : f32 to vector<2x288xf32>
    %2140 = arith.mulf %2139, %2137 : vector<2x288xf32>
    %2141 = arith.addf %2135, %2140 : vector<2x288xf32>
    %c4_510 = arith.constant 4 : index
    %c0_511 = arith.constant 0 : index
    %c19_512 = arith.constant 19 : index
    %2142 = vector.load %arg7[%c4_510, %c0_511, %c19_512] : memref<8x2x384xf32, #tpu.memory_space<vmem>>, vector<1x2x288xf32>
    %2143 = vector.shape_cast %2142 : vector<1x2x288xf32> to vector<2x288xf32>
    %c364 = arith.constant 364 : index
    %2144 = memref.load %arg0[%c364] : memref<396xf32, #tpu.memory_space<smem>>
    %2145 = vector.broadcast %2144 : f32 to vector<2x288xf32>
    %2146 = arith.mulf %2145, %2143 : vector<2x288xf32>
    %2147 = arith.addf %2141, %2146 : vector<2x288xf32>
    %c4_513 = arith.constant 4 : index
    %c0_514 = arith.constant 0 : index
    %c20_515 = arith.constant 20 : index
    %2148 = vector.load %arg7[%c4_513, %c0_514, %c20_515] : memref<8x2x384xf32, #tpu.memory_space<vmem>>, vector<1x2x288xf32>
    %2149 = vector.shape_cast %2148 : vector<1x2x288xf32> to vector<2x288xf32>
    %c365 = arith.constant 365 : index
    %2150 = memref.load %arg0[%c365] : memref<396xf32, #tpu.memory_space<smem>>
    %2151 = vector.broadcast %2150 : f32 to vector<2x288xf32>
    %2152 = arith.mulf %2151, %2149 : vector<2x288xf32>
    %2153 = arith.addf %2147, %2152 : vector<2x288xf32>
    %c4_516 = arith.constant 4 : index
    %c0_517 = arith.constant 0 : index
    %c36_518 = arith.constant 36 : index
    %2154 = vector.load %arg7[%c4_516, %c0_517, %c36_518] : memref<8x2x384xf32, #tpu.memory_space<vmem>>, vector<1x2x288xf32>
    %2155 = vector.shape_cast %2154 : vector<1x2x288xf32> to vector<2x288xf32>
    %c366 = arith.constant 366 : index
    %2156 = memref.load %arg0[%c366] : memref<396xf32, #tpu.memory_space<smem>>
    %2157 = vector.broadcast %2156 : f32 to vector<2x288xf32>
    %2158 = arith.mulf %2157, %2155 : vector<2x288xf32>
    %2159 = arith.addf %2153, %2158 : vector<2x288xf32>
    %c4_519 = arith.constant 4 : index
    %c0_520 = arith.constant 0 : index
    %c37_521 = arith.constant 37 : index
    %2160 = vector.load %arg7[%c4_519, %c0_520, %c37_521] : memref<8x2x384xf32, #tpu.memory_space<vmem>>, vector<1x2x288xf32>
    %2161 = vector.shape_cast %2160 : vector<1x2x288xf32> to vector<2x288xf32>
    %c367 = arith.constant 367 : index
    %2162 = memref.load %arg0[%c367] : memref<396xf32, #tpu.memory_space<smem>>
    %2163 = vector.broadcast %2162 : f32 to vector<2x288xf32>
    %2164 = arith.mulf %2163, %2161 : vector<2x288xf32>
    %2165 = arith.addf %2159, %2164 : vector<2x288xf32>
    %c4_522 = arith.constant 4 : index
    %c0_523 = arith.constant 0 : index
    %c38_524 = arith.constant 38 : index
    %2166 = vector.load %arg7[%c4_522, %c0_523, %c38_524] : memref<8x2x384xf32, #tpu.memory_space<vmem>>, vector<1x2x288xf32>
    %2167 = vector.shape_cast %2166 : vector<1x2x288xf32> to vector<2x288xf32>
    %c368 = arith.constant 368 : index
    %2168 = memref.load %arg0[%c368] : memref<396xf32, #tpu.memory_space<smem>>
    %2169 = vector.broadcast %2168 : f32 to vector<2x288xf32>
    %2170 = arith.mulf %2169, %2167 : vector<2x288xf32>
    %2171 = arith.addf %2165, %2170 : vector<2x288xf32>
    %c5_525 = arith.constant 5 : index
    %c0_526 = arith.constant 0 : index
    %c0_527 = arith.constant 0 : index
    %2172 = vector.load %arg7[%c5_525, %c0_526, %c0_527] : memref<8x2x384xf32, #tpu.memory_space<vmem>>, vector<1x2x288xf32>
    %2173 = vector.shape_cast %2172 : vector<1x2x288xf32> to vector<2x288xf32>
    %c369 = arith.constant 369 : index
    %2174 = memref.load %arg0[%c369] : memref<396xf32, #tpu.memory_space<smem>>
    %2175 = vector.broadcast %2174 : f32 to vector<2x288xf32>
    %2176 = arith.mulf %2175, %2173 : vector<2x288xf32>
    %2177 = arith.addf %2171, %2176 : vector<2x288xf32>
    %c5_528 = arith.constant 5 : index
    %c0_529 = arith.constant 0 : index
    %c1_530 = arith.constant 1 : index
    %2178 = vector.load %arg7[%c5_528, %c0_529, %c1_530] : memref<8x2x384xf32, #tpu.memory_space<vmem>>, vector<1x2x288xf32>
    %2179 = vector.shape_cast %2178 : vector<1x2x288xf32> to vector<2x288xf32>
    %c370 = arith.constant 370 : index
    %2180 = memref.load %arg0[%c370] : memref<396xf32, #tpu.memory_space<smem>>
    %2181 = vector.broadcast %2180 : f32 to vector<2x288xf32>
    %2182 = arith.mulf %2181, %2179 : vector<2x288xf32>
    %2183 = arith.addf %2177, %2182 : vector<2x288xf32>
    %c5_531 = arith.constant 5 : index
    %c0_532 = arith.constant 0 : index
    %c2_533 = arith.constant 2 : index
    %2184 = vector.load %arg7[%c5_531, %c0_532, %c2_533] : memref<8x2x384xf32, #tpu.memory_space<vmem>>, vector<1x2x288xf32>
    %2185 = vector.shape_cast %2184 : vector<1x2x288xf32> to vector<2x288xf32>
    %c371 = arith.constant 371 : index
    %2186 = memref.load %arg0[%c371] : memref<396xf32, #tpu.memory_space<smem>>
    %2187 = vector.broadcast %2186 : f32 to vector<2x288xf32>
    %2188 = arith.mulf %2187, %2185 : vector<2x288xf32>
    %2189 = arith.addf %2183, %2188 : vector<2x288xf32>
    %c5_534 = arith.constant 5 : index
    %c0_535 = arith.constant 0 : index
    %c18_536 = arith.constant 18 : index
    %2190 = vector.load %arg7[%c5_534, %c0_535, %c18_536] : memref<8x2x384xf32, #tpu.memory_space<vmem>>, vector<1x2x288xf32>
    %2191 = vector.shape_cast %2190 : vector<1x2x288xf32> to vector<2x288xf32>
    %c372 = arith.constant 372 : index
    %2192 = memref.load %arg0[%c372] : memref<396xf32, #tpu.memory_space<smem>>
    %2193 = vector.broadcast %2192 : f32 to vector<2x288xf32>
    %2194 = arith.mulf %2193, %2191 : vector<2x288xf32>
    %2195 = arith.addf %2189, %2194 : vector<2x288xf32>
    %c5_537 = arith.constant 5 : index
    %c0_538 = arith.constant 0 : index
    %c19_539 = arith.constant 19 : index
    %2196 = vector.load %arg7[%c5_537, %c0_538, %c19_539] : memref<8x2x384xf32, #tpu.memory_space<vmem>>, vector<1x2x288xf32>
    %2197 = vector.shape_cast %2196 : vector<1x2x288xf32> to vector<2x288xf32>
    %c373 = arith.constant 373 : index
    %2198 = memref.load %arg0[%c373] : memref<396xf32, #tpu.memory_space<smem>>
    %2199 = vector.broadcast %2198 : f32 to vector<2x288xf32>
    %2200 = arith.mulf %2199, %2197 : vector<2x288xf32>
    %2201 = arith.addf %2195, %2200 : vector<2x288xf32>
    %c5_540 = arith.constant 5 : index
    %c0_541 = arith.constant 0 : index
    %c20_542 = arith.constant 20 : index
    %2202 = vector.load %arg7[%c5_540, %c0_541, %c20_542] : memref<8x2x384xf32, #tpu.memory_space<vmem>>, vector<1x2x288xf32>
    %2203 = vector.shape_cast %2202 : vector<1x2x288xf32> to vector<2x288xf32>
    %c374 = arith.constant 374 : index
    %2204 = memref.load %arg0[%c374] : memref<396xf32, #tpu.memory_space<smem>>
    %2205 = vector.broadcast %2204 : f32 to vector<2x288xf32>
    %2206 = arith.mulf %2205, %2203 : vector<2x288xf32>
    %2207 = arith.addf %2201, %2206 : vector<2x288xf32>
    %c5_543 = arith.constant 5 : index
    %c0_544 = arith.constant 0 : index
    %c36_545 = arith.constant 36 : index
    %2208 = vector.load %arg7[%c5_543, %c0_544, %c36_545] : memref<8x2x384xf32, #tpu.memory_space<vmem>>, vector<1x2x288xf32>
    %2209 = vector.shape_cast %2208 : vector<1x2x288xf32> to vector<2x288xf32>
    %c375 = arith.constant 375 : index
    %2210 = memref.load %arg0[%c375] : memref<396xf32, #tpu.memory_space<smem>>
    %2211 = vector.broadcast %2210 : f32 to vector<2x288xf32>
    %2212 = arith.mulf %2211, %2209 : vector<2x288xf32>
    %2213 = arith.addf %2207, %2212 : vector<2x288xf32>
    %c5_546 = arith.constant 5 : index
    %c0_547 = arith.constant 0 : index
    %c37_548 = arith.constant 37 : index
    %2214 = vector.load %arg7[%c5_546, %c0_547, %c37_548] : memref<8x2x384xf32, #tpu.memory_space<vmem>>, vector<1x2x288xf32>
    %2215 = vector.shape_cast %2214 : vector<1x2x288xf32> to vector<2x288xf32>
    %c376 = arith.constant 376 : index
    %2216 = memref.load %arg0[%c376] : memref<396xf32, #tpu.memory_space<smem>>
    %2217 = vector.broadcast %2216 : f32 to vector<2x288xf32>
    %2218 = arith.mulf %2217, %2215 : vector<2x288xf32>
    %2219 = arith.addf %2213, %2218 : vector<2x288xf32>
    %c5_549 = arith.constant 5 : index
    %c0_550 = arith.constant 0 : index
    %c38_551 = arith.constant 38 : index
    %2220 = vector.load %arg7[%c5_549, %c0_550, %c38_551] : memref<8x2x384xf32, #tpu.memory_space<vmem>>, vector<1x2x288xf32>
    %2221 = vector.shape_cast %2220 : vector<1x2x288xf32> to vector<2x288xf32>
    %c377 = arith.constant 377 : index
    %2222 = memref.load %arg0[%c377] : memref<396xf32, #tpu.memory_space<smem>>
    %2223 = vector.broadcast %2222 : f32 to vector<2x288xf32>
    %2224 = arith.mulf %2223, %2221 : vector<2x288xf32>
    %2225 = arith.addf %2219, %2224 : vector<2x288xf32>
    %c6_552 = arith.constant 6 : index
    %c0_553 = arith.constant 0 : index
    %c0_554 = arith.constant 0 : index
    %2226 = vector.load %arg7[%c6_552, %c0_553, %c0_554] : memref<8x2x384xf32, #tpu.memory_space<vmem>>, vector<1x2x288xf32>
    %2227 = vector.shape_cast %2226 : vector<1x2x288xf32> to vector<2x288xf32>
    %c378 = arith.constant 378 : index
    %2228 = memref.load %arg0[%c378] : memref<396xf32, #tpu.memory_space<smem>>
    %2229 = vector.broadcast %2228 : f32 to vector<2x288xf32>
    %2230 = arith.mulf %2229, %2227 : vector<2x288xf32>
    %2231 = arith.addf %2225, %2230 : vector<2x288xf32>
    %c6_555 = arith.constant 6 : index
    %c0_556 = arith.constant 0 : index
    %c1_557 = arith.constant 1 : index
    %2232 = vector.load %arg7[%c6_555, %c0_556, %c1_557] : memref<8x2x384xf32, #tpu.memory_space<vmem>>, vector<1x2x288xf32>
    %2233 = vector.shape_cast %2232 : vector<1x2x288xf32> to vector<2x288xf32>
    %c379 = arith.constant 379 : index
    %2234 = memref.load %arg0[%c379] : memref<396xf32, #tpu.memory_space<smem>>
    %2235 = vector.broadcast %2234 : f32 to vector<2x288xf32>
    %2236 = arith.mulf %2235, %2233 : vector<2x288xf32>
    %2237 = arith.addf %2231, %2236 : vector<2x288xf32>
    %c6_558 = arith.constant 6 : index
    %c0_559 = arith.constant 0 : index
    %c2_560 = arith.constant 2 : index
    %2238 = vector.load %arg7[%c6_558, %c0_559, %c2_560] : memref<8x2x384xf32, #tpu.memory_space<vmem>>, vector<1x2x288xf32>
    %2239 = vector.shape_cast %2238 : vector<1x2x288xf32> to vector<2x288xf32>
    %c380 = arith.constant 380 : index
    %2240 = memref.load %arg0[%c380] : memref<396xf32, #tpu.memory_space<smem>>
    %2241 = vector.broadcast %2240 : f32 to vector<2x288xf32>
    %2242 = arith.mulf %2241, %2239 : vector<2x288xf32>
    %2243 = arith.addf %2237, %2242 : vector<2x288xf32>
    %c6_561 = arith.constant 6 : index
    %c0_562 = arith.constant 0 : index
    %c18_563 = arith.constant 18 : index
    %2244 = vector.load %arg7[%c6_561, %c0_562, %c18_563] : memref<8x2x384xf32, #tpu.memory_space<vmem>>, vector<1x2x288xf32>
    %2245 = vector.shape_cast %2244 : vector<1x2x288xf32> to vector<2x288xf32>
    %c381 = arith.constant 381 : index
    %2246 = memref.load %arg0[%c381] : memref<396xf32, #tpu.memory_space<smem>>
    %2247 = vector.broadcast %2246 : f32 to vector<2x288xf32>
    %2248 = arith.mulf %2247, %2245 : vector<2x288xf32>
    %2249 = arith.addf %2243, %2248 : vector<2x288xf32>
    %c6_564 = arith.constant 6 : index
    %c0_565 = arith.constant 0 : index
    %c19_566 = arith.constant 19 : index
    %2250 = vector.load %arg7[%c6_564, %c0_565, %c19_566] : memref<8x2x384xf32, #tpu.memory_space<vmem>>, vector<1x2x288xf32>
    %2251 = vector.shape_cast %2250 : vector<1x2x288xf32> to vector<2x288xf32>
    %c382 = arith.constant 382 : index
    %2252 = memref.load %arg0[%c382] : memref<396xf32, #tpu.memory_space<smem>>
    %2253 = vector.broadcast %2252 : f32 to vector<2x288xf32>
    %2254 = arith.mulf %2253, %2251 : vector<2x288xf32>
    %2255 = arith.addf %2249, %2254 : vector<2x288xf32>
    %c6_567 = arith.constant 6 : index
    %c0_568 = arith.constant 0 : index
    %c20_569 = arith.constant 20 : index
    %2256 = vector.load %arg7[%c6_567, %c0_568, %c20_569] : memref<8x2x384xf32, #tpu.memory_space<vmem>>, vector<1x2x288xf32>
    %2257 = vector.shape_cast %2256 : vector<1x2x288xf32> to vector<2x288xf32>
    %c383 = arith.constant 383 : index
    %2258 = memref.load %arg0[%c383] : memref<396xf32, #tpu.memory_space<smem>>
    %2259 = vector.broadcast %2258 : f32 to vector<2x288xf32>
    %2260 = arith.mulf %2259, %2257 : vector<2x288xf32>
    %2261 = arith.addf %2255, %2260 : vector<2x288xf32>
    %c6_570 = arith.constant 6 : index
    %c0_571 = arith.constant 0 : index
    %c36_572 = arith.constant 36 : index
    %2262 = vector.load %arg7[%c6_570, %c0_571, %c36_572] : memref<8x2x384xf32, #tpu.memory_space<vmem>>, vector<1x2x288xf32>
    %2263 = vector.shape_cast %2262 : vector<1x2x288xf32> to vector<2x288xf32>
    %c384 = arith.constant 384 : index
    %2264 = memref.load %arg0[%c384] : memref<396xf32, #tpu.memory_space<smem>>
    %2265 = vector.broadcast %2264 : f32 to vector<2x288xf32>
    %2266 = arith.mulf %2265, %2263 : vector<2x288xf32>
    %2267 = arith.addf %2261, %2266 : vector<2x288xf32>
    %c6_573 = arith.constant 6 : index
    %c0_574 = arith.constant 0 : index
    %c37_575 = arith.constant 37 : index
    %2268 = vector.load %arg7[%c6_573, %c0_574, %c37_575] : memref<8x2x384xf32, #tpu.memory_space<vmem>>, vector<1x2x288xf32>
    %2269 = vector.shape_cast %2268 : vector<1x2x288xf32> to vector<2x288xf32>
    %c385 = arith.constant 385 : index
    %2270 = memref.load %arg0[%c385] : memref<396xf32, #tpu.memory_space<smem>>
    %2271 = vector.broadcast %2270 : f32 to vector<2x288xf32>
    %2272 = arith.mulf %2271, %2269 : vector<2x288xf32>
    %2273 = arith.addf %2267, %2272 : vector<2x288xf32>
    %c6_576 = arith.constant 6 : index
    %c0_577 = arith.constant 0 : index
    %c38_578 = arith.constant 38 : index
    %2274 = vector.load %arg7[%c6_576, %c0_577, %c38_578] : memref<8x2x384xf32, #tpu.memory_space<vmem>>, vector<1x2x288xf32>
    %2275 = vector.shape_cast %2274 : vector<1x2x288xf32> to vector<2x288xf32>
    %c386 = arith.constant 386 : index
    %2276 = memref.load %arg0[%c386] : memref<396xf32, #tpu.memory_space<smem>>
    %2277 = vector.broadcast %2276 : f32 to vector<2x288xf32>
    %2278 = arith.mulf %2277, %2275 : vector<2x288xf32>
    %2279 = arith.addf %2273, %2278 : vector<2x288xf32>
    %c7_579 = arith.constant 7 : index
    %c0_580 = arith.constant 0 : index
    %c0_581 = arith.constant 0 : index
    %2280 = vector.load %arg7[%c7_579, %c0_580, %c0_581] : memref<8x2x384xf32, #tpu.memory_space<vmem>>, vector<1x2x288xf32>
    %2281 = vector.shape_cast %2280 : vector<1x2x288xf32> to vector<2x288xf32>
    %c387 = arith.constant 387 : index
    %2282 = memref.load %arg0[%c387] : memref<396xf32, #tpu.memory_space<smem>>
    %2283 = vector.broadcast %2282 : f32 to vector<2x288xf32>
    %2284 = arith.mulf %2283, %2281 : vector<2x288xf32>
    %2285 = arith.addf %2279, %2284 : vector<2x288xf32>
    %c7_582 = arith.constant 7 : index
    %c0_583 = arith.constant 0 : index
    %c1_584 = arith.constant 1 : index
    %2286 = vector.load %arg7[%c7_582, %c0_583, %c1_584] : memref<8x2x384xf32, #tpu.memory_space<vmem>>, vector<1x2x288xf32>
    %2287 = vector.shape_cast %2286 : vector<1x2x288xf32> to vector<2x288xf32>
    %c388 = arith.constant 388 : index
    %2288 = memref.load %arg0[%c388] : memref<396xf32, #tpu.memory_space<smem>>
    %2289 = vector.broadcast %2288 : f32 to vector<2x288xf32>
    %2290 = arith.mulf %2289, %2287 : vector<2x288xf32>
    %2291 = arith.addf %2285, %2290 : vector<2x288xf32>
    %c7_585 = arith.constant 7 : index
    %c0_586 = arith.constant 0 : index
    %c2_587 = arith.constant 2 : index
    %2292 = vector.load %arg7[%c7_585, %c0_586, %c2_587] : memref<8x2x384xf32, #tpu.memory_space<vmem>>, vector<1x2x288xf32>
    %2293 = vector.shape_cast %2292 : vector<1x2x288xf32> to vector<2x288xf32>
    %c389 = arith.constant 389 : index
    %2294 = memref.load %arg0[%c389] : memref<396xf32, #tpu.memory_space<smem>>
    %2295 = vector.broadcast %2294 : f32 to vector<2x288xf32>
    %2296 = arith.mulf %2295, %2293 : vector<2x288xf32>
    %2297 = arith.addf %2291, %2296 : vector<2x288xf32>
    %c7_588 = arith.constant 7 : index
    %c0_589 = arith.constant 0 : index
    %c18_590 = arith.constant 18 : index
    %2298 = vector.load %arg7[%c7_588, %c0_589, %c18_590] : memref<8x2x384xf32, #tpu.memory_space<vmem>>, vector<1x2x288xf32>
    %2299 = vector.shape_cast %2298 : vector<1x2x288xf32> to vector<2x288xf32>
    %c390 = arith.constant 390 : index
    %2300 = memref.load %arg0[%c390] : memref<396xf32, #tpu.memory_space<smem>>
    %2301 = vector.broadcast %2300 : f32 to vector<2x288xf32>
    %2302 = arith.mulf %2301, %2299 : vector<2x288xf32>
    %2303 = arith.addf %2297, %2302 : vector<2x288xf32>
    %c7_591 = arith.constant 7 : index
    %c0_592 = arith.constant 0 : index
    %c19_593 = arith.constant 19 : index
    %2304 = vector.load %arg7[%c7_591, %c0_592, %c19_593] : memref<8x2x384xf32, #tpu.memory_space<vmem>>, vector<1x2x288xf32>
    %2305 = vector.shape_cast %2304 : vector<1x2x288xf32> to vector<2x288xf32>
    %c391 = arith.constant 391 : index
    %2306 = memref.load %arg0[%c391] : memref<396xf32, #tpu.memory_space<smem>>
    %2307 = vector.broadcast %2306 : f32 to vector<2x288xf32>
    %2308 = arith.mulf %2307, %2305 : vector<2x288xf32>
    %2309 = arith.addf %2303, %2308 : vector<2x288xf32>
    %c7_594 = arith.constant 7 : index
    %c0_595 = arith.constant 0 : index
    %c20_596 = arith.constant 20 : index
    %2310 = vector.load %arg7[%c7_594, %c0_595, %c20_596] : memref<8x2x384xf32, #tpu.memory_space<vmem>>, vector<1x2x288xf32>
    %2311 = vector.shape_cast %2310 : vector<1x2x288xf32> to vector<2x288xf32>
    %c392 = arith.constant 392 : index
    %2312 = memref.load %arg0[%c392] : memref<396xf32, #tpu.memory_space<smem>>
    %2313 = vector.broadcast %2312 : f32 to vector<2x288xf32>
    %2314 = arith.mulf %2313, %2311 : vector<2x288xf32>
    %2315 = arith.addf %2309, %2314 : vector<2x288xf32>
    %c7_597 = arith.constant 7 : index
    %c0_598 = arith.constant 0 : index
    %c36_599 = arith.constant 36 : index
    %2316 = vector.load %arg7[%c7_597, %c0_598, %c36_599] : memref<8x2x384xf32, #tpu.memory_space<vmem>>, vector<1x2x288xf32>
    %2317 = vector.shape_cast %2316 : vector<1x2x288xf32> to vector<2x288xf32>
    %c393 = arith.constant 393 : index
    %2318 = memref.load %arg0[%c393] : memref<396xf32, #tpu.memory_space<smem>>
    %2319 = vector.broadcast %2318 : f32 to vector<2x288xf32>
    %2320 = arith.mulf %2319, %2317 : vector<2x288xf32>
    %2321 = arith.addf %2315, %2320 : vector<2x288xf32>
    %c7_600 = arith.constant 7 : index
    %c0_601 = arith.constant 0 : index
    %c37_602 = arith.constant 37 : index
    %2322 = vector.load %arg7[%c7_600, %c0_601, %c37_602] : memref<8x2x384xf32, #tpu.memory_space<vmem>>, vector<1x2x288xf32>
    %2323 = vector.shape_cast %2322 : vector<1x2x288xf32> to vector<2x288xf32>
    %c394 = arith.constant 394 : index
    %2324 = memref.load %arg0[%c394] : memref<396xf32, #tpu.memory_space<smem>>
    %2325 = vector.broadcast %2324 : f32 to vector<2x288xf32>
    %2326 = arith.mulf %2325, %2323 : vector<2x288xf32>
    %2327 = arith.addf %2321, %2326 : vector<2x288xf32>
    %c7_603 = arith.constant 7 : index
    %c0_604 = arith.constant 0 : index
    %c38_605 = arith.constant 38 : index
    %2328 = vector.load %arg7[%c7_603, %c0_604, %c38_605] : memref<8x2x384xf32, #tpu.memory_space<vmem>>, vector<1x2x288xf32>
    %2329 = vector.shape_cast %2328 : vector<1x2x288xf32> to vector<2x288xf32>
    %c395 = arith.constant 395 : index
    %2330 = memref.load %arg0[%c395] : memref<396xf32, #tpu.memory_space<smem>>
    %2331 = vector.broadcast %2330 : f32 to vector<2x288xf32>
    %2332 = arith.mulf %2331, %2329 : vector<2x288xf32>
    %2333 = arith.addf %2327, %2332 : vector<2x288xf32>
    %2334 = vector.extract_strided_slice %2333 {offsets = [0, 0], sizes = [2, 16], strides = [1, 1]} : vector<2x288xf32> to vector<2x16xf32>
    %2335 = vector.extract_strided_slice %2333 {offsets = [0, 18], sizes = [2, 16], strides = [1, 1]} : vector<2x288xf32> to vector<2x16xf32>
    %2336 = vector.extract_strided_slice %2333 {offsets = [0, 36], sizes = [2, 16], strides = [1, 1]} : vector<2x288xf32> to vector<2x16xf32>
    %2337 = vector.extract_strided_slice %2333 {offsets = [0, 54], sizes = [2, 16], strides = [1, 1]} : vector<2x288xf32> to vector<2x16xf32>
    %2338 = vector.extract_strided_slice %2333 {offsets = [0, 72], sizes = [2, 16], strides = [1, 1]} : vector<2x288xf32> to vector<2x16xf32>
    %2339 = vector.extract_strided_slice %2333 {offsets = [0, 90], sizes = [2, 16], strides = [1, 1]} : vector<2x288xf32> to vector<2x16xf32>
    %2340 = vector.extract_strided_slice %2333 {offsets = [0, 108], sizes = [2, 16], strides = [1, 1]} : vector<2x288xf32> to vector<2x16xf32>
    %2341 = vector.extract_strided_slice %2333 {offsets = [0, 126], sizes = [2, 16], strides = [1, 1]} : vector<2x288xf32> to vector<2x16xf32>
    %2342 = vector.extract_strided_slice %2333 {offsets = [0, 144], sizes = [2, 16], strides = [1, 1]} : vector<2x288xf32> to vector<2x16xf32>
    %2343 = vector.extract_strided_slice %2333 {offsets = [0, 162], sizes = [2, 16], strides = [1, 1]} : vector<2x288xf32> to vector<2x16xf32>
    %2344 = vector.extract_strided_slice %2333 {offsets = [0, 180], sizes = [2, 16], strides = [1, 1]} : vector<2x288xf32> to vector<2x16xf32>
    %2345 = vector.extract_strided_slice %2333 {offsets = [0, 198], sizes = [2, 16], strides = [1, 1]} : vector<2x288xf32> to vector<2x16xf32>
    %2346 = vector.extract_strided_slice %2333 {offsets = [0, 216], sizes = [2, 16], strides = [1, 1]} : vector<2x288xf32> to vector<2x16xf32>
    %2347 = vector.extract_strided_slice %2333 {offsets = [0, 234], sizes = [2, 16], strides = [1, 1]} : vector<2x288xf32> to vector<2x16xf32>
    %2348 = vector.extract_strided_slice %2333 {offsets = [0, 252], sizes = [2, 16], strides = [1, 1]} : vector<2x288xf32> to vector<2x16xf32>
    %2349 = vector.extract_strided_slice %2333 {offsets = [0, 270], sizes = [2, 16], strides = [1, 1]} : vector<2x288xf32> to vector<2x16xf32>
    %2350 = tpu.concatenate %2334, %2335, %2336, %2337, %2338, %2339, %2340, %2341, %2342, %2343, %2344, %2345, %2346, %2347, %2348, %2349 in 1 : vector<2x16xf32>, vector<2x16xf32>, vector<2x16xf32>, vector<2x16xf32>, vector<2x16xf32>, vector<2x16xf32>, vector<2x16xf32>, vector<2x16xf32>, vector<2x16xf32>, vector<2x16xf32>, vector<2x16xf32>, vector<2x16xf32>, vector<2x16xf32>, vector<2x16xf32>, vector<2x16xf32>, vector<2x16xf32> -> vector<2x256xf32>
    %2351 = math.tanh %2350 : vector<2x256xf32>
    %c0_606 = arith.constant 0 : index
    %c0_607 = arith.constant 0 : index
    %c0_608 = arith.constant 0 : index
    %2352 = vector.load %arg4[%c0_606, %c0_607, %c0_608] : memref<2x1x256xf32, #tpu.memory_space<vmem>>, vector<2x1x256xf32>
    %2353 = vector.shape_cast %2352 : vector<2x1x256xf32> to vector<2x256xf32>
    %2354 = vector.shape_cast %2351 : vector<2x256xf32> to vector<2x1x256xf32>
    tpu.vector_store %arg4[%c0_606, %c0_607, %c0_608], %2354 {strides = array<i32>} : memref<2x1x256xf32, #tpu.memory_space<vmem>>, vector<2x1x256xf32>,
    return
  }
}

</mosaic_0001>

<bundles_post_ra>
// kernel: tpu_custom_call.1
= control target key start
LH: loop header
LB: loop body
LE: loop exit
PB: predicated region body
PF: predicated region fallthrough
CT: control target
= control target key end

     0   :  { %9 = vsyncpa [#allocation7], 0  ;;  %s8049_s0 = inlined_call_operand.hbm [shape: f32[396], index: 0, kind: input, shape index: {}]   ;;  %s8050_s1 = inlined_call_operand.vmem [shape: f32[12], index: 1, kind: input, shape index: {}]   ;;  %s8051_s2 = inlined_call_operand.vmem [shape: f32[12], index: 2, kind: input, shape index: {}]   ;;  %s8052_s3 = inlined_call_operand.vmem [shape: f32[2,1,256], index: 3, kind: input, shape index: {}]   ;;  %s8053_s4 = inlined_call_operand.hbm [shape: f32[2,1,256], index: 4, kind: output, shape index: {}]  }
   0x1   :  { %10 = vsyncpa [#allocation8], 0 }
   0x2   :  { %11 = vsyncpa [#allocation11], 0 }
   0x3   :  { %12 = vsyncpa [#allocation6], 0  ;;  %s27_s17 = sshll.u32 %s8050_s1, 4  ;;  %s6034_s20 = scalar_lea.hbm %s8049_s0, 64  ;;  %s28_s17 = int_to_ptr.vmem [resolvable:$true] %s27_s17 }
   0x4   :  { %p6035_p0 = scmp.ne.s32.totalorder %s8049_s0, %s6034_s20  ;;  %p6038_p1 = scmp.lt.u32.totalorder %s6034_s20, %s8049_s0 }
   0x6   :  { %p6040_p2 = pnand %p6038_p1, %p6035_p0 }
   0x8   :  { %6043 = shalt.err (!%p6040_p2)
}
   0x9   :  { %s6098_s25 = smov [#allocation5]   ;;  %s6044_s1 = scalar_lea.vmem %s28_s17, 16 }
   0xa   :  { %20 = dma.hbm_to_smem %s8049_s0, 64, %s6098_s25, [#allocation7]  }
   0xb   :  { %p6045_p3 = scmp.ne.s32.totalorder %s28_s17, %s6044_s1  ;;  %p6049_p4 = scmp.lt.s32.totalorder %s28_s17, %s28_s17 }
   0xc   :  { %p6050_p5 = scmp.lt.s32.totalorder %s6044_s1, %s6044_s1 }
   0xe   :  { %p6051_p6 = por %p6050_p5, %p6049_p4 }
  0x10   :  { %p6052_p7 = pnand %p6051_p6, %p6045_p3 }
  0x12   :  { %6055 = shalt.err (!%p6052_p7)
}
  0x13   :  { %s6099_s28 = smov [#allocation9]   ;;  %s37_s5 = sshll.u32 %s8051_s2, 4  ;;  %s38_s5 = int_to_ptr.vmem [resolvable:$true] %s37_s5 }
  0x14   :  { %30 = dma.vmem_to_smem %s28_s17, 16, %s6099_s28, [#allocation8]  }
  0x15   :  { %s6056_s6 = scalar_lea.vmem %s38_s5, 16  ;;  %p6061_p9 = scmp.lt.s32.totalorder %s38_s5, %s38_s5 }
  0x16   :  { %p6057_p8 = scmp.ne.s32.totalorder %s38_s5, %s6056_s6  ;;  %p6062_p10 = scmp.lt.s32.totalorder %s6056_s6, %s6056_s6 }
  0x18   :  { %p6063_p11 = por %p6062_p10, %p6061_p9 }
  0x1a   :  { %p6064_p12 = pnand %p6063_p11, %p6057_p8 }
  0x1c   :  { %6067 = shalt.err (!%p6064_p12)
}
  0x1d   :  { %s6100_s0 = smov [#allocation10]  }
  0x1e   :  { %40 = dma.vmem_to_smem %s38_s5, 16, %s6100_s0, [#allocation11]  }
  0x1f   :  { %6090 = dma.done.wait [#allocation7], 64  }
  0x20   :  { %6091 = vsyncadd [#allocation7], 4294967232 }
  0x21   :  { %6092 = dma.done.wait [#allocation8], 16  }
  0x22   :  { %6093 = vsyncadd [#allocation8], 4294967280 }
  0x23   :  { %6094 = dma.done.wait [#allocation11], 16  }
  0x24   :  { %6095 = vsyncadd [#allocation11], 4294967280 }
  0x25   :  { %52 = sfence }
  0x26   :  { %v74_v0 = vlaneseq  ;;  %v100_v1 = vld [vmem:[%s8052_s3] sm:$0x1]  ;;  %v101_v2 = vld [vmem:[%s8052_s3 + $0x2] sm:$0x1]  ;;  %v6101_v3 = vmov 1935823168  }
  0x27   :  { %v72_v4 = vunpack.c.l.s4 %v6101_v3  ;;  %v66_v5 = vld [vmem:[%s8052_s3] sm:$0x1]  ;;  %v6102_v7 = vmov 0.0   ;;  %v67_v8 = vld [vmem:[%s8052_s3 + $0x2] sm:$0x1]  ;;  %v104_v10 = vcombine.low %v100_v1, %v101_v2  ;;  %s6103_s29 = smov 23  }
  0x28   :  { %v6197_v6 = vshrl.u32 %v74_v0, 7  ;;  %53 = vst [vmem:[#allocation2] sm:$0x3f] %v6102_v7  ;;  %54 = vst [vmem:[#allocation3] sm:$0x3f] %v6102_v7  ;;  %v70_v11 = vcombine.low %v66_v5, %v67_v8  ;;  %s6104_s30 = smov 19  }
  0x29   :  { %55 = vst [vmem:[#allocation3 + $0x6] sm:$0x3f] %v6102_v7  ;;  %56 = vst [vmem:[#allocation3 + $0xc] sm:$0x3f] %v6102_v7  ;;  %v73_v9 = vunpack.c.0.s8 %v72_v4  ;;  %v117_v12 = vld [vmem:[%s8052_s3] sm:$0x1] }
  0x2a   :  { %57 = vst [vmem:[#allocation3 + $0x12] sm:$0x3f] %v6102_v7  ;;  %58 = vst [vmem:[#allocation4] sm:$0x3f] %v6102_v7  ;;  %v118_v13 = vld [vmem:[%s8052_s3 + $0x2] sm:$0x1] }
  0x2b   :  { %59 = vst [vmem:[#allocation4 + $0x6] sm:$0x3f] %v6102_v7  ;;  %60 = vst [vmem:[#allocation4 + $0xc] sm:$0x3f] %v6102_v7  ;;  %v83_v14 = vld [vmem:[%s8052_s3] sm:$0x1]  ;;  %v6228_v16 = vsub.s32 %v73_v9, %v6197_v6  ;;  %v121_v17 = vcombine.low %v117_v12, %v118_v13 }
  0x2c   :  { %61 = vst [vmem:[#allocation4 + $0x12] sm:$0x3f] %v6102_v7  ;;  %62 = vst [vmem:[#allocation4 + $0x18] sm:$0x3f] %v6102_v7  ;;  %v84_v15 = vld [vmem:[%s8052_s3 + $0x2] sm:$0x1] }
  0x2d   :  { %63 = vst [vmem:[#allocation4 + $0x1e] sm:$0x3f] %v6102_v7  ;;  %64 = vst [vmem:[#allocation4 + $0x24] sm:$0x3f] %v6102_v7  ;;  %v87_v18 = vcombine.low %v83_v14, %v84_v15  ;;  %v134_v19 = vld [vmem:[%s8052_s3] sm:$0x1]  ;;  %v111_v22 = vrot.slane %v104_v10, %v6228_v16  ;;  %v77_v23 = vrot.slane %v70_v11, %v6228_v16 }
  0x2e   :  { %65 = vst [vmem:[#allocation4 + $0x2a] sm:$0x3f] %v6102_v7  ;;  %v135_v20 = vld [vmem:[%s8052_s3 + $0x2] sm:$0x1]  ;;  %v168_v21 = vld [vmem:[%s8052_s3] sm:$0x1]  ;;  %v128_v25 = vrot.slane %v121_v17, %v6228_v16 }
  0x2f   :  { %v169_v24 = vld [vmem:[%s8052_s3 + $0x2] sm:$0x1]  ;;  %112 = vrot.lane.b32.xlu1 %v111_v22, %s6103_s29  ;;  %78 = vrot.lane.b32.xlu0 %v77_v23, %s6104_s30  ;;  %v94_v26 = vrot.slane %v87_v18, %v6228_v16  ;;  %v138_v27 = vcombine.low %v134_v19, %v135_v20  ;;  %v190_v29 = vld [vmem:[%s8052_s3] sm:$0x1]  ;;  %s6105_s11 = smov 25   ;;  %s6106_s12 = smov 21  }
  0x30   :  { %v172_v28 = vcombine.low %v168_v21, %v169_v24  ;;  %v191_v30 = vld [vmem:[%s8052_s3 + $0x2] sm:$0x1]  ;;  %v151_v31 = vld [vmem:[%s8052_s3] sm:$0x1]  ;;  %v224_v37 = vld [vmem:[%s8052_s3 + $0x1] sm:$0x1] }
  0x31   :  { %v152_v32 = vld [vmem:[%s8052_s3 + $0x2] sm:$0x1]  ;;  %v194_v33 = vcombine.low %v190_v29, %v191_v30  ;;  %v145_v34 = vrot.slane %v138_v27, %v6228_v16  ;;  %v225_v38 = vld [vmem:[%s8052_s3 + $0x3] sm:$0x1]  ;;  %v207_v39 = vld [vmem:[%s8052_s3 + $0x1] sm:$0x1] }
  0x32   :  { %v179_v35 = vrot.slane %v172_v28, %v6228_v16  ;;  %v155_v36 = vcombine.low %v151_v31, %v152_v32  ;;  %v208_v40 = vld [vmem:[%s8052_s3 + $0x3] sm:$0x1]  ;;  %s6107_s21 = smov 27   ;;  %s6108_s22 = smov 31   ;;  %v228_v43 = vcombine.low %v224_v37, %v225_v38  ;;  %v292_v45 = vld [vmem:[%s8052_s3 + $0x1] sm:$0x1] }
  0x33   :  { %129 = vrot.lane.b32.xlu1 %v128_v25, %s6105_s11  ;;  %95 = vrot.lane.b32.xlu0 %v94_v26, %s6106_s12  ;;  %v201_v41 = vrot.slane %v194_v33, %v6228_v16  ;;  %v211_v44 = vcombine.low %v207_v39, %v208_v40  ;;  %v293_v46 = vld [vmem:[%s8052_s3 + $0x3] sm:$0x1]  ;;  %v241_v47 = vld [vmem:[%s8052_s3 + $0x1] sm:$0x1]  ;;  %s6109_s5 = smov 33   ;;  %s6110_s6 = smov 29  }
  0x34   :  { %v162_v42 = vrot.slane %v155_v36, %v6228_v16  ;;  %v242_v48 = vld [vmem:[%s8052_s3 + $0x3] sm:$0x1]  ;;  %v296_v49 = vcombine.low %v292_v45, %v293_v46  ;;  %v235_v50 = vrot.slane %v228_v43, %v6228_v16  ;;  %v258_v53 = vld [vmem:[%s8052_s3 + $0x1] sm:$0x1]  ;;  %s6111_s13 = smov 37   ;;  %s6112_s14 = smov 35  }
  0x35   :  { %v218_v51 = vrot.slane %v211_v44, %v6228_v16  ;;  %v245_v52 = vcombine.low %v241_v47, %v242_v48  ;;  %v259_v54 = vld [vmem:[%s8052_s3 + $0x3] sm:$0x1]  ;;  %v275_v55 = vld [vmem:[%s8052_s3 + $0x1] sm:$0x1]  ;;  %s6113_s23 = smov 45   ;;  %s6114_s24 = smov 39  }
  0x36   :  { %v276_v56 = vld [vmem:[%s8052_s3 + $0x3] sm:$0x1]  ;;  %v303_v57 = vrot.slane %v296_v49, %v6228_v16  ;;  %v262_v59 = vcombine.low %v258_v53, %v259_v54  ;;  %v314_v61 = vld [vmem:[%s8052_s3 + $0x1] sm:$0x1]  ;;  %s6115_s25 = smov 41   ;;  %s6116_s26 = smov 43  }
  0x37   :  { %146 = vrot.lane.b32.xlu1 %v145_v34, %s6107_s21  ;;  %180 = vrot.lane.b32.xlu0 %v179_v35, %s6108_s22  ;;  %v252_v58 = vrot.slane %v245_v52, %v6228_v16  ;;  %v279_v60 = vcombine.low %v275_v55, %v276_v56  ;;  %v315_v62 = vld [vmem:[%s8052_s3 + $0x3] sm:$0x1]  ;;  %v331_v63 = vld [vmem:[%s8052_s3 + $0x1] sm:$0x1]  ;;  %s6117_s27 = smov 47   ;;  %vm81_vm0 = vcmask 279704  }
  0x38   :  { %v332_v1 = vld [vmem:[%s8052_s3 + $0x3] sm:$0x1]  ;;  %v318_v2 = vcombine.low %v314_v61, %v315_v62  ;;  %v269_v3 = vrot.slane %v262_v59, %v6228_v16  ;;  %s6118_s3 = smov 49   ;;  %vm98_vm1 = vcmask 427304   ;;  %vm115_vm2 = vcmask 574904   ;;  %s5459_s1 = sld [smem:[#allocation5 + $0x2]] }
  0x39   :  { %v286_v4 = vrot.slane %v279_v60, %v6228_v16  ;;  %v335_v5 = vcombine.low %v331_v63, %v332_v1  ;;  %vm132_vm3 = vcmask 722504   ;;  %vm149_vm4 = vcmask 870104   ;;  %s5455_s28 = sld [smem:[#allocation5 + $0x1]]  ;;  %s5467_s29 = sld [smem:[#allocation5 + $0x4]] }
  0x3a   :  { %v325_v8 = vrot.slane %v318_v2, %v6228_v16  ;;  %vm186_vm5 = vcmask 1042424   ;;  %vm187_vm6 = vcmask 117762   ;;  %vm183_vm7 = vcmask 252928   ;;  %s5471_s0 = sld [smem:[#allocation5 + $0x5]]  ;;  %s5483_s7 = sld [smem:[#allocation5 + $0x8]] }
  0x3b   :  { %202 = vrot.lane.b32.xlu1 %v201_v41, %s6109_s5  ;;  %163 = vrot.lane.b32.xlu0 %v162_v42, %s6110_s6  ;;  %v342_v9 = vrot.slane %v335_v5, %v6228_v16  ;;  %vm166_vm8 = vcmask 1017704   ;;  %vm188_vm9 = vmor %vm187_vm6, %vm186_vm5  ;;  %vm205_vm10 = vcmask 263304   ;;  %vm222_vm11 = vcmask 410904   ;;  %s5463_s5 = sld [smem:[#allocation5 + $0x3]]  ;;  %s5475_s6 = sld [smem:[#allocation5 + $0x6]] }
  0x3c   :  { %vm239_vm12 = vcmask 558504   ;;  %vm256_vm13 = vcmask 706104   ;;  %vm310_vm14 = vcmask 1042408   ;;  %vm311_vm15 = vcmask 101378   ;;  %s5479_s2 = sld [smem:[#allocation5 + $0x7]]  ;;  %s6119_s8 = smov 126  }
  0x3d   :  { %vm346_vm5 = vcmask 394504   ;;  %s6120_s9 = smov 127   ;;  %s5456_s10 = sld [smem:[#allocation5 + $0xa]]  ;;  %v349_v63 = vand.u32 127, %v74_v0 }
  0x3e   :  { %v468_v30 = vstv %s5459_s1  ;;  %s6121_s11 = smov 109   ;;  %s6122_s12 = smov 110  }
  0x3f   :  { %236 = vrot.lane.b32.xlu1 %v235_v50, %s6111_s13  ;;  %219 = vrot.lane.b32.xlu0 %v218_v51, %s6112_s14  ;;  %v427_v31 = vstv %s5455_s28  ;;  %v550_v35 = vstv %s5467_s29  ;;  %s5460_s13 = sld [smem:[#allocation5 + $0xb]]  ;;  %s6123_s14 = smov 92   ;;  %v350_v1 = vadd.s32 128, %v349_v63 }
  0x40   :  { %v591_v40 = vstv %s5471_s0  ;;  %v714_v43 = vstv %s5483_s7  ;;  %s6124_s15 = smov 108   ;;  %s5464_s16 = sld [smem:[#allocation5 + $0xc]] }
  0x41   :  { %v509_v36 = vstv %s5463_s5  ;;  %v632_v39 = vstv %s5475_s6  ;;  %s6125_s17 = smov 90   ;;  %s6126_s18 = smov 91  }
  0x42   :  { %v673_v44 = vstv %s5479_s2  ;;  %s5468_s19 = sld [smem:[#allocation5 + $0xd]]  ;;  %s5472_s20 = sld [smem:[#allocation5 + $0xe]] }
  0x43   :  { %304 = vrot.lane.b32.xlu1 %v303_v57, %s6113_s23  ;;  %253 = vrot.lane.b32.xlu0 %v252_v58, %s6114_s24  ;;  %v438_v47 = vstv %s5456_s10  ;;  %s5476_s21 = sld [smem:[#allocation5 + $0xf]]  ;;  %s5480_s22 = sld [smem:[#allocation5 + $0x10]] }
  0x44   :  { %s5484_s23 = sld [smem:[#allocation5 + $0x11]]  ;;  %s410_s24 = sld [smem:[#allocation5]] }
  0x45   :  { %v479_v49 = vstv %s5460_s13  ;;  %s5457_s1 = sld [smem:[#allocation5 + $0x13]]  ;;  %s5461_s28 = sld [smem:[#allocation5 + $0x14]] }
  0x46   :  { %v520_v51 = vstv %s5464_s16  ;;  %s5465_s29 = sld [smem:[#allocation5 + $0x15]]  ;;  %s5469_s5 = sld [smem:[#allocation5 + $0x16]] }
  0x47   :  { %270 = vrot.lane.b32.xlu0 %v269_v3, %s6115_s25  ;;  %287 = vrot.lane.b32.xlu1 %v286_v4, %s6116_s26  ;;  %v6354_v2 = vmul.u32.u64.low 3817748708, %v349_v63  ;;  %v6355_v3 = vmul.u32.u64.high 3817748708, %v349_v63, %v6354_v2  ;;  %v351_v4 = vadd.s32 256, %v349_v63  ;;  %s5452_s25 = sld [smem:[#allocation5 + $0x9]]  ;;  %s5473_s26 = sld [smem:[#allocation5 + $0x17]] }
  0x48   :  { %v561_v53 = vstv %s5468_s19  ;;  %v602_v55 = vstv %s5472_s20  ;;  %s5477_s6 = sld [smem:[#allocation5 + $0x18]]  ;;  %s5481_s0 = sld [smem:[#allocation5 + $0x19]] }
  0x49   :  { %v643_v57 = vstv %s5476_s21  ;;  %v684_v59 = vstv %s5480_s22  ;;  %s5485_s7 = sld [smem:[#allocation5 + $0x1a]]  ;;  %s5462_s10 = sld [smem:[#allocation5 + $0x1d]] }
  0x4a   :  { %v725_v61 = vstv %s5484_s23  ;;  %s5453_s2 = sld [smem:[#allocation5 + $0x12]]  ;;  %s5474_s13 = sld [smem:[#allocation5 + $0x20]] }
  0x4b   :  { %326 = vrot.lane.b32.xlu0 %v325_v8, %s6117_s27  ;;  %343 = vrot.lane.b32.xlu1 %v342_v9, %s6118_s3  ;;  %v6357_v5 = vmul.u32.u64.low 3817748708, %v350_v1  ;;  %v6358_v8 = vmul.u32.u64.high 3817748708, %v350_v1, %v6357_v5  ;;  %s5482_s16 = sld [smem:[#allocation5 + $0x22]] }
  0xa1   :  { %v113_v10 = vpop.permute.xlu1 %112  ;;  %v79_v11 = vpop.permute.xlu0 %78 }
  0xa2   :  { %82 = vst.msk [vmem:[#allocation2] sm:$0x3] %vm81_vm0, %v79_v11  ;;  %vm273_vm0 = vcmask 853704   ;;  %v358_v11 = vshrl.u32 %v6355_v3, 4 }
  0xa5   :  { %v130_v12 = vpop.permute.xlu1 %129  ;;  %v96_v13 = vpop.permute.xlu0 %95 }
  0xa6   :  { %99 = vst.msk [vmem:[#allocation2] sm:$0x3] %vm98_vm1, %v96_v13  ;;  %vm307_vm1 = vcmask 367616   ;;  %v359_v13 = vmul.u32 18, %v358_v11 }
  0xa7   :  { %116 = vst.msk [vmem:[#allocation2] sm:$0x3] %vm115_vm2, %v113_v10  ;;  %vm290_vm2 = vcmask 1001304   ;;  %v6360_v9 = vmul.u32.u64.low 3817748708, %v351_v4  ;;  %v6361_v10 = vmul.u32.u64.high 3817748708, %v351_v4, %v6360_v9 }
  0xa8   :  { %133 = vst.msk [vmem:[#allocation2] sm:$0x3] %vm132_vm3, %v130_v12  ;;  %vm312_vm3 = vmor %vm311_vm15, %vm310_vm14  ;;  %v369_v12 = vshrl.u32 %v6358_v8, 4  ;;  %vm433_vm15 = vcmask 1039360  }
  0xa9   :  { %v147_v14 = vpop.permute.xlu1 %146  ;;  %v181_v15 = vpop.permute.xlu0 %180 }
  0xaa   :  { %150 = vst.msk [vmem:[#allocation2] sm:$0x3] %vm149_vm4, %v147_v14  ;;  %v182_v16 = vrot.slane %v181_v15, 6  ;;  %vm329_vm4 = vcmask 246904   ;;  %v370_v14 = vmul.u32 18, %v369_v12 }
  0xac   :  { %v184_v19 = vsel %vm183_vm7, %v182_v16, %v181_v15  ;;  %v380_v15 = vshrl.u32 %v6361_v10, 4  ;;  %v360_v16 = vsub.s32 %v349_v63, %v359_v13 }
  0xad   :  { %v203_v17 = vpop.permute.xlu1 %202  ;;  %v164_v18 = vpop.permute.xlu0 %163 }
  0xae   :  { %167 = vst.msk [vmem:[#allocation2] sm:$0x3] %vm166_vm8, %v164_v18  ;;  %v381_v18 = vmul.u32 18, %v380_v15  ;;  %vm385_vm6 = vcmp.ne.s32.totalorder %v360_v16, 0  ;;  %vm388_vm7 = vcmp.lt.s32.totalorder %v360_v16, 0 }
  0xaf   :  { %189 = vst.msk [vmem:[#allocation2] sm:$0xf] %vm188_vm9, %v184_v19 }
  0xb0   :  { %206 = vst.msk [vmem:[#allocation2 + $0x2] sm:$0x3] %vm205_vm10, %v203_v17  ;;  %v371_v17 = vsub.s32 %v350_v1, %v370_v14  ;;  %v382_v19 = vsub.s32 %v351_v4, %v381_v18  ;;  %vm391_vm10 = vmand %vm388_vm7, %vm385_vm6  ;;  %vm597_vm6 = vcmask 883712   ;;  %vm638_vm7 = vcmask 752640  }
  0xb1   :  { %v237_v20 = vpop.permute.xlu1 %236  ;;  %v220_v21 = vpop.permute.xlu0 %219 }
  0xb2   :  { %223 = vst.msk [vmem:[#allocation2 + $0x2] sm:$0x3] %vm222_vm11, %v220_v21  ;;  %vm386_vm8 = vcmp.ne.s32.totalorder %v371_v17, 0  ;;  %vm389_vm9 = vcmp.lt.s32.totalorder %v371_v17, 0  ;;  %v395_v21 = vadd.s32 18, %v371_v17 }
  0xb3   :  { %240 = vst.msk [vmem:[#allocation2 + $0x2] sm:$0x3] %vm239_vm12, %v237_v20  ;;  %v394_v20 = vadd.s32 18, %v360_v16  ;;  %vm6366_vm11 = vmand %vm389_vm9, %vm386_vm8  ;;  %vm387_vm12 = vcmp.ne.s32.totalorder %v382_v19, 0  ;;  %vm679_vm8 = vcmask 744448   ;;  %vm720_vm9 = vcmask 736256  }
  0xb5   :  { %v305_v22 = vpop.permute.xlu1 %304  ;;  %v254_v23 = vpop.permute.xlu0 %253 }
  0xb6   :  { %257 = vst.msk [vmem:[#allocation2 + $0x2] sm:$0x3] %vm256_vm13, %v254_v23  ;;  %v306_v24 = vrot.slane %v305_v22, 6  ;;  %vm390_vm13 = vcmp.lt.s32.totalorder %v382_v19, 0  ;;  %v397_v23 = vsel %vm391_vm10, %v394_v20, %v360_v16  ;;  %vm795_vm10 = vcmask 1041408  }
  0xb7   :  { %vm6372_vm14 = vmand %vm390_vm13, %vm387_vm12  ;;  %vm871_vm12 = vcmask 1041560   ;;  %vm872_vm13 = vcmask 1043458  }
  0xb8   :  { %v308_v27 = vsel %vm307_vm1, %v306_v24, %v305_v22  ;;  %v396_v24 = vadd.s32 18, %v382_v19 }
  0xb9   :  { %v271_v25 = vpop.permute.xlu0 %270  ;;  %v288_v26 = vpop.permute.xlu1 %287 }
  0xba   :  { %274 = vst.msk [vmem:[#allocation2 + $0x2] sm:$0x3] %vm273_vm0, %v271_v25  ;;  %v398_v25 = vsel %vm6366_vm11, %v395_v21, %v371_v17  ;;  %vm400_vm0 = vcmp.lt.s32.totalorder %v397_v23, 16  ;;  %vm799_vm11 = vcmask 254976  }
  0xbb   :  { %291 = vst.msk [vmem:[#allocation2 + $0x2] sm:$0x3] %vm290_vm2, %v288_v26  ;;  %v411_v26 = vstv %s410_s24  ;;  %vm401_vm1 = vcmp.lt.s32.totalorder %v398_v25, 16  ;;  %vm474_vm2 = vcmask 1031168  }
  0xbc   :  { %313 = vst.msk [vmem:[#allocation2 + $0x2] sm:$0xf] %vm312_vm3, %v308_v27  ;;  %vm515_vm3 = vcmask 900096  }
  0xbd   :  { %v327_v28 = vpop.permute.xlu0 %326  ;;  %v344_v29 = vpop.permute.xlu1 %343 }
  0xbe   :  { %330 = vst.msk [vmem:[#allocation2 + $0x4] sm:$0x3] %vm329_vm4, %v327_v28  ;;  %v6127_v28 = vmov 1983009808  }
  0xbf   :  { %347 = vst.msk [vmem:[#allocation2 + $0x4] sm:$0x3] %vm346_vm5, %v344_v29  ;;  %v759_v29 = vunpack.c.l.s4 %v6127_v28  ;;  %vm556_vm5 = vcmask 891904  }
  0xc6   :  { %v6319_v32 = vld [vmem:[#allocation2] sm:$0x3f] }
  0xc7   :  { %v469_v33 = vmul.f32 %v468_v30, %v6319_v32  ;;  %v428_v34 = vmul.f32 %v427_v31, %v6319_v32  ;;  %v551_v37 = vmul.f32 %v550_v35, %v6319_v32  ;;  %v510_v38 = vmul.f32 %v509_v36, %v6319_v32 }
  0xc8   :  { %v633_v41 = vmul.f32 %v632_v39, %v6319_v32  ;;  %v592_v42 = vmul.f32 %v591_v40, %v6319_v32  ;;  %v715_v45 = vmul.f32 %v714_v43, %v6319_v32  ;;  %v674_v46 = vmul.f32 %v673_v44, %v6319_v32 }
  0xc9   :  { %471 = vrot.lane.b32.xlu1 %v469_v33, %s6119_s8  ;;  %430 = vrot.lane.b32.xlu0 %v428_v34, %s6120_s9  ;;  %v439_v48 = vmul.f32 %v438_v47, %v6319_v32  ;;  %v480_v50 = vmul.f32 %v479_v49, %v6319_v32  ;;  %v521_v52 = vmul.f32 %v520_v51, %v6319_v32  ;;  %v5449_v39 = vsel %vm400_vm0, 1.0, %v6102_v7 }
  0xca   :  { %v562_v54 = vmul.f32 %v561_v53, %v6319_v32  ;;  %v603_v56 = vmul.f32 %v602_v55, %v6319_v32  ;;  %v644_v58 = vmul.f32 %v643_v57, %v6319_v32  ;;  %v685_v60 = vmul.f32 %v684_v59, %v6319_v32 }
  0xcb   :  { %v726_v62 = vmul.f32 %v725_v61, %v6319_v32  ;;  %v412_v35 = vmul.f32 %v411_v26, %v6319_v32  ;;  %v399_v36 = vsel %vm6372_vm14, %v396_v24, %v382_v19  ;;  %v5450_v43 = vsel %vm401_vm1, 1.0, %v6102_v7  ;;  %vm873_vm14 = vmor %vm872_vm13, %vm871_vm12 }
  0xcc   :  { %vm402_vm4 = vcmp.lt.s32.totalorder %v399_v36, 16  ;;  %v415_v26 = vstv %s5452_s25  ;;  %s5458_s25 = sld [smem:[#allocation5 + $0x1c]]  ;;  %vm874_vm0 = vcmask 414724   ;;  %vm868_vm1 = vcmask 154624  }
  0xcd   :  { %553 = vrot.lane.b32.xlu1 %v551_v37, %s6121_s11  ;;  %512 = vrot.lane.b32.xlu0 %v510_v38, %s6122_s12  ;;  %v760_v38 = vunpack.c.0.s8 %v759_v29 }
  0xcf   :  { %v6385_v49 = vsub.s32 %v760_v38, %v6197_v6 }
  0xd1   :  { %635 = vrot.lane.b32.xlu1 %v633_v41, %s6123_s14  ;;  %594 = vrot.lane.b32.xlu0 %v592_v42, %s6124_s15 }
  0xd5   :  { %717 = vrot.lane.b32.xlu1 %v715_v45, %s6125_s17  ;;  %676 = vrot.lane.b32.xlu0 %v674_v46, %s6126_s18 }
  0xd9   :  { %441 = vrot.lane.b32.xlu1 %v439_v48, %s6120_s9 }
  0xdd   :  { %482 = vrot.lane.b32.xlu1 %v480_v50, %s6119_s8  ;;  %v757_v50 = vcombine.low %v5449_v39, %v5450_v43 }
  0xe1   :  { %523 = vrot.lane.b32.xlu1 %v521_v52, %s6122_s12 }
  0xe5   :  { %564 = vrot.lane.b32.xlu1 %v562_v54, %s6121_s11  ;;  %v5451_v54 = vsel %vm402_vm4, 1.0, %v6102_v7  ;;  %vm6533_vm4 = vmor %vm874_vm0, %vm873_vm14 }
  0xe6   :  { %v771_v61 = vrot.slane %v5451_v54, %v6385_v49 }
  0xe9   :  { %605 = vrot.lane.b32.xlu1 %v603_v56, %s6124_s15 }
  0xed   :  { %646 = vrot.lane.b32.xlu1 %v644_v58, %s6123_s14 }
  0xf1   :  { %687 = vrot.lane.b32.xlu1 %v685_v60, %s6126_s18  ;;  %v764_v60 = vrot.slane %v757_v50, %v6385_v49 }
  0xf3   :  { %v6394_v8 = vcombine.low %v764_v60, %v771_v61 }
  0xf5   :  { %728 = vrot.lane.b32.xlu1 %v726_v62, %s6125_s17 }
 0x13b   :  { %v472_v30 = vpop.permute.xlu1 %471  ;;  %v431_v31 = vpop.permute.xlu0 %430 }
 0x13c   :  { %v473_v33 = vrot.slane %v472_v30, 2  ;;  %v432_v34 = vrot.slane %v431_v31, 2 }
 0x13e   :  { %v434_v37 = vsel %vm433_vm15, %v431_v31, %v432_v34  ;;  %v475_v44 = vsel %vm474_vm2, %v472_v30, %v473_v33  ;;  %v416_v31 = vmul.f32 %v415_v26, %v6319_v32 }
 0x13f   :  { %v436_v40 = vadd.f32 %v434_v37, %v412_v35  ;;  %v554_v41 = vpop.permute.xlu1 %553  ;;  %v513_v42 = vpop.permute.xlu0 %512 }
 0x140   :  { %v555_v45 = vrot.slane %v554_v41, 2  ;;  %v514_v46 = vrot.slane %v513_v42, 2 }
 0x141   :  { %v477_v47 = vadd.f32 %v475_v44, %v436_v40 }
 0x142   :  { %v516_v48 = vsel %vm515_vm3, %v513_v42, %v514_v46  ;;  %v557_v55 = vsel %vm556_vm5, %v554_v41, %v555_v45 }
 0x143   :  { %v518_v51 = vadd.f32 %v516_v48, %v477_v47  ;;  %v636_v52 = vpop.permute.xlu1 %635  ;;  %v595_v53 = vpop.permute.xlu0 %594 }
 0x144   :  { %v637_v56 = vrot.slane %v636_v52, 2  ;;  %v596_v57 = vrot.slane %v595_v53, 2 }
 0x145   :  { %v559_v58 = vadd.f32 %v557_v55, %v518_v51 }
 0x146   :  { %v598_v59 = vsel %vm597_vm6, %v595_v53, %v596_v57  ;;  %v639_v2 = vsel %vm638_vm7, %v636_v52, %v637_v56 }
 0x147   :  { %v600_v62 = vadd.f32 %v598_v59, %v559_v58  ;;  %v718_v63 = vpop.permute.xlu1 %717  ;;  %v677_v1 = vpop.permute.xlu0 %676 }
 0x148   :  { %v719_v3 = vrot.slane %v718_v63, 2  ;;  %v678_v7 = vrot.slane %v677_v1, 2 }
 0x149   :  { %v641_v4 = vadd.f32 %v639_v2, %v600_v62 }
 0x14a   :  { %v680_v5 = vsel %vm679_vm8, %v677_v1, %v678_v7  ;;  %v721_v11 = vsel %vm720_vm9, %v718_v63, %v719_v3 }
 0x14b   :  { %v682_v9 = vadd.f32 %v680_v5, %v641_v4  ;;  %v442_v10 = vpop.permute.xlu1 %441  ;;  %v612_v4 = vstv %s5473_s26  ;;  %s5466_s26 = sld [smem:[#allocation5 + $0x1e]] }
 0x14c   :  { %v443_v22 = vrot.slane %v442_v10, 2  ;;  %v613_v5 = vmul.f32 %v612_v4, %v6319_v32 }
 0x14d   :  { %v6397_v12 = vadd.f32 %v721_v11, %v682_v9 }
 0x14e   :  { %v444_v29 = vsel %vm433_vm15, %v442_v10, %v443_v22 }
 0x14f   :  { %v483_v13 = vpop.permute.xlu1 %482  ;;  %v774_v14 = vmul.f32 %v6394_v8, %v6397_v12  ;;  %v446_v36 = vadd.f32 %v444_v29, %v416_v31  ;;  %v448_v29 = vstv %s5457_s1  ;;  %v489_v31 = vstv %s5461_s28  ;;  %s5486_s1 = sld [smem:[#allocation5 + $0x23]] }
 0x150   :  { %v484_v27 = vrot.slane %v483_v13, 2  ;;  %s5454_s28 = sld [smem:[#allocation5 + $0x1b]] }
 0x151   :  { %v776_v15 = vcombine.high %v774_v14, %v774_v14  ;;  %v783_v16 = vrot.slane %v774_v14, %v6385_v49 }
 0x152   :  { %v485_v34 = vsel %vm474_vm2, %v483_v13, %v484_v27 }
 0x153   :  { %v524_v17 = vpop.permute.xlu1 %523  ;;  %v790_v18 = vrot.slane %v776_v15, %v6385_v49  ;;  %v791_v19 = vcombine.high %v783_v16, %v783_v16  ;;  %v796_v20 = vsel %vm795_vm10, %v783_v16, 0.0  ;;  %v487_v39 = vadd.f32 %v485_v34, %v446_v36 }
 0x154   :  { %v525_v30 = vrot.slane %v524_v17, 2  ;;  %v530_v34 = vstv %s5465_s29  ;;  %v571_v36 = vstv %s5469_s5 }
 0x155   :  { %v797_v21 = vsel %vm795_vm10, %v791_v19, 0.0  ;;  %v800_v25 = vsel %vm799_vm11, %v790_v18, 0.0 }
 0x156   :  { %v798_v23 = vadd.f32 %v797_v21, %v796_v20  ;;  %v526_v37 = vsel %vm515_vm3, %v524_v17, %v525_v30  ;;  %v449_v30 = vmul.f32 %v448_v29, %v6319_v32 }
 0x157   :  { %v565_v24 = vpop.permute.xlu1 %564  ;;  %v528_v43 = vadd.f32 %v526_v37, %v487_v39  ;;  %v572_v37 = vmul.f32 %v571_v36, %v6319_v32 }
 0x158   :  { %v801_v28 = vadd.f32 %v800_v25, %v798_v23  ;;  %v566_v35 = vrot.slane %v565_v24, 2 }
 0x15a   :  { %802 = vadd.xlane.f32.xlu0 %v801_v28  ;;  %v567_v41 = vsel %vm556_vm5, %v565_v24, %v566_v35  ;;  %v531_v35 = vmul.f32 %v530_v34, %v6319_v32 }
 0x15b   :  { %v606_v33 = vpop.permute.xlu1 %605  ;;  %v569_v45 = vadd.f32 %v567_v41, %v528_v43 }
 0x15c   :  { %v607_v38 = vrot.slane %v606_v33, 2 }
 0x15e   :  { %v608_v44 = vsel %vm597_vm6, %v606_v33, %v607_v38  ;;  %v490_v33 = vmul.f32 %v489_v31, %v6319_v32  ;;  %v653_v38 = vstv %s5477_s6 }
 0x15f   :  { %v647_v40 = vpop.permute.xlu1 %646  ;;  %v610_v50 = vadd.f32 %v608_v44, %v569_v45  ;;  %v654_v39 = vmul.f32 %v653_v38, %v6319_v32 }
 0x160   :  { %v648_v42 = vrot.slane %v647_v40, 2 }
 0x162   :  { %v649_v47 = vsel %vm638_vm7, %v647_v40, %v648_v42  ;;  %v694_v40 = vstv %s5481_s0  ;;  %v735_v42 = vstv %s5485_s7 }
 0x163   :  { %v688_v46 = vpop.permute.xlu1 %687  ;;  %v651_v52 = vadd.f32 %v649_v47, %v610_v50  ;;  %v695_v41 = vmul.f32 %v694_v40, %v6319_v32  ;;  %v736_v43 = vmul.f32 %v735_v42, %v6319_v32  ;;  %v622_v42 = vstv %s5474_s13  ;;  %s852_s13 = sld [smem:[#allocation10]] }
 0x164   :  { %v689_v48 = vrot.slane %v688_v46, 2 }
 0x166   :  { %v690_v51 = vsel %vm679_vm8, %v688_v46, %v689_v48 }
 0x167   :  { %v729_v53 = vpop.permute.xlu1 %728  ;;  %v692_v55 = vadd.f32 %v690_v51, %v651_v52 }
 0x168   :  { %v730_v54 = vrot.slane %v729_v53, 2 }
 0x16a   :  { %v731_v56 = vsel %vm720_vm9, %v729_v53, %v730_v54  ;;  %v419_v53 = vstv %s5453_s2 }
 0x16b   :  { %v6415_v57 = vadd.f32 %v731_v56, %v692_v55 }
 0x16d   :  { %v877_v58 = vmul.f32 %v6394_v8, %v6415_v57 }
 0x16f   :  { %v879_v59 = vcombine.high %v877_v58, %v877_v58  ;;  %v886_v60 = vrot.slane %v877_v58, %v6385_v49 }
 0x171   :  { %v893_v61 = vrot.slane %v879_v59, %v6385_v49  ;;  %v894_v62 = vcombine.high %v886_v60, %v886_v60  ;;  %v898_v63 = vsel %vm795_vm10, %v886_v60, 0.0  ;;  %v420_v60 = vmul.f32 %v419_v53, %v6319_v32 }
 0x173   :  { %v899_v1 = vsel %vm795_vm10, %v894_v62, 0.0  ;;  %v901_v3 = vsel %vm799_vm11, %v893_v61, 0.0 }
 0x174   :  { %v900_v2 = vadd.f32 %v899_v1, %v898_v63 }
 0x176   :  { %v902_v7 = vadd.f32 %v901_v3, %v900_v2 }
 0x178   :  { %903 = vadd.xlane.f32.xlu1 %v902_v7 }
 0x189   :  { %615 = vrot.lane.b32.xlu1 %v613_v5, %s6124_s15 }
 0x1e7   :  { %v803_v9 = vpop.xlane.xlu0 %802 }
 0x1e8   :  { %v804_v10 = vrot.slane %v803_v9, 4 }
 0x1ea   :  { %v805_v11 = vadd.f32 %v804_v10, %v803_v9 }
 0x1ec   :  { %v806_v13 = vrot.slane %v805_v11, 2 }
 0x1ee   :  { %v807_v14 = vadd.f32 %v806_v13, %v805_v11 }
 0x1f0   :  { %v808_v15 = vrot.slane %v807_v14, 1 }
 0x1f2   :  { %v809_v16 = vadd.f32 %v808_v15, %v807_v14 }
 0x1f4   :  { %5875 = vpush %v809_v16 }
 0x205   :  { %v904_v56 = vpop.xlane.xlu1 %903 }
 0x206   :  { %v905_v40 = vrot.slane %v904_v56, 4 }
 0x209   :  { %v616_v3 = vpop.permute.xlu1 %615 }
 0x20a   :  { %v617_v10 = vrot.slane %v616_v3, 2 }
 0x20c   :  { %v618_v16 = vsel %vm597_vm6, %v616_v3, %v617_v10 }
 0x225   :  { %s5876_s27 = spop %5875 }
 0x226   :  { %s811_s3 = smul.f32 0.001953125, %s5876_s27  ;;  %s5470_s27 = sld [smem:[#allocation5 + $0x1f]] }
 0x228   :  { %v812_v17 = vstv %s811_s3  ;;  %s5478_s3 = sld [smem:[#allocation5 + $0x21]] }
 0x229   :  { %v6427_v18 = vsub.f32 %v6397_v12, %v812_v17 }
 0x22b   :  { %v814_v19 = vmul.f32 %v6427_v18, %v6427_v18 }
 0x22c   :  { %v581_v10 = vstv %s5470_s27 }
 0x22d   :  { %v815_v20 = vmul.f32 %v814_v19, %v6394_v8 }
 0x22f   :  { %v817_v21 = vcombine.high %v815_v20, %v815_v20  ;;  %v824_v22 = vrot.slane %v815_v20, %v6385_v49 }
 0x231   :  { %v831_v23 = vrot.slane %v817_v21, %v6385_v49  ;;  %v832_v24 = vcombine.high %v824_v22, %v824_v22  ;;  %v836_v25 = vsel %vm795_vm10, %v824_v22, 0.0 }
 0x233   :  { %v837_v26 = vsel %vm795_vm10, %v832_v24, 0.0  ;;  %v839_v28 = vsel %vm799_vm11, %v831_v23, 0.0 }
 0x234   :  { %v838_v27 = vadd.f32 %v837_v26, %v836_v25 }
 0x236   :  { %v840_v12 = vadd.f32 %v839_v28, %v838_v27 }
 0x238   :  { %841 = vadd.xlane.f32.xlu0 %v840_v12 }
 0x24e   :  { %451 = vrot.lane.b32.xlu0 %v449_v30, %s6120_s9 }
 0x252   :  { %492 = vrot.lane.b32.xlu0 %v490_v33, %s6119_s8 }
 0x256   :  { %533 = vrot.lane.b32.xlu0 %v531_v35, %s6122_s12 }
 0x25a   :  { %574 = vrot.lane.b32.xlu0 %v572_v37, %s6121_s11 }
 0x25e   :  { %656 = vrot.lane.b32.xlu0 %v654_v39, %s6123_s14  ;;  %v499_v39 = vstv %s5462_s10  ;;  %s851_s10 = sld [smem:[#allocation9]] }
 0x262   :  { %697 = vrot.lane.b32.xlu0 %v695_v41, %s6126_s18  ;;  %v500_v41 = vmul.f32 %v499_v39, %v6319_v32 }
 0x266   :  { %738 = vrot.lane.b32.xlu0 %v736_v43, %s6125_s17  ;;  %v906_v43 = vadd.f32 %v905_v40, %v904_v56 }
 0x2c5   :  { %v842_v44 = vpop.xlane.xlu0 %841 }
 0x2c6   :  { %v843_v45 = vrot.slane %v842_v44, 4 }
 0x2c8   :  { %v844_v46 = vadd.f32 %v843_v45, %v842_v44  ;;  %v623_v44 = vmul.f32 %v622_v42, %v6319_v32  ;;  %v704_v45 = vstv %s5482_s16 }
 0x2c9   :  { %v452_v47 = vpop.permute.xlu0 %451 }
 0x2ca   :  { %v845_v48 = vrot.slane %v844_v46, 2  ;;  %v453_v50 = vrot.slane %v452_v47, 2 }
 0x2cc   :  { %v846_v51 = vadd.f32 %v845_v48, %v844_v46  ;;  %v454_v58 = vsel %vm433_vm15, %v452_v47, %v453_v50  ;;  %v907_v46 = vrot.slane %v906_v43, 2  ;;  %v705_v48 = vmul.f32 %v704_v45, %v6319_v32 }
 0x2cd   :  { %v493_v52 = vpop.permute.xlu0 %492  ;;  %v456_v1 = vadd.f32 %v454_v58, %v420_v60 }
 0x2ce   :  { %v494_v54 = vrot.slane %v493_v52, 2  ;;  %v847_v55 = vrot.slane %v846_v51, 1  ;;  %v908_v50 = vadd.f32 %v907_v46, %v906_v43 }
 0x2d0   :  { %v848_v59 = vadd.f32 %v847_v55, %v846_v51  ;;  %v495_v62 = vsel %vm474_vm2, %v493_v52, %v494_v54  ;;  %v909_v51 = vrot.slane %v908_v50, 1 }
 0x2d1   :  { %v534_v61 = vpop.permute.xlu0 %533  ;;  %v497_v7 = vadd.f32 %v495_v62, %v456_v1 }
 0x2d2   :  { %v535_v63 = vrot.slane %v534_v61, 2  ;;  %5877 = vpush %v848_v59  ;;  %v910_v53 = vadd.f32 %v909_v51, %v908_v50 }
 0x2d4   :  { %v536_v2 = vsel %vm515_vm3, %v534_v61, %v535_v63 }
 0x2d5   :  { %v575_v4 = vpop.permute.xlu0 %574  ;;  %v538_v9 = vadd.f32 %v536_v2, %v497_v7  ;;  %v458_v7 = vstv %s5458_s25 }
 0x2d6   :  { %v576_v5 = vrot.slane %v575_v4, 2 }
 0x2d8   :  { %v577_v11 = vsel %vm556_vm5, %v575_v4, %v576_v5  ;;  %v459_v4 = vmul.f32 %v458_v7, %v6319_v32  ;;  %v540_v5 = vstv %s5466_s26 }
 0x2d9   :  { %v579_v13 = vadd.f32 %v577_v11, %v538_v9  ;;  %v657_v14 = vpop.permute.xlu0 %656  ;;  %v541_v9 = vmul.f32 %v540_v5, %v6319_v32  ;;  %v582_v11 = vmul.f32 %v581_v10, %v6319_v32 }
 0x2da   :  { %v658_v15 = vrot.slane %v657_v14, 2 }
 0x2db   :  { %v620_v17 = vadd.f32 %v618_v16, %v579_v13  ;;  %v663_v13 = vstv %s5478_s3  ;;  %s5487_s3 = sld [smem:[#allocation9 + $0x1]] }
 0x2dc   :  { %v659_v20 = vsel %vm638_vm7, %v657_v14, %v658_v15  ;;  %v664_v14 = vmul.f32 %v663_v13, %v6319_v32  ;;  %v745_v15 = vstv %s5486_s1  ;;  %s5488_s1 = sld [smem:[#allocation10 + $0x1]] }
 0x2dd   :  { %v698_v19 = vpop.permute.xlu0 %697  ;;  %v661_v23 = vadd.f32 %v659_v20, %v620_v17  ;;  %v746_v16 = vmul.f32 %v745_v15, %v6319_v32 }
 0x2de   :  { %v699_v21 = vrot.slane %v698_v19, 2 }
 0x2e0   :  { %v700_v22 = vsel %vm679_vm8, %v698_v19, %v699_v21 }
 0x2e1   :  { %v739_v24 = vpop.permute.xlu0 %738  ;;  %v702_v26 = vadd.f32 %v700_v22, %v661_v23  ;;  %v423_v23 = vstv %s5454_s28 }
 0x2e2   :  { %v740_v25 = vrot.slane %v739_v24, 2 }
 0x2e4   :  { %v741_v27 = vsel %vm720_vm9, %v739_v24, %v740_v25 }
 0x2e5   :  { %v6460_v28 = vadd.f32 %v741_v27, %v702_v26 }
 0x2e7   :  { %v973_v12 = vmul.f32 %v6394_v8, %v6460_v28 }
 0x2e9   :  { %v975_v29 = vcombine.high %v973_v12, %v973_v12  ;;  %v982_v30 = vrot.slane %v973_v12, %v6385_v49  ;;  %v424_v12 = vmul.f32 %v423_v23, %v6319_v32 }
 0x2eb   :  { %v989_v31 = vrot.slane %v975_v29, %v6385_v49  ;;  %v990_v33 = vcombine.high %v982_v30, %v982_v30  ;;  %v994_v34 = vsel %vm795_vm10, %v982_v30, 0.0 }
 0x2ed   :  { %v995_v35 = vsel %vm795_vm10, %v990_v33, 0.0  ;;  %v997_v37 = vsel %vm799_vm11, %v989_v31, 0.0 }
 0x2ee   :  { %v996_v36 = vadd.f32 %v995_v35, %v994_v34 }
 0x2f0   :  { %v998_v38 = vadd.f32 %v997_v37, %v996_v36 }
 0x2f2   :  { %999 = vadd.xlane.f32.xlu1 %v998_v38 }
 0x303   :  { %s5878_s19 = spop %5877  ;;  %502 = vrot.lane.b32.xlu1 %v500_v41, %s6119_s8 }
 0x304   :  { %s850_s20 = smul.f32 0.001953125, %s5878_s19 }
 0x306   :  { %s853_s21 = sadd.f32 1e-05, %s850_s20 }
 0x307   :  { %625 = vrot.lane.b32.xlu1 %v623_v44, %s6124_s15 }
 0x308   :  { %v854_v47 = vstv %s853_s21 }
 0x309   :  { %5993 = vrsqrt.f32 %v854_v47 }
 0x30b   :  { %707 = vrot.lane.b32.xlu1 %v705_v48, %s6126_s18 }
 0x313   :  { %v5994_v52 = vpop.eup %5993 }
 0x314   :  { %5879 = vpush %v5994_v52 }
 0x315   :  { %5881 = vpush %v910_v53 }
 0x345   :  { %s6475_s22 = spop %5879 }
 0x346   :  { %s5882_s23 = spop %5881  ;;  %s857_s16 = smul.f32 %s6475_s22, %s851_s10 }
 0x347   :  { %s912_s24 = smul.f32 0.001953125, %s5882_s23  ;;  %s5489_s22 = sld [smem:[#allocation9 + $0x2]] }
 0x348   :  { %s5490_s23 = sld [smem:[#allocation10 + $0x2]] }
 0x349   :  { %v913_v54 = vstv %s912_s24  ;;  %s5605_s10 = sld [smem:[#allocation5 + $0x32]] }
 0x34a   :  { %v6478_v55 = vsub.f32 %v6415_v57, %v913_v54 }
 0x34c   :  { %v915_v56 = vmul.f32 %v6478_v55, %v6478_v55 }
 0x34e   :  { %v916_v58 = vmul.f32 %v915_v56, %v6394_v8 }
 0x350   :  { %v918_v59 = vcombine.high %v916_v58, %v916_v58  ;;  %v925_v60 = vrot.slane %v916_v58, %v6385_v49 }
 0x352   :  { %v932_v61 = vrot.slane %v918_v59, %v6385_v49  ;;  %v933_v62 = vcombine.high %v925_v60, %v925_v60  ;;  %v937_v63 = vsel %vm795_vm10, %v925_v60, 0.0 }
 0x354   :  { %v938_v1 = vsel %vm795_vm10, %v933_v62, 0.0  ;;  %v940_v3 = vsel %vm799_vm11, %v932_v61, 0.0 }
 0x355   :  { %v939_v2 = vadd.f32 %v938_v1, %v937_v63 }
 0x357   :  { %v941_v57 = vadd.f32 %v940_v3, %v939_v2 }
 0x359   :  { %942 = vadd.xlane.f32.xlu0 %v941_v57 }
 0x36f   :  { %461 = vrot.lane.b32.xlu0 %v459_v4, %s6120_s9 }
 0x373   :  { %543 = vrot.lane.b32.xlu0 %v541_v9, %s6122_s12 }
 0x377   :  { %584 = vrot.lane.b32.xlu0 %v582_v11, %s6121_s11 }
 0x37b   :  { %666 = vrot.lane.b32.xlu0 %v664_v14, %s6123_s14 }
 0x37f   :  { %748 = vrot.lane.b32.xlu0 %v746_v16, %s6125_s17  ;;  %v1000_v17 = vpop.xlane.xlu1 %999 }
 0x380   :  { %v1001_v11 = vrot.slane %v1000_v17, 4 }
 0x382   :  { %v1002_v13 = vadd.f32 %v1001_v11, %v1000_v17 }
 0x383   :  { %v503_v21 = vpop.permute.xlu1 %502 }
 0x384   :  { %v504_v25 = vrot.slane %v503_v21, 2  ;;  %v1003_v14 = vrot.slane %v1002_v13, 2 }
 0x386   :  { %v505_v35 = vsel %vm474_vm2, %v503_v21, %v504_v25  ;;  %v1004_v16 = vadd.f32 %v1003_v14, %v1002_v13 }
 0x387   :  { %v626_v31 = vpop.permute.xlu1 %625 }
 0x388   :  { %v627_v42 = vrot.slane %v626_v31, 2 }
 0x38a   :  { %v628_v48 = vsel %vm597_vm6, %v626_v31, %v627_v42 }
 0x38b   :  { %v708_v44 = vpop.permute.xlu1 %707 }
 0x38c   :  { %v709_v50 = vrot.slane %v708_v44, 2 }
 0x38e   :  { %v710_v58 = vsel %vm679_vm8, %v708_v44, %v709_v50 }
 0x3e6   :  { %v943_v19 = vpop.xlane.xlu0 %942 }
 0x3e7   :  { %v944_v20 = vrot.slane %v943_v19, 4 }
 0x3e9   :  { %v945_v22 = vadd.f32 %v944_v20, %v943_v19  ;;  %v1005_v19 = vrot.slane %v1004_v16, 1 }
 0x3ea   :  { %v462_v24 = vpop.permute.xlu0 %461 }
 0x3eb   :  { %v463_v26 = vrot.slane %v462_v24, 2  ;;  %v946_v27 = vrot.slane %v945_v22, 2  ;;  %v1006_v21 = vadd.f32 %v1005_v19, %v1004_v16 }
 0x3ed   :  { %v464_v29 = vsel %vm433_vm15, %v462_v24, %v463_v26  ;;  %v947_v30 = vadd.f32 %v946_v27, %v945_v22 }
 0x3ee   :  { %v466_v33 = vadd.f32 %v464_v29, %v424_v12  ;;  %v544_v34 = vpop.permute.xlu0 %543 }
 0x3ef   :  { %v545_v36 = vrot.slane %v544_v34, 2  ;;  %v948_v37 = vrot.slane %v947_v30, 1 }
 0x3f0   :  { %v507_v38 = vadd.f32 %v505_v35, %v466_v33 }
 0x3f1   :  { %v546_v39 = vsel %vm515_vm3, %v544_v34, %v545_v36  ;;  %v949_v40 = vadd.f32 %v948_v37, %v947_v30  ;;  %v858_v34 = vstv %s857_s16  ;;  %v860_v36 = vstv %s852_s13  ;;  %s5621_s13 = sld [smem:[#allocation5 + $0x34]]  ;;  %s5645_s16 = sld [smem:[#allocation5 + $0x37]] }
 0x3f2   :  { %v585_v41 = vpop.permute.xlu0 %584  ;;  %v548_v32 = vadd.f32 %v546_v39, %v507_v38  ;;  %v859_v35 = vmul.f32 %v858_v34, %v6427_v18 }
 0x3f3   :  { %v586_v43 = vrot.slane %v585_v41, 2  ;;  %5883 = vpush %v949_v40 }
 0x3f4   :  { %v861_v37 = vadd.f32 %v860_v36, %v859_v35 }
 0x3f5   :  { %v587_v45 = vsel %vm556_vm5, %v585_v41, %v586_v43 }
 0x3f6   :  { %v589_v46 = vadd.f32 %v587_v45, %v548_v32  ;;  %v667_v47 = vpop.permute.xlu0 %666  ;;  %v862_v38 = vmax.f32 %v861_v37, 0.0 }
 0x3f7   :  { %v668_v51 = vrot.slane %v667_v47, 2 }
 0x3f8   :  { %v630_v52 = vadd.f32 %v628_v48, %v589_v46  ;;  %v863_v39 = vmul.f32 %v862_v38, %v6394_v8 }
 0x3f9   :  { %v669_v53 = vsel %vm638_vm7, %v667_v47, %v668_v51 }
 0x3fa   :  { %v671_v54 = vadd.f32 %v669_v53, %v630_v52  ;;  %v749_v56 = vpop.permute.xlu0 %748 }
 0x3fb   :  { %v750_v59 = vrot.slane %v749_v56, 2 }
 0x3fc   :  { %v712_v60 = vadd.f32 %v710_v58, %v671_v54 }
 0x3fd   :  { %v751_v61 = vsel %vm720_vm9, %v749_v56, %v750_v59 }
 0x3fe   :  { %v6507_v62 = vadd.f32 %v751_v61, %v712_v60 }
 0x400   :  { %v1069_v63 = vmul.f32 %v6394_v8, %v6507_v62 }
 0x402   :  { %v1071_v1 = vcombine.high %v1069_v63, %v1069_v63  ;;  %v1078_v2 = vrot.slane %v1069_v63, %v6385_v49  ;;  %v1057_v63 = vstv %s5490_s23 }
 0x404   :  { %v1085_v3 = vrot.slane %v1071_v1, %v6385_v49  ;;  %v1086_v57 = vcombine.high %v1078_v2, %v1078_v2  ;;  %v1090_v7 = vsel %vm795_vm10, %v1078_v2, 0.0 }
 0x406   :  { %v1091_v4 = vsel %vm795_vm10, %v1086_v57, 0.0  ;;  %v1093_v9 = vsel %vm799_vm11, %v1085_v3, 0.0 }
 0x407   :  { %v1092_v5 = vadd.f32 %v1091_v4, %v1090_v7 }
 0x409   :  { %v1094_v10 = vadd.f32 %v1093_v9, %v1092_v5 }
 0x40b   :  { %1095 = vadd.xlane.f32.xlu0 %v1094_v10 }
 0x424   :  { %s5884_s29 = spop %5883 }
 0x425   :  { %s951_s5 = smul.f32 0.001953125, %s5884_s29  ;;  %s5501_s29 = sld [smem:[#allocation5 + $0x25]] }
 0x427   :  { %s954_s6 = sadd.f32 1e-05, %s951_s5  ;;  %s5517_s5 = sld [smem:[#allocation5 + $0x27]] }
 0x429   :  { %v955_v15 = vstv %s954_s6  ;;  %s5533_s6 = sld [smem:[#allocation5 + $0x29]] }
 0x42a   :  { %5995 = vrsqrt.f32 %v955_v15 }
 0x434   :  { %v5996_v20 = vpop.eup %5995 }
 0x435   :  { %5885 = vpush %v5996_v20 }
 0x436   :  { %5887 = vpush %v1006_v21 }
 0x466   :  { %s6516_s0 = spop %5885 }
 0x467   :  { %s5888_s7 = spop %5887  ;;  %s958_s28 = smul.f32 %s6516_s0, %s5487_s3 }
 0x468   :  { %s1008_s2 = smul.f32 0.001953125, %s5888_s7  ;;  %s5549_s0 = sld [smem:[#allocation5 + $0x2b]] }
 0x469   :  { %v959_v21 = vstv %s958_s28  ;;  %s5573_s7 = sld [smem:[#allocation5 + $0x2e]]  ;;  %s5525_s28 = sld [smem:[#allocation5 + $0x28]] }
 0x46a   :  { %v1009_v22 = vstv %s1008_s2  ;;  %s5589_s2 = sld [smem:[#allocation5 + $0x30]] }
 0x46b   :  { %v6519_v17 = vsub.f32 %v6460_v28, %v1009_v22  ;;  %v960_v22 = vmul.f32 %v959_v21, %v6478_v55 }
 0x46d   :  { %v1011_v23 = vmul.f32 %v6519_v17, %v6519_v17 }
 0x46f   :  { %v1012_v24 = vmul.f32 %v1011_v23, %v6394_v8 }
 0x471   :  { %v1014_v25 = vcombine.high %v1012_v24, %v1012_v24  ;;  %v1021_v26 = vrot.slane %v1012_v24, %v6385_v49 }
 0x473   :  { %v1028_v27 = vrot.slane %v1014_v25, %v6385_v49  ;;  %v1029_v12 = vcombine.high %v1021_v26, %v1021_v26  ;;  %v1033_v29 = vsel %vm795_vm10, %v1021_v26, 0.0 }
 0x475   :  { %v1034_v30 = vsel %vm795_vm10, %v1029_v12, 0.0  ;;  %v1036_v31 = vsel %vm799_vm11, %v1028_v27, 0.0  ;;  %v1199_v27 = vstv %s5501_s29  ;;  %s5541_s29 = sld [smem:[#allocation5 + $0x2a]] }
 0x476   :  { %v1035_v28 = vadd.f32 %v1034_v30, %v1033_v29  ;;  %v1359_v29 = vstv %s5517_s5  ;;  %v1519_v30 = vstv %s5533_s6  ;;  %s5557_s5 = sld [smem:[#allocation5 + $0x2c]]  ;;  %s5581_s6 = sld [smem:[#allocation5 + $0x2f]] }
 0x478   :  { %v1037_v33 = vadd.f32 %v1036_v31, %v1035_v28  ;;  %v1679_v31 = vstv %s5549_s0  ;;  %s5597_s0 = sld [smem:[#allocation5 + $0x31]] }
 0x47a   :  { %1038 = vadd.xlane.f32.xlu1 %v1037_v33 }
 0x47b   :  { %v1599_v21 = vstv %s5541_s29  ;;  %s6678_s29 = sld [smem:[#allocation5 + $0x4a]] }
 0x48b   :  { %865 = vrot.lane.b32.xlu1 %v863_v39, %s6104_s30 }
 0x498   :  { %v1096_v50 = vpop.xlane.xlu0 %1095 }
 0x499   :  { %v1097_v51 = vrot.slane %v1096_v50, 4 }
 0x49b   :  { %v1098_v52 = vadd.f32 %v1097_v51, %v1096_v50  ;;  %v2032_v50 = vstv %s5589_s2  ;;  %s5629_s2 = sld [smem:[#allocation5 + $0x35]] }
 0x49d   :  { %v1099_v53 = vrot.slane %v1098_v52, 2 }
 0x49f   :  { %v1100_v56 = vadd.f32 %v1099_v53, %v1098_v52  ;;  %v2192_v52 = vstv %s5605_s10  ;;  %s5653_s10 = sld [smem:[#allocation5 + $0x38]] }
 0x4a1   :  { %v1101_v58 = vrot.slane %v1100_v56, 1 }
 0x4a3   :  { %v1102_v60 = vadd.f32 %v1101_v58, %v1100_v56 }
 0x507   :  { %v1039_v40 = vpop.xlane.xlu1 %1038 }
 0x508   :  { %v1040_v41 = vrot.slane %v1039_v40, 4 }
 0x50a   :  { %v1041_v42 = vadd.f32 %v1040_v41, %v1039_v40 }
 0x50b   :  { %v866_v43 = vpop.permute.xlu1 %865 }
 0x50c   :  { %v867_v18 = vrot.slane %v866_v43, 6  ;;  %v1042_v32 = vrot.slane %v1041_v42, 2 }
 0x50e   :  { %v869_v45 = vsel %vm868_vm1, %v867_v18, %v866_v43  ;;  %v1043_v46 = vadd.f32 %v1042_v32, %v1041_v42 }
 0x50f   :  { %876 = vst.msk [vmem:[#allocation3] sm:$0x3f] %vm6533_vm4, %v869_v45 }
 0x510   :  { %v1044_v47 = vrot.slane %v1043_v46, 1 }
 0x512   :  { %v1045_v48 = vadd.f32 %v1044_v47, %v1043_v46  ;;  %v1872_v46 = vstv %s5573_s7  ;;  %s5613_s7 = sld [smem:[#allocation5 + $0x33]] }
 0x514   :  { %5889 = vpush %v1045_v48 }
 0x516   :  { %v6557_v26 = vld [vmem:[#allocation3] sm:$0x3f] }
 0x517   :  { %v1200_v12 = vmul.f32 %v1199_v27, %v6557_v26  ;;  %v1360_v55 = vmul.f32 %v1359_v29, %v6557_v26  ;;  %v1520_v28 = vmul.f32 %v1519_v30, %v6557_v26  ;;  %v1680_v33 = vmul.f32 %v1679_v31, %v6557_v26 }
 0x545   :  { %s5890_s19 = spop %5889 }
 0x546   :  { %s1047_s20 = smul.f32 0.001953125, %s5890_s19  ;;  %s5661_s19 = sld [smem:[#allocation5 + $0x39]] }
 0x548   :  { %s1050_s21 = sadd.f32 1e-05, %s1047_s20  ;;  %s5677_s20 = sld [smem:[#allocation5 + $0x3b]] }
 0x54a   :  { %v1051_v54 = vstv %s1050_s21  ;;  %s5693_s21 = sld [smem:[#allocation5 + $0x3d]] }
 0x54b   :  { %5997 = vrsqrt.f32 %v1051_v54  ;;  %v2352_v54 = vstv %s5621_s13  ;;  %s5669_s13 = sld [smem:[#allocation5 + $0x3a]] }
 0x555   :  { %v5998_v59 = vpop.eup %5997 }
 0x556   :  { %5891 = vpush %v5998_v59  ;;  %v2545_v59 = vstv %s5645_s16  ;;  %s5685_s16 = sld [smem:[#allocation5 + $0x3c]] }
 0x557   :  { %5893 = vpush %v1102_v60 }
 0x587   :  { %s5892_s24 = spop %5891 }
 0x588   :  { %s1054_s25 = smul.f32 %s5892_s24, %s5489_s22  ;;  %s5894_s26 = spop %5893 }
 0x589   :  { %s1104_s27 = smul.f32 0.001953125, %s5894_s26  ;;  %s5492_s26 = sld [smem:[#allocation10 + $0x3]] }
 0x58a   :  { %v1055_v61 = vstv %s1054_s25  ;;  %s5491_s25 = sld [smem:[#allocation9 + $0x3]] }
 0x58b   :  { %v1056_v1 = vmul.f32 %v1055_v61, %v6519_v17  ;;  %v1105_v2 = vstv %s1104_s27  ;;  %v961_v17 = vstv %s5488_s1  ;;  %v2705_v61 = vstv %s5661_s19  ;;  %s5509_s1 = sld [smem:[#allocation5 + $0x26]] }
 0x58c   :  { %v6542_v3 = vsub.f32 %v6507_v62, %v1105_v2  ;;  %v962_v23 = vadd.f32 %v961_v17, %v960_v22  ;;  %v1759_v22 = vstv %s5557_s5  ;;  %s5701_s19 = sld [smem:[#allocation5 + $0x3e]]  ;;  %s6688_s5 = sld [smem:[#allocation5 + $0x4b]] }
 0x58d   :  { %v1058_v57 = vadd.f32 %v1057_v63, %v1056_v1  ;;  %v2865_v1 = vstv %s5677_s20  ;;  %v1760_v17 = vmul.f32 %v1759_v22, %v6557_v26  ;;  %s5493_s20 = sld [smem:[#allocation5 + $0x24]] }
 0x58e   :  { %v1107_v7 = vmul.f32 %v6542_v3, %v6542_v3  ;;  %v963_v24 = vmax.f32 %v962_v23, 0.0  ;;  %v1952_v23 = vstv %s5581_s6  ;;  %s6693_s6 = sld [smem:[#allocation5 + $0x36]] }
 0x58f   :  { %v1059_v4 = vmax.f32 %v1058_v57, 0.0  ;;  %v3025_v57 = vstv %s5693_s21  ;;  %s6621_s21 = sld [smem:[#allocation5 + $0x41]] }
 0x590   :  { %v1108_v5 = vmul.f32 %v1107_v7, %v6394_v8  ;;  %v964_v25 = vmul.f32 %v963_v24, %v6394_v8 }
 0x591   :  { %v1060_v9 = vmul.f32 %v1059_v4, %v6394_v8 }
 0x592   :  { %v1110_v10 = vcombine.high %v1108_v5, %v1108_v5  ;;  %v1117_v11 = vrot.slane %v1108_v5, %v6385_v49 }
 0x593   :  { %1062 = vrot.lane.b32.xlu1 %v1060_v9, %s6104_s30 }
 0x594   :  { %v1124_v13 = vrot.slane %v1110_v10, %v6385_v49  ;;  %v1125_v62 = vcombine.high %v1117_v11, %v1117_v11  ;;  %v1129_v14 = vsel %vm795_vm10, %v1117_v11, 0.0  ;;  %v1153_v10 = vstv %s5492_s26  ;;  %s6642_s26 = sld [smem:[#allocation5 + $0x45]] }
 0x596   :  { %v1130_v15 = vsel %vm795_vm10, %v1125_v62, 0.0  ;;  %v1132_v19 = vsel %vm799_vm11, %v1124_v13, 0.0 }
 0x597   :  { %v1131_v16 = vadd.f32 %v1130_v15, %v1129_v14  ;;  %v1279_v15 = vstv %s5509_s1  ;;  %s6656_s1 = sld [smem:[#allocation5 + $0x46]] }
 0x599   :  { %v1133_v20 = vadd.f32 %v1132_v19, %v1131_v16  ;;  %v1280_v16 = vmul.f32 %v1279_v15, %v6557_v26  ;;  %v1439_v19 = vstv %s5525_s28  ;;  %s6667_s28 = sld [smem:[#allocation5 + $0x49]] }
 0x59b   :  { %1134 = vadd.xlane.f32.xlu0 %v1133_v20  ;;  %v1440_v20 = vmul.f32 %v1439_v19, %v6557_v26 }
 0x5b1   :  { %966 = vrot.lane.b32.xlu0 %v964_v25, %s6104_s30  ;;  %v2112_v25 = vstv %s5597_s0  ;;  %s6698_s0 = sld [smem:[#allocation5 + $0x4c]] }
 0x5b5   :  { %1202 = vrot.lane.b32.xlu0 %v1200_v12, %s6120_s9  ;;  %v2272_v12 = vstv %s5613_s7  ;;  %s6705_s7 = sld [smem:[#allocation5 + $0x4d]] }
 0x5b9   :  { %1362 = vrot.lane.b32.xlu0 %v1360_v55, %s6122_s12  ;;  %v2432_v55 = vstv %s5629_s2  ;;  %s6713_s2 = sld [smem:[#allocation5 + $0x4e]] }
 0x5bd   :  { %1522 = vrot.lane.b32.xlu0 %v1520_v28, %s6124_s15  ;;  %v2625_v28 = vstv %s5653_s10  ;;  %s5550_s10 = sld [smem:[#allocation5 + $0x4f]] }
 0x5c1   :  { %1682 = vrot.lane.b32.xlu0 %v1680_v33, %s6126_s18  ;;  %v2785_v33 = vstv %s5669_s13  ;;  %s5558_s13 = sld [smem:[#allocation5 + $0x50]] }
 0x605   :  { %v1063_v34 = vpop.permute.xlu1 %1062 }
 0x606   :  { %v1064_v35 = vrot.slane %v1063_v34, 6 }
 0x608   :  { %v1065_v36 = vsel %vm868_vm1, %v1064_v35, %v1063_v34  ;;  %v2945_v35 = vstv %s5685_s16  ;;  %s5709_s16 = sld [smem:[#allocation5 + $0x3f]] }
 0x609   :  { %1068 = vst.msk [vmem:[#allocation3 + $0xc] sm:$0x3f] %vm6533_vm4, %v1065_v36 }
 0x610   :  { %v6583_v58 = vld [vmem:[#allocation3 + $0xc] sm:$0x3f] }
 0x611   :  { %v2546_v60 = vmul.f32 %v2545_v59, %v6583_v58  ;;  %v2706_v63 = vmul.f32 %v2705_v61, %v6583_v58  ;;  %v2866_v2 = vmul.f32 %v2865_v1, %v6583_v58  ;;  %v3026_v7 = vmul.f32 %v3025_v57, %v6583_v58 }
 0x612   :  { %v2626_v31 = vmul.f32 %v2625_v28, %v6583_v58  ;;  %v2786_v34 = vmul.f32 %v2785_v33, %v6583_v58  ;;  %v2946_v36 = vmul.f32 %v2945_v35, %v6583_v58  ;;  %v3298_v57 = vstv %s6621_s21  ;;  %s5598_s21 = sld [smem:[#allocation5 + $0x55]] }
 0x628   :  { %v1135_v37 = vpop.xlane.xlu0 %1134 }
 0x629   :  { %v1136_v38 = vrot.slane %v1135_v37, 4 }
 0x62b   :  { %v1137_v39 = vadd.f32 %v1136_v38, %v1135_v37  ;;  %v3105_v37 = vstv %s5701_s19  ;;  %s5582_s19 = sld [smem:[#allocation5 + $0x53]] }
 0x62c   :  { %v967_v40 = vpop.permute.xlu0 %966  ;;  %v3106_v38 = vmul.f32 %v3105_v37, %v6583_v58 }
 0x62d   :  { %v968_v41 = vrot.slane %v967_v40, 6  ;;  %v1138_v42 = vrot.slane %v1137_v39, 2 }
 0x62f   :  { %v969_v43 = vsel %vm868_vm1, %v968_v41, %v967_v40  ;;  %v1139_v18 = vadd.f32 %v1138_v42, %v1137_v39 }
 0x630   :  { %972 = vst.msk [vmem:[#allocation3 + $0x6] sm:$0x3f] %vm6533_vm4, %v969_v43  ;;  %v1203_v39 = vpop.permute.xlu0 %1202 }
 0x631   :  { %v1140_v32 = vrot.slane %v1139_v18, 1  ;;  %v1204_v42 = vrot.slane %v1203_v39, 2 }
 0x633   :  { %v1141_v45 = vadd.f32 %v1140_v32, %v1139_v18  ;;  %v1167_v32 = vstv %s5493_s20  ;;  %s5590_s20 = sld [smem:[#allocation5 + $0x54]] }
 0x634   :  { %v1363_v40 = vpop.permute.xlu0 %1362 }
 0x635   :  { %5895 = vpush %v1141_v45 }
 0x637   :  { %v6574_v47 = vld [vmem:[#allocation3 + $0x6] sm:$0x3f] }
 0x638   :  { %v1873_v48 = vmul.f32 %v1872_v46, %v6574_v47  ;;  %v2033_v51 = vmul.f32 %v2032_v50, %v6574_v47  ;;  %v2193_v53 = vmul.f32 %v2192_v52, %v6574_v47  ;;  %v2353_v56 = vmul.f32 %v2352_v54, %v6574_v47  ;;  %v1523_v41 = vpop.permute.xlu0 %1522 }
 0x639   :  { %v1953_v24 = vmul.f32 %v1952_v23, %v6574_v47  ;;  %v2113_v27 = vmul.f32 %v2112_v25, %v6574_v47  ;;  %v2273_v29 = vmul.f32 %v2272_v12, %v6574_v47  ;;  %v2433_v30 = vmul.f32 %v2432_v55, %v6574_v47 }
 0x63a   :  { %1875 = vrot.lane.b32.xlu0 %v1873_v48, %s6120_s9  ;;  %v1205_v46 = vsel %vm433_vm15, %v1203_v39, %v1204_v42  ;;  %v1168_v50 = vmul.f32 %v1167_v32, %v6557_v26  ;;  %v3698_v42 = vstv %s6656_s1  ;;  %s5718_s1 = sld [smem:[#allocation5 + $0x64]] }
 0x63c   :  { %v1683_v43 = vpop.permute.xlu0 %1682 }
 0x63e   :  { %2035 = vrot.lane.b32.xlu0 %v2033_v51, %s6122_s12 }
 0x642   :  { %2195 = vrot.lane.b32.xlu0 %v2193_v53, %s6124_s15  ;;  %v1364_v53 = vrot.slane %v1363_v40, 2 }
 0x644   :  { %v1365_v1 = vsel %vm515_vm3, %v1363_v40, %v1364_v53 }
 0x646   :  { %2355 = vrot.lane.b32.xlu0 %v2353_v56, %s6126_s18  ;;  %v1207_v56 = vadd.f32 %v1205_v46, %v1168_v50 }
 0x64a   :  { %2548 = vrot.lane.b32.xlu0 %v2546_v60, %s6120_s9  ;;  %v1524_v60 = vrot.slane %v1523_v41, 2 }
 0x64e   :  { %2708 = vrot.lane.b32.xlu0 %v2706_v63, %s6122_s12 }
 0x652   :  { %2868 = vrot.lane.b32.xlu0 %v2866_v2, %s6124_s15 }
 0x656   :  { %3028 = vrot.lane.b32.xlu0 %v3026_v7, %s6126_s18 }
 0x666   :  { %s5896_s22 = spop %5895 }
 0x667   :  { %s1143_s23 = smul.f32 0.001953125, %s5896_s22  ;;  %s6623_s22 = sld [smem:[#allocation5 + $0x40]] }
 0x669   :  { %s1146_s24 = sadd.f32 1e-05, %s1143_s23  ;;  %s6632_s23 = sld [smem:[#allocation5 + $0x43]] }
 0x66b   :  { %v1147_v4 = vstv %s1146_s24  ;;  %s6634_s24 = sld [smem:[#allocation5 + $0x42]] }
 0x66c   :  { %5999 = vrsqrt.f32 %v1147_v4 }
 0x66d   :  { %v3218_v7 = vstv %s6623_s22  ;;  %s5606_s22 = sld [smem:[#allocation5 + $0x56]] }
 0x676   :  { %v6000_v5 = vpop.eup %5999 }
 0x677   :  { %5897 = vpush %v6000_v5 }
 0x6a8   :  { %s5898_s27 = spop %5897 }
 0x6a9   :  { %s1150_s3 = smul.f32 %s5898_s27, %s5491_s25  ;;  %s6637_s25 = sld [smem:[#allocation5 + $0x2d]] }
 0x6aa   :  { %s6644_s27 = sld [smem:[#allocation5 + $0x44]] }
 0x6ab   :  { %v1151_v9 = vstv %s1150_s3  ;;  %s6654_s3 = sld [smem:[#allocation5 + $0x47]] }
 0x6ac   :  { %v1152_v11 = vmul.f32 %v1151_v9, %v6542_v3  ;;  %v1600_v3 = vmul.f32 %v1599_v21, %v6557_v26  ;;  %v6628_v51 = vpop.permute.xlu0 %1875  ;;  %v3378_v21 = vstv %s6634_s24  ;;  %s5622_s24 = sld [smem:[#allocation5 + $0x58]] }
 0x6ad   :  { %v1877_v33 = vrot.slane %v6628_v51, 2 }
 0x6ae   :  { %v1154_v13 = vadd.f32 %v1153_v10, %v1152_v11  ;;  %v1525_v11 = vsel %vm597_vm6, %v1523_v41, %v1524_v60 }
 0x6af   :  { %v1878_v32 = vsel %vm433_vm15, %v6628_v51, %v1877_v33 }
 0x6b0   :  { %v1155_v62 = vmax.f32 %v1154_v13, 0.0  ;;  %v2036_v4 = vpop.permute.xlu0 %2035  ;;  %v3538_v28 = vstv %s6644_s27  ;;  %s5678_s27 = sld [smem:[#allocation5 + $0x5f]] }
 0x6b1   :  { %v3778_v41 = vstv %s6654_s3  ;;  %s5694_s3 = sld [smem:[#allocation5 + $0x61]] }
 0x6b2   :  { %v1156_v14 = vmul.f32 %v1155_v62, %v6394_v8 }
 0x6b4   :  { %1158 = vrot.lane.b32.xlu1 %v1156_v14, %s6104_s30 }
 0x6b8   :  { %1282 = vrot.lane.b32.xlu1 %v1280_v16, %s6119_s8  ;;  %v1684_v16 = vrot.slane %v1683_v43, 2 }
 0x6bc   :  { %1442 = vrot.lane.b32.xlu1 %v1440_v20, %s6121_s11  ;;  %v3458_v20 = vstv %s6632_s23  ;;  %s5614_s23 = sld [smem:[#allocation5 + $0x57]] }
 0x6c0   :  { %1602 = vrot.lane.b32.xlu1 %v1600_v3, %s6123_s14 }
 0x6c4   :  { %1762 = vrot.lane.b32.xlu1 %v1760_v17, %s6125_s17  ;;  %v2196_v17 = vpop.permute.xlu0 %2195 }
 0x6c5   :  { %v2197_v60 = vrot.slane %v2196_v17, 2 }
 0x6c8   :  { %1955 = vrot.lane.b32.xlu1 %v1953_v24, %s6119_s8  ;;  %v1840_v24 = vstv %s6637_s25  ;;  %s5646_s25 = sld [smem:[#allocation5 + $0x5b]] }
 0x6cc   :  { %2115 = vrot.lane.b32.xlu1 %v2113_v27, %s6121_s11 }
 0x6d0   :  { %2275 = vrot.lane.b32.xlu1 %v2273_v29, %s6123_s14  ;;  %v1685_v29 = vsel %vm679_vm8, %v1683_v43, %v1684_v16  ;;  %v2356_v43 = vpop.permute.xlu0 %2355 }
 0x6d4   :  { %2435 = vrot.lane.b32.xlu1 %v2433_v30, %s6125_s17  ;;  %v3618_v30 = vstv %s6642_s26  ;;  %s5662_s26 = sld [smem:[#allocation5 + $0x5d]] }
 0x6d8   :  { %2628 = vrot.lane.b32.xlu1 %v2626_v31, %s6119_s8 }
 0x6dc   :  { %2788 = vrot.lane.b32.xlu1 %v2786_v34, %s6121_s11 }
 0x6e0   :  { %2948 = vrot.lane.b32.xlu1 %v2946_v36, %s6123_s14  ;;  %v1841_v36 = vmul.f32 %v1840_v24, %v6574_v47 }
 0x6e4   :  { %3108 = vrot.lane.b32.xlu1 %v3106_v38, %s6125_s17 }
 0x726   :  { %v1159_v18 = vpop.permute.xlu1 %1158 }
 0x727   :  { %v1160_v45 = vrot.slane %v1159_v18, 6 }
 0x729   :  { %v1161_v48 = vsel %vm868_vm1, %v1160_v45, %v1159_v18  ;;  %v2037_v45 = vrot.slane %v2036_v4, 2 }
 0x72a   :  { %1164 = vst.msk [vmem:[#allocation3 + $0x12] sm:$0x3f] %vm6533_vm4, %v1161_v48  ;;  %v1283_v52 = vpop.permute.xlu1 %1282 }
 0x72b   :  { %v1284_v54 = vrot.slane %v1283_v52, 2  ;;  %v2038_v51 = vsel %vm515_vm3, %v2036_v4, %v2037_v45  ;;  %v2198_v4 = vsel %vm597_vm6, %v2196_v17, %v2197_v60  ;;  %v1609_v45 = vstv %s6713_s2  ;;  %s5630_s2 = sld [smem:[#allocation5 + $0x59]] }
 0x72c   :  { %v1689_v60 = vstv %s5550_s10  ;;  %s5654_s10 = sld [smem:[#allocation5 + $0x5c]] }
 0x72d   :  { %v1285_v59 = vsel %vm474_vm2, %v1283_v52, %v1284_v54 }
 0x72e   :  { %v1287_v61 = vadd.f32 %v1285_v59, %v1207_v56  ;;  %v1443_v63 = vpop.permute.xlu1 %1442  ;;  %v1209_v56 = vstv %s6667_s28  ;;  %s5734_s28 = sld [smem:[#allocation5 + $0x66]] }
 0x72f   :  { %v1444_v2 = vrot.slane %v1443_v63, 2 }
 0x730   :  { %v1367_v5 = vadd.f32 %v1365_v1, %v1287_v61  ;;  %v2549_v61 = vpop.permute.xlu0 %2548 }
 0x731   :  { %v6646_v9 = vld [vmem:[#allocation3 + $0x12] sm:$0x3f]  ;;  %v1445_v10 = vsel %vm556_vm5, %v1443_v63, %v1444_v2  ;;  %v1210_v2 = vmul.f32 %v1209_v56, %v6557_v26  ;;  %v1610_v56 = vmul.f32 %v1609_v45, %v6557_v26 }
 0x732   :  { %v1447_v13 = vadd.f32 %v1445_v10, %v1367_v5  ;;  %v1603_v62 = vpop.permute.xlu1 %1602  ;;  %v3299_v14 = vmul.f32 %v3298_v57, %v6646_v9  ;;  %v3219_v15 = vmul.f32 %v3218_v7, %v6646_v9  ;;  %v3459_v27 = vmul.f32 %v3458_v20, %v6646_v9 }
 0x733   :  { %v1604_v19 = vrot.slane %v1603_v62, 2  ;;  %v3379_v12 = vmul.f32 %v3378_v21, %v6646_v9  ;;  %v3619_v38 = vmul.f32 %v3618_v30, %v6646_v9  ;;  %v3539_v39 = vmul.f32 %v3538_v28, %v6646_v9 }
 0x734   :  { %v1527_v3 = vadd.f32 %v1525_v11, %v1447_v13  ;;  %3301 = vrot.lane.b32.xlu1 %v3299_v14, %s6119_s8  ;;  %3221 = vrot.lane.b32.xlu0 %v3219_v15, %s6120_s9  ;;  %v3779_v50 = vmul.f32 %v3778_v41, %v6646_v9  ;;  %v3699_v52 = vmul.f32 %v3698_v42, %v6646_v9  ;;  %v1289_v5 = vstv %s6678_s29  ;;  %v2709_v20 = vpop.permute.xlu0 %2708  ;;  %s5750_s29 = sld [smem:[#allocation5 + $0x68]] }
 0x735   :  { %v1605_v22 = vsel %vm638_vm7, %v1603_v62, %v1604_v19  ;;  %v2357_v11 = vrot.slane %v2356_v43, 2  ;;  %v1290_v14 = vmul.f32 %v1289_v5, %v6557_v26  ;;  %v1369_v19 = vstv %s6688_s5  ;;  %s5766_s5 = sld [smem:[#allocation5 + $0x6a]] }
 0x736   :  { %v1607_v23 = vadd.f32 %v1605_v22, %v1527_v3  ;;  %v1763_v25 = vpop.permute.xlu1 %1762  ;;  %v2513_v22 = vstv %s6693_s6  ;;  %v1370_v24 = vmul.f32 %v1369_v19, %v6557_v26  ;;  %v1769_v5 = vstv %s5558_s13  ;;  %s5494_s6 = sld [smem:[#allocation5 + $0x48]]  ;;  %s5670_s13 = sld [smem:[#allocation5 + $0x5e]] }
 0x737   :  { %v1764_v55 = vrot.slane %v1763_v25, 2  ;;  %v2358_v3 = vsel %vm679_vm8, %v2356_v43, %v2357_v11 }
 0x738   :  { %v1687_v31 = vadd.f32 %v1685_v29, %v1607_v23  ;;  %3461 = vrot.lane.b32.xlu1 %v3459_v27, %s6121_s11  ;;  %3381 = vrot.lane.b32.xlu0 %v3379_v12, %s6122_s12  ;;  %v1449_v12 = vstv %s6698_s0  ;;  %v2514_v29 = vmul.f32 %v2513_v22, %v6583_v58  ;;  %v2869_v28 = vpop.permute.xlu0 %2868  ;;  %s5566_s0 = sld [smem:[#allocation5 + $0x51]] }
 0x739   :  { %v1765_v34 = vsel %vm720_vm9, %v1763_v25, %v1764_v55  ;;  %v2550_v25 = vrot.slane %v2549_v61, 2 }
 0x73a   :  { %v1767_v35 = vadd.f32 %v1765_v34, %v1687_v31  ;;  %v1956_v37 = vpop.permute.xlu1 %1955  ;;  %v1450_v34 = vmul.f32 %v1449_v12, %v6557_v26 }
 0x73b   :  { %v1957_v40 = vrot.slane %v1956_v37, 2 }
 0x73c   :  { %v1842_v18 = vadd.f32 %v1841_v36, %v1767_v35  ;;  %3621 = vrot.lane.b32.xlu1 %v3619_v38, %s6123_s14  ;;  %3541 = vrot.lane.b32.xlu0 %v3539_v39, %s6124_s15  ;;  %v2551_v35 = vsel %vm433_vm15, %v2549_v61, %v2550_v25  ;;  %v2710_v36 = vrot.slane %v2709_v20, 2 }
 0x73d   :  { %v1958_v53 = vsel %vm474_vm2, %v1956_v37, %v1957_v40  ;;  %v1529_v37 = vstv %s6705_s7  ;;  %s5574_s7 = sld [smem:[#allocation5 + $0x52]] }
 0x73e   :  { %v1880_v46 = vadd.f32 %v1878_v32, %v1842_v18  ;;  %v2116_v48 = vpop.permute.xlu1 %2115  ;;  %v1530_v43 = vmul.f32 %v1529_v37, %v6557_v26  ;;  %v2711_v18 = vsel %vm515_vm3, %v2709_v20, %v2710_v36  ;;  %v2870_v32 = vrot.slane %v2869_v28, 2 }
 0x73f   :  { %v2117_v54 = vrot.slane %v2116_v48, 2  ;;  %v2042_v20 = vstv %s5590_s20  ;;  %v3228_v36 = vstv %s5718_s1  ;;  %s5726_s20 = sld [smem:[#allocation5 + $0x65]]  ;;  %s5527_s1 = sld [smem:[#allocation5 + $0x70]] }
 0x740   :  { %v1960_v59 = vadd.f32 %v1958_v53, %v1880_v46  ;;  %3781 = vrot.lane.b32.xlu1 %v3779_v50, %s6125_s17  ;;  %3701 = vrot.lane.b32.xlu0 %v3699_v52, %s6126_s18  ;;  %v3029_v46 = vpop.permute.xlu0 %3028  ;;  %v3229_v37 = vmul.f32 %v3228_v36, %v6646_v9 }
 0x741   :  { %v2118_v57 = vsel %vm556_vm5, %v2116_v48, %v2117_v54 }
 0x742   :  { %v2040_v63 = vadd.f32 %v2038_v51, %v1960_v59  ;;  %v2276_v1 = vpop.permute.xlu1 %2275  ;;  %v2871_v59 = vsel %vm597_vm6, %v2869_v28, %v2870_v32  ;;  %v3030_v51 = vrot.slane %v3029_v46, 2 }
 0x743   :  { %v2277_v7 = vrot.slane %v2276_v1, 2 }
 0x744   :  { %v2120_v10 = vadd.f32 %v2118_v57, %v2040_v63  ;;  %1212 = vrot.lane.b32.xlu1 %v1210_v2, %s6120_s9  ;;  %v1690_v57 = vmul.f32 %v1689_v60, %v6557_v26 }
 0x745   :  { %v2278_v15 = vsel %vm638_vm7, %v2276_v1, %v2277_v7  ;;  %v3031_v7 = vsel %vm679_vm8, %v3029_v46, %v3030_v51 }
 0x746   :  { %v2200_v13 = vadd.f32 %v2198_v4, %v2120_v10  ;;  %v2436_v62 = vpop.permute.xlu1 %2435  ;;  %v3186_v10 = vstv %s5709_s16  ;;  %s5686_s16 = sld [smem:[#allocation5 + $0x60]] }
 0x747   :  { %v2437_v16 = vrot.slane %v2436_v62, 2 }
 0x748   :  { %v2280_v21 = vadd.f32 %v2278_v15, %v2200_v13  ;;  %1292 = vrot.lane.b32.xlu1 %v1290_v14, %s6119_s8  ;;  %v3187_v14 = vmul.f32 %v3186_v10, %v6646_v9  ;;  %v1962_v15 = vstv %s5582_s19  ;;  %s5702_s19 = sld [smem:[#allocation5 + $0x62]] }
 0x749   :  { %v2438_v27 = vsel %vm720_vm9, %v2436_v62, %v2437_v16  ;;  %v1770_v62 = vmul.f32 %v1769_v5, %v6557_v26  ;;  %v1963_v19 = vmul.f32 %v1962_v15, %v6574_v47 }
 0x74a   :  { %v2360_v17 = vadd.f32 %v2358_v3, %v2280_v21  ;;  %v2629_v23 = vpop.permute.xlu1 %2628  ;;  %v2043_v21 = vmul.f32 %v2042_v20, %v6574_v47  ;;  %v2122_v3 = vstv %s5598_s21  ;;  %s5742_s21 = sld [smem:[#allocation5 + $0x67]] }
 0x74b   :  { %v2630_v30 = vrot.slane %v2629_v23, 2  ;;  %v2123_v22 = vmul.f32 %v2122_v3, %v6574_v47 }
 0x74c   :  { %v2440_v55 = vadd.f32 %v2438_v27, %v2360_v17  ;;  %1372 = vrot.lane.b32.xlu1 %v1370_v24, %s6122_s12  ;;  %v2202_v17 = vstv %s5606_s22  ;;  %v2282_v24 = vstv %s5614_s23  ;;  %v2362_v27 = vstv %s5622_s24  ;;  %s5758_s22 = sld [smem:[#allocation5 + $0x69]]  ;;  %s5774_s23 = sld [smem:[#allocation5 + $0x6b]] }
 0x74d   :  { %v2631_v39 = vsel %vm474_vm2, %v2629_v23, %v2630_v30  ;;  %v2203_v23 = vmul.f32 %v2202_v17, %v6574_v47  ;;  %v2283_v25 = vmul.f32 %v2282_v24, %v6574_v47  ;;  %v2363_v12 = vmul.f32 %v2362_v27, %v6574_v47  ;;  %s5638_s24 = sld [smem:[#allocation5 + $0x5a]] }
 0x74e   :  { %v2515_v31 = vadd.f32 %v2514_v29, %v2440_v55  ;;  %v2789_v33 = vpop.permute.xlu1 %2788  ;;  %v2555_v29 = vstv %s5646_s25  ;;  %v2715_v30 = vstv %s5662_s26  ;;  %s5710_s25 = sld [smem:[#allocation5 + $0x63]] }
 0x74f   :  { %v2790_v40 = vrot.slane %v2789_v33, 2  ;;  %v2556_v55 = vmul.f32 %v2555_v29, %v6583_v58  ;;  %v2716_v28 = vmul.f32 %v2715_v30, %v6583_v58 }
 0x750   :  { %v2553_v38 = vadd.f32 %v2551_v35, %v2515_v31  ;;  %1452 = vrot.lane.b32.xlu1 %v1450_v34, %s6121_s11  ;;  %v2875_v31 = vstv %s5678_s27  ;;  %v3035_v34 = vstv %s5694_s3  ;;  %s5503_s3 = sld [smem:[#allocation5 + $0x6d]] }
 0x751   :  { %v2791_v50 = vsel %vm556_vm5, %v2789_v33, %v2790_v40  ;;  %v2876_v33 = vmul.f32 %v2875_v31, %v6583_v58  ;;  %v3036_v35 = vmul.f32 %v3035_v34, %v6583_v58  ;;  %v3548_v40 = vstv %s5750_s29  ;;  %s5543_s29 = sld [smem:[#allocation5 + $0x72]] }
 0x752   :  { %v2633_v41 = vadd.f32 %v2631_v39, %v2553_v38  ;;  %v2949_v42 = vpop.permute.xlu1 %2948  ;;  %v3388_v38 = vstv %s5734_s28  ;;  %s5511_s28 = sld [smem:[#allocation5 + $0x6e]] }
 0x753   :  { %v2950_v52 = vrot.slane %v2949_v42, 2  ;;  %v3389_v39 = vmul.f32 %v3388_v38, %v6646_v9 }
 0x754   :  { %v2713_v48 = vadd.f32 %v2711_v18, %v2633_v41  ;;  %1532 = vrot.lane.b32.xlu1 %v1530_v43, %s6124_s15  ;;  %v3549_v41 = vmul.f32 %v3548_v40, %v6646_v9 }
 0x755   :  { %v2951_v63 = vsel %vm638_vm7, %v2949_v42, %v2950_v52  ;;  %v3708_v42 = vstv %s5766_s5  ;;  %s5519_s5 = sld [smem:[#allocation5 + $0x6f]] }
 0x756   :  { %v2793_v53 = vadd.f32 %v2791_v50, %v2713_v48  ;;  %v3109_v54 = vpop.permute.xlu1 %3108  ;;  %v3709_v43 = vmul.f32 %v3708_v42, %v6646_v9 }
 0x757   :  { %v3110_v1 = vrot.slane %v3109_v54, 2 }
 0x758   :  { %v2873_v61 = vadd.f32 %v2871_v59, %v2793_v53  ;;  %1612 = vrot.lane.b32.xlu1 %v1610_v56, %s6123_s14 }
 0x759   :  { %v3111_v11 = vsel %vm720_vm9, %v3109_v54, %v3110_v1 }
 0x75a   :  { %v2953_v2 = vadd.f32 %v2951_v63, %v2873_v61 }
 0x75c   :  { %v3033_v4 = vadd.f32 %v3031_v7, %v2953_v2  ;;  %1692 = vrot.lane.b32.xlu1 %v1690_v57, %s6126_s18 }
 0x75e   :  { %v3113_v13 = vadd.f32 %v3111_v11, %v3033_v4 }
 0x760   :  { %1772 = vrot.lane.b32.xlu1 %v1770_v62, %s6125_s17  ;;  %v3188_v16 = vadd.f32 %v3187_v14, %v3113_v13 }
 0x764   :  { %1965 = vrot.lane.b32.xlu1 %v1963_v19, %s6119_s8 }
 0x768   :  { %2045 = vrot.lane.b32.xlu1 %v2043_v21, %s6122_s12 }
 0x76c   :  { %2125 = vrot.lane.b32.xlu1 %v2123_v22, %s6121_s11 }
 0x770   :  { %2205 = vrot.lane.b32.xlu1 %v2203_v23, %s6124_s15 }
 0x774   :  { %2285 = vrot.lane.b32.xlu1 %v2283_v25, %s6123_s14 }
 0x778   :  { %2365 = vrot.lane.b32.xlu1 %v2363_v12, %s6126_s18 }
 0x77c   :  { %2558 = vrot.lane.b32.xlu1 %v2556_v55, %s6120_s9 }
 0x780   :  { %2718 = vrot.lane.b32.xlu1 %v2716_v28, %s6122_s12 }
 0x784   :  { %2878 = vrot.lane.b32.xlu1 %v2876_v33, %s6124_s15 }
 0x788   :  { %3038 = vrot.lane.b32.xlu1 %v3036_v35, %s6126_s18  ;;  %v1171_v35 = vstv %s5494_s6  ;;  %s5559_s6 = sld [smem:[#allocation5 + $0x74]] }
 0x789   :  { %v1172_v40 = vmul.f32 %v1171_v35, %v6557_v26 }
 0x78c   :  { %3231 = vrot.lane.b32.xlu1 %v3229_v37, %s6120_s9 }
 0x790   :  { %3391 = vrot.lane.b32.xlu1 %v3389_v39, %s6122_s12 }
 0x794   :  { %3551 = vrot.lane.b32.xlu1 %v3549_v41, %s6124_s15 }
 0x798   :  { %3711 = vrot.lane.b32.xlu1 %v3709_v43, %s6126_s18 }
 0x7a6   :  { %v3302_v18 = vpop.permute.xlu1 %3301  ;;  %v3222_v32 = vpop.permute.xlu0 %3221 }
 0x7a7   :  { %v3303_v45 = vrot.slane %v3302_v18, 2  ;;  %v3223_v46 = vrot.slane %v3222_v32, 2 }
 0x7a9   :  { %v3224_v48 = vsel %vm433_vm15, %v3222_v32, %v3223_v46  ;;  %v3304_v54 = vsel %vm474_vm2, %v3302_v18, %v3303_v45 }
 0x7aa   :  { %v3226_v50 = vadd.f32 %v3224_v48, %v3188_v16  ;;  %v3462_v52 = vpop.permute.xlu1 %3461  ;;  %v3382_v53 = vpop.permute.xlu0 %3381 }
 0x7ab   :  { %v3463_v56 = vrot.slane %v3462_v52, 2  ;;  %v3383_v59 = vrot.slane %v3382_v53, 2 }
 0x7ac   :  { %v3306_v51 = vadd.f32 %v3304_v54, %v3226_v50 }
 0x7ad   :  { %v3384_v60 = vsel %vm515_vm3, %v3382_v53, %v3383_v59  ;;  %v3464_v2 = vsel %vm556_vm5, %v3462_v52, %v3463_v56 }
 0x7ae   :  { %v3386_v61 = vadd.f32 %v3384_v60, %v3306_v51  ;;  %v3622_v63 = vpop.permute.xlu1 %3621  ;;  %v3542_v1 = vpop.permute.xlu0 %3541 }
 0x7af   :  { %v3623_v57 = vrot.slane %v3622_v63, 2  ;;  %v3543_v7 = vrot.slane %v3542_v1, 2 }
 0x7b0   :  { %v3466_v5 = vadd.f32 %v3464_v2, %v3386_v61 }
 0x7b1   :  { %v3544_v10 = vsel %vm597_vm6, %v3542_v1, %v3543_v7  ;;  %v3624_v62 = vsel %vm638_vm7, %v3622_v63, %v3623_v57  ;;  %v1844_v57 = vstv %s5566_s0  ;;  %s5535_s0 = sld [smem:[#allocation5 + $0x71]] }
 0x7b2   :  { %v3546_v4 = vadd.f32 %v3544_v10, %v3466_v5  ;;  %v3782_v11 = vpop.permute.xlu1 %3781  ;;  %v3702_v13 = vpop.permute.xlu0 %3701 }
 0x7b3   :  { %v3783_v14 = vrot.slane %v3782_v11, 2  ;;  %v3703_v15 = vrot.slane %v3702_v13, 2 }
 0x7b4   :  { %v3626_v16 = vadd.f32 %v3624_v62, %v3546_v4  ;;  %v1882_v4 = vstv %s5574_s7  ;;  %s5583_s7 = sld [smem:[#allocation5 + $0x77]] }
 0x7b5   :  { %v3704_v19 = vsel %vm679_vm8, %v3702_v13, %v3703_v15  ;;  %v3784_v3 = vsel %vm720_vm9, %v3782_v11, %v3783_v14  ;;  %v1845_v11 = vmul.f32 %v1844_v57, %v6574_v47  ;;  %v1883_v62 = vmul.f32 %v1882_v4, %v6574_v47 }
 0x7b6   :  { %v3706_v20 = vadd.f32 %v3704_v19, %v3626_v16  ;;  %v1213_v21 = vpop.permute.xlu1 %1212  ;;  %v2442_v14 = vstv %s5630_s2  ;;  %v2635_v16 = vstv %s5654_s10  ;;  %s5551_s2 = sld [smem:[#allocation5 + $0x73]]  ;;  %s5599_s10 = sld [smem:[#allocation5 + $0x79]] }
 0x7b7   :  { %v1214_v28 = vrot.slane %v1213_v21, 2  ;;  %v2443_v15 = vmul.f32 %v2442_v14, %v6574_v47  ;;  %v2636_v19 = vmul.f32 %v2635_v16, %v6583_v58 }
 0x7b8   :  { %v6774_v22 = vadd.f32 %v3784_v3, %v3706_v20  ;;  %v2795_v20 = vstv %s5670_s13  ;;  %v2955_v3 = vstv %s5686_s16  ;;  %s5575_s13 = sld [smem:[#allocation5 + $0x76]]  ;;  %s5615_s16 = sld [smem:[#allocation5 + $0x7b]] }
 0x7b9   :  { %v1215_v38 = vsel %vm433_vm15, %v1213_v21, %v1214_v28  ;;  %v2796_v21 = vmul.f32 %v2795_v20, %v6583_v58 }
 0x7ba   :  { %v1293_v17 = vpop.permute.xlu1 %1292  ;;  %v3857_v23 = vmul.f32 %v6774_v22, %v6394_v8  ;;  %v1217_v18 = vadd.f32 %v1215_v38, %v1172_v40 }
 0x7bb   :  { %v1294_v36 = vrot.slane %v1293_v17, 2 }
 0x7bc   :  { %v3859_v24 = vcombine.high %v3857_v23, %v3857_v23  ;;  %v3866_v25 = vrot.slane %v3857_v23, %v6385_v49  ;;  %v3115_v23 = vstv %s5702_s19  ;;  %s5591_s19 = sld [smem:[#allocation5 + $0x78]] }
 0x7bd   :  { %v1295_v42 = vsel %vm474_vm2, %v1293_v17, %v1294_v36  ;;  %v2956_v17 = vmul.f32 %v2955_v3, %v6583_v58  ;;  %v3116_v47 = vmul.f32 %v3115_v23, %v6583_v58 }
 0x7be   :  { %v1373_v27 = vpop.permute.xlu1 %1372  ;;  %v3873_v12 = vrot.slane %v3859_v24, %v6385_v49  ;;  %v3874_v29 = vcombine.high %v3866_v25, %v3866_v25  ;;  %v3878_v55 = vsel %vm795_vm10, %v3866_v25, 0.0  ;;  %v1297_v46 = vadd.f32 %v1295_v42, %v1217_v18 }
 0x7bf   :  { %v1374_v39 = vrot.slane %v1373_v27, 2  ;;  %v3308_v24 = vstv %s5726_s20  ;;  %s5631_s20 = sld [smem:[#allocation5 + $0x7d]] }
 0x7c0   :  { %v3879_v30 = vsel %vm795_vm10, %v3874_v29, 0.0  ;;  %v3881_v34 = vsel %vm799_vm11, %v3873_v12, 0.0  ;;  %v3309_v25 = vmul.f32 %v3308_v24, %v6646_v9  ;;  %v3628_v29 = vstv %s5758_s22  ;;  %s5655_s22 = sld [smem:[#allocation5 + $0x80]] }
 0x7c1   :  { %v3880_v31 = vadd.f32 %v3879_v30, %v3878_v55  ;;  %v1375_v32 = vsel %vm515_vm3, %v1373_v27, %v1374_v39  ;;  %v3468_v27 = vstv %s5742_s21  ;;  %v3629_v55 = vmul.f32 %v3628_v29, %v6646_v9  ;;  %s5607_s21 = sld [smem:[#allocation5 + $0x7a]] }
 0x7c2   :  { %v1453_v33 = vpop.permute.xlu1 %1452  ;;  %v1377_v53 = vadd.f32 %v1375_v32, %v1297_v46  ;;  %v3469_v12 = vmul.f32 %v3468_v27, %v6646_v9  ;;  %v3788_v30 = vstv %s5774_s23  ;;  %s5623_s23 = sld [smem:[#allocation5 + $0x7c]] }
 0x7c3   :  { %v3882_v37 = vadd.f32 %v3881_v34, %v3880_v31  ;;  %v1454_v43 = vrot.slane %v1453_v33, 2  ;;  %v3789_v28 = vmul.f32 %v3788_v30, %v6646_v9 }
 0x7c5   :  { %3883 = vadd.xlane.f32.xlu0 %v3882_v37  ;;  %v1455_v50 = vsel %vm556_vm5, %v1453_v33, %v1454_v43 }
 0x7c6   :  { %v1533_v41 = vpop.permute.xlu1 %1532  ;;  %v1457_v56 = vadd.f32 %v1455_v50, %v1377_v53 }
 0x7c7   :  { %v1534_v45 = vrot.slane %v1533_v41, 2 }
 0x7c9   :  { %v1535_v54 = vsel %vm597_vm6, %v1533_v41, %v1534_v45 }
 0x7ca   :  { %v1613_v48 = vpop.permute.xlu1 %1612  ;;  %v1537_v60 = vadd.f32 %v1535_v54, %v1457_v56 }
 0x7cb   :  { %v1614_v52 = vrot.slane %v1613_v48, 2 }
 0x7cd   :  { %v1615_v26 = vsel %vm638_vm7, %v1613_v48, %v1614_v52 }
 0x7ce   :  { %v1693_v59 = vpop.permute.xlu1 %1692  ;;  %v1617_v63 = vadd.f32 %v1615_v26, %v1537_v60 }
 0x7cf   :  { %v1694_v51 = vrot.slane %v1693_v59, 2 }
 0x7d1   :  { %v1695_v61 = vsel %vm679_vm8, %v1693_v59, %v1694_v51 }
 0x7d2   :  { %v1773_v1 = vpop.permute.xlu1 %1772  ;;  %v1697_v7 = vadd.f32 %v1695_v61, %v1617_v63 }
 0x7d3   :  { %v1774_v2 = vrot.slane %v1773_v1, 2 }
 0x7d5   :  { %v1775_v5 = vsel %vm720_vm9, %v1773_v1, %v1774_v2 }
 0x7d6   :  { %v1777_v10 = vadd.f32 %v1775_v5, %v1697_v7  ;;  %v1966_v31 = vpop.permute.xlu1 %1965 }
 0x7d7   :  { %v1967_v42 = vrot.slane %v1966_v31, 2 }
 0x7d8   :  { %v1846_v13 = vadd.f32 %v1845_v11, %v1777_v10 }
 0x7d9   :  { %v1968_v53 = vsel %vm474_vm2, %v1966_v31, %v1967_v42 }
 0x7da   :  { %v2046_v33 = vpop.permute.xlu1 %2045 }
 0x7db   :  { %1885 = vrot.lane.b32.xlu0 %v1883_v62, %s6120_s9  ;;  %v2047_v45 = vrot.slane %v2046_v33, 2 }
 0x7dd   :  { %v2048_v26 = vsel %vm515_vm3, %v2046_v33, %v2047_v45 }
 0x7de   :  { %v2126_v34 = vpop.permute.xlu1 %2125 }
 0x7df   :  { %2445 = vrot.lane.b32.xlu0 %v2443_v15, %s6125_s17  ;;  %v2127_v54 = vrot.slane %v2126_v34, 2 }
 0x7e1   :  { %v2128_v2 = vsel %vm556_vm5, %v2126_v34, %v2127_v54 }
 0x7e2   :  { %v2206_v35 = vpop.permute.xlu1 %2205 }
 0x7e3   :  { %2638 = vrot.lane.b32.xlu0 %v2636_v19, %s6119_s8  ;;  %v2207_v51 = vrot.slane %v2206_v35, 2  ;;  %v2517_v19 = vstv %s5638_s24  ;;  %s5671_s24 = sld [smem:[#allocation5 + $0x82]] }
 0x7e4   :  { %v2518_v23 = vmul.f32 %v2517_v19, %v6583_v58 }
 0x7e5   :  { %v2208_v5 = vsel %vm597_vm6, %v2206_v35, %v2207_v51 }
 0x7e6   :  { %v2286_v36 = vpop.permute.xlu1 %2285 }
 0x7e7   :  { %2798 = vrot.lane.b32.xlu0 %v2796_v21, %s6121_s11  ;;  %v2287_v57 = vrot.slane %v2286_v36, 2 }
 0x7ea   :  { %v2366_v37 = vpop.permute.xlu1 %2365 }
 0x7eb   :  { %2958 = vrot.lane.b32.xlu0 %v2956_v17, %s6123_s14  ;;  %v2367_v10 = vrot.slane %v2366_v37, 2 }
 0x7ed   :  { %v2368_v16 = vsel %vm679_vm8, %v2366_v37, %v2367_v10 }
 0x7ee   :  { %v2559_v32 = vpop.permute.xlu1 %2558 }
 0x7ef   :  { %3118 = vrot.lane.b32.xlu0 %v3116_v47, %s6125_s17  ;;  %v2560_v3 = vrot.slane %v2559_v32, 2 }
 0x7f2   :  { %v2719_v61 = vpop.permute.xlu1 %2718 }
 0x7f3   :  { %3311 = vrot.lane.b32.xlu0 %v3309_v25, %s6119_s8  ;;  %v2720_v29 = vrot.slane %v2719_v61, 2 }
 0x7f5   :  { %v2721_v34 = vsel %vm515_vm3, %v2719_v61, %v2720_v29 }
 0x7f6   :  { %v2879_v14 = vpop.permute.xlu1 %2878 }
 0x7f7   :  { %3471 = vrot.lane.b32.xlu0 %v3469_v12, %s6121_s11  ;;  %v2561_v12 = vsel %vm433_vm15, %v2559_v32, %v2560_v3  ;;  %v2880_v35 = vrot.slane %v2879_v14, 2 }
 0x7fa   :  { %v3039_v25 = vpop.permute.xlu1 %3038 }
 0x7fb   :  { %3631 = vrot.lane.b32.xlu0 %v3629_v55, %s6123_s14  ;;  %v3040_v42 = vrot.slane %v3039_v25, 2 }
 0x7ff   :  { %3791 = vrot.lane.b32.xlu0 %v3789_v28, %s6125_s17 }
 0x852   :  { %v3884_v38 = vpop.xlane.xlu0 %3883 }
 0x853   :  { %v3885_v39 = vrot.slane %v3884_v38, 4 }
 0x855   :  { %v3886_v40 = vadd.f32 %v3885_v39, %v3884_v38 }
 0x856   :  { %v1886_v41 = vpop.permute.xlu0 %1885 }
 0x857   :  { %v1887_v43 = vrot.slane %v1886_v41, 2  ;;  %v3887_v18 = vrot.slane %v3886_v40, 2 }
 0x859   :  { %v1888_v46 = vsel %vm433_vm15, %v1886_v41, %v1887_v43  ;;  %v3888_v48 = vadd.f32 %v3887_v18, %v3886_v40  ;;  %v2881_v41 = vsel %vm597_vm6, %v2879_v14, %v2880_v35 }
 0x85a   :  { %v1890_v50 = vadd.f32 %v1888_v46, %v1846_v13  ;;  %v2446_v52 = vpop.permute.xlu0 %2445  ;;  %v2288_v13 = vsel %vm638_vm7, %v2286_v36, %v2287_v57  ;;  %v3232_v36 = vpop.permute.xlu1 %3231 }
 0x85b   :  { %v3889_v56 = vrot.slane %v3888_v48, 1  ;;  %v2447_v62 = vrot.slane %v2446_v52, 2  ;;  %v3233_v54 = vrot.slane %v3232_v36, 2 }
 0x85c   :  { %v1970_v59 = vadd.f32 %v1968_v53, %v1890_v50  ;;  %v3190_v50 = vstv %s5710_s25  ;;  %s5647_s25 = sld [smem:[#allocation5 + $0x7f]] }
 0x85d   :  { %v3890_v60 = vadd.f32 %v3889_v56, %v3888_v48  ;;  %v2448_v17 = vsel %vm720_vm9, %v2446_v52, %v2447_v62  ;;  %v3041_v48 = vsel %vm679_vm8, %v3039_v25, %v3040_v42 }
 0x85e   :  { %v2050_v63 = vadd.f32 %v2048_v26, %v1970_v59  ;;  %v2639_v1 = vpop.permute.xlu0 %2638  ;;  %v3392_v45 = vpop.permute.xlu1 %3391  ;;  %v3191_v59 = vmul.f32 %v3190_v50, %v6646_v9  ;;  %v6859_v50 = vld [vmem:[#allocation3] sm:$0x3f] }
 0x85f   :  { %5899 = vpush %v3890_v60  ;;  %v2640_v24 = vrot.slane %v2639_v1, 2 }
 0x860   :  { %v2130_v7 = vadd.f32 %v2128_v2, %v2050_v63  ;;  %v3234_v63 = vsel %vm433_vm15, %v3232_v36, %v3233_v54  ;;  %v1299_v54 = vstv %s5511_s28  ;;  %s5727_s28 = sld [smem:[#allocation5 + $0x89]] }
 0x861   :  { %v2641_v28 = vsel %vm474_vm2, %v2639_v1, %v2640_v24  ;;  %v3393_v1 = vrot.slane %v3392_v45, 2 }
 0x862   :  { %v2210_v4 = vadd.f32 %v2208_v5, %v2130_v7  ;;  %v2799_v11 = vpop.permute.xlu0 %2798  ;;  %v3552_v60 = vpop.permute.xlu1 %3551 }
 0x863   :  { %v2800_v31 = vrot.slane %v2799_v11, 2 }
 0x864   :  { %v2290_v15 = vadd.f32 %v2288_v13, %v2210_v4  ;;  %v3394_v4 = vsel %vm515_vm3, %v3392_v45, %v3393_v1  ;;  %v1539_v1 = vstv %s5535_s0  ;;  %s5759_s0 = sld [smem:[#allocation5 + $0x8d]] }
 0x865   :  { %v2801_v58 = vsel %vm556_vm5, %v2799_v11, %v2800_v31  ;;  %v3553_v11 = vrot.slane %v3552_v60, 2 }
 0x866   :  { %v2370_v20 = vadd.f32 %v2368_v16, %v2290_v15  ;;  %v2959_v21 = vpop.permute.xlu0 %2958  ;;  %v3712_v13 = vpop.permute.xlu1 %3711 }
 0x867   :  { %v2960_v38 = vrot.slane %v2959_v21, 2  ;;  %v3554_v19 = vsel %vm597_vm6, %v3552_v60, %v3553_v11 }
 0x868   :  { %v2450_v47 = vadd.f32 %v2448_v17, %v2370_v20  ;;  %v3713_v20 = vrot.slane %v3712_v13, 2 }
 0x869   :  { %v2961_v18 = vsel %vm638_vm7, %v2959_v21, %v2960_v38 }
 0x86a   :  { %v2519_v27 = vadd.f32 %v2518_v23, %v2450_v47  ;;  %v3119_v30 = vpop.permute.xlu0 %3118  ;;  %v3714_v47 = vsel %vm679_vm8, %v3712_v13, %v3713_v20  ;;  %v2132_v13 = vstv %s5599_s10  ;;  %s5751_s10 = sld [smem:[#allocation5 + $0x8c]] }
 0x86b   :  { %v3120_v32 = vrot.slane %v3119_v30, 2 }
 0x86c   :  { %v2563_v55 = vadd.f32 %v2561_v12, %v2519_v27 }
 0x86d   :  { %v3121_v56 = vsel %vm720_vm9, %v3119_v30, %v3120_v32 }
 0x86e   :  { %v2643_v33 = vadd.f32 %v2641_v28, %v2563_v55  ;;  %v3312_v40 = vpop.permute.xlu0 %3311 }
 0x86f   :  { %v3313_v51 = vrot.slane %v3312_v40, 2 }
 0x870   :  { %v2723_v37 = vadd.f32 %v2721_v34, %v2643_v33 }
 0x871   :  { %v3314_v7 = vsel %vm474_vm2, %v3312_v40, %v3313_v51  ;;  %v1379_v51 = vstv %s5519_s5  ;;  %s5743_s5 = sld [smem:[#allocation5 + $0x8b]] }
 0x872   :  { %v2803_v39 = vadd.f32 %v2801_v58, %v2723_v37  ;;  %v3472_v53 = vpop.permute.xlu0 %3471 }
 0x873   :  { %v3473_v5 = vrot.slane %v3472_v53, 2 }
 0x874   :  { %v2883_v43 = vadd.f32 %v2881_v41, %v2803_v39 }
 0x875   :  { %v3474_v9 = vsel %vm556_vm5, %v3472_v53, %v3473_v5  ;;  %v1459_v53 = vstv %s5527_s1  ;;  %v1699_v5 = vstv %s5551_s2  ;;  %s5679_s1 = sld [smem:[#allocation5 + $0x83]]  ;;  %s5775_s2 = sld [smem:[#allocation5 + $0x8f]] }
 0x876   :  { %v2963_v46 = vadd.f32 %v2961_v18, %v2883_v43  ;;  %v3632_v57 = vpop.permute.xlu0 %3631  ;;  %v1700_v11 = vmul.f32 %v6859_v50, %v1699_v5 }
 0x877   :  { %v3633_v14 = vrot.slane %v3632_v57, 2 }
 0x878   :  { %v3043_v52 = vadd.f32 %v3041_v48, %v2963_v46  ;;  %v1219_v48 = vstv %s5503_s3  ;;  %s5703_s3 = sld [smem:[#allocation5 + $0x86]] }
 0x879   :  { %v3634_v3 = vsel %vm638_vm7, %v3632_v57, %v3633_v14  ;;  %v1540_v57 = vmul.f32 %v6859_v50, %v1539_v1 }
 0x87a   :  { %v3123_v26 = vadd.f32 %v3121_v56, %v3043_v52  ;;  %v3792_v16 = vpop.permute.xlu0 %3791  ;;  %v1220_v52 = vmul.f32 %v6859_v50, %v1219_v48  ;;  %v1460_v56 = vmul.f32 %v6859_v50, %v1459_v53 }
 0x87b   :  { %v3793_v17 = vrot.slane %v3792_v16, 2 }
 0x87c   :  { %v3192_v61 = vadd.f32 %v3191_v59, %v3123_v26  ;;  %v1300_v59 = vmul.f32 %v6859_v50, %v1299_v54  ;;  %v1619_v26 = vstv %s5543_s29  ;;  %s5695_s29 = sld [smem:[#allocation5 + $0x85]] }
 0x87d   :  { %v3794_v25 = vsel %vm720_vm9, %v3792_v16, %v3793_v17  ;;  %v1620_v60 = vmul.f32 %v6859_v50, %v1619_v26  ;;  %v2052_v16 = vstv %s5591_s19  ;;  %v3558_v26 = vstv %s5751_s10  ;;  %s5567_s19 = sld [smem:[#allocation5 + $0x75]]  ;;  %s5672_s10 = sld [smem:[#allocation5 + $0xa6]] }
 0x87e   :  { %v3236_v2 = vadd.f32 %v3234_v63, %v3192_v61  ;;  %v1380_v61 = vmul.f32 %v6859_v50, %v1379_v51  ;;  %v1779_v63 = vstv %s5559_s6  ;;  %s5719_s6 = sld [smem:[#allocation5 + $0x88]] }
 0x880   :  { %v3316_v10 = vadd.f32 %v3314_v7, %v3236_v2  ;;  %v1780_v2 = vmul.f32 %v6859_v50, %v1779_v63  ;;  %v1972_v7 = vstv %s5583_s7  ;;  %s5735_s7 = sld [smem:[#allocation5 + $0x8a]] }
 0x882   :  { %v3396_v62 = vadd.f32 %v3394_v4, %v3316_v10  ;;  %v6875_v10 = vld [vmem:[#allocation3 + $0x6] sm:$0x3f] }
 0x883   :  { %v1973_v4 = vmul.f32 %v6875_v10, %v1972_v7  ;;  %v2053_v20 = vmul.f32 %v6875_v10, %v2052_v16 }
 0x884   :  { %v3476_v15 = vadd.f32 %v3474_v9, %v3396_v62  ;;  %v1892_v62 = vstv %s5575_s13  ;;  %v2133_v9 = vmul.f32 %v6875_v10, %v2132_v13  ;;  %s5767_s13 = sld [smem:[#allocation5 + $0x8e]] }
 0x885   :  { %v1893_v14 = vmul.f32 %v6875_v10, %v1892_v62 }
 0x886   :  { %v3556_v21 = vadd.f32 %v3554_v19, %v3476_v15  ;;  %v2292_v15 = vstv %s5615_s16  ;;  %v3398_v53 = vstv %s5735_s7  ;;  %s5495_s16 = sld [smem:[#allocation5 + $0x6c]] }
 0x887   :  { %v2293_v19 = vmul.f32 %v6875_v10, %v2292_v15 }
 0x888   :  { %v3636_v23 = vadd.f32 %v3634_v3, %v3556_v21  ;;  %v2452_v21 = vstv %s5631_s20  ;;  %v2212_v3 = vstv %s5607_s21  ;;  %s5639_s20 = sld [smem:[#allocation5 + $0x7e]]  ;;  %s5711_s21 = sld [smem:[#allocation5 + $0x87]] }
 0x889   :  { %v2453_v17 = vmul.f32 %v6875_v10, %v2452_v21 }
 0x88a   :  { %v3716_v24 = vadd.f32 %v3714_v47, %v3636_v23  ;;  %v2213_v23 = vmul.f32 %v6875_v10, %v2212_v3  ;;  %v2645_v47 = vstv %s5655_s22 }
 0x88c   :  { %v6839_v27 = vadd.f32 %v3794_v25, %v3716_v24  ;;  %v2372_v24 = vstv %s5623_s23  ;;  %v6893_v25 = vld [vmem:[#allocation3 + $0xc] sm:$0x3f]  ;;  %v1175_v13 = vstv %s5495_s16  ;;  %s5704_s16 = sld [smem:[#allocation5 + $0xaa]] }
 0x88e   :  { %v3952_v12 = vmul.f32 %v6839_v27, %v6394_v8 }
 0x890   :  { %v3954_v29 = vcombine.high %v3952_v12, %v3952_v12  ;;  %v3961_v55 = vrot.slane %v3952_v12, %v6385_v49  ;;  %s5900_s26 = spop %5899  ;;  %v2646_v12 = vmul.f32 %v6893_v25, %v2645_v47 }
 0x891   :  { %s3892_s27 = smul.f32 0.001953125, %s5900_s26  ;;  %s5687_s26 = sld [smem:[#allocation5 + $0x84]] }
 0x892   :  { %v3968_v30 = vrot.slane %v3954_v29, %v6385_v49  ;;  %v3969_v28 = vcombine.high %v3961_v55, %v3961_v55  ;;  %v3973_v34 = vsel %vm795_vm10, %v3961_v55, 0.0  ;;  %v2373_v29 = vmul.f32 %v6875_v10, %v2372_v24 }
 0x893   :  { %v3893_v31 = vstv %s3892_s27  ;;  %s5663_s27 = sld [smem:[#allocation5 + $0x81]]  ;;  %v2805_v55 = vstv %s5671_s24 }
 0x894   :  { %v6846_v33 = vsub.f32 %v6774_v22, %v3893_v31  ;;  %v3974_v35 = vsel %vm795_vm10, %v3969_v28, 0.0  ;;  %v3976_v58 = vsel %vm799_vm11, %v3968_v30, 0.0  ;;  %v2565_v30 = vstv %s5647_s25  ;;  %s5504_s25 = sld [smem:[#allocation5 + $0x91]] }
 0x895   :  { %v3975_v36 = vadd.f32 %v3974_v35, %v3973_v34  ;;  %v2806_v28 = vmul.f32 %v6893_v25, %v2805_v55  ;;  %v2566_v31 = vmul.f32 %v6893_v25, %v2565_v30 }
 0x896   :  { %v3895_v37 = vmul.f32 %v6846_v33, %v6846_v33 }
 0x897   :  { %v3977_v38 = vadd.f32 %v3976_v58, %v3975_v36  ;;  %v2965_v34 = vstv %s5687_s26  ;;  %v3125_v58 = vstv %s5703_s3  ;;  %s5528_s26 = sld [smem:[#allocation5 + $0x94]]  ;;  %s5560_s3 = sld [smem:[#allocation5 + $0x98]] }
 0x898   :  { %v3896_v39 = vmul.f32 %v3895_v37, %v6394_v8  ;;  %v2966_v36 = vmul.f32 %v6893_v25, %v2965_v34 }
 0x899   :  { %3978 = vadd.xlane.f32.xlu0 %v3977_v38  ;;  %v2725_v35 = vstv %s5663_s27  ;;  %v2885_v38 = vstv %s5679_s1  ;;  %s5544_s27 = sld [smem:[#allocation5 + $0x96]]  ;;  %s5584_s1 = sld [smem:[#allocation5 + $0x9b]] }
 0x89a   :  { %v3898_v40 = vcombine.high %v3896_v39, %v3896_v39  ;;  %v3905_v41 = vrot.slane %v3896_v39, %v6385_v49  ;;  %v2726_v37 = vmul.f32 %v6893_v25, %v2725_v35  ;;  %v3126_v39 = vmul.f32 %v6893_v25, %v3125_v58 }
 0x89c   :  { %v3912_v22 = vrot.slane %v3898_v40, %v6385_v49  ;;  %v3913_v42 = vcombine.high %v3905_v41, %v3905_v41  ;;  %v3917_v43 = vsel %vm795_vm10, %v3905_v41, 0.0  ;;  %v2886_v40 = vmul.f32 %v6893_v25, %v2885_v38 }
 0x89d   :  { %v3318_v41 = vstv %s5727_s28  ;;  %s5600_s28 = sld [smem:[#allocation5 + $0x9d]] }
 0x89e   :  { %v3918_v18 = vsel %vm795_vm10, %v3913_v42, 0.0  ;;  %v3920_v45 = vsel %vm799_vm11, %v3912_v22, 0.0  ;;  %v3045_v22 = vstv %s5695_s29  ;;  %v6911_v42 = vld [vmem:[#allocation3 + $0x12] sm:$0x3f]  ;;  %s5616_s29 = sld [smem:[#allocation5 + $0x9f]] }
 0x89f   :  { %v3919_v32 = vadd.f32 %v3918_v18, %v3917_v43  ;;  %v3319_v43 = vmul.f32 %v6911_v42, %v3318_v41  ;;  %v3046_v18 = vmul.f32 %v6893_v25, %v3045_v22 }
 0x8a1   :  { %v3921_v46 = vadd.f32 %v3920_v45, %v3919_v32  ;;  %v3478_v32 = vstv %s5743_s5  ;;  %v3238_v45 = vstv %s5719_s6  ;;  %s5632_s5 = sld [smem:[#allocation5 + $0xa1]] }
 0x8a2   :  { %v3239_v48 = vmul.f32 %v6911_v42, %v3238_v45 }
 0x8a3   :  { %3922 = vadd.xlane.f32.xlu1 %v3921_v46  ;;  %v3479_v46 = vmul.f32 %v6911_v42, %v3478_v32 }
 0x8af   :  { %1222 = vrot.lane.b32.xlu0 %v1220_v52, %s6120_s9  ;;  %v3638_v52 = vstv %s5759_s0 }
 0x8b0   :  { %v3639_v54 = vmul.f32 %v6911_v42, %v3638_v52 }
 0x8b3   :  { %1462 = vrot.lane.b32.xlu0 %v1460_v56, %s6121_s11  ;;  %v3399_v56 = vmul.f32 %v6911_v42, %v3398_v53 }
 0x8b4   :  { %1302 = vrot.lane.b32.xlu1 %v1300_v59, %s6119_s8  ;;  %v3798_v59 = vstv %s5775_s2  ;;  %s5656_s2 = sld [smem:[#allocation5 + $0xa4]] }
 0x8b5   :  { %v3799_v51 = vmul.f32 %v6911_v42, %v3798_v59 }
 0x8b7   :  { %1622 = vrot.lane.b32.xlu0 %v1620_v60, %s6123_s14  ;;  %v3559_v60 = vmul.f32 %v6911_v42, %v3558_v26 }
 0x8b8   :  { %1382 = vrot.lane.b32.xlu1 %v1380_v61, %s6122_s12  ;;  %v3718_v61 = vstv %s5767_s13  ;;  %s5688_s13 = sld [smem:[#allocation5 + $0xa8]] }
 0x8b9   :  { %v3719_v63 = vmul.f32 %v6911_v42, %v3718_v61 }
 0x8bb   :  { %1782 = vrot.lane.b32.xlu0 %v1780_v2, %s6125_s17 }
 0x8bc   :  { %1542 = vrot.lane.b32.xlu1 %v1540_v57, %s6124_s15 }
 0x8bf   :  { %1975 = vrot.lane.b32.xlu0 %v1973_v4, %s6119_s8 }
 0x8c0   :  { %1702 = vrot.lane.b32.xlu1 %v1700_v11, %s6126_s18 }
 0x8c3   :  { %2135 = vrot.lane.b32.xlu0 %v2133_v9, %s6121_s11 }
 0x8c4   :  { %1895 = vrot.lane.b32.xlu1 %v1893_v14, %s6120_s9 }
 0x8c7   :  { %2295 = vrot.lane.b32.xlu0 %v2293_v19, %s6123_s14  ;;  %v1176_v19 = vmul.f32 %v6859_v50, %v1175_v13 }
 0x8c8   :  { %2055 = vrot.lane.b32.xlu1 %v2053_v20, %s6122_s12 }
 0x8cb   :  { %2455 = vrot.lane.b32.xlu0 %v2453_v17, %s6125_s17 }
 0x8cc   :  { %2215 = vrot.lane.b32.xlu1 %v2213_v23, %s6124_s15 }
 0x8cf   :  { %2648 = vrot.lane.b32.xlu0 %v2646_v12, %s6119_s8 }
 0x8d0   :  { %2375 = vrot.lane.b32.xlu1 %v2373_v29, %s6126_s18 }
 0x8d3   :  { %2808 = vrot.lane.b32.xlu0 %v2806_v28, %s6121_s11 }
 0x8d4   :  { %2568 = vrot.lane.b32.xlu1 %v2566_v31, %s6120_s9 }
 0x8d7   :  { %2968 = vrot.lane.b32.xlu0 %v2966_v36, %s6123_s14 }
 0x8d8   :  { %2728 = vrot.lane.b32.xlu1 %v2726_v37, %s6122_s12 }
 0x8db   :  { %3128 = vrot.lane.b32.xlu0 %v3126_v39, %s6125_s17 }
 0x8dc   :  { %2888 = vrot.lane.b32.xlu1 %v2886_v40, %s6124_s15 }
 0x8df   :  { %3321 = vrot.lane.b32.xlu0 %v3319_v43, %s6119_s8 }
 0x8e0   :  { %3048 = vrot.lane.b32.xlu1 %v3046_v18, %s6126_s18 }
 0x8e3   :  { %3481 = vrot.lane.b32.xlu0 %v3479_v46, %s6121_s11 }
 0x8e4   :  { %3241 = vrot.lane.b32.xlu1 %v3239_v48, %s6120_s9  ;;  %v1848_v48 = vstv %s5567_s19  ;;  %s5728_s19 = sld [smem:[#allocation5 + $0xad]] }
 0x8e5   :  { %v1849_v26 = vmul.f32 %v6875_v10, %v1848_v48 }
 0x8e7   :  { %3641 = vrot.lane.b32.xlu0 %v3639_v54, %s6123_s14 }
 0x8e8   :  { %3401 = vrot.lane.b32.xlu1 %v3399_v56, %s6122_s12 }
 0x8eb   :  { %3801 = vrot.lane.b32.xlu0 %v3799_v51, %s6125_s17 }
 0x8ec   :  { %3561 = vrot.lane.b32.xlu1 %v3559_v60, %s6124_s15 }
 0x8f0   :  { %3721 = vrot.lane.b32.xlu1 %v3719_v63, %s6126_s18 }
 0x926   :  { %v6931_v1 = vpop.xlane.xlu0 %3978 }
 0x92a   :  { %v1223_v2 = vpop.permute.xlu0 %1222 }
 0x92b   :  { %v1224_v5 = vrot.slane %v1223_v2, 2 }
 0x92d   :  { %v1225_v14 = vsel %vm433_vm15, %v1223_v2, %v1224_v5 }
 0x92e   :  { %v1463_v57 = vpop.permute.xlu0 %1462  ;;  %v1227_v17 = vadd.f32 %v1225_v14, %v1176_v19 }
 0x92f   :  { %v1464_v47 = vrot.slane %v1463_v57, 2 }
 0x930   :  { %v3923_v7 = vpop.xlane.xlu1 %3922 }
 0x931   :  { %v3924_v4 = vrot.slane %v3923_v7, 4  ;;  %v1465_v35 = vsel %vm556_vm5, %v1463_v57, %v1464_v47 }
 0x932   :  { %v1623_v11 = vpop.permute.xlu0 %1622 }
 0x933   :  { %v3925_v62 = vadd.f32 %v3924_v4, %v3923_v7  ;;  %v1624_v36 = vrot.slane %v1623_v11, 2 }
 0x934   :  { %v1303_v9 = vpop.permute.xlu1 %1302 }
 0x935   :  { %v1304_v15 = vrot.slane %v1303_v9, 2  ;;  %v3926_v16 = vrot.slane %v3925_v62, 2  ;;  %v1625_v22 = vsel %vm638_vm7, %v1623_v11, %v1624_v36 }
 0x936   :  { %v1783_v20 = vpop.permute.xlu0 %1782 }
 0x937   :  { %v1305_v21 = vsel %vm474_vm2, %v1303_v9, %v1304_v15  ;;  %v3927_v3 = vadd.f32 %v3926_v16, %v3925_v62  ;;  %v1784_v43 = vrot.slane %v1783_v20, 2 }
 0x938   :  { %v1383_v23 = vpop.permute.xlu1 %1382  ;;  %v1307_v29 = vadd.f32 %v1305_v21, %v1227_v17 }
 0x939   :  { %v1384_v24 = vrot.slane %v1383_v23, 2  ;;  %v3928_v12 = vrot.slane %v3927_v3, 1  ;;  %v1785_v54 = vsel %vm720_vm9, %v1783_v20, %v1784_v43 }
 0x93a   :  { %v1976_v55 = vpop.permute.xlu0 %1975 }
 0x93b   :  { %v1385_v30 = vsel %vm515_vm3, %v1383_v23, %v1384_v24  ;;  %v3929_v28 = vadd.f32 %v3928_v12, %v3927_v3  ;;  %v1977_v60 = vrot.slane %v1976_v55, 2 }
 0x93c   :  { %v1387_v31 = vadd.f32 %v1385_v30, %v1307_v29  ;;  %v1543_v34 = vpop.permute.xlu1 %1542 }
 0x93d   :  { %v1544_v37 = vrot.slane %v1543_v34, 2  ;;  %5901 = vpush %v3929_v28  ;;  %v1978_v4 = vsel %vm474_vm2, %v1976_v55, %v1977_v60  ;;  %v2521_v28 = vstv %s5639_s20  ;;  %s5744_s20 = sld [smem:[#allocation5 + $0xaf]] }
 0x93e   :  { %v1467_v58 = vadd.f32 %v1465_v35, %v1387_v31  ;;  %v2136_v38 = vpop.permute.xlu0 %2135 }
 0x93f   :  { %v1545_v39 = vsel %vm597_vm6, %v1543_v34, %v1544_v37  ;;  %v2137_v11 = vrot.slane %v2136_v38, 2 }
 0x940   :  { %v1547_v40 = vadd.f32 %v1545_v39, %v1467_v58  ;;  %v1703_v41 = vpop.permute.xlu1 %1702  ;;  %v2522_v58 = vmul.f32 %v6893_v25, %v2521_v28 }
 0x941   :  { %v1704_v18 = vrot.slane %v1703_v41, 2  ;;  %v2138_v16 = vsel %vm556_vm5, %v2136_v38, %v2137_v11 }
 0x942   :  { %v1627_v32 = vadd.f32 %v1625_v22, %v1547_v40  ;;  %v2296_v45 = vpop.permute.xlu0 %2295 }
 0x943   :  { %v1705_v46 = vsel %vm679_vm8, %v1703_v41, %v1704_v18  ;;  %v2297_v19 = vrot.slane %v2296_v45, 2 }
 0x944   :  { %v1707_v52 = vadd.f32 %v1705_v46, %v1627_v32  ;;  %v1896_v53 = vpop.permute.xlu1 %1895 }
 0x945   :  { %v1897_v56 = vrot.slane %v1896_v53, 2  ;;  %v2298_v24 = vsel %vm638_vm7, %v2296_v45, %v2297_v19  ;;  %v3980_v19 = vrot.slane %v6931_v1, 4 }
 0x946   :  { %v1787_v59 = vadd.f32 %v1785_v54, %v1707_v52  ;;  %v2456_v51 = vpop.permute.xlu0 %2455 }
 0x947   :  { %v1898_v2 = vsel %vm433_vm15, %v1896_v53, %v1897_v56  ;;  %v2457_v12 = vrot.slane %v2456_v51, 2 }
 0x948   :  { %v1850_v61 = vadd.f32 %v1849_v26, %v1787_v59  ;;  %v2056_v63 = vpop.permute.xlu1 %2055 }
 0x949   :  { %v2057_v57 = vrot.slane %v2056_v63, 2  ;;  %v2458_v35 = vsel %vm720_vm9, %v2456_v51, %v2457_v12  ;;  %v3981_v12 = vadd.f32 %v3980_v19, %v6931_v1 }
 0x94a   :  { %v1900_v7 = vadd.f32 %v1898_v2, %v1850_v61  ;;  %v2649_v5 = vpop.permute.xlu0 %2648 }
 0x94b   :  { %v2058_v9 = vsel %vm515_vm3, %v2056_v63, %v2057_v57  ;;  %v2650_v39 = vrot.slane %v2649_v5, 2 }
 0x94c   :  { %v1980_v13 = vadd.f32 %v1978_v4, %v1900_v7  ;;  %v2216_v62 = vpop.permute.xlu1 %2215 }
 0x94d   :  { %v2217_v14 = vrot.slane %v2216_v62, 2  ;;  %v2651_v45 = vsel %vm474_vm2, %v2649_v5, %v2650_v39 }
 0x94e   :  { %v2060_v15 = vadd.f32 %v2058_v9, %v1980_v13  ;;  %v2809_v21 = vpop.permute.xlu0 %2808  ;;  %v3194_v13 = vstv %s5711_s21  ;;  %s5512_s21 = sld [smem:[#allocation5 + $0x92]] }
 0x94f   :  { %v2218_v17 = vsel %vm597_vm6, %v2216_v62, %v2217_v14  ;;  %v2810_v46 = vrot.slane %v2809_v21, 2 }
 0x950   :  { %v2140_v20 = vadd.f32 %v2138_v16, %v2060_v15  ;;  %v2376_v3 = vpop.permute.xlu1 %2375 }
 0x951   :  { %v2377_v23 = vrot.slane %v2376_v3, 2  ;;  %v2811_v59 = vsel %vm556_vm5, %v2809_v21, %v2810_v46  ;;  %v3195_v21 = vmul.f32 %v6911_v42, %v3194_v13 }
 0x952   :  { %v2220_v47 = vadd.f32 %v2218_v17, %v2140_v20  ;;  %v2969_v34 = vpop.permute.xlu0 %2968 }
 0x953   :  { %v2378_v30 = vsel %vm679_vm8, %v2376_v3, %v2377_v23  ;;  %v2970_v26 = vrot.slane %v2969_v34, 2 }
 0x954   :  { %v2300_v29 = vadd.f32 %v2298_v24, %v2220_v47  ;;  %v2569_v55 = vpop.permute.xlu1 %2568 }
 0x955   :  { %v2570_v36 = vrot.slane %v2569_v55, 2  ;;  %v2971_v7 = vsel %vm638_vm7, %v2969_v34, %v2970_v26 }
 0x956   :  { %v2380_v31 = vadd.f32 %v2378_v30, %v2300_v29  ;;  %v3129_v18 = vpop.permute.xlu0 %3128 }
 0x957   :  { %v2571_v41 = vsel %vm433_vm15, %v2569_v55, %v2570_v36  ;;  %v3130_v5 = vrot.slane %v3129_v18, 2 }
 0x958   :  { %v2460_v37 = vadd.f32 %v2458_v35, %v2380_v31  ;;  %v2729_v38 = vpop.permute.xlu1 %2728 }
 0x959   :  { %v2730_v22 = vrot.slane %v2729_v38, 2  ;;  %v3131_v15 = vsel %vm720_vm9, %v3129_v18, %v3130_v5 }
 0x95a   :  { %v2523_v40 = vadd.f32 %v2522_v58, %v2460_v37  ;;  %v3322_v51 = vpop.permute.xlu0 %3321  ;;  %v3982_v58 = vrot.slane %v3981_v12, 2 }
 0x95b   :  { %v2731_v52 = vsel %vm515_vm3, %v2729_v38, %v2730_v22  ;;  %v3323_v3 = vrot.slane %v3322_v51, 2 }
 0x95c   :  { %v2573_v43 = vadd.f32 %v2571_v41, %v2523_v40  ;;  %v2889_v32 = vpop.permute.xlu1 %2888 }
 0x95d   :  { %v2890_v53 = vrot.slane %v2889_v32, 2  ;;  %v3324_v30 = vsel %vm474_vm2, %v3322_v51, %v3323_v3  ;;  %v1982_v3 = vstv %s5584_s1  ;;  %s5608_s1 = sld [smem:[#allocation5 + $0x9e]] }
 0x95e   :  { %v2653_v48 = vadd.f32 %v2651_v45, %v2573_v43  ;;  %v3482_v62 = vpop.permute.xlu0 %3481 }
 0x95f   :  { %v2891_v61 = vsel %vm597_vm6, %v2889_v32, %v2890_v53  ;;  %v3483_v28 = vrot.slane %v3482_v62, 2  ;;  %v3983_v32 = vadd.f32 %v3982_v58, %v3981_v12 }
 0x960   :  { %v2733_v54 = vadd.f32 %v2731_v52, %v2653_v48  ;;  %v3049_v56 = vpop.permute.xlu1 %3048 }
 0x961   :  { %v3050_v63 = vrot.slane %v3049_v56, 2  ;;  %v3484_v38 = vsel %vm556_vm5, %v3482_v62, %v3483_v28  ;;  %v1229_v62 = vstv %s5504_s25  ;;  %s5536_s25 = sld [smem:[#allocation5 + $0x95]] }
 0x962   :  { %v2813_v60 = vadd.f32 %v2811_v59, %v2733_v54  ;;  %v3642_v29 = vpop.permute.xlu0 %3641  ;;  %v3984_v54 = vrot.slane %v3983_v32, 1 }
 0x963   :  { %v3051_v11 = vsel %vm679_vm8, %v3049_v56, %v3050_v63  ;;  %v3643_v39 = vrot.slane %v3642_v29, 2 }
 0x964   :  { %v2893_v2 = vadd.f32 %v2891_v61, %v2813_v60  ;;  %v3242_v57 = vpop.permute.xlu1 %3241  ;;  %v3985_v60 = vadd.f32 %v3984_v54, %v3983_v32  ;;  %v2975_v32 = vstv %s5688_s13  ;;  %v3488_v54 = vstv %s5744_s20  ;;  %s5752_s13 = sld [smem:[#allocation5 + $0xb0]]  ;;  %s5568_s20 = sld [smem:[#allocation5 + $0x99]] }
 0x965   :  { %v3243_v16 = vrot.slane %v3242_v57, 2  ;;  %v3644_v45 = vsel %vm638_vm7, %v3642_v29, %v3643_v39  ;;  %v2815_v39 = vstv %s5672_s10  ;;  %s5736_s10 = sld [smem:[#allocation5 + $0xae]] }
 0x966   :  { %v2973_v4 = vadd.f32 %v2971_v7, %v2893_v2  ;;  %v3802_v1 = vpop.permute.xlu0 %3801 }
 0x967   :  { %v3244_v47 = vsel %vm433_vm15, %v3242_v57, %v3243_v16  ;;  %v3803_v46 = vrot.slane %v3802_v1, 2  ;;  %v1629_v16 = vstv %s5544_s27  ;;  %s5576_s27 = sld [smem:[#allocation5 + $0x9a]] }
 0x968   :  { %v3053_v9 = vadd.f32 %v3051_v11, %v2973_v4  ;;  %v3402_v14 = vpop.permute.xlu1 %3401  ;;  %v1630_v19 = vmul.f32 %v6859_v50, %v1629_v16  ;;  %v2222_v16 = vstv %s5608_s1  ;;  %s5561_s1 = sld [smem:[#allocation5 + $0xbc]] }
 0x969   :  { %v3403_v24 = vrot.slane %v3402_v14, 2  ;;  %v3804_v56 = vsel %vm720_vm9, %v3802_v1, %v3803_v46  ;;  %v3135_v46 = vstv %s5704_s16  ;;  %s5768_s16 = sld [smem:[#allocation5 + $0xb2]] }
 0x96a   :  { %v3133_v20 = vadd.f32 %v3131_v15, %v3053_v9  ;;  %v1230_v9 = vmul.f32 %v6859_v50, %v1229_v62 }
 0x96b   :  { %v3404_v34 = vsel %vm515_vm3, %v3402_v14, %v3403_v24  ;;  %v1469_v14 = vstv %s5528_s26  ;;  %v2302_v24 = vstv %s5616_s29  ;;  %s5552_s26 = sld [smem:[#allocation5 + $0x97]]  ;;  %s5648_s29 = sld [smem:[#allocation5 + $0xa3]] }
 0x96c   :  { %v3196_v17 = vadd.f32 %v3195_v21, %v3133_v20  ;;  %v3562_v23 = vpop.permute.xlu1 %3561  ;;  %v1470_v15 = vmul.f32 %v6859_v50, %v1469_v14  ;;  %v1789_v20 = vstv %s5560_s3  ;;  %s5592_s3 = sld [smem:[#allocation5 + $0x9c]] }
 0x96d   :  { %v3563_v35 = vrot.slane %v3562_v23, 2  ;;  %v1790_v21 = vmul.f32 %v6859_v50, %v1789_v20  ;;  %v1902_v62 = vstv %s5576_s27  ;;  %s5529_s27 = sld [smem:[#allocation5 + $0xb8]] }
 0x96e   :  { %v3246_v55 = vadd.f32 %v3244_v47, %v3196_v17  ;;  %s5902_s22 = spop %5901  ;;  %v1983_v17 = vmul.f32 %v6875_v10, %v1982_v3 }
 0x96f   :  { %s3931_s23 = smul.f32 0.001953125, %s5902_s22  ;;  %v3564_v22 = vsel %vm597_vm6, %v3562_v23, %v3563_v35  ;;  %v2142_v23 = vstv %s5600_s28  ;;  %v2655_v35 = vstv %s5656_s2  ;;  %s5760_s22 = sld [smem:[#allocation5 + $0xb1]] }
 0x970   :  { %v3326_v31 = vadd.f32 %v3324_v30, %v3246_v55  ;;  %v3722_v37 = vpop.permute.xlu1 %3721  ;;  %v2143_v47 = vmul.f32 %v6875_v10, %v2142_v23  ;;  %v2303_v55 = vmul.f32 %v6875_v10, %v2302_v24  ;;  %v2462_v30 = vstv %s5632_s5  ;;  %s5624_s28 = sld [smem:[#allocation5 + $0xa0]]  ;;  %s5664_s5 = sld [smem:[#allocation5 + $0xa5]] }
 0x971   :  { %s3934_s24 = sadd.f32 1e-05, %s3931_s23  ;;  %v3723_v43 = vrot.slane %v3722_v37, 2  ;;  %s5520_s23 = sld [smem:[#allocation5 + $0x93]]  ;;  %v2575_v3 = vstv %s5648_s29 }
 0x972   :  { %v3406_v36 = vadd.f32 %v3404_v34, %v3326_v31  ;;  %v2463_v34 = vmul.f32 %v6875_v10, %v2462_v30  ;;  %v2062_v14 = vstv %s5592_s3  ;;  %s5720_s2 = sld [smem:[#allocation5 + $0xac]]  ;;  %s5545_s3 = sld [smem:[#allocation5 + $0xba]] }
 0x973   :  { %v3935_v40 = vstv %s3934_s24  ;;  %v3724_v52 = vsel %vm679_vm8, %v3722_v37, %v3723_v43  ;;  %v2816_v43 = vmul.f32 %v6893_v25, %v2815_v39  ;;  %s5776_s24 = sld [smem:[#allocation5 + $0xb3]]  ;;  %s5601_s29 = sld [smem:[#allocation5 + $0xc1]] }
 0x974   :  { %v3486_v41 = vadd.f32 %v3484_v38, %v3406_v36  ;;  %6001 = vrsqrt.f32 %v3935_v40 }
 0x976   :  { %v3566_v18 = vadd.f32 %v3564_v22, %v3486_v41  ;;  %v2382_v20 = vstv %s5624_s28  ;;  %v2735_v23 = vstv %s5664_s5  ;;  %s5585_s28 = sld [smem:[#allocation5 + $0xbf]]  ;;  %s5617_s5 = sld [smem:[#allocation5 + $0xc3]] }
 0x978   :  { %v3646_v48 = vadd.f32 %v3644_v45, %v3566_v18  ;;  %v2976_v45 = vmul.f32 %v6893_v25, %v2975_v32 }
 0x97a   :  { %v3726_v53 = vadd.f32 %v3724_v52, %v3646_v48  ;;  %v3136_v48 = vmul.f32 %v6893_v25, %v3135_v46  ;;  %v3328_v52 = vstv %s5728_s19  ;;  %s5496_s19 = sld [smem:[#allocation5 + $0x90]] }
 0x97c   :  { %v6971_v59 = vadd.f32 %v3804_v56, %v3726_v53  ;;  %v3329_v53 = vmul.f32 %v6911_v42, %v3328_v52  ;;  %v1309_v56 = vstv %s5512_s21  ;;  %s5640_s21 = sld [smem:[#allocation5 + $0xa2]] }
 0x97e   :  { %v6002_v26 = vpop.eup %6001  ;;  %v4048_v51 = vmul.f32 %v6971_v59, %v6394_v8 }
 0x97f   :  { %5903 = vpush %v6002_v26  ;;  %v3489_v26 = vmul.f32 %v6911_v42, %v3488_v54 }
 0x980   :  { %5905 = vpush %v3985_v60  ;;  %v4050_v61 = vcombine.high %v4048_v51, %v4048_v51  ;;  %v4057_v63 = vrot.slane %v4048_v51, %v6385_v49  ;;  %v3648_v51 = vstv %s5760_s22  ;;  %v1310_v60 = vmul.f32 %v6859_v50, %v1309_v56  ;;  %s5712_s22 = sld [smem:[#allocation5 + $0xab]] }
 0x982   :  { %v4064_v2 = vrot.slane %v4050_v61, %v6385_v49  ;;  %v4065_v57 = vcombine.high %v4057_v63, %v4057_v63  ;;  %v4069_v7 = vsel %vm795_vm10, %v4057_v63, 0.0  ;;  %v1389_v61 = vstv %s5520_s23 }
 0x983   :  { %v3649_v63 = vmul.f32 %v6911_v42, %v3648_v51 }
 0x984   :  { %v4070_v5 = vsel %vm795_vm10, %v4065_v57, 0.0  ;;  %v4072_v11 = vsel %vm799_vm11, %v4064_v2, 0.0  ;;  %v3808_v2 = vstv %s5776_s24  ;;  %v1390_v57 = vmul.f32 %v6859_v50, %v1389_v61 }
 0x985   :  { %v4071_v4 = vadd.f32 %v4070_v5, %v4069_v7  ;;  %v1549_v7 = vstv %s5536_s25  ;;  %v3809_v5 = vmul.f32 %v6911_v42, %v3808_v2 }
 0x987   :  { %v4073_v13 = vadd.f32 %v4072_v11, %v4071_v4  ;;  %v1550_v4 = vmul.f32 %v6859_v50, %v1549_v7  ;;  %v1709_v11 = vstv %s5552_s26  ;;  %s5505_s26 = sld [smem:[#allocation5 + $0xb5]] }
 0x989   :  { %4074 = vadd.xlane.f32.xlu0 %v4073_v13  ;;  %v1710_v13 = vmul.f32 %v6859_v50, %v1709_v11 }
 0x99f   :  { %1232 = vrot.lane.b32.xlu0 %v1230_v9, %s6120_s9  ;;  %v1903_v9 = vmul.f32 %v6875_v10, %v1902_v62 }
 0x9a3   :  { %1472 = vrot.lane.b32.xlu0 %v1470_v15, %s6121_s11  ;;  %v2063_v15 = vmul.f32 %v6875_v10, %v2062_v14 }
 0x9a7   :  { %1632 = vrot.lane.b32.xlu0 %v1630_v19, %s6123_s14  ;;  %v2223_v19 = vmul.f32 %v6875_v10, %v2222_v16 }
 0x9ab   :  { %1792 = vrot.lane.b32.xlu0 %v1790_v21, %s6125_s17  ;;  %v2383_v21 = vmul.f32 %v6875_v10, %v2382_v20 }
 0x9af   :  { %1985 = vrot.lane.b32.xlu0 %v1983_v17, %s6119_s8  ;;  %v2576_v17 = vmul.f32 %v6893_v25, %v2575_v3 }
 0x9b0   :  { %s6990_s6 = spop %5903 }
 0x9b1   :  { %s5906_s0 = spop %5905 }
 0x9b2   :  { %s3987_s7 = smul.f32 0.001953125, %s5906_s0  ;;  %s5680_s0 = sld [smem:[#allocation5 + $0xa7]] }
 0x9b3   :  { %2145 = vrot.lane.b32.xlu0 %v2143_v47, %s6121_s11  ;;  %v2736_v47 = vmul.f32 %v6893_v25, %v2735_v23 }
 0x9b4   :  { %v3988_v12 = vstv %s3987_s7  ;;  %s5696_s7 = sld [smem:[#allocation5 + $0xa9]] }
 0x9b5   :  { %v6995_v29 = vsub.f32 %v6839_v27, %v3988_v12  ;;  %v2656_v27 = vmul.f32 %v6893_v25, %v2655_v35 }
 0x9b7   :  { %v3990_v28 = vmul.f32 %v6995_v29, %v6995_v29  ;;  %2305 = vrot.lane.b32.xlu0 %v2303_v55, %s6123_s14 }
 0x9b8   :  { %v2895_v24 = vstv %s5680_s0  ;;  %s5633_s0 = sld [smem:[#allocation5 + $0xc5]] }
 0x9b9   :  { %v3991_v31 = vmul.f32 %v3990_v28, %v6394_v8  ;;  %v2896_v12 = vmul.f32 %v6893_v25, %v2895_v24  ;;  %v3248_v28 = vstv %s5720_s2 }
 0x9ba   :  { %v3055_v55 = vstv %s5696_s7 }
 0x9bb   :  { %v3993_v36 = vcombine.high %v3991_v31, %v3991_v31  ;;  %v4000_v37 = vrot.slane %v3991_v31, %v6385_v49  ;;  %2465 = vrot.lane.b32.xlu0 %v2463_v34, %s6125_s17  ;;  %v3056_v30 = vmul.f32 %v6893_v25, %v3055_v55  ;;  %v3249_v31 = vmul.f32 %v6911_v42, %v3248_v28 }
 0x9bc   :  { %v3408_v34 = vstv %s5736_s10 }
 0x9bd   :  { %v4007_v58 = vrot.slane %v3993_v36, %v6385_v49  ;;  %v4008_v38 = vcombine.high %v4000_v37, %v4000_v37  ;;  %v4012_v40 = vsel %vm795_vm10, %v4000_v37, 0.0  ;;  %v3409_v35 = vmul.f32 %v6911_v42, %v3408_v34 }
 0x9be   :  { %v3568_v36 = vstv %s5752_s13  ;;  %s5657_s13 = sld [smem:[#allocation5 + $0xc8]] }
 0x9bf   :  { %2658 = vrot.lane.b32.xlu0 %v2656_v27, %s6119_s8  ;;  %v4013_v1 = vsel %vm795_vm10, %v4008_v38, 0.0  ;;  %v4015_v22 = vsel %vm799_vm11, %v4007_v58, 0.0  ;;  %v3569_v37 = vmul.f32 %v6911_v42, %v3568_v36  ;;  %v3728_v27 = vstv %s5768_s16  ;;  %s5673_s16 = sld [smem:[#allocation5 + $0xca]] }
 0x9c0   :  { %v4014_v41 = vadd.f32 %v4013_v1, %v4012_v40  ;;  %v3729_v58 = vmul.f32 %v6911_v42, %v3728_v27 }
 0x9c2   :  { %v4016_v18 = vadd.f32 %v4015_v22, %v4014_v41 }
 0x9c3   :  { %2818 = vrot.lane.b32.xlu0 %v2816_v43, %s6121_s11 }
 0x9c4   :  { %4017 = vadd.xlane.f32.xlu1 %v4016_v18 }
 0x9c7   :  { %2978 = vrot.lane.b32.xlu0 %v2976_v45, %s6123_s14  ;;  %v1179_v45 = vstv %s5496_s19  ;;  %s5689_s19 = sld [smem:[#allocation5 + $0xcc]] }
 0x9c8   :  { %v1180_v56 = vmul.f32 %v6859_v50, %v1179_v45 }
 0x9cb   :  { %3138 = vrot.lane.b32.xlu0 %v3136_v48, %s6125_s17 }
 0x9cf   :  { %3331 = vrot.lane.b32.xlu0 %v3329_v53, %s6119_s8 }
 0x9d3   :  { %3491 = vrot.lane.b32.xlu0 %v3489_v26, %s6121_s11 }
 0x9d5   :  { %1312 = vrot.lane.b32.xlu1 %v1310_v60, %s6119_s8 }
 0x9d7   :  { %3651 = vrot.lane.b32.xlu0 %v3649_v63, %s6123_s14 }
 0x9d9   :  { %1392 = vrot.lane.b32.xlu1 %v1390_v57, %s6122_s12 }
 0x9db   :  { %3811 = vrot.lane.b32.xlu0 %v3809_v5, %s6125_s17 }
 0x9dd   :  { %1552 = vrot.lane.b32.xlu1 %v1550_v4, %s6124_s15 }
 0x9e1   :  { %1712 = vrot.lane.b32.xlu1 %v1710_v13, %s6126_s18 }
 0x9e5   :  { %1905 = vrot.lane.b32.xlu1 %v1903_v9, %s6120_s9 }
 0x9e9   :  { %2065 = vrot.lane.b32.xlu1 %v2063_v15, %s6122_s12 }
 0x9ed   :  { %2225 = vrot.lane.b32.xlu1 %v2223_v19, %s6124_s15 }
 0x9f1   :  { %2385 = vrot.lane.b32.xlu1 %v2383_v21, %s6126_s18 }
 0x9f5   :  { %2578 = vrot.lane.b32.xlu1 %v2576_v17, %s6120_s9 }
 0x9f9   :  { %2738 = vrot.lane.b32.xlu1 %v2736_v47, %s6122_s12 }
 0x9fd   :  { %2898 = vrot.lane.b32.xlu1 %v2896_v12, %s6124_s15  ;;  %v1852_v12 = vstv %s5568_s20  ;;  %s5705_s20 = sld [smem:[#allocation5 + $0xce]] }
 0x9fe   :  { %v1853_v36 = vmul.f32 %v6875_v10, %v1852_v12 }
 0xa01   :  { %3058 = vrot.lane.b32.xlu1 %v3056_v30, %s6126_s18 }
 0xa05   :  { %3251 = vrot.lane.b32.xlu1 %v3249_v31, %s6120_s9 }
 0xa09   :  { %3411 = vrot.lane.b32.xlu1 %v3409_v35, %s6122_s12 }
 0xa0d   :  { %3571 = vrot.lane.b32.xlu1 %v3569_v37, %s6124_s15 }
 0xa11   :  { %3731 = vrot.lane.b32.xlu1 %v3729_v58, %s6126_s18 }
 0xa16   :  { %v7057_v38 = vpop.xlane.xlu0 %4074 }
 0xa1a   :  { %v1233_v39 = vpop.permute.xlu0 %1232 }
 0xa1b   :  { %v1234_v43 = vrot.slane %v1233_v39, 2 }
 0xa1d   :  { %v1235_v52 = vsel %vm433_vm15, %v1233_v39, %v1234_v43 }
 0xa1e   :  { %v1473_v40 = vpop.permute.xlu0 %1472  ;;  %v1237_v60 = vadd.f32 %v1235_v52, %v1180_v56 }
 0xa1f   :  { %v1474_v2 = vrot.slane %v1473_v40, 2 }
 0xa21   :  { %v1475_v9 = vsel %vm556_vm5, %v1473_v40, %v1474_v2 }
 0xa22   :  { %v1633_v1 = vpop.permute.xlu0 %1632 }
 0xa23   :  { %v1634_v14 = vrot.slane %v1633_v1, 2 }
 0xa25   :  { %v1635_v3 = vsel %vm638_vm7, %v1633_v1, %v1634_v14 }
 0xa26   :  { %v1793_v41 = vpop.permute.xlu0 %1792 }
 0xa27   :  { %v1794_v17 = vrot.slane %v1793_v41, 2 }
 0xa29   :  { %v1795_v31 = vsel %vm720_vm9, %v1793_v41, %v1794_v17 }
 0xa2a   :  { %v1986_v32 = vpop.permute.xlu0 %1985 }
 0xa2b   :  { %v1987_v37 = vrot.slane %v1986_v32, 2 }
 0xa2d   :  { %v1988_v43 = vsel %vm474_vm2, %v1986_v32, %v1987_v37 }
 0xa2e   :  { %v2146_v61 = vpop.permute.xlu0 %2145 }
 0xa32   :  { %v2306_v15 = vpop.permute.xlu0 %2305 }
 0xa36   :  { %v2466_v55 = vpop.permute.xlu0 %2465 }
 0xa37   :  { %v2467_v2 = vrot.slane %v2466_v55, 2 }
 0xa3a   :  { %v2659_v1 = vpop.permute.xlu0 %2658 }
 0xa51   :  { %v4018_v22 = vpop.xlane.xlu1 %4017 }
 0xa52   :  { %v4019_v18 = vrot.slane %v4018_v22, 4 }
 0xa54   :  { %v4020_v46 = vadd.f32 %v4019_v18, %v4018_v22  ;;  %v2147_v18 = vrot.slane %v2146_v61, 2 }
 0xa55   :  { %v1313_v48 = vpop.permute.xlu1 %1312 }
 0xa56   :  { %v1314_v53 = vrot.slane %v1313_v48, 2  ;;  %v4021_v54 = vrot.slane %v4020_v46, 2  ;;  %v2148_v10 = vsel %vm556_vm5, %v2146_v61, %v2147_v18  ;;  %v2468_v61 = vsel %vm720_vm9, %v2466_v55, %v2467_v2 }
 0xa58   :  { %v1315_v26 = vsel %vm474_vm2, %v1313_v48, %v1314_v53  ;;  %v4022_v51 = vadd.f32 %v4021_v54, %v4020_v46  ;;  %v2307_v53 = vrot.slane %v2306_v15, 2  ;;  %v2819_v54 = vpop.permute.xlu0 %2818 }
 0xa59   :  { %v1393_v63 = vpop.permute.xlu1 %1392  ;;  %v1317_v5 = vadd.f32 %v1315_v26, %v1237_v60 }
 0xa5a   :  { %v1394_v57 = vrot.slane %v1393_v63, 2  ;;  %v4023_v7 = vrot.slane %v4022_v51, 1  ;;  %v2308_v32 = vsel %vm638_vm7, %v2306_v15, %v2307_v53 }
 0xa5c   :  { %v1395_v4 = vsel %vm515_vm3, %v1393_v63, %v1394_v57  ;;  %v4024_v11 = vadd.f32 %v4023_v7, %v4022_v51 }
 0xa5d   :  { %v1397_v13 = vadd.f32 %v1395_v4, %v1317_v5  ;;  %v1553_v62 = vpop.permute.xlu1 %1552  ;;  %v2525_v4 = vstv %s5640_s21  ;;  %s5729_s21 = sld [smem:[#allocation5 + $0xd1]] }
 0xa5e   :  { %v1554_v50 = vrot.slane %v1553_v62, 2  ;;  %5907 = vpush %v4024_v11  ;;  %v2979_v11 = vpop.permute.xlu0 %2978  ;;  %v2526_v14 = vmul.f32 %v6893_v25, %v2525_v4 }
 0xa5f   :  { %v1477_v16 = vadd.f32 %v1475_v9, %v1397_v13 }
 0xa60   :  { %v1555_v19 = vsel %vm597_vm6, %v1553_v62, %v1554_v50 }
 0xa61   :  { %v1557_v20 = vadd.f32 %v1555_v19, %v1477_v16  ;;  %v1713_v21 = vpop.permute.xlu1 %1712  ;;  %v2660_v16 = vrot.slane %v2659_v1, 2 }
 0xa62   :  { %v1714_v23 = vrot.slane %v1713_v21, 2 }
 0xa63   :  { %v1637_v47 = vadd.f32 %v1635_v3, %v1557_v20 }
 0xa64   :  { %v1715_v24 = vsel %vm679_vm8, %v1713_v21, %v1714_v23  ;;  %v3139_v21 = vpop.permute.xlu0 %3138  ;;  %v2661_v23 = vsel %vm474_vm2, %v2659_v1, %v2660_v16 }
 0xa65   :  { %v1717_v30 = vadd.f32 %v1715_v24, %v1637_v47  ;;  %v1906_v28 = vpop.permute.xlu1 %1905  ;;  %v2820_v47 = vrot.slane %v2819_v54, 2 }
 0xa66   :  { %v1907_v34 = vrot.slane %v1906_v28, 2 }
 0xa67   :  { %v1797_v35 = vadd.f32 %v1795_v31, %v1717_v30  ;;  %v2821_v25 = vsel %vm556_vm5, %v2819_v54, %v2820_v47  ;;  %v2980_v31 = vrot.slane %v2979_v11, 2 }
 0xa68   :  { %v1908_v39 = vsel %vm433_vm15, %v1906_v28, %v1907_v34  ;;  %v3332_v34 = vpop.permute.xlu0 %3331 }
 0xa69   :  { %v1854_v27 = vadd.f32 %v1853_v36, %v1797_v35  ;;  %v2066_v58 = vpop.permute.xlu1 %2065  ;;  %v3333_v54 = vrot.slane %v3332_v34, 2 }
 0xa6a   :  { %v2067_v40 = vrot.slane %v2066_v58, 2 }
 0xa6b   :  { %v1910_v22 = vadd.f32 %v1908_v39, %v1854_v27  ;;  %v2981_v39 = vsel %vm638_vm7, %v2979_v11, %v2980_v31 }
 0xa6c   :  { %v2068_v48 = vsel %vm515_vm3, %v2066_v58, %v2067_v40  ;;  %v3140_v40 = vrot.slane %v3139_v21, 2  ;;  %v3492_v18 = vpop.permute.xlu0 %3491 }
 0xa6d   :  { %v1990_v45 = vadd.f32 %v1988_v43, %v1910_v22  ;;  %v2226_v46 = vpop.permute.xlu1 %2225  ;;  %v3198_v43 = vstv %s5712_s22  ;;  %s5745_s22 = sld [smem:[#allocation5 + $0xd3]] }
 0xa6e   :  { %v2227_v41 = vrot.slane %v2226_v46, 2  ;;  %v3199_v53 = vmul.f32 %v6911_v42, %v3198_v43 }
 0xa6f   :  { %v2070_v52 = vadd.f32 %v2068_v48, %v1990_v45  ;;  %v3141_v48 = vsel %vm720_vm9, %v3139_v21, %v3140_v40 }
 0xa70   :  { %v2228_v51 = vsel %vm597_vm6, %v2226_v46, %v2227_v41 }
 0xa71   :  { %v2150_v56 = vadd.f32 %v2148_v10, %v2070_v52  ;;  %v2386_v26 = vpop.permute.xlu1 %2385  ;;  %v4076_v52 = vrot.slane %v7057_v38, 4 }
 0xa72   :  { %v2387_v60 = vrot.slane %v2386_v26, 2 }
 0xa73   :  { %v2230_v63 = vadd.f32 %v2228_v51, %v2150_v56 }
 0xa74   :  { %v2388_v5 = vsel %vm679_vm8, %v2386_v26, %v2387_v60 }
 0xa75   :  { %v2310_v57 = vadd.f32 %v2308_v32, %v2230_v63  ;;  %v2579_v7 = vpop.permute.xlu1 %2578  ;;  %v4077_v63 = vadd.f32 %v4076_v52, %v7057_v38  ;;  %v3652_v32 = vpop.permute.xlu0 %3651 }
 0xa76   :  { %v2580_v62 = vrot.slane %v2579_v7, 2 }
 0xa77   :  { %v2390_v13 = vadd.f32 %v2388_v5, %v2310_v57  ;;  %v3334_v57 = vsel %vm474_vm2, %v3332_v34, %v3333_v54 }
 0xa78   :  { %v2581_v20 = vsel %vm433_vm15, %v2579_v7, %v2580_v62  ;;  %v3493_v7 = vrot.slane %v3492_v18, 2 }
 0xa79   :  { %v2470_v9 = vadd.f32 %v2468_v61, %v2390_v13  ;;  %v2739_v50 = vpop.permute.xlu1 %2738  ;;  %v4078_v61 = vrot.slane %v4077_v63, 2  ;;  %v3812_v38 = vpop.permute.xlu0 %3811 }
 0xa7a   :  { %v2740_v15 = vrot.slane %v2739_v50, 2  ;;  %v3494_v62 = vsel %vm556_vm5, %v3492_v18, %v3493_v7  ;;  %v1479_v18 = vstv %s5529_s27  ;;  %s5537_s27 = sld [smem:[#allocation5 + $0xb9]] }
 0xa7b   :  { %v2527_v19 = vadd.f32 %v2526_v14, %v2470_v9  ;;  %v3653_v9 = vrot.slane %v3652_v32, 2 }
 0xa7c   :  { %v2741_v12 = vsel %vm515_vm3, %v2739_v50, %v2740_v15  ;;  %v4079_v15 = vadd.f32 %v4078_v61, %v4077_v63 }
 0xa7d   :  { %v2583_v3 = vadd.f32 %v2581_v20, %v2527_v19  ;;  %v2899_v17 = vpop.permute.xlu1 %2898  ;;  %v3654_v21 = vsel %vm638_vm7, %v3652_v32, %v3653_v9  ;;  %v2825_v9 = vstv %s5673_s16  ;;  %s5721_s16 = sld [smem:[#allocation5 + $0xd0]] }
 0xa7e   :  { %v2900_v55 = vrot.slane %v2899_v17, 2 }
 0xa7f   :  { %v2663_v24 = vadd.f32 %v2661_v23, %v2583_v3  ;;  %v3813_v3 = vrot.slane %v3812_v38, 2 }
 0xa80   :  { %v2901_v36 = vsel %vm597_vm6, %v2899_v17, %v2900_v55 }
 0xa81   :  { %v2743_v30 = vadd.f32 %v2741_v12, %v2663_v24  ;;  %v3059_v28 = vpop.permute.xlu1 %3058  ;;  %v4080_v24 = vrot.slane %v4079_v15, 1  ;;  %v3814_v12 = vsel %vm720_vm9, %v3812_v38, %v3813_v3  ;;  %v3145_v3 = vstv %s5705_s20  ;;  %s5753_s20 = sld [smem:[#allocation5 + $0xd4]] }
 0xa82   :  { %v3060_v37 = vrot.slane %v3059_v28, 2 }
 0xa83   :  { %v2823_v35 = vadd.f32 %v2821_v25, %v2743_v30  ;;  %v4081_v25 = vadd.f32 %v4080_v24, %v4079_v15  ;;  %v2985_v15 = vstv %s5689_s19  ;;  %s5737_s19 = sld [smem:[#allocation5 + $0xd2]] }
 0xa84   :  { %v3061_v22 = vsel %vm679_vm8, %v3059_v28, %v3060_v37 }
 0xa85   :  { %v2903_v27 = vadd.f32 %v2901_v36, %v2823_v35  ;;  %v3252_v58 = vpop.permute.xlu1 %3251 }
 0xa86   :  { %v3253_v41 = vrot.slane %v3252_v58, 2 }
 0xa87   :  { %v2983_v1 = vadd.f32 %v2981_v39, %v2903_v27 }
 0xa88   :  { %v3254_v51 = vsel %vm433_vm15, %v3252_v58, %v3253_v41  ;;  %v1799_v41 = vstv %s5561_s1  ;;  %s5577_s1 = sld [smem:[#allocation5 + $0xbe]] }
 0xa89   :  { %v3063_v45 = vadd.f32 %v3061_v22, %v2983_v1  ;;  %v3412_v46 = vpop.permute.xlu1 %3411  ;;  %v1239_v1 = vstv %s5505_s26  ;;  %v7106_v22 = vld [vmem:[#allocation3] sm:$0x3f]  ;;  %s5777_s26 = sld [smem:[#allocation5 + $0xd7]] }
 0xa8a   :  { %v3413_v60 = vrot.slane %v3412_v46, 2  ;;  %v1240_v43 = vmul.f32 %v7106_v22, %v1239_v1  ;;  %v1800_v52 = vmul.f32 %v7106_v22, %v1799_v41 }
 0xa8b   :  { %v3143_v10 = vadd.f32 %v3141_v48, %v3063_v45  ;;  %v1480_v45 = vmul.f32 %v7106_v22, %v1479_v18 }
 0xa8c   :  { %v3414_v4 = vsel %vm515_vm3, %v3412_v46, %v3413_v60  ;;  %v1639_v46 = vstv %s5545_s3  ;;  %s5553_s3 = sld [smem:[#allocation5 + $0xbb]] }
 0xa8d   :  { %v3200_v56 = vadd.f32 %v3199_v53, %v3143_v10  ;;  %v3572_v26 = vpop.permute.xlu1 %3571  ;;  %v1640_v48 = vmul.f32 %v7106_v22, %v1639_v46  ;;  %v1992_v10 = vstv %s5585_s28  ;;  %v7116_v53 = vld [vmem:[#allocation3 + $0x6] sm:$0x3f]  ;;  %s5593_s28 = sld [smem:[#allocation5 + $0xc0]] }
 0xa8e   :  { %v3573_v11 = vrot.slane %v3572_v26, 2  ;;  %v1993_v54 = vmul.f32 %v7116_v53, %v1992_v10 }
 0xa8f   :  { %v3256_v2 = vadd.f32 %v3254_v51, %v3200_v56  ;;  %s5908_s23 = spop %5907  ;;  %v2152_v56 = vstv %s5601_s29  ;;  %v2312_v51 = vstv %s5617_s5  ;;  %s5609_s29 = sld [smem:[#allocation5 + $0xc2]] }
 0xa90   :  { %s4026_s24 = smul.f32 0.001953125, %s5908_s23  ;;  %v3574_v16 = vsel %vm597_vm6, %v3572_v26, %v3573_v11  ;;  %v2153_v26 = vmul.f32 %v7116_v53, %v2152_v56  ;;  %v2313_v32 = vmul.f32 %v7116_v53, %v2312_v51  ;;  %s5513_s23 = sld [smem:[#allocation5 + $0xb6]] }
 0xa91   :  { %v3336_v5 = vadd.f32 %v3334_v57, %v3256_v2  ;;  %v3732_v13 = vpop.permute.xlu1 %3731  ;;  %v2472_v2 = vstv %s5633_s0  ;;  %s5625_s5 = sld [smem:[#allocation5 + $0xc4]]  ;;  %s5649_s0 = sld [smem:[#allocation5 + $0xc7]] }
 0xa92   :  { %s4029_s25 = sadd.f32 1e-05, %s4026_s24  ;;  %v3733_v19 = vrot.slane %v3732_v13, 2  ;;  %s5761_s24 = sld [smem:[#allocation5 + $0xd5]] }
 0xa93   :  { %v3416_v42 = vadd.f32 %v3414_v4, %v3336_v5  ;;  %v2473_v5 = vmul.f32 %v7116_v53, %v2472_v2  ;;  %v2665_v4 = vstv %s5657_s13  ;;  %s5697_s13 = sld [smem:[#allocation5 + $0xcd]] }
 0xa94   :  { %v4030_v14 = vstv %s4029_s25  ;;  %v3734_v23 = vsel %vm679_vm8, %v3732_v13, %v3733_v19  ;;  %s5521_s25 = sld [smem:[#allocation5 + $0xb7]] }
 0xa95   :  { %v3496_v50 = vadd.f32 %v3494_v62, %v3416_v42  ;;  %6003 = vrsqrt.f32 %v4030_v14 }
 0xa97   :  { %v3576_v20 = vadd.f32 %v3574_v16, %v3496_v50 }
 0xa99   :  { %v3656_v17 = vadd.f32 %v3654_v21, %v3576_v20  ;;  %v3065_v2 = vstv %s5697_s13  ;;  %s5634_s13 = sld [smem:[#allocation5 + $0xe9]] }
 0xa9b   :  { %v3736_v47 = vadd.f32 %v3734_v23, %v3656_v17  ;;  %v3338_v23 = vstv %s5729_s21  ;;  %s5769_s21 = sld [smem:[#allocation5 + $0xd6]] }
 0xa9d   :  { %v7097_v55 = vadd.f32 %v3814_v12, %v3736_v47  ;;  %v7149_v47 = vld [vmem:[#allocation3 + $0x12] sm:$0x3f]  ;;  %v3498_v12 = vstv %s5745_s22  ;;  %s5497_s22 = sld [smem:[#allocation5 + $0xb4]] }
 0xa9e   :  { %v3339_v24 = vmul.f32 %v7149_v47, %v3338_v23 }
 0xa9f   :  { %v6004_v30 = vpop.eup %6003  ;;  %v4144_v28 = vmul.f32 %v7097_v55, %v6394_v8 }
 0xaa0   :  { %5909 = vpush %v6004_v30  ;;  %v1319_v30 = vstv %s5513_s23  ;;  %s5569_s23 = sld [smem:[#allocation5 + $0xbd]] }
 0xaa1   :  { %5911 = vpush %v4081_v25  ;;  %v4146_v31 = vcombine.high %v4144_v28, %v4144_v28  ;;  %v4153_v34 = vrot.slane %v4144_v28, %v6385_v49  ;;  %v3499_v28 = vmul.f32 %v7149_v47, %v3498_v12  ;;  %v3658_v25 = vstv %s5761_s24  ;;  %s5641_s24 = sld [smem:[#allocation5 + $0xc6]] }
 0xaa3   :  { %v4160_v35 = vrot.slane %v4146_v31, %v6385_v49  ;;  %v4161_v36 = vcombine.high %v4153_v34, %v4153_v34  ;;  %v4165_v37 = vsel %vm795_vm10, %v4153_v34, 0.0  ;;  %v1320_v31 = vmul.f32 %v7106_v22, %v1319_v30 }
 0xaa4   :  { %v1399_v34 = vstv %s5521_s25  ;;  %s5713_s25 = sld [smem:[#allocation5 + $0xcf]] }
 0xaa5   :  { %v4166_v27 = vsel %vm795_vm10, %v4161_v36, 0.0  ;;  %v4168_v39 = vsel %vm799_vm11, %v4160_v35, 0.0  ;;  %v3659_v35 = vmul.f32 %v7149_v47, %v3658_v25  ;;  %v3818_v36 = vstv %s5777_s26 }
 0xaa6   :  { %v4167_v58 = vadd.f32 %v4166_v27, %v4165_v37  ;;  %v1400_v37 = vmul.f32 %v7106_v22, %v1399_v34  ;;  %v1559_v27 = vstv %s5537_s27 }
 0xaa8   :  { %v4169_v40 = vadd.f32 %v4168_v39, %v4167_v58  ;;  %v3819_v58 = vmul.f32 %v7149_v47, %v3818_v36  ;;  %v1560_v39 = vmul.f32 %v7106_v22, %v1559_v27 }
 0xaaa   :  { %4170 = vadd.xlane.f32.xlu0 %v4169_v40  ;;  %v1719_v40 = vstv %s5553_s3 }
 0xaab   :  { %v1720_v1 = vmul.f32 %v7106_v22, %v1719_v40 }
 0xac0   :  { %1242 = vrot.lane.b32.xlu0 %v1240_v43, %s6120_s9  ;;  %v1912_v43 = vstv %s5577_s1  ;;  %s5506_s1 = sld [smem:[#allocation5 + $0xd9]] }
 0xac1   :  { %v1913_v18 = vmul.f32 %v7116_v53, %v1912_v43 }
 0xac4   :  { %1482 = vrot.lane.b32.xlu0 %v1480_v45, %s6121_s11  ;;  %v2072_v45 = vstv %s5593_s28  ;;  %s5530_s28 = sld [smem:[#allocation5 + $0xdc]] }
 0xac5   :  { %v2073_v46 = vmul.f32 %v7116_v53, %v2072_v45 }
 0xac8   :  { %1642 = vrot.lane.b32.xlu0 %v1640_v48, %s6123_s14  ;;  %v2232_v48 = vstv %s5609_s29  ;;  %s5546_s29 = sld [smem:[#allocation5 + $0xde]] }
 0xac9   :  { %v2233_v41 = vmul.f32 %v7116_v53, %v2232_v48 }
 0xacc   :  { %1802 = vrot.lane.b32.xlu0 %v1800_v52, %s6125_s17  ;;  %v2392_v52 = vstv %s5625_s5  ;;  %s5562_s5 = sld [smem:[#allocation5 + $0xe0]] }
 0xacd   :  { %v2393_v10 = vmul.f32 %v7116_v53, %v2392_v52 }
 0xad0   :  { %1995 = vrot.lane.b32.xlu0 %v1993_v54, %s6119_s8  ;;  %v2585_v54 = vstv %s5649_s0  ;;  %s5586_s0 = sld [smem:[#allocation5 + $0xe3]] }
 0xad1   :  { %s7120_s7 = spop %5909 }
 0xad2   :  { %s5912_s2 = spop %5911 }
 0xad3   :  { %s4083_s10 = smul.f32 0.001953125, %s5912_s2  ;;  %s5665_s2 = sld [smem:[#allocation5 + $0xc9]] }
 0xad4   :  { %2155 = vrot.lane.b32.xlu0 %v2153_v26, %s6121_s11 }
 0xad5   :  { %v4084_v60 = vstv %s4083_s10  ;;  %s5681_s10 = sld [smem:[#allocation5 + $0xcb]] }
 0xad6   :  { %v7125_v63 = vsub.f32 %v6971_v59, %v4084_v60  ;;  %v7135_v59 = vld [vmem:[#allocation3 + $0xc] sm:$0x3f] }
 0xad7   :  { %v2666_v13 = vmul.f32 %v7135_v59, %v2665_v4  ;;  %v2826_v19 = vmul.f32 %v7135_v59, %v2825_v9  ;;  %v2986_v21 = vmul.f32 %v7135_v59, %v2985_v15  ;;  %v3146_v17 = vmul.f32 %v7135_v59, %v3145_v3 }
 0xad8   :  { %v4086_v57 = vmul.f32 %v7125_v63, %v7125_v63  ;;  %2315 = vrot.lane.b32.xlu0 %v2313_v32, %s6123_s14  ;;  %v2586_v56 = vmul.f32 %v7135_v59, %v2585_v54  ;;  %v3418_v4 = vstv %s5737_s19  ;;  %v1183_v3 = vstv %s5497_s22  ;;  %s5674_s22 = sld [smem:[#allocation5 + $0xee]] }
 0xad9   :  { %v2745_v26 = vstv %s5665_s2  ;;  %s5602_s2 = sld [smem:[#allocation5 + $0xe5]] }
 0xada   :  { %v4087_v7 = vmul.f32 %v4086_v57, %v6394_v8  ;;  %v2746_v51 = vmul.f32 %v7135_v59, %v2745_v26  ;;  %v3066_v57 = vmul.f32 %v7135_v59, %v3065_v2 }
 0xadb   :  { %v2905_v60 = vstv %s5681_s10  ;;  %s5618_s10 = sld [smem:[#allocation5 + $0xe7]] }
 0xadc   :  { %v4089_v11 = vcombine.high %v4087_v7, %v4087_v7  ;;  %v4096_v42 = vrot.slane %v4087_v7, %v6385_v49  ;;  %2475 = vrot.lane.b32.xlu0 %v2473_v5, %s6125_s17  ;;  %v2906_v32 = vmul.f32 %v7135_v59, %v2905_v60  ;;  %v3258_v7 = vstv %s5721_s16 }
 0xadd   :  { %v3259_v5 = vmul.f32 %v7149_v47, %v3258_v7 }
 0xade   :  { %v4103_v61 = vrot.slane %v4089_v11, %v6385_v49  ;;  %v4104_v62 = vcombine.high %v4096_v42, %v4096_v42  ;;  %v4108_v14 = vsel %vm795_vm10, %v4096_v42, 0.0  ;;  %v3419_v11 = vmul.f32 %v7149_v47, %v3418_v4 }
 0xadf   :  { %v3578_v42 = vstv %s5753_s20 }
 0xae0   :  { %2668 = vrot.lane.b32.xlu0 %v2666_v13, %s6119_s8  ;;  %v4109_v38 = vsel %vm795_vm10, %v4104_v62, 0.0  ;;  %v4111_v16 = vsel %vm799_vm11, %v4103_v61, 0.0  ;;  %v3579_v13 = vmul.f32 %v7149_v47, %v3578_v42  ;;  %v3738_v61 = vstv %s5769_s21  ;;  %s5658_s21 = sld [smem:[#allocation5 + $0xec]] }
 0xae1   :  { %v4110_v50 = vadd.f32 %v4109_v38, %v4108_v14  ;;  %v3739_v62 = vmul.f32 %v7149_v47, %v3738_v61 }
 0xae3   :  { %v4112_v20 = vadd.f32 %v4111_v16, %v4110_v50 }
 0xae4   :  { %2828 = vrot.lane.b32.xlu0 %v2826_v19, %s6121_s11 }
 0xae5   :  { %4113 = vadd.xlane.f32.xlu1 %v4112_v20 }
 0xae8   :  { %2988 = vrot.lane.b32.xlu0 %v2986_v21, %s6123_s14 }
 0xaec   :  { %3148 = vrot.lane.b32.xlu0 %v3146_v17, %s6125_s17 }
 0xaf0   :  { %3341 = vrot.lane.b32.xlu0 %v3339_v24, %s6119_s8 }
 0xaf4   :  { %3501 = vrot.lane.b32.xlu0 %v3499_v28, %s6121_s11  ;;  %v1184_v28 = vmul.f32 %v7106_v22, %v1183_v3 }
 0xaf6   :  { %1322 = vrot.lane.b32.xlu1 %v1320_v31, %s6119_s8 }
 0xaf8   :  { %3661 = vrot.lane.b32.xlu0 %v3659_v35, %s6123_s14 }
 0xafa   :  { %1402 = vrot.lane.b32.xlu1 %v1400_v37, %s6122_s12 }
 0xafc   :  { %3821 = vrot.lane.b32.xlu0 %v3819_v58, %s6125_s17 }
 0xafe   :  { %1562 = vrot.lane.b32.xlu1 %v1560_v39, %s6124_s15 }
 0xb02   :  { %1722 = vrot.lane.b32.xlu1 %v1720_v1, %s6126_s18 }
 0xb06   :  { %1915 = vrot.lane.b32.xlu1 %v1913_v18, %s6120_s9 }
 0xb0a   :  { %2075 = vrot.lane.b32.xlu1 %v2073_v46, %s6122_s12 }
 0xb0e   :  { %2235 = vrot.lane.b32.xlu1 %v2233_v41, %s6124_s15 }
 0xb12   :  { %2395 = vrot.lane.b32.xlu1 %v2393_v10, %s6126_s18 }
 0xb16   :  { %2588 = vrot.lane.b32.xlu1 %v2586_v56, %s6120_s9 }
 0xb1a   :  { %2748 = vrot.lane.b32.xlu1 %v2746_v51, %s6122_s12 }
 0xb1e   :  { %2908 = vrot.lane.b32.xlu1 %v2906_v32, %s6124_s15 }
 0xb22   :  { %3068 = vrot.lane.b32.xlu1 %v3066_v57, %s6126_s18  ;;  %v1856_v57 = vstv %s5569_s23  ;;  %s5690_s23 = sld [smem:[#allocation5 + $0xf0]] }
 0xb23   :  { %v1857_v61 = vmul.f32 %v7116_v53, %v1856_v57 }
 0xb26   :  { %3261 = vrot.lane.b32.xlu1 %v3259_v5, %s6120_s9 }
 0xb2a   :  { %3421 = vrot.lane.b32.xlu1 %v3419_v11, %s6122_s12 }
 0xb2e   :  { %3581 = vrot.lane.b32.xlu1 %v3579_v13, %s6124_s15 }
 0xb32   :  { %3741 = vrot.lane.b32.xlu1 %v3739_v62, %s6126_s18 }
 0xb37   :  { %v7191_v9 = vpop.xlane.xlu0 %4170 }
 0xb3b   :  { %v1243_v14 = vpop.permute.xlu0 %1242 }
 0xb3c   :  { %v1244_v20 = vrot.slane %v1243_v14, 2 }
 0xb3e   :  { %v1245_v24 = vsel %vm433_vm15, %v1243_v14, %v1244_v20 }
 0xb3f   :  { %v1483_v38 = vpop.permute.xlu0 %1482  ;;  %v1247_v34 = vadd.f32 %v1245_v24, %v1184_v28 }
 0xb40   :  { %v1484_v37 = vrot.slane %v1483_v38, 2 }
 0xb42   :  { %v1485_v45 = vsel %vm556_vm5, %v1483_v38, %v1484_v37 }
 0xb43   :  { %v1643_v50 = vpop.permute.xlu0 %1642 }
 0xb44   :  { %v1644_v46 = vrot.slane %v1643_v50, 2 }
 0xb46   :  { %v1645_v26 = vsel %vm638_vm7, %v1643_v50, %v1644_v46 }
 0xb47   :  { %v1803_v16 = vpop.permute.xlu0 %1802 }
 0xb48   :  { %v1804_v51 = vrot.slane %v1803_v16, 2 }
 0xb4a   :  { %v1805_v11 = vsel %vm720_vm9, %v1803_v16, %v1804_v51 }
 0xb4b   :  { %v1996_v21 = vpop.permute.xlu0 %1995 }
 0xb4c   :  { %v1997_v62 = vrot.slane %v1996_v21, 2 }
 0xb4e   :  { %v1998_v3 = vsel %vm474_vm2, %v1996_v21, %v1997_v62 }
 0xb4f   :  { %v2156_v35 = vpop.permute.xlu0 %2155 }
 0xb53   :  { %v2316_v41 = vpop.permute.xlu0 %2315 }
 0xb57   :  { %v2476_v7 = vpop.permute.xlu0 %2475 }
 0xb5b   :  { %v2669_v20 = vpop.permute.xlu0 %2668 }
 0xb72   :  { %v4114_v19 = vpop.xlane.xlu1 %4113 }
 0xb73   :  { %v4115_v15 = vrot.slane %v4114_v19, 4 }
 0xb75   :  { %v4116_v17 = vadd.f32 %v4115_v15, %v4114_v19 }
 0xb76   :  { %v1323_v23 = vpop.permute.xlu1 %1322 }
 0xb77   :  { %v1324_v12 = vrot.slane %v1323_v23, 2  ;;  %v4117_v30 = vrot.slane %v4116_v17, 2 }
 0xb79   :  { %v1325_v25 = vsel %vm474_vm2, %v1323_v23, %v1324_v12  ;;  %v4118_v31 = vadd.f32 %v4117_v30, %v4116_v17  ;;  %v2157_v17 = vrot.slane %v2156_v35, 2 }
 0xb7a   :  { %v1403_v36 = vpop.permute.xlu1 %1402  ;;  %v1327_v39 = vadd.f32 %v1325_v25, %v1247_v34  ;;  %v2317_v25 = vrot.slane %v2316_v41, 2 }
 0xb7b   :  { %v1404_v27 = vrot.slane %v1403_v36, 2  ;;  %v4119_v58 = vrot.slane %v4118_v31, 1  ;;  %v2158_v28 = vsel %vm556_vm5, %v2156_v35, %v2157_v17 }
 0xb7c   :  { %v2318_v21 = vsel %vm638_vm7, %v2316_v41, %v2317_v25 }
 0xb7d   :  { %v1405_v40 = vsel %vm515_vm3, %v1403_v36, %v1404_v27  ;;  %v4120_v1 = vadd.f32 %v4119_v58, %v4118_v31  ;;  %v2829_v31 = vpop.permute.xlu0 %2828 }
 0xb7e   :  { %v1407_v43 = vadd.f32 %v1405_v40, %v1327_v39  ;;  %v1563_v18 = vpop.permute.xlu1 %1562  ;;  %v2477_v39 = vrot.slane %v2476_v7, 2 }
 0xb7f   :  { %v1564_v48 = vrot.slane %v1563_v18, 2  ;;  %5913 = vpush %v4120_v1 }
 0xb80   :  { %v1487_v52 = vadd.f32 %v1485_v45, %v1407_v43  ;;  %v2478_v35 = vsel %vm720_vm9, %v2476_v7, %v2477_v39 }
 0xb81   :  { %v1565_v10 = vsel %vm597_vm6, %v1563_v18, %v1564_v48  ;;  %v2529_v18 = vstv %s5641_s24  ;;  %v2989_v45 = vpop.permute.xlu0 %2988  ;;  %s5706_s24 = sld [smem:[#allocation5 + $0xf2]] }
 0xb82   :  { %v1567_v54 = vadd.f32 %v1565_v10, %v1487_v52  ;;  %v1723_v56 = vpop.permute.xlu1 %1722  ;;  %v2530_v10 = vmul.f32 %v7135_v59, %v2529_v18  ;;  %v2990_v62 = vrot.slane %v2989_v45, 2 }
 0xb83   :  { %v1724_v60 = vrot.slane %v1723_v56, 2 }
 0xb84   :  { %v1647_v32 = vadd.f32 %v1645_v26, %v1567_v54 }
 0xb85   :  { %v1725_v2 = vsel %vm679_vm8, %v1723_v56, %v1724_v60  ;;  %v2670_v56 = vrot.slane %v2669_v20, 2  ;;  %v3149_v60 = vpop.permute.xlu0 %3148 }
 0xb86   :  { %v1727_v5 = vadd.f32 %v1725_v2, %v1647_v32  ;;  %v1916_v4 = vpop.permute.xlu1 %1915  ;;  %v3150_v17 = vrot.slane %v3149_v60, 2 }
 0xb87   :  { %v1917_v42 = vrot.slane %v1916_v4, 2  ;;  %v2671_v57 = vsel %vm474_vm2, %v2669_v20, %v2670_v56  ;;  %v2991_v20 = vsel %vm638_vm7, %v2989_v45, %v2990_v62 }
 0xb88   :  { %v1807_v13 = vadd.f32 %v1805_v11, %v1727_v5  ;;  %v2830_v5 = vrot.slane %v2829_v31, 2  ;;  %v3151_v25 = vsel %vm720_vm9, %v3149_v60, %v3150_v17 }
 0xb89   :  { %v1918_v50 = vsel %vm433_vm15, %v1916_v4, %v1917_v42 }
 0xb8a   :  { %v1858_v14 = vadd.f32 %v1857_v61, %v1807_v13  ;;  %v2076_v38 = vpop.permute.xlu1 %2075  ;;  %v2831_v61 = vsel %vm556_vm5, %v2829_v31, %v2830_v5 }
 0xb8b   :  { %v2077_v19 = vrot.slane %v2076_v38, 2 }
 0xb8c   :  { %v1920_v15 = vadd.f32 %v1918_v50, %v1858_v14  ;;  %v3342_v14 = vpop.permute.xlu0 %3341 }
 0xb8d   :  { %v2078_v12 = vsel %vm515_vm3, %v2076_v38, %v2077_v19 }
 0xb8e   :  { %v2000_v23 = vadd.f32 %v1998_v3, %v1920_v15  ;;  %v2236_v24 = vpop.permute.xlu1 %2235 }
 0xb8f   :  { %v2237_v16 = vrot.slane %v2236_v24, 2 }
 0xb90   :  { %v2080_v30 = vadd.f32 %v2078_v12, %v2000_v23  ;;  %v3202_v12 = vstv %s5713_s25  ;;  %s5730_s25 = sld [smem:[#allocation5 + $0xf5]] }
 0xb91   :  { %v2238_v37 = vsel %vm597_vm6, %v2236_v24, %v2237_v16  ;;  %v3502_v16 = vpop.permute.xlu0 %3501 }
 0xb92   :  { %v2160_v34 = vadd.f32 %v2158_v28, %v2080_v30  ;;  %v2396_v36 = vpop.permute.xlu1 %2395 }
 0xb93   :  { %v2397_v27 = vrot.slane %v2396_v36, 2 }
 0xb94   :  { %v2240_v58 = vadd.f32 %v2238_v37, %v2160_v34  ;;  %v4172_v34 = vrot.slane %v7191_v9, 4  ;;  %v3203_v37 = vmul.f32 %v7149_v47, %v3202_v12 }
 0xb95   :  { %v2398_v43 = vsel %vm679_vm8, %v2396_v36, %v2397_v27  ;;  %v3343_v27 = vrot.slane %v3342_v14, 2 }
 0xb96   :  { %v2320_v40 = vadd.f32 %v2318_v21, %v2240_v58  ;;  %v2589_v1 = vpop.permute.xlu1 %2588 }
 0xb97   :  { %v2590_v48 = vrot.slane %v2589_v1, 2  ;;  %v3344_v45 = vsel %vm474_vm2, %v3342_v14, %v3343_v27  ;;  %v1809_v27 = vstv %s5562_s5  ;;  %s5554_s5 = sld [smem:[#allocation5 + $0xdf]] }
 0xb98   :  { %v2400_v46 = vadd.f32 %v2398_v43, %v2320_v40  ;;  %v3662_v43 = vpop.permute.xlu0 %3661 }
 0xb99   :  { %v2591_v51 = vsel %vm433_vm15, %v2589_v1, %v2590_v48  ;;  %v4173_v1 = vadd.f32 %v4172_v34, %v7191_v9 }
 0xb9a   :  { %v2480_v52 = vadd.f32 %v2478_v35, %v2400_v46  ;;  %v2749_v54 = vpop.permute.xlu1 %2748  ;;  %v3503_v46 = vrot.slane %v3502_v16, 2 }
 0xb9b   :  { %v2750_v41 = vrot.slane %v2749_v54, 2  ;;  %v4174_v56 = vrot.slane %v4173_v1, 2 }
 0xb9c   :  { %v2531_v26 = vadd.f32 %v2530_v10, %v2480_v52  ;;  %v3822_v9 = vpop.permute.xlu0 %3821 }
 0xb9d   :  { %v2751_v11 = vsel %vm515_vm3, %v2749_v54, %v2750_v41  ;;  %v4175_v5 = vadd.f32 %v4174_v56, %v4173_v1 }
 0xb9e   :  { %v2593_v32 = vadd.f32 %v2591_v51, %v2531_v26  ;;  %v2909_v2 = vpop.permute.xlu1 %2908  ;;  %v3504_v26 = vsel %vm556_vm5, %v3502_v16, %v3503_v46  ;;  %v3663_v51 = vrot.slane %v3662_v43, 2 }
 0xb9f   :  { %v2910_v7 = vrot.slane %v2909_v2, 2 }
 0xba0   :  { %v2673_v4 = vadd.f32 %v2671_v57, %v2593_v32 }
 0xba1   :  { %v2911_v50 = vsel %vm597_vm6, %v2909_v2, %v2910_v7 }
 0xba2   :  { %v2753_v42 = vadd.f32 %v2751_v11, %v2673_v4  ;;  %v3069_v13 = vpop.permute.xlu1 %3068  ;;  %v3664_v4 = vsel %vm638_vm7, %v3662_v43, %v3663_v51  ;;  %v3823_v11 = vrot.slane %v3822_v9, 2  ;;  %v2322_v43 = vstv %s5618_s10  ;;  %s5610_s10 = sld [smem:[#allocation5 + $0xe6]] }
 0xba3   :  { %v3070_v19 = vrot.slane %v3069_v13, 2  ;;  %v2323_v46 = vmul.f32 %v7116_v53, %v2322_v43 }
 0xba4   :  { %v2833_v38 = vadd.f32 %v2831_v61, %v2753_v42  ;;  %v4176_v61 = vrot.slane %v4175_v5, 1  ;;  %v3824_v62 = vsel %vm720_vm9, %v3822_v9, %v3823_v11  ;;  %v2835_v9 = vstv %s5674_s22  ;;  %s5698_s22 = sld [smem:[#allocation5 + $0xf1]] }
 0xba5   :  { %v3071_v24 = vsel %vm679_vm8, %v3069_v13, %v3070_v19  ;;  %v2995_v11 = vstv %s5690_s23  ;;  %s5722_s23 = sld [smem:[#allocation5 + $0xf4]] }
 0xba6   :  { %v2913_v15 = vadd.f32 %v2911_v50, %v2833_v38  ;;  %v3262_v3 = vpop.permute.xlu1 %3261  ;;  %v4177_v19 = vadd.f32 %v4176_v61, %v4175_v5  ;;  %v2836_v5 = vmul.f32 %v7135_v59, %v2835_v9  ;;  %v3348_v61 = vstv %s5730_s25  ;;  %s5754_s25 = sld [smem:[#allocation5 + $0xf8]] }
 0xba7   :  { %v3263_v31 = vrot.slane %v3262_v3, 2 }
 0xba8   :  { %v2993_v23 = vadd.f32 %v2991_v20, %v2913_v15 }
 0xba9   :  { %v3264_v39 = vsel %vm433_vm15, %v3262_v3, %v3263_v31  ;;  %v1489_v31 = vstv %s5530_s28  ;;  %s5778_s28 = sld [smem:[#allocation5 + $0xfb]] }
 0xbaa   :  { %v3073_v30 = vadd.f32 %v3071_v24, %v2993_v23  ;;  %v3422_v28 = vpop.permute.xlu1 %3421  ;;  %v1490_v34 = vmul.f32 %v7106_v22, %v1489_v31 }
 0xbab   :  { %v3423_v40 = vrot.slane %v3422_v28, 2 }
 0xbac   :  { %v3153_v36 = vadd.f32 %v3151_v25, %v3073_v30 }
 0xbad   :  { %v3424_v48 = vsel %vm515_vm3, %v3422_v28, %v3423_v40  ;;  %v1249_v28 = vstv %s5506_s1  ;;  %v2162_v40 = vstv %s5602_s2  ;;  %s5522_s1 = sld [smem:[#allocation5 + $0xdb]]  ;;  %s5594_s2 = sld [smem:[#allocation5 + $0xe4]] }
 0xbae   :  { %v3204_v58 = vadd.f32 %v3203_v37, %v3153_v36  ;;  %v3582_v21 = vpop.permute.xlu1 %3581  ;;  %v1250_v25 = vmul.f32 %v7106_v22, %v1249_v28  ;;  %v1649_v36 = vstv %s5546_s29  ;;  %v2163_v1 = vmul.f32 %v7116_v53, %v2162_v40  ;;  %s5538_s29 = sld [smem:[#allocation5 + $0xdd]] }
 0xbaf   :  { %v3583_v52 = vrot.slane %v3582_v21, 2  ;;  %v1650_v37 = vmul.f32 %v7106_v22, %v1649_v36  ;;  %v1729_v28 = vstv %s5554_s5 }
 0xbb0   :  { %v3266_v18 = vadd.f32 %v3264_v39, %v3204_v58  ;;  %s5914_s26 = spop %5913  ;;  %v1810_v58 = vmul.f32 %v7106_v22, %v1809_v27  ;;  %v2242_v27 = vstv %s5610_s10  ;;  %s5531_s10 = sld [smem:[#allocation5 + $0x100]] }
 0xbb1   :  { %s4122_s27 = smul.f32 0.001953125, %s5914_s26  ;;  %v3584_v32 = vsel %vm597_vm6, %v3582_v21, %v3583_v52  ;;  %v2002_v21 = vstv %s5586_s0  ;;  %s5746_s26 = sld [smem:[#allocation5 + $0xf7]] }
 0xbb2   :  { %v3346_v35 = vadd.f32 %v3344_v45, %v3266_v18  ;;  %v3742_v54 = vpop.permute.xlu1 %3741  ;;  %v2003_v39 = vmul.f32 %v7116_v53, %v2002_v21  ;;  %s5578_s0 = sld [smem:[#allocation5 + $0xe2]] }
 0xbb3   :  { %s4125_s3 = sadd.f32 1e-05, %s4122_s27  ;;  %v3743_v2 = vrot.slane %v3742_v54, 2  ;;  %s5514_s27 = sld [smem:[#allocation5 + $0xda]]  ;;  %v2082_v36 = vstv %s5594_s2 }
 0xbb4   :  { %v3426_v10 = vadd.f32 %v3424_v48, %v3346_v35  ;;  %v2482_v35 = vstv %s5634_s13  ;;  %s5626_s13 = sld [smem:[#allocation5 + $0xe8]]  ;;  %s5507_s2 = sld [smem:[#allocation5 + $0xfd]] }
 0xbb5   :  { %v4126_v41 = vstv %s4125_s3  ;;  %v3744_v42 = vsel %vm679_vm8, %v3742_v54, %v3743_v2  ;;  %v2675_v54 = vstv %s5658_s21  ;;  %s5762_s3 = sld [smem:[#allocation5 + $0xf9]]  ;;  %s5682_s21 = sld [smem:[#allocation5 + $0xef]] }
 0xbb6   :  { %v3506_v60 = vadd.f32 %v3504_v26, %v3426_v10  ;;  %6005 = vrsqrt.f32 %v4126_v41  ;;  %v2483_v10 = vmul.f32 %v7116_v53, %v2482_v35 }
 0xbb8   :  { %v3586_v57 = vadd.f32 %v3584_v32, %v3506_v60  ;;  %v1922_v31 = vstv %s5578_s0 }
 0xbba   :  { %v3666_v7 = vadd.f32 %v3664_v4, %v3586_v57  ;;  %v2402_v21 = vstv %s5626_s13  ;;  %s5547_s13 = sld [smem:[#allocation5 + $0x102]] }
 0xbbc   :  { %v3746_v13 = vadd.f32 %v3744_v42, %v3666_v7  ;;  %v2996_v7 = vmul.f32 %v7135_v59, %v2995_v11  ;;  %v3155_v42 = vstv %s5706_s24  ;;  %s5738_s24 = sld [smem:[#allocation5 + $0xf6]] }
 0xbbe   :  { %v7231_v14 = vadd.f32 %v3824_v62, %v3746_v13  ;;  %v3156_v13 = vmul.f32 %v7135_v59, %v3155_v42  ;;  %v3349_v62 = vmul.f32 %v7149_v47, %v3348_v61 }
 0xbc0   :  { %v6006_v38 = vpop.eup %6005  ;;  %v4240_v50 = vmul.f32 %v7231_v14, %v6394_v8 }
 0xbc1   :  { %5915 = vpush %v6006_v38  ;;  %v3508_v38 = vstv %s5746_s26  ;;  %s5770_s26 = sld [smem:[#allocation5 + $0xfa]] }
 0xbc2   :  { %5917 = vpush %v4177_v19  ;;  %v4242_v15 = vcombine.high %v4240_v50, %v4240_v50  ;;  %v4249_v3 = vrot.slane %v4240_v50, %v6385_v49  ;;  %v1329_v50 = vstv %s5514_s27  ;;  %v3509_v19 = vmul.f32 %v7149_v47, %v3508_v38  ;;  %s5498_s27 = sld [smem:[#allocation5 + $0xd8]] }
 0xbc4   :  { %v4256_v20 = vrot.slane %v4242_v15, %v6385_v49  ;;  %v4257_v17 = vcombine.high %v4249_v3, %v4249_v3  ;;  %v4261_v23 = vsel %vm795_vm10, %v4249_v3, 0.0  ;;  %v3668_v15 = vstv %s5762_s3  ;;  %s5570_s3 = sld [smem:[#allocation5 + $0xe1]] }
 0xbc5   :  { %v1330_v3 = vmul.f32 %v7106_v22, %v1329_v50 }
 0xbc6   :  { %v4262_v24 = vsel %vm795_vm10, %v4257_v17, 0.0  ;;  %v4264_v16 = vsel %vm799_vm11, %v4256_v20, 0.0  ;;  %v1409_v20 = vstv %s5522_s1  ;;  %v3669_v17 = vmul.f32 %v7149_v47, %v3668_v15  ;;  %s5642_s1 = sld [smem:[#allocation5 + $0xea]] }
 0xbc7   :  { %v4263_v12 = vadd.f32 %v4262_v24, %v4261_v23  ;;  %v3828_v23 = vstv %s5778_s28  ;;  %v1410_v24 = vmul.f32 %v7106_v22, %v1409_v20  ;;  %s5714_s28 = sld [smem:[#allocation5 + $0xf3]] }
 0xbc9   :  { %v4265_v30 = vadd.f32 %v4264_v16, %v4263_v12  ;;  %v1569_v12 = vstv %s5538_s29  ;;  %v3829_v16 = vmul.f32 %v7149_v47, %v3828_v23 }
 0xbcb   :  { %4266 = vadd.xlane.f32.xlu0 %v4265_v30  ;;  %v1570_v30 = vmul.f32 %v7106_v22, %v1569_v12 }
 0xbe1   :  { %1252 = vrot.lane.b32.xlu0 %v1250_v25, %s6120_s9  ;;  %v1730_v25 = vmul.f32 %v7106_v22, %v1729_v28 }
 0xbe5   :  { %1492 = vrot.lane.b32.xlu0 %v1490_v34, %s6121_s11  ;;  %v1923_v34 = vmul.f32 %v7116_v53, %v1922_v31 }
 0xbe9   :  { %1652 = vrot.lane.b32.xlu0 %v1650_v37, %s6123_s14  ;;  %v2083_v37 = vmul.f32 %v7116_v53, %v2082_v36 }
 0xbed   :  { %1812 = vrot.lane.b32.xlu0 %v1810_v58, %s6125_s17  ;;  %v2243_v58 = vmul.f32 %v7116_v53, %v2242_v27 }
 0xbf1   :  { %2005 = vrot.lane.b32.xlu0 %v2003_v39, %s6119_s8  ;;  %v2403_v39 = vmul.f32 %v7116_v53, %v2402_v21 }
 0xbf2   :  { %s7250_s16 = spop %5915 }
 0xbf3   :  { %s5918_s19 = spop %5917 }
 0xbf4   :  { %s4179_s20 = smul.f32 0.001953125, %s5918_s19  ;;  %s5650_s19 = sld [smem:[#allocation5 + $0xeb]] }
 0xbf5   :  { %2165 = vrot.lane.b32.xlu0 %v2163_v1, %s6121_s11 }
 0xbf6   :  { %v4180_v18 = vstv %s4179_s20  ;;  %s5666_s20 = sld [smem:[#allocation5 + $0xed]] }
 0xbf7   :  { %v7255_v45 = vsub.f32 %v7097_v55, %v4180_v18  ;;  %v2676_v55 = vmul.f32 %v7135_v59, %v2675_v54 }
 0xbf9   :  { %v4182_v48 = vmul.f32 %v7255_v45, %v7255_v45  ;;  %2325 = vrot.lane.b32.xlu0 %v2323_v46, %s6123_s14  ;;  %v2915_v46 = vstv %s5682_s21  ;;  %s5603_s21 = sld [smem:[#allocation5 + $0x109]] }
 0xbfa   :  { %v2595_v40 = vstv %s5650_s19  ;;  %v2916_v35 = vmul.f32 %v7135_v59, %v2915_v46  ;;  %s5563_s19 = sld [smem:[#allocation5 + $0x104]] }
 0xbfb   :  { %v4183_v52 = vmul.f32 %v4182_v48, %v6394_v8  ;;  %v2596_v1 = vmul.f32 %v7135_v59, %v2595_v40  ;;  %v3075_v48 = vstv %s5698_s22  ;;  %s5619_s22 = sld [smem:[#allocation5 + $0x10b]] }
 0xbfc   :  { %v2755_v43 = vstv %s5666_s20  ;;  %s5587_s20 = sld [smem:[#allocation5 + $0x107]] }
 0xbfd   :  { %v4185_v56 = vcombine.high %v4183_v52, %v4183_v52  ;;  %v4192_v26 = vrot.slane %v4183_v52, %v6385_v49  ;;  %2485 = vrot.lane.b32.xlu0 %v2483_v10, %s6125_s17  ;;  %v2756_v18 = vmul.f32 %v7135_v59, %v2755_v43  ;;  %v3076_v52 = vmul.f32 %v7135_v59, %v3075_v48 }
 0xbfe   :  { %v3268_v10 = vstv %s5722_s23  ;;  %v1860_v48 = vstv %s5570_s3  ;;  %s5635_s23 = sld [smem:[#allocation5 + $0x10d]]  ;;  %s5675_s3 = sld [smem:[#allocation5 + $0x112]] }
 0xbff   :  { %v4199_v51 = vrot.slane %v4185_v56, %v6385_v49  ;;  %v4200_v41 = vcombine.high %v4192_v26, %v4192_v26  ;;  %v4204_v60 = vsel %vm795_vm10, %v4192_v26, 0.0  ;;  %v3269_v54 = vmul.f32 %v7149_v47, %v3268_v10 }
 0xc00   :  { %v3428_v56 = vstv %s5738_s24 }
 0xc01   :  { %2678 = vrot.lane.b32.xlu0 %v2676_v55, %s6119_s8  ;;  %v4205_v32 = vsel %vm795_vm10, %v4200_v41, 0.0  ;;  %v4207_v57 = vsel %vm799_vm11, %v4199_v51, 0.0  ;;  %v3429_v26 = vmul.f32 %v7149_v47, %v3428_v56  ;;  %v3588_v55 = vstv %s5754_s25 }
 0xc02   :  { %v4206_v2 = vadd.f32 %v4205_v32, %v4204_v60  ;;  %v3589_v51 = vmul.f32 %v7149_v47, %v3588_v55  ;;  %v3748_v41 = vstv %s5770_s26 }
 0xc03   :  { %v3749_v9 = vmul.f32 %v7149_v47, %v3748_v41 }
 0xc04   :  { %v4208_v4 = vadd.f32 %v4207_v57, %v4206_v2 }
 0xc05   :  { %2838 = vrot.lane.b32.xlu0 %v2836_v5, %s6121_s11 }
 0xc06   :  { %4209 = vadd.xlane.f32.xlu1 %v4208_v4 }
 0xc09   :  { %2998 = vrot.lane.b32.xlu0 %v2996_v7, %s6123_s14 }
 0xc0d   :  { %3158 = vrot.lane.b32.xlu0 %v3156_v13, %s6125_s17  ;;  %v1187_v13 = vstv %s5498_s27  ;;  %s5659_s27 = sld [smem:[#allocation5 + $0x110]] }
 0xc11   :  { %3351 = vrot.lane.b32.xlu0 %v3349_v62, %s6119_s8 }
 0xc15   :  { %3511 = vrot.lane.b32.xlu0 %v3509_v19, %s6121_s11  ;;  %v1188_v19 = vmul.f32 %v7106_v22, %v1187_v13 }
 0xc17   :  { %1332 = vrot.lane.b32.xlu1 %v1330_v3, %s6119_s8 }
 0xc19   :  { %3671 = vrot.lane.b32.xlu0 %v3669_v17, %s6123_s14 }
 0xc1b   :  { %1412 = vrot.lane.b32.xlu1 %v1410_v24, %s6122_s12 }
 0xc1d   :  { %3831 = vrot.lane.b32.xlu0 %v3829_v16, %s6125_s17 }
 0xc1f   :  { %1572 = vrot.lane.b32.xlu1 %v1570_v30, %s6124_s15 }
 0xc23   :  { %1732 = vrot.lane.b32.xlu1 %v1730_v25, %s6126_s18 }
 0xc27   :  { %1925 = vrot.lane.b32.xlu1 %v1923_v34, %s6120_s9 }
 0xc2b   :  { %2085 = vrot.lane.b32.xlu1 %v2083_v37, %s6122_s12 }
 0xc2f   :  { %2245 = vrot.lane.b32.xlu1 %v2243_v58, %s6124_s15 }
 0xc33   :  { %2405 = vrot.lane.b32.xlu1 %v2403_v39, %s6126_s18 }
 0xc37   :  { %2598 = vrot.lane.b32.xlu1 %v2596_v1, %s6120_s9 }
 0xc3b   :  { %2758 = vrot.lane.b32.xlu1 %v2756_v18, %s6122_s12 }
 0xc3f   :  { %2918 = vrot.lane.b32.xlu1 %v2916_v35, %s6124_s15 }
 0xc43   :  { %3078 = vrot.lane.b32.xlu1 %v3076_v52, %s6126_s18 }
 0xc47   :  { %3271 = vrot.lane.b32.xlu1 %v3269_v54, %s6120_s9 }
 0xc4b   :  { %3431 = vrot.lane.b32.xlu1 %v3429_v26, %s6122_s12 }
 0xc4f   :  { %3591 = vrot.lane.b32.xlu1 %v3589_v51, %s6124_s15  ;;  %v1861_v51 = vmul.f32 %v7116_v53, %v1860_v48 }
 0xc53   :  { %3751 = vrot.lane.b32.xlu1 %v3749_v9, %s6126_s18 }
 0xc58   :  { %v7317_v60 = vpop.xlane.xlu0 %4266 }
 0xc5c   :  { %v1253_v32 = vpop.permute.xlu0 %1252 }
 0xc5d   :  { %v1254_v11 = vrot.slane %v1253_v32, 2 }
 0xc5f   :  { %v1255_v38 = vsel %vm433_vm15, %v1253_v32, %v1254_v11 }
 0xc60   :  { %v1493_v2 = vpop.permute.xlu0 %1492  ;;  %v1257_v20 = vadd.f32 %v1255_v38, %v1188_v19 }
 0xc61   :  { %v1494_v24 = vrot.slane %v1493_v2, 2 }
 0xc63   :  { %v1495_v36 = vsel %vm556_vm5, %v1493_v2, %v1494_v24 }
 0xc64   :  { %v1653_v57 = vpop.permute.xlu0 %1652 }
 0xc65   :  { %v1654_v37 = vrot.slane %v1653_v57, 2 }
 0xc67   :  { %v1655_v1 = vsel %vm638_vm7, %v1653_v57, %v1654_v37 }
 0xc68   :  { %v1813_v5 = vpop.permute.xlu0 %1812 }
 0xc69   :  { %v1814_v43 = vrot.slane %v1813_v5, 2 }
 0xc6b   :  { %v1815_v56 = vsel %vm720_vm9, %v1813_v5, %v1814_v43 }
 0xc6c   :  { %v2006_v42 = vpop.permute.xlu0 %2005 }
 0xc6d   :  { %v2007_v41 = vrot.slane %v2006_v42, 2 }
 0xc70   :  { %v2166_v17 = vpop.permute.xlu0 %2165 }
 0xc71   :  { %v2167_v13 = vrot.slane %v2166_v17, 2 }
 0xc73   :  { %v2168_v53 = vsel %vm556_vm5, %v2166_v17, %v2167_v13  ;;  %v3206_v13 = vstv %s5714_s28  ;;  %s5707_s28 = sld [smem:[#allocation5 + $0x116]] }
 0xc74   :  { %v2326_v27 = vpop.permute.xlu0 %2325 }
 0xc78   :  { %v2486_v52 = vpop.permute.xlu0 %2485 }
 0xc93   :  { %v4210_v4 = vpop.xlane.xlu1 %4209 }
 0xc94   :  { %v4211_v7 = vrot.slane %v4210_v4, 4 }
 0xc96   :  { %v4212_v61 = vadd.f32 %v4211_v7, %v4210_v4  ;;  %v2679_v4 = vpop.permute.xlu0 %2678  ;;  %v2008_v7 = vsel %vm474_vm2, %v2006_v42, %v2007_v41 }
 0xc97   :  { %v1333_v62 = vpop.permute.xlu1 %1332 }
 0xc98   :  { %v1334_v50 = vrot.slane %v1333_v62, 2  ;;  %v4213_v47 = vrot.slane %v4212_v61, 2 }
 0xc9a   :  { %v1335_v15 = vsel %vm474_vm2, %v1333_v62, %v1334_v50  ;;  %v4214_v3 = vadd.f32 %v4213_v47, %v4212_v61  ;;  %v2327_v47 = vrot.slane %v2326_v27, 2  ;;  %v2839_v19 = vpop.permute.xlu0 %2838 }
 0xc9b   :  { %v1413_v23 = vpop.permute.xlu1 %1412  ;;  %v1337_v30 = vadd.f32 %v1335_v15, %v1257_v20 }
 0xc9c   :  { %v1414_v12 = vrot.slane %v1413_v23, 2  ;;  %v4215_v16 = vrot.slane %v4214_v3, 1  ;;  %v2328_v42 = vsel %vm638_vm7, %v2326_v27, %v2327_v47 }
 0xc9e   :  { %v1415_v28 = vsel %vm515_vm3, %v1413_v23, %v1414_v12  ;;  %v4216_v25 = vadd.f32 %v4215_v16, %v4214_v3  ;;  %v2487_v12 = vrot.slane %v2486_v52, 2 }
 0xc9f   :  { %v1417_v31 = vadd.f32 %v1415_v28, %v1337_v30  ;;  %v1573_v34 = vpop.permute.xlu1 %1572 }
 0xca0   :  { %v1574_v22 = vrot.slane %v1573_v34, 2  ;;  %5919 = vpush %v4216_v25  ;;  %v2533_v25 = vstv %s5642_s1  ;;  %v2488_v17 = vsel %vm720_vm9, %v2486_v52, %v2487_v12  ;;  %s5691_s1 = sld [smem:[#allocation5 + $0x114]] }
 0xca1   :  { %v1497_v58 = vadd.f32 %v1495_v36, %v1417_v31  ;;  %v2999_v31 = vpop.permute.xlu0 %2998 }
 0xca2   :  { %v1575_v21 = vsel %vm597_vm6, %v1573_v34, %v1574_v22  ;;  %v2534_v22 = vmul.f32 %v7135_v59, %v2533_v25 }
 0xca3   :  { %v1577_v39 = vadd.f32 %v1575_v21, %v1497_v58  ;;  %v1733_v40 = vpop.permute.xlu1 %1732  ;;  %v2680_v21 = vrot.slane %v2679_v4, 2 }
 0xca4   :  { %v1734_v18 = vrot.slane %v1733_v40, 2 }
 0xca5   :  { %v1657_v46 = vadd.f32 %v1655_v1, %v1577_v39  ;;  %v3159_v1 = vpop.permute.xlu0 %3158 }
 0xca6   :  { %v1735_v35 = vsel %vm679_vm8, %v1733_v40, %v1734_v18 }
 0xca7   :  { %v1737_v10 = vadd.f32 %v1735_v35, %v1657_v46  ;;  %v1926_v54 = vpop.permute.xlu1 %1925  ;;  %v2681_v46 = vsel %vm474_vm2, %v2679_v4, %v2680_v21  ;;  %v2840_v35 = vrot.slane %v2839_v19, 2  ;;  %v3160_v4 = vrot.slane %v3159_v1, 2 }
 0xca8   :  { %v1927_v26 = vrot.slane %v1926_v54, 2 }
 0xca9   :  { %v1817_v55 = vadd.f32 %v1815_v56, %v1737_v10  ;;  %v2841_v59 = vsel %vm556_vm5, %v2839_v19, %v2840_v35  ;;  %v7347_v19 = vld [vmem:[#allocation3 + $0x12] sm:$0x3f] }
 0xcaa   :  { %v1928_v2 = vsel %vm433_vm15, %v1926_v54, %v1927_v26  ;;  %v3000_v26 = vrot.slane %v2999_v31, 2 }
 0xcab   :  { %v1862_v9 = vadd.f32 %v1861_v51, %v1817_v55  ;;  %v2086_v32 = vpop.permute.xlu1 %2085  ;;  %v3352_v55 = vpop.permute.xlu0 %3351 }
 0xcac   :  { %v2087_v57 = vrot.slane %v2086_v32, 2 }
 0xcad   :  { %v1930_v11 = vadd.f32 %v1928_v2, %v1862_v9 }
 0xcae   :  { %v2088_v38 = vsel %vm515_vm3, %v2086_v32, %v2087_v57  ;;  %v3001_v57 = vsel %vm638_vm7, %v2999_v31, %v3000_v26 }
 0xcaf   :  { %v2010_v61 = vadd.f32 %v2008_v7, %v1930_v11  ;;  %v2246_v62 = vpop.permute.xlu1 %2245 }
 0xcb0   :  { %v2247_v5 = vrot.slane %v2246_v62, 2 }
 0xcb1   :  { %v2090_v50 = vadd.f32 %v2088_v38, %v2010_v61  ;;  %v3512_v61 = vpop.permute.xlu0 %3511 }
 0xcb2   :  { %v2248_v20 = vsel %vm597_vm6, %v2246_v62, %v2247_v5  ;;  %v3161_v5 = vsel %vm720_vm9, %v3159_v1, %v3160_v4  ;;  %v3513_v25 = vrot.slane %v3512_v61, 2 }
 0xcb3   :  { %v2170_v15 = vadd.f32 %v2168_v53, %v2090_v50  ;;  %v2406_v3 = vpop.permute.xlu1 %2405  ;;  %v4268_v53 = vrot.slane %v7317_v60, 4 }
 0xcb4   :  { %v2407_v23 = vrot.slane %v2406_v3, 2 }
 0xcb5   :  { %v2250_v24 = vadd.f32 %v2248_v20, %v2170_v15  ;;  %v3207_v15 = vmul.f32 %v7347_v19, %v3206_v13  ;;  %v4269_v12 = vadd.f32 %v4268_v53, %v7317_v60  ;;  %v1659_v53 = vstv %s5547_s13  ;;  %s5779_s13 = sld [smem:[#allocation5 + $0x11f]] }
 0xcb6   :  { %v2408_v28 = vsel %vm679_vm8, %v2406_v3, %v2407_v23  ;;  %v3353_v3 = vrot.slane %v3352_v55, 2 }
 0xcb7   :  { %v2330_v16 = vadd.f32 %v2328_v42, %v2250_v24  ;;  %v2599_v30 = vpop.permute.xlu1 %2598 }
 0xcb8   :  { %v2600_v36 = vrot.slane %v2599_v30, 2 }
 0xcb9   :  { %v2410_v34 = vadd.f32 %v2408_v28, %v2330_v16  ;;  %v3672_v16 = vpop.permute.xlu0 %3671  ;;  %v3354_v28 = vsel %vm474_vm2, %v3352_v55, %v3353_v3 }
 0xcba   :  { %v2601_v40 = vsel %vm433_vm15, %v2599_v30, %v2600_v36  ;;  %v3673_v21 = vrot.slane %v3672_v16, 2 }
 0xcbb   :  { %v2490_v37 = vadd.f32 %v2488_v17, %v2410_v34  ;;  %v2759_v58 = vpop.permute.xlu1 %2758 }
 0xcbc   :  { %v2760_v27 = vrot.slane %v2759_v58, 2 }
 0xcbd   :  { %v2535_v39 = vadd.f32 %v2534_v22, %v2490_v37  ;;  %v4270_v22 = vrot.slane %v4269_v12, 2  ;;  %v3832_v60 = vpop.permute.xlu0 %3831 }
 0xcbe   :  { %v2761_v10 = vsel %vm515_vm3, %v2759_v58, %v2760_v27  ;;  %v3514_v58 = vsel %vm556_vm5, %v3512_v61, %v3513_v25  ;;  %v3833_v35 = vrot.slane %v3832_v60, 2  ;;  %v1259_v61 = vstv %s5507_s2  ;;  %s5763_s2 = sld [smem:[#allocation5 + $0x11d]] }
 0xcbf   :  { %v2603_v43 = vadd.f32 %v2601_v40, %v2535_v39  ;;  %v2919_v18 = vpop.permute.xlu1 %2918 }
 0xcc0   :  { %v2920_v52 = vrot.slane %v2919_v18, 2 }
 0xcc1   :  { %v2683_v48 = vadd.f32 %v2681_v46, %v2603_v43  ;;  %v3674_v46 = vsel %vm638_vm7, %v3672_v16, %v3673_v21  ;;  %v2332_v16 = vstv %s5619_s22  ;;  %s5595_s22 = sld [smem:[#allocation5 + $0x108]] }
 0xcc2   :  { %v2921_v41 = vsel %vm597_vm6, %v2919_v18, %v2920_v52  ;;  %v4271_v18 = vadd.f32 %v4270_v22, %v4269_v12 }
 0xcc3   :  { %v2763_v54 = vadd.f32 %v2761_v10, %v2683_v48  ;;  %v3079_v56 = vpop.permute.xlu1 %3078 }
 0xcc4   :  { %v3080_v9 = vrot.slane %v3079_v56, 2 }
 0xcc5   :  { %v2843_v51 = vadd.f32 %v2841_v59, %v2763_v54  ;;  %v4272_v54 = vrot.slane %v4271_v18, 1 }
 0xcc6   :  { %v3081_v7 = vsel %vm679_vm8, %v3079_v56, %v3080_v9  ;;  %v3834_v56 = vsel %vm720_vm9, %v3832_v60, %v3833_v35 }
 0xcc7   :  { %v2923_v32 = vadd.f32 %v2921_v41, %v2843_v51  ;;  %v3272_v2 = vpop.permute.xlu1 %3271  ;;  %v4273_v51 = vadd.f32 %v4272_v54, %v4271_v18 }
 0xcc8   :  { %v3273_v50 = vrot.slane %v3272_v2, 2 }
 0xcc9   :  { %v3003_v11 = vadd.f32 %v3001_v57, %v2923_v32 }
 0xcca   :  { %v3274_v24 = vsel %vm433_vm15, %v3272_v2, %v3273_v50 }
 0xccb   :  { %v3083_v62 = vadd.f32 %v3081_v7, %v3003_v11  ;;  %v3432_v38 = vpop.permute.xlu1 %3431 }
 0xccc   :  { %v3433_v42 = vrot.slane %v3432_v38, 2 }
 0xccd   :  { %v3163_v47 = vadd.f32 %v3161_v5, %v3083_v62  ;;  %v7368_v62 = vld [vmem:[#allocation3] sm:$0x3f]  ;;  %v1499_v5 = vstv %s5531_s10  ;;  %s5523_s10 = sld [smem:[#allocation5 + $0xff]] }
 0xcce   :  { %v3434_v34 = vsel %vm515_vm3, %v3432_v38, %v3433_v42  ;;  %v1260_v38 = vmul.f32 %v7368_v62, %v1259_v61  ;;  %v1500_v50 = vmul.f32 %v7368_v62, %v1499_v5  ;;  %v2172_v42 = vstv %s5603_s21  ;;  %s5579_s21 = sld [smem:[#allocation5 + $0x106]] }
 0xccf   :  { %v3208_v20 = vadd.f32 %v3207_v15, %v3163_v47  ;;  %v3592_v23 = vpop.permute.xlu1 %3591  ;;  %v1660_v47 = vmul.f32 %v7368_v62, %v1659_v53  ;;  %v1819_v15 = vstv %s5563_s19  ;;  %s5539_s19 = sld [smem:[#allocation5 + $0x101]] }
 0xcd0   :  { %v3593_v17 = vrot.slane %v3592_v23, 2  ;;  %v1820_v3 = vmul.f32 %v7368_v62, %v1819_v15 }
 0xcd1   :  { %v3276_v30 = vadd.f32 %v3274_v24, %v3208_v20  ;;  %s5920_s29 = spop %5919  ;;  %v2012_v20 = vstv %s5587_s20  ;;  %s5555_s20 = sld [smem:[#allocation5 + $0x103]] }
 0xcd2   :  { %s4218_s5 = smul.f32 0.001953125, %s5920_s29  ;;  %v3594_v27 = vsel %vm597_vm6, %v3592_v23, %v3593_v17  ;;  %v7378_v23 = vld [vmem:[#allocation3 + $0x6] sm:$0x3f]  ;;  %s5731_s29 = sld [smem:[#allocation5 + $0x119]] }
 0xcd3   :  { %v3356_v31 = vadd.f32 %v3354_v28, %v3276_v30  ;;  %v3752_v37 = vpop.permute.xlu1 %3751  ;;  %v2013_v24 = vmul.f32 %v7378_v23, %v2012_v20  ;;  %v2173_v12 = vmul.f32 %v7378_v23, %v2172_v42  ;;  %v2333_v25 = vmul.f32 %v7378_v23, %v2332_v16 }
 0xcd4   :  { %s4221_s0 = sadd.f32 1e-05, %s4218_s5  ;;  %v3753_v1 = vrot.slane %v3752_v37, 2  ;;  %s5747_s5 = sld [smem:[#allocation5 + $0x11b]] }
 0xcd5   :  { %v3436_v36 = vadd.f32 %v3434_v34, %v3356_v31  ;;  %v2492_v31 = vstv %s5635_s23  ;;  %s5611_s23 = sld [smem:[#allocation5 + $0x10a]] }
 0xcd6   :  { %v4222_v39 = vstv %s4221_s0  ;;  %v3754_v10 = vsel %vm679_vm8, %v3752_v37, %v3753_v1  ;;  %v2685_v37 = vstv %s5659_s27  ;;  %s5515_s0 = sld [smem:[#allocation5 + $0xfe]]  ;;  %s5667_s27 = sld [smem:[#allocation5 + $0x111]] }
 0xcd7   :  { %v3516_v40 = vadd.f32 %v3514_v58, %v3436_v36  ;;  %6007 = vrsqrt.f32 %v4222_v39  ;;  %v2493_v36 = vmul.f32 %v7378_v23, %v2492_v31 }
 0xcd9   :  { %v3596_v43 = vadd.f32 %v3594_v27, %v3516_v40  ;;  %v2845_v40 = vstv %s5675_s3  ;;  %s5683_s3 = sld [smem:[#allocation5 + $0x113]] }
 0xcdb   :  { %v3676_v48 = vadd.f32 %v3674_v46, %v3596_v43 }
 0xcdd   :  { %v3756_v52 = vadd.f32 %v3754_v10, %v3676_v48  ;;  %v3005_v48 = vstv %s5691_s1  ;;  %s5699_s1 = sld [smem:[#allocation5 + $0x115]] }
 0xcdf   :  { %v7359_v59 = vadd.f32 %v3834_v56, %v3756_v52  ;;  %v3165_v52 = vstv %s5707_s28  ;;  %v3358_v56 = vstv %s5731_s29  ;;  %v2925_v31 = vstv %s5683_s3  ;;  %s5723_s28 = sld [smem:[#allocation5 + $0x118]]  ;;  %s5739_s29 = sld [smem:[#allocation5 + $0x11a]] }
 0xce0   :  { %s5588_s3 = sld [smem:[#allocation5 + $0x12b]] }
 0xce1   :  { %v6008_v26 = vpop.eup %6007  ;;  %v4336_v55 = vmul.f32 %v7359_v59, %v6394_v8 }
 0xce2   :  { %5921 = vpush %v6008_v26  ;;  %v3359_v26 = vmul.f32 %v7347_v19, %v3358_v56 }
 0xce3   :  { %5923 = vpush %v4273_v51  ;;  %v4338_v41 = vcombine.high %v4336_v55, %v4336_v55  ;;  %v4345_v9 = vrot.slane %v4336_v55, %v6385_v49  ;;  %v3518_v55 = vstv %s5747_s5  ;;  %v1339_v51 = vstv %s5515_s0  ;;  %s5755_s5 = sld [smem:[#allocation5 + $0x11c]]  ;;  %s5771_s0 = sld [smem:[#allocation5 + $0x11e]] }
 0xce5   :  { %v4352_v32 = vrot.slane %v4338_v41, %v6385_v49  ;;  %v4353_v2 = vcombine.high %v4345_v9, %v4345_v9  ;;  %v4357_v57 = vsel %vm795_vm10, %v4345_v9, 0.0  ;;  %v3519_v41 = vmul.f32 %v7347_v19, %v3518_v55 }
 0xce6   :  { %v3678_v9 = vstv %s5763_s2  ;;  %s5499_s2 = sld [smem:[#allocation5 + $0xfc]] }
 0xce7   :  { %v4358_v4 = vsel %vm795_vm10, %v4353_v2, 0.0  ;;  %v4360_v7 = vsel %vm799_vm11, %v4352_v32, 0.0  ;;  %v1340_v32 = vmul.f32 %v7368_v62, %v1339_v51  ;;  %v1419_v2 = vstv %s5523_s10  ;;  %s5571_s10 = sld [smem:[#allocation5 + $0x105]] }
 0xce8   :  { %v4359_v11 = vadd.f32 %v4358_v4, %v4357_v57  ;;  %v3679_v57 = vmul.f32 %v7347_v19, %v3678_v9  ;;  %v3838_v4 = vstv %s5779_s13  ;;  %s5643_s13 = sld [smem:[#allocation5 + $0x10e]] }
 0xcea   :  { %v4361_v13 = vadd.f32 %v4360_v7, %v4359_v11  ;;  %v1420_v11 = vmul.f32 %v7368_v62, %v1419_v2  ;;  %v1579_v7 = vstv %s5539_s19  ;;  %s5715_s19 = sld [smem:[#allocation5 + $0x117]] }
 0xceb   :  { %v1580_v61 = vmul.f32 %v7368_v62, %v1579_v7 }
 0xcec   :  { %4362 = vadd.xlane.f32.xlu0 %v4361_v13  ;;  %v3839_v13 = vmul.f32 %v7347_v19, %v3838_v4  ;;  %v1191_v56 = vstv %s5499_s2 }
 0xd02   :  { %1262 = vrot.lane.b32.xlu0 %v1260_v38, %s6120_s9  ;;  %v1739_v38 = vstv %s5555_s20 }
 0xd03   :  { %v1740_v5 = vmul.f32 %v7368_v62, %v1739_v38 }
 0xd06   :  { %1502 = vrot.lane.b32.xlu0 %v1500_v50, %s6121_s11  ;;  %v1932_v50 = vstv %s5579_s21 }
 0xd07   :  { %v1933_v53 = vmul.f32 %v7378_v23, %v1932_v50 }
 0xd0a   :  { %1662 = vrot.lane.b32.xlu0 %v1660_v47, %s6123_s14  ;;  %v2092_v47 = vstv %s5595_s22 }
 0xd0b   :  { %v2093_v15 = vmul.f32 %v7378_v23, %v2092_v47 }
 0xd0e   :  { %1822 = vrot.lane.b32.xlu0 %v1820_v3, %s6125_s17  ;;  %v2252_v3 = vstv %s5611_s23  ;;  %s5508_s23 = sld [smem:[#allocation5 + $0x121]] }
 0xd0f   :  { %v2253_v20 = vmul.f32 %v7378_v23, %v2252_v3 }
 0xd12   :  { %2015 = vrot.lane.b32.xlu0 %v2013_v24, %s6119_s8 }
 0xd13   :  { %s7382_s24 = spop %5921 }
 0xd14   :  { %s5924_s25 = spop %5923 }
 0xd15   :  { %s4275_s26 = smul.f32 0.001953125, %s5924_s25  ;;  %s5627_s25 = sld [smem:[#allocation5 + $0x10c]] }
 0xd16   :  { %2175 = vrot.lane.b32.xlu0 %v2173_v12, %s6121_s11 }
 0xd17   :  { %v4276_v30 = vstv %s4275_s26  ;;  %s5651_s26 = sld [smem:[#allocation5 + $0x10f]] }
 0xd18   :  { %v7387_v28 = vsub.f32 %v7231_v14, %v4276_v30  ;;  %v7397_v14 = vld [vmem:[#allocation3 + $0xc] sm:$0x3f]  ;;  %v2765_v30 = vstv %s5667_s27  ;;  %s5564_s27 = sld [smem:[#allocation5 + $0x128]] }
 0xd19   :  { %v2686_v21 = vmul.f32 %v7397_v14, %v2685_v37  ;;  %v2846_v46 = vmul.f32 %v7397_v14, %v2845_v40  ;;  %v3006_v10 = vmul.f32 %v7397_v14, %v3005_v48  ;;  %v3166_v54 = vmul.f32 %v7397_v14, %v3165_v52 }
 0xd1a   :  { %v4278_v34 = vmul.f32 %v7387_v28, %v7387_v28  ;;  %2335 = vrot.lane.b32.xlu0 %v2333_v25, %s6123_s14  ;;  %v2766_v25 = vmul.f32 %v7397_v14, %v2765_v30  ;;  %v3278_v37 = vstv %s5723_s28  ;;  %v3758_v40 = vstv %s5771_s0  ;;  %s5620_s28 = sld [smem:[#allocation5 + $0x12f]] }
 0xd1b   :  { %v2412_v24 = vstv %s5627_s25  ;;  %s5532_s25 = sld [smem:[#allocation5 + $0x124]] }
 0xd1c   :  { %v4279_v17 = vmul.f32 %v4278_v34, %v6394_v8  ;;  %v2413_v42 = vmul.f32 %v7378_v23, %v2412_v24  ;;  %v2926_v34 = vmul.f32 %v7397_v14, %v2925_v31 }
 0xd1d   :  { %v2605_v12 = vstv %s5651_s26  ;;  %s5548_s26 = sld [smem:[#allocation5 + $0x126]] }
 0xd1e   :  { %v4281_v22 = vcombine.high %v4279_v17, %v4279_v17  ;;  %v4288_v58 = vrot.slane %v4279_v17, %v6385_v49  ;;  %2495 = vrot.lane.b32.xlu0 %v2493_v36, %s6125_s17  ;;  %v2606_v16 = vmul.f32 %v7397_v14, %v2605_v12  ;;  %v3085_v17 = vstv %s5699_s1  ;;  %s5604_s1 = sld [smem:[#allocation5 + $0x12d]] }
 0xd1f   :  { %v3086_v36 = vmul.f32 %v7397_v14, %v3085_v17 }
 0xd20   :  { %v4295_v39 = vrot.slane %v4281_v22, %v6385_v49  ;;  %v4296_v60 = vcombine.high %v4288_v58, %v4288_v58  ;;  %v4300_v27 = vsel %vm795_vm10, %v4288_v58, 0.0  ;;  %v3279_v22 = vmul.f32 %v7347_v19, %v3278_v37 }
 0xd21   :  { %v3438_v58 = vstv %s5739_s29  ;;  %s5636_s29 = sld [smem:[#allocation5 + $0x131]] }
 0xd22   :  { %2688 = vrot.lane.b32.xlu0 %v2686_v21, %s6119_s8  ;;  %v4301_v1 = vsel %vm795_vm10, %v4296_v60, 0.0  ;;  %v4303_v18 = vsel %vm799_vm11, %v4295_v39, 0.0  ;;  %v3439_v21 = vmul.f32 %v7347_v19, %v3438_v58  ;;  %v3598_v39 = vstv %s5755_s5 }
 0xd23   :  { %v4302_v43 = vadd.f32 %v4301_v1, %v4300_v27  ;;  %v3599_v60 = vmul.f32 %v7347_v19, %v3598_v39  ;;  %v3759_v27 = vmul.f32 %v7347_v19, %v3758_v40 }
 0xd25   :  { %v4304_v35 = vadd.f32 %v4303_v18, %v4302_v43 }
 0xd26   :  { %2848 = vrot.lane.b32.xlu0 %v2846_v46, %s6121_s11 }
 0xd27   :  { %4305 = vadd.xlane.f32.xlu1 %v4304_v35 }
 0xd2a   :  { %3008 = vrot.lane.b32.xlu0 %v3006_v10, %s6123_s14 }
 0xd2e   :  { %3168 = vrot.lane.b32.xlu0 %v3166_v54, %s6125_s17 }
 0xd32   :  { %3361 = vrot.lane.b32.xlu0 %v3359_v26, %s6119_s8 }
 0xd36   :  { %3521 = vrot.lane.b32.xlu0 %v3519_v41, %s6121_s11 }
 0xd38   :  { %1342 = vrot.lane.b32.xlu1 %v1340_v32, %s6119_s8  ;;  %v1192_v32 = vmul.f32 %v7368_v62, %v1191_v56 }
 0xd3a   :  { %3681 = vrot.lane.b32.xlu0 %v3679_v57, %s6123_s14 }
 0xd3c   :  { %1422 = vrot.lane.b32.xlu1 %v1420_v11, %s6122_s12 }
 0xd3e   :  { %3841 = vrot.lane.b32.xlu0 %v3839_v13, %s6125_s17 }
 0xd40   :  { %1582 = vrot.lane.b32.xlu1 %v1580_v61, %s6124_s15 }
 0xd44   :  { %1742 = vrot.lane.b32.xlu1 %v1740_v5, %s6126_s18 }
 0xd48   :  { %1935 = vrot.lane.b32.xlu1 %v1933_v53, %s6120_s9 }
 0xd4c   :  { %2095 = vrot.lane.b32.xlu1 %v2093_v15, %s6122_s12 }
 0xd50   :  { %2255 = vrot.lane.b32.xlu1 %v2253_v20, %s6124_s15 }
 0xd54   :  { %2415 = vrot.lane.b32.xlu1 %v2413_v42, %s6126_s18 }
 0xd58   :  { %2608 = vrot.lane.b32.xlu1 %v2606_v16, %s6120_s9 }
 0xd5c   :  { %2768 = vrot.lane.b32.xlu1 %v2766_v25, %s6122_s12 }
 0xd60   :  { %2928 = vrot.lane.b32.xlu1 %v2926_v34, %s6124_s15 }
 0xd64   :  { %3088 = vrot.lane.b32.xlu1 %v3086_v36, %s6126_s18 }
 0xd68   :  { %3281 = vrot.lane.b32.xlu1 %v3279_v22, %s6120_s9  ;;  %v1864_v22 = vstv %s5571_s10  ;;  %s5660_s10 = sld [smem:[#allocation5 + $0x134]] }
 0xd6c   :  { %3441 = vrot.lane.b32.xlu1 %v3439_v21, %s6122_s12 }
 0xd70   :  { %3601 = vrot.lane.b32.xlu1 %v3599_v60, %s6124_s15 }
 0xd74   :  { %3761 = vrot.lane.b32.xlu1 %v3759_v27, %s6126_s18 }
 0xd79   :  { %v7451_v1 = vpop.xlane.xlu0 %4362 }
 0xd7d   :  { %v1263_v43 = vpop.permute.xlu0 %1262 }
 0xd7e   :  { %v1264_v10 = vrot.slane %v1263_v43, 2 }
 0xd80   :  { %v1265_v51 = vsel %vm433_vm15, %v1263_v43, %v1264_v10  ;;  %v1865_v43 = vmul.f32 %v7378_v23, %v1864_v22 }
 0xd81   :  { %v1503_v18 = vpop.permute.xlu0 %1502  ;;  %v1267_v4 = vadd.f32 %v1265_v51, %v1192_v32 }
 0xd82   :  { %v1504_v13 = vrot.slane %v1503_v18, 2 }
 0xd84   :  { %v1505_v3 = vsel %vm556_vm5, %v1503_v18, %v1504_v13 }
 0xd85   :  { %v1663_v46 = vpop.permute.xlu0 %1662 }
 0xd86   :  { %v1664_v20 = vrot.slane %v1663_v46, 2 }
 0xd88   :  { %v1665_v31 = vsel %vm638_vm7, %v1663_v46, %v1664_v20  ;;  %v2537_v20 = vstv %s5643_s13  ;;  %s5676_s13 = sld [smem:[#allocation5 + $0x136]] }
 0xd89   :  { %v1823_v35 = vpop.permute.xlu0 %1822 }
 0xd8a   :  { %v1824_v34 = vrot.slane %v1823_v35, 2 }
 0xd8c   :  { %v1825_v60 = vsel %vm720_vm9, %v1823_v35, %v1824_v34 }
 0xd8d   :  { %v2016_v54 = vpop.permute.xlu0 %2015 }
 0xd8e   :  { %v2017_v18 = vrot.slane %v2016_v54, 2 }
 0xd91   :  { %v2176_v11 = vpop.permute.xlu0 %2175 }
 0xd92   :  { %v2177_v51 = vrot.slane %v2176_v11, 2 }
 0xd95   :  { %v2336_v42 = vpop.permute.xlu0 %2335 }
 0xd99   :  { %v2496_v58 = vpop.permute.xlu0 %2495 }
 0xd9d   :  { %v2689_v56 = vpop.permute.xlu0 %2688 }
 0xd9e   :  { %v2690_v34 = vrot.slane %v2689_v56, 2 }
 0xdb4   :  { %v4306_v48 = vpop.xlane.xlu1 %4305 }
 0xdb5   :  { %v4307_v52 = vrot.slane %v4306_v48, 4 }
 0xdb7   :  { %v4308_v26 = vadd.f32 %v4307_v52, %v4306_v48 }
 0xdb8   :  { %v1343_v55 = vpop.permute.xlu1 %1342 }
 0xdb9   :  { %v1344_v41 = vrot.slane %v1343_v55, 2  ;;  %v4309_v9 = vrot.slane %v4308_v26, 2 }
 0xdbb   :  { %v1345_v2 = vsel %vm474_vm2, %v1343_v55, %v1344_v41  ;;  %v4310_v57 = vadd.f32 %v4309_v9, %v4308_v26  ;;  %v2018_v55 = vsel %vm474_vm2, %v2016_v54, %v2017_v18 }
 0xdbc   :  { %v1423_v7 = vpop.permute.xlu1 %1422  ;;  %v1347_v5 = vadd.f32 %v1345_v2, %v1267_v4  ;;  %v2337_v4 = vrot.slane %v2336_v42, 2 }
 0xdbd   :  { %v1424_v61 = vrot.slane %v1423_v7, 2  ;;  %v4311_v38 = vrot.slane %v4310_v57, 1 }
 0xdbe   :  { %v2338_v54 = vsel %vm638_vm7, %v2336_v42, %v2337_v4 }
 0xdbf   :  { %v1425_v50 = vsel %vm515_vm3, %v1423_v7, %v1424_v61  ;;  %v4312_v53 = vadd.f32 %v4311_v38, %v4310_v57  ;;  %v2178_v57 = vsel %vm556_vm5, %v2176_v11, %v2177_v51  ;;  %v2849_v7 = vpop.permute.xlu0 %2848 }
 0xdc0   :  { %v1427_v47 = vadd.f32 %v1425_v50, %v1347_v5  ;;  %v1583_v15 = vpop.permute.xlu1 %1582 }
 0xdc1   :  { %v1584_v24 = vrot.slane %v1583_v15, 2  ;;  %5925 = vpush %v4312_v53  ;;  %v2497_v53 = vrot.slane %v2496_v58, 2 }
 0xdc2   :  { %v1507_v12 = vadd.f32 %v1505_v3, %v1427_v47 }
 0xdc3   :  { %v1585_v16 = vsel %vm597_vm6, %v1583_v15, %v1584_v24  ;;  %v3009_v24 = vpop.permute.xlu0 %3008  ;;  %v2498_v11 = vsel %vm720_vm9, %v2496_v58, %v2497_v53 }
 0xdc4   :  { %v1587_v30 = vadd.f32 %v1585_v16, %v1507_v12  ;;  %v1743_v25 = vpop.permute.xlu1 %1742 }
 0xdc5   :  { %v1744_v17 = vrot.slane %v1743_v25, 2 }
 0xdc6   :  { %v1667_v36 = vadd.f32 %v1665_v31, %v1587_v30 }
 0xdc7   :  { %v1745_v37 = vsel %vm679_vm8, %v1743_v25, %v1744_v17  ;;  %v2538_v25 = vmul.f32 %v7397_v14, %v2537_v20 }
 0xdc8   :  { %v1747_v21 = vadd.f32 %v1745_v37, %v1667_v36  ;;  %v1936_v39 = vpop.permute.xlu1 %1935  ;;  %v3169_v37 = vpop.permute.xlu0 %3168 }
 0xdc9   :  { %v1937_v40 = vrot.slane %v1936_v39, 2 }
 0xdca   :  { %v1827_v27 = vadd.f32 %v1825_v60, %v1747_v21  ;;  %v2850_v60 = vrot.slane %v2849_v7, 2 }
 0xdcb   :  { %v1938_v46 = vsel %vm433_vm15, %v1936_v39, %v1937_v40  ;;  %v2691_v39 = vsel %vm474_vm2, %v2689_v56, %v2690_v34 }
 0xdcc   :  { %v1866_v48 = vadd.f32 %v1865_v43, %v1827_v27  ;;  %v2096_v10 = vpop.permute.xlu1 %2095 }
 0xdcd   :  { %v2097_v52 = vrot.slane %v2096_v10, 2 }
 0xdce   :  { %v1940_v26 = vadd.f32 %v1938_v46, %v1866_v48  ;;  %v2851_v48 = vsel %vm556_vm5, %v2849_v7, %v2850_v60  ;;  %v3362_v46 = vpop.permute.xlu0 %3361 }
 0xdcf   :  { %v2098_v32 = vsel %vm515_vm3, %v2096_v10, %v2097_v52  ;;  %v3010_v10 = vrot.slane %v3009_v24, 2 }
 0xdd0   :  { %v2020_v41 = vadd.f32 %v2018_v55, %v1940_v26  ;;  %v2256_v9 = vpop.permute.xlu1 %2255 }
 0xdd1   :  { %v2257_v35 = vrot.slane %v2256_v9, 2  ;;  %v3011_v56 = vsel %vm638_vm7, %v3009_v24, %v3010_v10 }
 0xdd2   :  { %v2100_v2 = vadd.f32 %v2098_v32, %v2020_v41 }
 0xdd3   :  { %v2258_v38 = vsel %vm597_vm6, %v2256_v9, %v2257_v35  ;;  %v3170_v9 = vrot.slane %v3169_v37, 2 }
 0xdd4   :  { %v2180_v13 = vadd.f32 %v2178_v57, %v2100_v2  ;;  %v2416_v61 = vpop.permute.xlu1 %2415  ;;  %v3210_v2 = vstv %s5715_s19  ;;  %v3522_v57 = vpop.permute.xlu0 %3521  ;;  %s5692_s19 = sld [smem:[#allocation5 + $0x138]] }
 0xdd5   :  { %v2417_v5 = vrot.slane %v2416_v61, 2  ;;  %v3171_v7 = vsel %vm720_vm9, %v3169_v37, %v3170_v9 }
 0xdd6   :  { %v2260_v50 = vadd.f32 %v2258_v38, %v2180_v13  ;;  %v4364_v38 = vrot.slane %v7451_v1, 4 }
 0xdd7   :  { %v2418_v3 = vsel %vm679_vm8, %v2416_v61, %v2417_v5 }
 0xdd8   :  { %v2340_v47 = vadd.f32 %v2338_v54, %v2260_v50  ;;  %v2609_v15 = vpop.permute.xlu1 %2608  ;;  %v3211_v50 = vmul.f32 %v7347_v19, %v3210_v2  ;;  %v3363_v54 = vrot.slane %v3362_v46, 2  ;;  %v4365_v20 = vadd.f32 %v4364_v38, %v7451_v1  ;;  %v3682_v24 = vpop.permute.xlu0 %3681 }
 0xdd9   :  { %v2610_v16 = vrot.slane %v2609_v15, 2  ;;  %v3683_v37 = vrot.slane %v3682_v24, 2 }
 0xdda   :  { %v2420_v12 = vadd.f32 %v2418_v3, %v2340_v47 }
 0xddb   :  { %v2611_v36 = vsel %vm433_vm15, %v2609_v15, %v2610_v16  ;;  %v3523_v16 = vrot.slane %v3522_v57, 2 }
 0xddc   :  { %v2500_v30 = vadd.f32 %v2498_v11, %v2420_v12  ;;  %v2769_v31 = vpop.permute.xlu1 %2768  ;;  %v3364_v11 = vsel %vm474_vm2, %v3362_v46, %v3363_v54  ;;  %v3842_v1 = vpop.permute.xlu0 %3841  ;;  %v1669_v54 = vstv %s5548_s26  ;;  %s5524_s26 = sld [smem:[#allocation5 + $0x123]] }
 0xddd   :  { %v2770_v42 = vrot.slane %v2769_v31, 2 }
 0xdde   :  { %v2539_v17 = vadd.f32 %v2538_v25, %v2500_v30 }
 0xddf   :  { %v2771_v27 = vsel %vm515_vm3, %v2769_v31, %v2770_v42  ;;  %v3524_v42 = vsel %vm556_vm5, %v3522_v57, %v3523_v16 }
 0xde0   :  { %v2613_v22 = vadd.f32 %v2611_v36, %v2539_v17  ;;  %v2929_v21 = vpop.permute.xlu1 %2928  ;;  %v4366_v36 = vrot.slane %v4365_v20, 2 }
 0xde1   :  { %v2930_v58 = vrot.slane %v2929_v21, 2 }
 0xde2   :  { %v2693_v40 = vadd.f32 %v2691_v39, %v2613_v22 }
 0xde3   :  { %v2931_v26 = vsel %vm597_vm6, %v2929_v21, %v2930_v58  ;;  %v3684_v58 = vsel %vm638_vm7, %v3682_v24, %v3683_v37  ;;  %v2182_v24 = vstv %s5604_s1  ;;  %s5556_s1 = sld [smem:[#allocation5 + $0x127]] }
 0xde4   :  { %v2773_v43 = vadd.f32 %v2771_v27, %v2693_v40  ;;  %v3089_v18 = vpop.permute.xlu1 %3088  ;;  %v4367_v27 = vadd.f32 %v4366_v36, %v4365_v20 }
 0xde5   :  { %v3090_v55 = vrot.slane %v3089_v18, 2 }
 0xde6   :  { %v2853_v52 = vadd.f32 %v2851_v48, %v2773_v43  ;;  %v3843_v43 = vrot.slane %v3842_v1, 2  ;;  %v4368_v46 = vrot.slane %v4367_v27, 1 }
 0xde7   :  { %v3091_v35 = vsel %vm679_vm8, %v3089_v18, %v3090_v55 }
 0xde8   :  { %v2933_v51 = vadd.f32 %v2931_v26, %v2853_v52  ;;  %v3282_v41 = vpop.permute.xlu1 %3281  ;;  %v3844_v52 = vsel %vm720_vm9, %v3842_v1, %v3843_v43 }
 0xde9   :  { %v3283_v61 = vrot.slane %v3282_v41, 2 }
 0xdea   :  { %v3013_v32 = vadd.f32 %v3011_v56, %v2933_v51 }
 0xdeb   :  { %v3284_v15 = vsel %vm433_vm15, %v3282_v41, %v3283_v61  ;;  %v4369_v41 = vadd.f32 %v4368_v46, %v4367_v27  ;;  %v1269_v61 = vstv %s5508_s23  ;;  %s5516_s23 = sld [smem:[#allocation5 + $0x122]] }
 0xdec   :  { %v3093_v4 = vadd.f32 %v3091_v35, %v3013_v32  ;;  %v3442_v13 = vpop.permute.xlu1 %3441  ;;  %v1270_v38 = vmul.f32 %v7368_v62, %v1269_v61 }
 0xded   :  { %v3443_v3 = vrot.slane %v3442_v13, 2 }
 0xdee   :  { %v3173_v5 = vadd.f32 %v3171_v7, %v3093_v4 }
 0xdef   :  { %v3444_v25 = vsel %vm515_vm3, %v3442_v13, %v3443_v3  ;;  %v2022_v3 = vstv %s5588_s3  ;;  %s5540_s3 = sld [smem:[#allocation5 + $0x125]] }
 0xdf0   :  { %v3212_v53 = vadd.f32 %v3211_v50, %v3173_v5  ;;  %v3602_v47 = vpop.permute.xlu1 %3601  ;;  %v1509_v5 = vstv %s5532_s25  ;;  %v2023_v20 = vmul.f32 %v7378_v23, %v2022_v3  ;;  %s5764_s25 = sld [smem:[#allocation5 + $0x141]] }
 0xdf1   :  { %v3603_v31 = vrot.slane %v3602_v47, 2  ;;  %v1510_v50 = vmul.f32 %v7368_v62, %v1509_v5  ;;  %v1749_v5 = vstv %s5556_s1  ;;  %s5716_s1 = sld [smem:[#allocation5 + $0x13b]] }
 0xdf2   :  { %v3286_v12 = vadd.f32 %v3284_v15, %v3212_v53  ;;  %s5926_s20 = spop %5925  ;;  %v1670_v53 = vmul.f32 %v7368_v62, %v1669_v54 }
 0xdf3   :  { %s4314_s21 = smul.f32 0.001953125, %s5926_s20  ;;  %v3604_v39 = vsel %vm597_vm6, %v3602_v47, %v3603_v31  ;;  %v1829_v47 = vstv %s5564_s27  ;;  %v2502_v31 = vstv %s5636_s29  ;;  %s5708_s20 = sld [smem:[#allocation5 + $0x13a]] }
 0xdf4   :  { %v3366_v30 = vadd.f32 %v3364_v11, %v3286_v12  ;;  %v3762_v17 = vpop.permute.xlu1 %3761  ;;  %v1830_v15 = vmul.f32 %v7368_v62, %v1829_v47  ;;  %v2183_v12 = vmul.f32 %v7378_v23, %v2182_v24  ;;  %v2342_v11 = vstv %s5620_s28  ;;  %s5780_s27 = sld [smem:[#allocation5 + $0x143]]  ;;  %s5580_s28 = sld [smem:[#allocation5 + $0x12a]] }
 0xdf5   :  { %s4317_s22 = sadd.f32 1e-05, %s4314_s21  ;;  %v3763_v60 = vrot.slane %v3762_v17, 2  ;;  %v2503_v36 = vmul.f32 %v7378_v23, %v2502_v31  ;;  %s5732_s21 = sld [smem:[#allocation5 + $0x13d]] }
 0xdf6   :  { %v3446_v34 = vadd.f32 %v3444_v25, %v3366_v30  ;;  %v2343_v25 = vmul.f32 %v7378_v23, %v2342_v11  ;;  %s5596_s29 = sld [smem:[#allocation5 + $0x12c]] }
 0xdf7   :  { %v4318_v22 = vstv %s4317_s22  ;;  %v3764_v48 = vsel %vm679_vm8, %v3762_v17, %v3763_v60  ;;  %s5748_s22 = sld [smem:[#allocation5 + $0x13f]] }
 0xdf8   :  { %v3526_v21 = vadd.f32 %v3524_v42, %v3446_v34  ;;  %6009 = vrsqrt.f32 %v4318_v22  ;;  %v2695_v42 = vstv %s5660_s10  ;;  %s5652_s10 = sld [smem:[#allocation5 + $0x133]] }
 0xdf9   :  { %v3175_v46 = vstv %s5708_s20  ;;  %s5700_s20 = sld [smem:[#allocation5 + $0x139]] }
 0xdfa   :  { %v3606_v40 = vadd.f32 %v3604_v39, %v3526_v21  ;;  %v2855_v39 = vstv %s5676_s13  ;;  %v1942_v54 = vstv %s5580_s28  ;;  %s5668_s13 = sld [smem:[#allocation5 + $0x135]] }
 0xdfb   :  { %v2856_v43 = vmul.f32 %v7397_v14, %v2855_v39 }
 0xdfc   :  { %v3686_v18 = vadd.f32 %v3684_v58, %v3606_v40  ;;  %v2102_v47 = vstv %s5596_s29 }
 0xdfe   :  { %v3766_v10 = vadd.f32 %v3764_v48, %v3686_v18  ;;  %v3015_v48 = vstv %s5692_s19  ;;  %v2615_v11 = vstv %s5652_s10  ;;  %s5684_s19 = sld [smem:[#allocation5 + $0x137]] }
 0xe00   :  { %v7491_v26 = vadd.f32 %v3844_v52, %v3766_v10  ;;  %v3016_v10 = vmul.f32 %v7397_v14, %v3015_v48  ;;  %v3176_v52 = vmul.f32 %v7397_v14, %v3175_v46 }
 0xe02   :  { %v6010_v55 = vpop.eup %6009  ;;  %v4432_v51 = vmul.f32 %v7491_v26, %v6394_v8 }
 0xe03   :  { %5927 = vpush %v6010_v55  ;;  %v3368_v55 = vstv %s5732_s21  ;;  %s5724_s21 = sld [smem:[#allocation5 + $0x13c]] }
 0xe04   :  { %5929 = vpush %v4369_v41  ;;  %v4434_v56 = vcombine.high %v4432_v51, %v4432_v51  ;;  %v4441_v9 = vrot.slane %v4432_v51, %v6385_v49  ;;  %v3369_v51 = vmul.f32 %v7347_v19, %v3368_v55  ;;  %v3528_v41 = vstv %s5748_s22  ;;  %s5740_s22 = sld [smem:[#allocation5 + $0x13e]] }
 0xe06   :  { %v4448_v32 = vrot.slane %v4434_v56, %v6385_v49  ;;  %v4449_v35 = vcombine.high %v4441_v9, %v4441_v9  ;;  %v4453_v2 = vsel %vm795_vm10, %v4441_v9, 0.0  ;;  %v1349_v56 = vstv %s5516_s23  ;;  %s5756_s23 = sld [smem:[#allocation5 + $0x140]] }
 0xe07   :  { %v3529_v9 = vmul.f32 %v7347_v19, %v3528_v41 }
 0xe08   :  { %v4454_v57 = vsel %vm795_vm10, %v4449_v35, 0.0  ;;  %v4456_v13 = vsel %vm799_vm11, %v4448_v32, 0.0  ;;  %v3688_v32 = vstv %s5764_s25  ;;  %v1350_v35 = vmul.f32 %v7368_v62, %v1349_v56  ;;  %s5772_s25 = sld [smem:[#allocation5 + $0x142]] }
 0xe09   :  { %v4455_v4 = vadd.f32 %v4454_v57, %v4453_v2  ;;  %v1429_v2 = vstv %s5524_s26  ;;  %v3689_v57 = vmul.f32 %v7347_v19, %v3688_v32  ;;  %s5500_s26 = sld [smem:[#allocation5 + $0x120]] }
 0xe0b   :  { %v4457_v7 = vadd.f32 %v4456_v13, %v4455_v4  ;;  %v3848_v4 = vstv %s5780_s27  ;;  %v1430_v13 = vmul.f32 %v7368_v62, %v1429_v2  ;;  %s5572_s27 = sld [smem:[#allocation5 + $0x129]] }
 0xe0c   :  { %v3849_v61 = vmul.f32 %v7347_v19, %v3848_v4  ;;  %v3608_v39 = vstv %s5756_s23  ;;  %s5787_s23 = sld [smem:[#allocation9 + $0x7]] }
 0xe0d   :  { %4458 = vadd.xlane.f32.xlu0 %v4457_v7  ;;  %v1589_v7 = vstv %s5540_s3  ;;  %s5644_s3 = sld [smem:[#allocation5 + $0x132]] }
 0xe23   :  { %1272 = vrot.lane.b32.xlu0 %v1270_v38, %s6120_s9  ;;  %v1590_v38 = vmul.f32 %v7368_v62, %v1589_v7 }
 0xe27   :  { %1512 = vrot.lane.b32.xlu0 %v1510_v50, %s6121_s11  ;;  %v1750_v50 = vmul.f32 %v7368_v62, %v1749_v5 }
 0xe2b   :  { %1672 = vrot.lane.b32.xlu0 %v1670_v53, %s6123_s14  ;;  %v1943_v53 = vmul.f32 %v7378_v23, %v1942_v54 }
 0xe2f   :  { %1832 = vrot.lane.b32.xlu0 %v1830_v15, %s6125_s17  ;;  %v2103_v15 = vmul.f32 %v7378_v23, %v2102_v47 }
 0xe33   :  { %2025 = vrot.lane.b32.xlu0 %v2023_v20, %s6119_s8 }
 0xe34   :  { %s7510_s5 = spop %5927 }
 0xe35   :  { %s5930_s0 = spop %5929 }
 0xe36   :  { %s4371_s2 = smul.f32 0.001953125, %s5930_s0  ;;  %s5612_s0 = sld [smem:[#allocation5 + $0x12e]] }
 0xe37   :  { %2185 = vrot.lane.b32.xlu0 %v2183_v12, %s6121_s11 }
 0xe38   :  { %v4372_v16 = vstv %s4371_s2  ;;  %s5628_s2 = sld [smem:[#allocation5 + $0x130]] }
 0xe39   :  { %v7515_v30 = vsub.f32 %v7359_v59, %v4372_v16  ;;  %v2696_v59 = vmul.f32 %v7397_v14, %v2695_v42  ;;  %v2616_v16 = vmul.f32 %v7397_v14, %v2615_v11 }
 0xe3b   :  { %v4374_v34 = vmul.f32 %v7515_v30, %v7515_v30  ;;  %2345 = vrot.lane.b32.xlu0 %v2343_v25, %s6123_s14  ;;  %v2775_v25 = vstv %s5668_s13 }
 0xe3c   :  { %v2262_v3 = vstv %s5612_s0  ;;  %v2776_v31 = vmul.f32 %v7397_v14, %v2775_v25 }
 0xe3d   :  { %v4375_v17 = vmul.f32 %v4374_v34, %v6394_v8  ;;  %v2263_v20 = vmul.f32 %v7378_v23, %v2262_v3  ;;  %v2935_v34 = vstv %s5684_s19  ;;  %s5783_s19 = sld [smem:[#allocation9 + $0x5]] }
 0xe3e   :  { %v2422_v24 = vstv %s5628_s2 }
 0xe3f   :  { %v4377_v37 = vcombine.high %v4375_v17, %v4375_v17  ;;  %v4384_v22 = vrot.slane %v4375_v17, %v6385_v49  ;;  %2505 = vrot.lane.b32.xlu0 %v2503_v36, %s6125_s17  ;;  %v2423_v12 = vmul.f32 %v7378_v23, %v2422_v24  ;;  %v2936_v17 = vmul.f32 %v7397_v14, %v2935_v34 }
 0xe40   :  { %v3095_v36 = vstv %s5700_s20  ;;  %s5785_s20 = sld [smem:[#allocation9 + $0x6]] }
 0xe41   :  { %v4391_v1 = vrot.slane %v4377_v37, %v6385_v49  ;;  %v4392_v21 = vcombine.high %v4384_v22, %v4384_v22  ;;  %v4396_v60 = vsel %vm795_vm10, %v4384_v22, 0.0  ;;  %v3096_v42 = vmul.f32 %v7397_v14, %v3095_v36 }
 0xe42   :  { %v3288_v37 = vstv %s5724_s21  ;;  %s5784_s21 = sld [smem:[#allocation10 + $0x5]] }
 0xe43   :  { %2698 = vrot.lane.b32.xlu0 %v2696_v59, %s6119_s8  ;;  %v4397_v40 = vsel %vm795_vm10, %v4392_v21, 0.0  ;;  %v4399_v58 = vsel %vm799_vm11, %v4391_v1, 0.0  ;;  %v3289_v22 = vmul.f32 %v7347_v19, %v3288_v37  ;;  %v3448_v59 = vstv %s5740_s22  ;;  %v7571_v1 = vld [vmem:[#allocation3 + $0x12] sm:$0x3f]  ;;  %s4033_s22 = smul.f32 %s7120_s7, %s5783_s19  ;;  %s5790_s7 = sld [smem:[#allocation10 + $0x8]] }
 0xe44   :  { %v4398_v27 = vadd.f32 %v4397_v40, %v4396_v60  ;;  %v3449_v21 = vmul.f32 %v7571_v1, %v3448_v59  ;;  %v3609_v60 = vmul.f32 %v7571_v1, %v3608_v39  ;;  %v3768_v40 = vstv %s5772_s25  ;;  %s5786_s25 = sld [smem:[#allocation10 + $0x6]]  ;;  %s5782_s19 = sld [smem:[#allocation10 + $0x4]] }
 0xe46   :  { %v4400_v18 = vadd.f32 %v4399_v58, %v4398_v27  ;;  %v3769_v27 = vmul.f32 %v7571_v1, %v3768_v40 }
 0xe47   :  { %2858 = vrot.lane.b32.xlu0 %v2856_v43, %s6121_s11 }
 0xe48   :  { %4401 = vadd.xlane.f32.xlu1 %v4400_v18 }
 0xe4b   :  { %3018 = vrot.lane.b32.xlu0 %v3016_v10, %s6123_s14 }
 0xe4f   :  { %3178 = vrot.lane.b32.xlu0 %v3176_v52, %s6125_s17 }
 0xe53   :  { %3371 = vrot.lane.b32.xlu0 %v3369_v51, %s6119_s8  ;;  %v1195_v51 = vstv %s5500_s26  ;;  %s4129_s26 = smul.f32 %s7250_s16, %s5785_s20 }
 0xe54   :  { %v1196_v2 = vmul.f32 %v7368_v62, %v1195_v51 }
 0xe57   :  { %3531 = vrot.lane.b32.xlu0 %v3529_v9, %s6121_s11 }
 0xe59   :  { %1352 = vrot.lane.b32.xlu1 %v1350_v35, %s6119_s8 }
 0xe5b   :  { %3691 = vrot.lane.b32.xlu0 %v3689_v57, %s6123_s14 }
 0xe5d   :  { %1432 = vrot.lane.b32.xlu1 %v1430_v13, %s6122_s12 }
 0xe5f   :  { %3851 = vrot.lane.b32.xlu0 %v3849_v61, %s6125_s17 }
 0xe61   :  { %1592 = vrot.lane.b32.xlu1 %v1590_v38, %s6124_s15 }
 0xe65   :  { %1752 = vrot.lane.b32.xlu1 %v1750_v50, %s6126_s18 }
 0xe69   :  { %1945 = vrot.lane.b32.xlu1 %v1943_v53, %s6120_s9 }
 0xe6d   :  { %2105 = vrot.lane.b32.xlu1 %v2103_v15, %s6122_s12 }
 0xe71   :  { %2265 = vrot.lane.b32.xlu1 %v2263_v20, %s6124_s15 }
 0xe75   :  { %2425 = vrot.lane.b32.xlu1 %v2423_v12, %s6126_s18 }
 0xe79   :  { %2618 = vrot.lane.b32.xlu1 %v2616_v16, %s6120_s9 }
 0xe7d   :  { %2778 = vrot.lane.b32.xlu1 %v2776_v31, %s6122_s12 }
 0xe81   :  { %2938 = vrot.lane.b32.xlu1 %v2936_v17, %s6124_s15 }
 0xe85   :  { %3098 = vrot.lane.b32.xlu1 %v3096_v42, %s6126_s18 }
 0xe89   :  { %3291 = vrot.lane.b32.xlu1 %v3289_v22, %s6120_s9  ;;  %v1868_v22 = vstv %s5572_s27  ;;  %s5789_s27 = sld [smem:[#allocation9 + $0x8]] }
 0xe8d   :  { %3451 = vrot.lane.b32.xlu1 %v3449_v21, %s6122_s12 }
 0xe91   :  { %3611 = vrot.lane.b32.xlu1 %v3609_v60, %s6124_s15 }
 0xe95   :  { %3771 = vrot.lane.b32.xlu1 %v3769_v27, %s6126_s18 }
 0xe9a   :  { %v7579_v19 = vpop.xlane.xlu0 %4458 }
 0xe9e   :  { %v1273_v58 = vpop.permute.xlu0 %1272 }
 0xe9f   :  { %v1274_v46 = vrot.slane %v1273_v58, 2 }
 0xea1   :  { %v1275_v9 = vsel %vm433_vm15, %v1273_v58, %v1274_v46  ;;  %v1869_v58 = vmul.f32 %v7378_v23, %v1868_v22 }
 0xea2   :  { %v1513_v43 = vpop.permute.xlu0 %1512  ;;  %v1277_v13 = vadd.f32 %v1275_v9, %v1196_v2 }
 0xea3   :  { %v1514_v38 = vrot.slane %v1513_v43, 2 }
 0xea5   :  { %v1515_v20 = vsel %vm556_vm5, %v1513_v43, %v1514_v38 }
 0xea6   :  { %v1673_v18 = vpop.permute.xlu0 %1672 }
 0xea7   :  { %v1674_v24 = vrot.slane %v1673_v18, 2 }
 0xea9   :  { %v1675_v34 = vsel %vm638_vm7, %v1673_v18, %v1674_v24 }
 0xeaa   :  { %v1833_v48 = vpop.permute.xlu0 %1832 }
 0xeab   :  { %v1834_v17 = vrot.slane %v1833_v48, 2 }
 0xead   :  { %v1835_v60 = vsel %vm720_vm9, %v1833_v48, %v1834_v17 }
 0xeae   :  { %v2026_v55 = vpop.permute.xlu0 %2025 }
 0xeaf   :  { %v2027_v43 = vrot.slane %v2026_v55, 2 }
 0xeb2   :  { %v2186_v7 = vpop.permute.xlu0 %2185 }
 0xeb3   :  { %v2187_v9 = vrot.slane %v2186_v7, 2 }
 0xeb5   :  { %v2188_v23 = vsel %vm556_vm5, %v2186_v7, %v2187_v9 }
 0xeb6   :  { %v2346_v12 = vpop.permute.xlu0 %2345 }
 0xeba   :  { %v2506_v59 = vpop.permute.xlu0 %2505 }
 0xebe   :  { %v2699_v51 = vpop.permute.xlu0 %2698 }
 0xed5   :  { %v4402_v10 = vpop.xlane.xlu1 %4401 }
 0xed6   :  { %v4403_v52 = vrot.slane %v4402_v10, 4 }
 0xed8   :  { %v4404_v41 = vadd.f32 %v4403_v52, %v4402_v10 }
 0xed9   :  { %v1353_v56 = vpop.permute.xlu1 %1352 }
 0xeda   :  { %v1354_v32 = vrot.slane %v1353_v56, 2  ;;  %v4405_v35 = vrot.slane %v4404_v41, 2 }
 0xedc   :  { %v1355_v57 = vsel %vm474_vm2, %v1353_v56, %v1354_v32  ;;  %v4406_v4 = vadd.f32 %v4405_v35, %v4404_v41  ;;  %v2028_v56 = vsel %vm474_vm2, %v2026_v55, %v2027_v43 }
 0xedd   :  { %v1433_v61 = vpop.permute.xlu1 %1432  ;;  %v1357_v54 = vadd.f32 %v1355_v57, %v1277_v13  ;;  %v2859_v13 = vpop.permute.xlu0 %2858 }
 0xede   :  { %v1434_v5 = vrot.slane %v1433_v61, 2  ;;  %v4407_v50 = vrot.slane %v4406_v4, 1 }
 0xee0   :  { %v1435_v53 = vsel %vm515_vm3, %v1433_v61, %v1434_v5  ;;  %v4408_v47 = vadd.f32 %v4407_v50, %v4406_v4  ;;  %v2347_v4 = vrot.slane %v2346_v12, 2 }
 0xee1   :  { %v1437_v15 = vadd.f32 %v1435_v53, %v1357_v54  ;;  %v1593_v3 = vpop.permute.xlu1 %1592  ;;  %v2507_v53 = vrot.slane %v2506_v59, 2  ;;  %v3019_v24 = vpop.permute.xlu0 %3018 }
 0xee2   :  { %v1594_v62 = vrot.slane %v1593_v3, 2  ;;  %5931 = vpush %v4408_v47  ;;  %v2348_v55 = vsel %vm638_vm7, %v2346_v12, %v2347_v4  ;;  %v3020_v43 = vrot.slane %v3019_v24, 2 }
 0xee3   :  { %v1517_v11 = vadd.f32 %v1515_v20, %v1437_v15  ;;  %v2541_v20 = vstv %s5644_s3  ;;  %v2508_v7 = vsel %vm720_vm9, %v2506_v59, %v2507_v53  ;;  %s5788_s3 = sld [smem:[#allocation10 + $0x7]] }
 0xee4   :  { %v1595_v16 = vsel %vm597_vm6, %v1593_v3, %v1594_v62 }
 0xee5   :  { %v1597_v25 = vadd.f32 %v1595_v16, %v1517_v11  ;;  %v1753_v31 = vpop.permute.xlu1 %1752 }
 0xee6   :  { %v1754_v36 = vrot.slane %v1753_v31, 2 }
 0xee7   :  { %v1677_v42 = vadd.f32 %v1675_v34, %v1597_v25  ;;  %v2542_v25 = vmul.f32 %v7397_v14, %v2541_v20  ;;  %v2700_v34 = vrot.slane %v2699_v51, 2 }
 0xee8   :  { %v1755_v37 = vsel %vm679_vm8, %v1753_v31, %v1754_v36 }
 0xee9   :  { %v1757_v21 = vadd.f32 %v1755_v37, %v1677_v42  ;;  %v1946_v39 = vpop.permute.xlu1 %1945  ;;  %v3179_v42 = vpop.permute.xlu0 %3178 }
 0xeea   :  { %v1947_v40 = vrot.slane %v1946_v39, 2  ;;  %v3180_v9 = vrot.slane %v3179_v42, 2 }
 0xeeb   :  { %v1837_v27 = vadd.f32 %v1835_v60, %v1757_v21  ;;  %v2701_v21 = vsel %vm474_vm2, %v2699_v51, %v2700_v34  ;;  %v3021_v51 = vsel %vm638_vm7, %v3019_v24, %v3020_v43 }
 0xeec   :  { %v1948_v18 = vsel %vm433_vm15, %v1946_v39, %v1947_v40  ;;  %v2860_v39 = vrot.slane %v2859_v13, 2  ;;  %v3181_v4 = vsel %vm720_vm9, %v3179_v42, %v3180_v9 }
 0xeed   :  { %v1870_v10 = vadd.f32 %v1869_v58, %v1837_v27  ;;  %v2106_v46 = vpop.permute.xlu1 %2105 }
 0xeee   :  { %v2107_v52 = vrot.slane %v2106_v46, 2  ;;  %v2861_v14 = vsel %vm556_vm5, %v2859_v13, %v2860_v39 }
 0xeef   :  { %v1950_v41 = vadd.f32 %v1948_v18, %v1870_v10  ;;  %v3372_v10 = vpop.permute.xlu0 %3371 }
 0xef0   :  { %v2108_v2 = vsel %vm515_vm3, %v2106_v46, %v2107_v52 }
 0xef1   :  { %v2030_v32 = vadd.f32 %v2028_v56, %v1950_v41  ;;  %v2266_v35 = vpop.permute.xlu1 %2265 }
 0xef2   :  { %v2267_v48 = vrot.slane %v2266_v35, 2 }
 0xef3   :  { %v2110_v57 = vadd.f32 %v2108_v2, %v2030_v32  ;;  %v3214_v2 = vstv %s5716_s1  ;;  %s4225_s1 = smul.f32 %s7382_s24, %s5787_s23  ;;  %s5802_s23 = sld [smem:[#allocation5 + $0x149]] }
 0xef4   :  { %v2268_v5 = vsel %vm597_vm6, %v2266_v35, %v2267_v48  ;;  %v3532_v48 = vpop.permute.xlu0 %3531 }
 0xef5   :  { %v2190_v61 = vadd.f32 %v2188_v23, %v2110_v57  ;;  %v2426_v38 = vpop.permute.xlu1 %2425 }
 0xef6   :  { %v2427_v50 = vrot.slane %v2426_v38, 2 }
 0xef7   :  { %v2270_v54 = vadd.f32 %v2268_v5, %v2190_v61  ;;  %v4460_v61 = vrot.slane %v7579_v19, 4  ;;  %v3215_v5 = vmul.f32 %v7571_v1, %v3214_v2 }
 0xef8   :  { %v2428_v3 = vsel %vm679_vm8, %v2426_v38, %v2427_v50  ;;  %v3373_v50 = vrot.slane %v3372_v10, 2 }
 0xef9   :  { %v2350_v47 = vadd.f32 %v2348_v55, %v2270_v54  ;;  %v2619_v15 = vpop.permute.xlu1 %2618 }
 0xefa   :  { %v2620_v11 = vrot.slane %v2619_v15, 2  ;;  %v3374_v24 = vsel %vm474_vm2, %v3372_v10, %v3373_v50 }
 0xefb   :  { %v2430_v62 = vadd.f32 %v2428_v3, %v2350_v47  ;;  %v3692_v3 = vpop.permute.xlu0 %3691 }
 0xefc   :  { %v2621_v36 = vsel %vm433_vm15, %v2619_v15, %v2620_v11  ;;  %v4461_v15 = vadd.f32 %v4460_v61, %v7579_v19 }
 0xefd   :  { %v2510_v16 = vadd.f32 %v2508_v7, %v2430_v62  ;;  %v2779_v31 = vpop.permute.xlu1 %2778  ;;  %v3533_v62 = vrot.slane %v3532_v48, 2 }
 0xefe   :  { %v2780_v12 = vrot.slane %v2779_v31, 2 }
 0xeff   :  { %v2543_v17 = vadd.f32 %v2542_v25, %v2510_v16  ;;  %v3534_v34 = vsel %vm556_vm5, %v3532_v48, %v3533_v62  ;;  %v3852_v19 = vpop.permute.xlu0 %3851 }
 0xf00   :  { %v2781_v40 = vsel %vm515_vm3, %v2779_v31, %v2780_v12  ;;  %v4462_v31 = vrot.slane %v4461_v15, 2 }
 0xf01   :  { %v2623_v37 = vadd.f32 %v2621_v36, %v2543_v17  ;;  %v2939_v22 = vpop.permute.xlu1 %2938  ;;  %v3693_v17 = vrot.slane %v3692_v3, 2 }
 0xf02   :  { %v2940_v59 = vrot.slane %v2939_v22, 2 }
 0xf03   :  { %v2703_v60 = vadd.f32 %v2701_v21, %v2623_v37  ;;  %v4463_v21 = vadd.f32 %v4462_v31, %v4461_v15  ;;  %v3694_v39 = vsel %vm638_vm7, %v3692_v3, %v3693_v17  ;;  %v4034_v15 = vstv %s4033_s22  ;;  %s5798_s22 = sld [smem:[#allocation5 + $0x145]] }
 0xf04   :  { %v2941_v18 = vsel %vm597_vm6, %v2939_v22, %v2940_v59  ;;  %v4035_v3 = vmul.f32 %v4034_v15, %v6995_v29 }
 0xf05   :  { %v2783_v27 = vadd.f32 %v2781_v40, %v2703_v60  ;;  %v3099_v58 = vpop.permute.xlu1 %3098  ;;  %v3853_v60 = vrot.slane %v3852_v19, 2 }
 0xf06   :  { %v3100_v52 = vrot.slane %v3099_v58, 2 }
 0xf07   :  { %v2863_v46 = vadd.f32 %v2861_v14, %v2783_v27  ;;  %v3854_v14 = vsel %vm720_vm9, %v3852_v19, %v3853_v60 }
 0xf08   :  { %v3101_v35 = vsel %vm679_vm8, %v3099_v58, %v3100_v52  ;;  %v4464_v58 = vrot.slane %v4463_v21, 1 }
 0xf09   :  { %v2943_v41 = vadd.f32 %v2941_v18, %v2863_v46  ;;  %v3292_v56 = vpop.permute.xlu1 %3291 }
 0xf0a   :  { %v3293_v13 = vrot.slane %v3292_v56, 2  ;;  %v4465_v18 = vadd.f32 %v4464_v58, %v4463_v21 }
 0xf0b   :  { %v3023_v32 = vadd.f32 %v3021_v51, %v2943_v41 }
 0xf0c   :  { %v3294_v53 = vsel %vm433_vm15, %v3292_v56, %v3293_v13 }
 0xf0d   :  { %v3103_v57 = vadd.f32 %v3101_v35, %v3023_v32  ;;  %v3452_v23 = vpop.permute.xlu1 %3451 }
 0xf0e   :  { %v3453_v47 = vrot.slane %v3452_v23, 2 }
 0xf0f   :  { %v3183_v38 = vadd.f32 %v3181_v4, %v3103_v57 }
 0xf10   :  { %v3454_v11 = vsel %vm515_vm3, %v3452_v23, %v3453_v47 }
 0xf11   :  { %v3216_v54 = vadd.f32 %v3215_v5, %v3183_v38  ;;  %v3612_v55 = vpop.permute.xlu1 %3611 }
 0xf12   :  { %v3613_v16 = vrot.slane %v3612_v55, 2 }
 0xf13   :  { %v3296_v20 = vadd.f32 %v3294_v53, %v3216_v54  ;;  %s5932_s28 = spop %5931 }
 0xf14   :  { %s4410_s29 = smul.f32 0.001953125, %s5932_s28  ;;  %v3614_v42 = vsel %vm597_vm6, %v3612_v55, %v3613_v16  ;;  %v4226_v16 = vstv %s4225_s1 }
 0xf15   :  { %v3376_v7 = vadd.f32 %v3374_v24, %v3296_v20  ;;  %v3772_v25 = vpop.permute.xlu1 %3771  ;;  %v4036_v20 = vstv %s5784_s21  ;;  %v4130_v24 = vstv %s4129_s26  ;;  %s4321_s28 = smul.f32 %s7510_s5, %s5789_s27  ;;  %v4227_v31 = vmul.f32 %v4226_v16, %v7255_v45  ;;  %s5800_s21 = sld [smem:[#allocation5 + $0x147]] }
 0xf16   :  { %s4413_s0 = sadd.f32 1e-05, %s4410_s29  ;;  %v3773_v37 = vrot.slane %v3772_v25, 2  ;;  %v4037_v62 = vadd.f32 %v4036_v20, %v4035_v3  ;;  %s5804_s26 = sld [smem:[#allocation5 + $0x14b]] }
 0xf17   :  { %v3456_v1 = vadd.f32 %v3454_v11, %v3376_v7  ;;  %v4131_v7 = vmul.f32 %v4130_v24, %v7125_v63  ;;  %v4132_v11 = vstv %s5786_s25  ;;  %v4322_v17 = vstv %s4321_s28  ;;  %s5799_s25 = sld [smem:[#allocation5 + $0x146]]  ;;  %s5801_s27 = sld [smem:[#allocation5 + $0x148]] }
 0xf18   :  { %v4414_v36 = vstv %s4413_s0  ;;  %v3774_v59 = vsel %vm679_vm8, %v3772_v25, %v3773_v37  ;;  %s5803_s28 = sld [smem:[#allocation5 + $0x14a]] }
 0xf19   :  { %v3536_v12 = vadd.f32 %v3534_v34, %v3456_v1  ;;  %6011 = vrsqrt.f32 %v4414_v36  ;;  %v4038_v1 = vmax.f32 %v4037_v62, 0.0  ;;  %v4133_v25 = vadd.f32 %v4132_v11, %v4131_v7 }
 0xf1a   :  { %v4228_v34 = vstv %s5788_s3  ;;  %s7691_s3 = sld [smem:[#allocation10 + $0x9]] }
 0xf1b   :  { %v3616_v22 = vadd.f32 %v3614_v42, %v3536_v12  ;;  %v4039_v36 = vmul.f32 %v4038_v1, %v6394_v8  ;;  %v4134_v29 = vmax.f32 %v4133_v25, 0.0  ;;  %v4229_v19 = vadd.f32 %v4228_v34, %v4227_v31 }
 0xf1c   :  { %v4323_v12 = vmul.f32 %v4322_v17, %v7387_v28  ;;  %v4324_v42 = vstv %s5790_s7  ;;  %v3941_v34 = vstv %s5782_s19  ;;  %s5807_s7 = sld [smem:[#allocation5 + $0x14e]] }
 0xf1d   :  { %v3696_v40 = vadd.f32 %v3694_v39, %v3616_v22  ;;  %v4135_v63 = vmul.f32 %v4134_v29, %v6394_v8  ;;  %v4230_v37 = vmax.f32 %v4229_v19, 0.0 }
 0xf1e   :  { %v4325_v22 = vadd.f32 %v4324_v42, %v4323_v12 }
 0xf1f   :  { %v3776_v27 = vadd.f32 %v3774_v59, %v3696_v40  ;;  %v4231_v21 = vmul.f32 %v4230_v37, %v6394_v8 }
 0xf20   :  { %v4326_v45 = vmax.f32 %v4325_v22, 0.0 }
 0xf21   :  { %v7619_v43 = vadd.f32 %v3854_v14, %v3776_v27 }
 0xf22   :  { %v4327_v39 = vmul.f32 %v4326_v45, %v6394_v8 }
 0xf23   :  { %v6012_v10 = vpop.eup %6011  ;;  %v4528_v46 = vmul.f32 %v7619_v43, %v6394_v8 }
 0xf24   :  { %5933 = vpush %v6012_v10 }
 0xf25   :  { %v4530_v52 = vcombine.high %v4528_v46, %v4528_v46  ;;  %v4537_v41 = vrot.slane %v4528_v46, %v6385_v49  ;;  %5935 = vpush %v4465_v18 }
 0xf27   :  { %v4544_v56 = vrot.slane %v4530_v52, %v6385_v49  ;;  %v4545_v51 = vcombine.high %v4537_v41, %v4537_v41  ;;  %v4549_v9 = vsel %vm795_vm10, %v4537_v41, 0.0 }
 0xf29   :  { %v4550_v32 = vsel %vm795_vm10, %v4545_v51, 0.0  ;;  %v4552_v2 = vsel %vm799_vm11, %v4544_v56, 0.0 }
 0xf2a   :  { %v4551_v35 = vadd.f32 %v4550_v32, %v4549_v9 }
 0xf2c   :  { %v4553_v48 = vadd.f32 %v4552_v2, %v4551_v35 }
 0xf2e   :  { %4554 = vadd.xlane.f32.xlu0 %v4553_v48 }
 0xf55   :  { %s7628_s2 = spop %5933 }
 0xf56   :  { %s5936_s10 = spop %5935 }
 0xf57   :  { %s4467_s13 = smul.f32 0.001953125, %s5936_s10 }
 0xf59   :  { %v4468_v57 = vstv %s4467_s13  ;;  %s5781_s13 = sld [smem:[#allocation9 + $0x4]] }
 0xf5a   :  { %v7631_v23 = vsub.f32 %v7491_v26, %v4468_v57 }
 0xf5c   :  { %v4470_v4 = vmul.f32 %v7631_v23, %v7631_v23 }
 0xf5e   :  { %v4471_v13 = vmul.f32 %v4470_v4, %v6394_v8 }
 0xf5f   :  { %s3938_s20 = smul.f32 %s6990_s6, %s5781_s13  ;;  %s5791_s6 = sld [smem:[#allocation9 + $0x9]] }
 0xf60   :  { %v4473_v61 = vcombine.high %v4471_v13, %v4471_v13  ;;  %v4480_v38 = vrot.slane %v4471_v13, %v6385_v49  ;;  %s5794_s13 = sld [smem:[#allocation10 + $0xa]] }
 0xf61   :  { %v3939_v25 = vstv %s3938_s20  ;;  %s5814_s20 = sld [smem:[#allocation5 + $0x155]] }
 0xf62   :  { %v4487_v5 = vrot.slane %v4473_v61, %v6385_v49  ;;  %v4488_v50 = vcombine.high %v4480_v38, %v4480_v38  ;;  %v4492_v54 = vsel %vm795_vm10, %v4480_v38, 0.0  ;;  %v3940_v31 = vmul.f32 %v3939_v25, %v6846_v33 }
 0xf64   :  { %v4493_v26 = vsel %vm795_vm10, %v4488_v50, 0.0  ;;  %v4495_v53 = vsel %vm799_vm11, %v4487_v5, 0.0  ;;  %v3942_v17 = vadd.f32 %v3941_v34, %v3940_v31 }
 0xf65   :  { %v4494_v55 = vadd.f32 %v4493_v26, %v4492_v54  ;;  %s4417_s1 = smul.f32 %s7628_s2, %s5791_s6  ;;  %s7700_s2 = sld [smem:[#allocation9 + $0xa]] }
 0xf66   :  { %s5816_s6 = sld [smem:[#allocation5 + $0x157]] }
 0xf67   :  { %v4496_v47 = vadd.f32 %v4495_v53, %v4494_v55 }
 0xf69   :  { %4497 = vadd.xlane.f32.xlu1 %v4496_v47 }
 0xf7a   :  { %4041 = vrot.lane.b32.xlu1 %v4039_v36, %s6104_s30  ;;  %v3943_v36 = vmax.f32 %v3942_v17, 0.0 }
 0xf7c   :  { %v3944_v29 = vmul.f32 %v3943_v36, %v6394_v8 }
 0xf7e   :  { %4137 = vrot.lane.b32.xlu1 %v4135_v63, %s6104_s30 }
 0xf82   :  { %4233 = vrot.lane.b32.xlu1 %v4231_v21, %s6104_s30 }
 0xf86   :  { %4329 = vrot.lane.b32.xlu1 %v4327_v39, %s6104_s30 }
 0xfbb   :  { %v4555_v57 = vpop.xlane.xlu0 %4554 }
 0xfbc   :  { %v4556_v4 = vrot.slane %v4555_v57, 4 }
 0xfbe   :  { %v4557_v13 = vadd.f32 %v4556_v4, %v4555_v57 }
 0xfc0   :  { %v4558_v61 = vrot.slane %v4557_v13, 2 }
 0xfc2   :  { %v4559_v5 = vadd.f32 %v4558_v61, %v4557_v13 }
 0xfc4   :  { %v4560_v50 = vrot.slane %v4559_v5, 1 }
 0xfc6   :  { %v4561_v26 = vadd.f32 %v4560_v50, %v4559_v5 }
 0xff6   :  { %v4498_v60 = vpop.xlane.xlu1 %4497 }
 0xff7   :  { %v4499_v28 = vrot.slane %v4498_v60, 4 }
 0xff9   :  { %v4500_v40 = vadd.f32 %v4499_v28, %v4498_v60  ;;  %v4650_v60 = vstv %s5800_s21  ;;  %v4630_v28 = vstv %s5798_s22  ;;  %s5811_s21 = sld [smem:[#allocation5 + $0x152]]  ;;  %s5818_s22 = sld [smem:[#allocation5 + $0x159]] }
 0xffa   :  { %v4042_v59 = vpop.permute.xlu1 %4041 }
 0xffb   :  { %v4501_v27 = vrot.slane %v4500_v40, 2  ;;  %v4043_v58 = vrot.slane %v4042_v59, 6 }
 0xffd   :  { %v4044_v14 = vsel %vm868_vm1, %v4043_v58, %v4042_v59  ;;  %v4502_v10 = vadd.f32 %v4501_v27, %v4500_v40  ;;  %v4670_v58 = vstv %s5802_s23  ;;  %s5820_s23 = sld [smem:[#allocation5 + $0x15b]] }
 0xffe   :  { %4047 = vst.msk [vmem:[#allocation4 + $0x6] sm:$0x3f] %vm6533_vm4, %v4044_v14  ;;  %v4138_v46 = vpop.permute.xlu1 %4137  ;;  %v4640_v14 = vstv %s5799_s25  ;;  %s5817_s25 = sld [smem:[#allocation5 + $0x158]] }
 0xfff   :  { %v4139_v18 = vrot.slane %v4138_v46, 6  ;;  %v4503_v52 = vrot.slane %v4502_v10, 1 }
0x1001   :  { %v4140_v41 = vsel %vm868_vm1, %v4139_v18, %v4138_v46  ;;  %v4504_v56 = vadd.f32 %v4503_v52, %v4502_v10  ;;  %v4418_v18 = vstv %s4417_s1  ;;  %v4690_v52 = vstv %s5804_s26  ;;  %s5822_s26 = sld [smem:[#allocation5 + $0x15d]]  ;;  %s5821_s1 = sld [smem:[#allocation5 + $0x15c]] }
0x1002   :  { %4143 = vst.msk [vmem:[#allocation4 + $0xc] sm:$0x3f] %vm6533_vm4, %v4140_v41  ;;  %v4234_v51 = vpop.permute.xlu1 %4233  ;;  %v4660_v41 = vstv %s5801_s27  ;;  %s5819_s27 = sld [smem:[#allocation5 + $0x15a]] }
0x1003   :  { %v4235_v9 = vrot.slane %v4234_v51, 6  ;;  %5937 = vpush %v4504_v56  ;;  %v4419_v56 = vmul.f32 %v4418_v18, %v7515_v30 }
0x1005   :  { %v4236_v32 = vsel %vm868_vm1, %v4235_v9, %v4234_v51 }
0x1006   :  { %4239 = vst.msk [vmem:[#allocation4 + $0x12] sm:$0x3f] %vm6533_vm4, %v4236_v32  ;;  %v4330_v35 = vpop.permute.xlu1 %4329  ;;  %v4420_v32 = vstv %s7691_s3  ;;  %s5825_s3 = sld [smem:[#allocation5 + $0x160]] }
0x1007   :  { %v4331_v2 = vrot.slane %v4330_v35, 6  ;;  %v4421_v57 = vadd.f32 %v4420_v32, %v4419_v56 }
0x1009   :  { %v4332_v48 = vsel %vm868_vm1, %v4331_v2, %v4330_v35  ;;  %v7708_v35 = vld [vmem:[#allocation4 + $0x6] sm:$0x3f]  ;;  %v4715_v2 = vstv %s5807_s7  ;;  %v7737_v36 = vld [vmem:[#allocation4 + $0xc] sm:$0x3f]  ;;  %s5826_s7 = sld [smem:[#allocation5 + $0x161]] }
0x100a   :  { %4335 = vst.msk [vmem:[#allocation4 + $0x18] sm:$0x3f] %vm6533_vm4, %v4332_v48  ;;  %v4680_v48 = vstv %s5803_s28  ;;  %v4716_v4 = vmul.f32 %v4715_v2, %v7708_v35  ;;  %s5823_s28 = sld [smem:[#allocation5 + $0x15e]] }
0x1034   :  { %s5938_s16 = spop %5937 }
0x1035   :  { %s4506_s24 = smul.f32 0.001953125, %s5938_s16  ;;  %s5808_s16 = sld [smem:[#allocation5 + $0x14f]] }
0x1037   :  { %s4509_s5 = sadd.f32 1e-05, %s4506_s24  ;;  %s5805_s24 = sld [smem:[#allocation5 + $0x14c]] }
0x1039   :  { %v4510_v38 = vstv %s4509_s5  ;;  %s5810_s5 = sld [smem:[#allocation5 + $0x151]] }
0x103a   :  { %6013 = vrsqrt.f32 %v4510_v38  ;;  %v4422_v38 = vmax.f32 %v4421_v57, 0.0 }
0x103b   :  { %v4725_v13 = vstv %s5808_s16  ;;  %s5828_s16 = sld [smem:[#allocation5 + $0x163]] }
0x103c   :  { %v4726_v5 = vmul.f32 %v4725_v13, %v7708_v35 }
0x103d   :  { %v4700_v61 = vstv %s5805_s24 }
0x1041   :  { %v4915_v56 = vstv %s5828_s16  ;;  %s7814_s16 = sld [smem:[#allocation5 + $0x173]] }
0x1044   :  { %v6014_v54 = vpop.eup %6013 }
0x1045   :  { %5939 = vpush %v6014_v54 }
0x1046   :  { %5941 = vpush %v4561_v26  ;;  %v4745_v26 = vstv %s5810_s5 }
0x1076   :  { %s7669_s29 = spop %5939 }
0x1077   :  { %s5942_s0 = spop %5941  ;;  %s4513_s19 = smul.f32 %s7669_s29, %s7700_s2 }
0x1078   :  { %s4563_s10 = smul.f32 0.001953125, %s5942_s0  ;;  %s5812_s0 = sld [smem:[#allocation5 + $0x153]] }
0x1079   :  { %v4514_v54 = vstv %s4513_s19  ;;  %s5813_s29 = sld [smem:[#allocation5 + $0x154]] }
0x107a   :  { %v4564_v55 = vstv %s4563_s10  ;;  %s5809_s10 = sld [smem:[#allocation5 + $0x150]]  ;;  %s5837_s19 = sld [smem:[#allocation5 + $0x16c]] }
0x107b   :  { %v7672_v53 = vsub.f32 %v7619_v43, %v4564_v55  ;;  %v4423_v55 = vmul.f32 %v4422_v38, %v6394_v8 }
0x107d   :  { %v4566_v47 = vmul.f32 %v7672_v53, %v7672_v53 }
0x107f   :  { %v4567_v15 = vmul.f32 %v4566_v47, %v6394_v8  ;;  %v4515_v47 = vmul.f32 %v4514_v54, %v7631_v23  ;;  %v4775_v31 = vstv %s5813_s29  ;;  %s5795_s29 = sld [smem:[#allocation9 + $0xb]] }
0x1080   :  { %v4776_v17 = vmul.f32 %v4775_v31, %v7708_v35 }
0x1081   :  { %v4569_v3 = vcombine.high %v4567_v15, %v4567_v15  ;;  %v4576_v20 = vrot.slane %v4567_v15, %v6385_v49  ;;  %v4746_v15 = vmul.f32 %v4745_v26, %v7708_v35 }
0x1083   :  { %v4583_v24 = vrot.slane %v4569_v3, %v6385_v49  ;;  %v4584_v62 = vcombine.high %v4576_v20, %v4576_v20  ;;  %v4588_v7 = vsel %vm795_vm10, %v4576_v20, 0.0  ;;  %v4516_v3 = vstv %s5794_s13  ;;  %s5835_s13 = sld [smem:[#allocation5 + $0x16a]] }
0x1084   :  { %v4765_v20 = vstv %s5812_s0  ;;  %s5830_s0 = sld [smem:[#allocation5 + $0x165]] }
0x1085   :  { %v4589_v11 = vsel %vm795_vm10, %v4584_v62, 0.0  ;;  %v4591_v43 = vsel %vm799_vm11, %v4583_v24, 0.0  ;;  %v4735_v24 = vstv %s5809_s10  ;;  %v4517_v62 = vadd.f32 %v4516_v3, %v4515_v47  ;;  %s5832_s10 = sld [smem:[#allocation5 + $0x167]] }
0x1086   :  { %v4590_v16 = vadd.f32 %v4589_v11, %v4588_v7  ;;  %v4766_v7 = vmul.f32 %v4765_v20, %v7708_v35  ;;  %v4736_v11 = vmul.f32 %v4735_v24, %v7708_v35  ;;  %vm5386_vm10 = vcmask 916480  }
0x1087   :  { %v4518_v23 = vmax.f32 %v4517_v62, 0.0  ;;  %vm5426_vm11 = vcmp.lt.s32.totalorder %v74_v0, 256 }
0x1088   :  { %v4592_v1 = vadd.f32 %v4591_v43, %v4590_v16  ;;  %v4785_v16 = vstv %s5814_s20  ;;  %v4755_v43 = vstv %s5811_s21  ;;  %s5839_s20 = sld [smem:[#allocation5 + $0x16e]]  ;;  %s5841_s21 = sld [smem:[#allocation5 + $0x170]] }
0x1089   :  { %v4756_v25 = vmul.f32 %v4755_v43, %v7708_v35  ;;  %v4519_v34 = vmul.f32 %v4518_v23, %v6394_v8 }
0x108a   :  { %4593 = vadd.xlane.f32.xlu0 %v4592_v1  ;;  %v4786_v1 = vmul.f32 %v4785_v16, %v7708_v35 }
0x108b   :  { %v4955_v2 = vstv %s5832_s10  ;;  %s7838_s10 = sld [smem:[#allocation5 + $0x177]] }
0x108e   :  { %v5040_v54 = vstv %s5841_s21  ;;  %s7867_s21 = sld [smem:[#allocation5 + $0x17c]] }
0x10a0   :  { %3946 = vrot.lane.b32.xlu0 %v3944_v29, %s6104_s30  ;;  %v4820_v29 = vstv %s5818_s22  ;;  %s5796_s22 = sld [smem:[#allocation10 + $0xb]] }
0x10a6   :  { %v4612_v47 = vstv %s5796_s22  ;;  %s7879_s22 = sld [smem:[#allocation5 + $0x17e]] }
0x1117   :  { %v4594_v19 = vpop.xlane.xlu0 %4593 }
0x1118   :  { %v4595_v12 = vrot.slane %v4594_v19, 4 }
0x111a   :  { %v4596_v42 = vadd.f32 %v4595_v12, %v4594_v19  ;;  %v4800_v19 = vstv %s5816_s6  ;;  %v4821_v12 = vmul.f32 %v4820_v29, %v7737_v36  ;;  %s5797_s6 = sld [smem:[#allocation5 + $0x144]] }
0x111b   :  { %v3947_v63 = vpop.permute.xlu0 %3946 }
0x111c   :  { %v4597_v37 = vrot.slane %v4596_v42, 2  ;;  %v3948_v22 = vrot.slane %v3947_v63, 6 }
0x111e   :  { %v3949_v21 = vsel %vm868_vm1, %v3948_v22, %v3947_v63  ;;  %v4598_v45 = vadd.f32 %v4597_v37, %v4596_v42  ;;  %v4801_v42 = vmul.f32 %v4800_v19, %v7737_v36  ;;  %v4840_v63 = vstv %s5820_s23 }
0x111f   :  { %3951 = vst.msk [vmem:[#allocation4] sm:$0x3f] %vm6533_vm4, %v3949_v21  ;;  %v4810_v37 = vstv %s5817_s25  ;;  %v4841_v22 = vmul.f32 %v4840_v63, %v7737_v36 }
0x1120   :  { %v4599_v33 = vrot.slane %v4598_v45, 1  ;;  %v4811_v21 = vmul.f32 %v4810_v37, %v7737_v36 }
0x1122   :  { %v4600_v39 = vadd.f32 %v4599_v33, %v4598_v45  ;;  %v4860_v45 = vstv %s5822_s26  ;;  %v4830_v33 = vstv %s5819_s27  ;;  %s5827_s26 = sld [smem:[#allocation5 + $0x162]]  ;;  %s7782_s27 = sld [smem:[#allocation5 + $0x164]] }
0x1124   :  { %5943 = vpush %v4600_v39  ;;  %v4861_v39 = vmul.f32 %v4860_v45, %v7737_v36 }
0x1126   :  { %v7689_v40 = vld [vmem:[#allocation4] sm:$0x3f] }
0x1127   :  { %v4651_v59 = vmul.f32 %v4650_v60, %v7689_v40  ;;  %v4631_v27 = vmul.f32 %v4630_v28, %v7689_v40  ;;  %v4671_v10 = vmul.f32 %v4670_v58, %v7689_v40  ;;  %v4641_v46 = vmul.f32 %v4640_v14, %v7689_v40  ;;  %v7751_v28 = vld [vmem:[#allocation4 + $0x12] sm:$0x3f] }
0x1128   :  { %v4691_v51 = vmul.f32 %v4690_v52, %v7689_v40  ;;  %v4661_v9 = vmul.f32 %v4660_v41, %v7689_v40  ;;  %v4681_v30 = vmul.f32 %v4680_v48, %v7689_v40  ;;  %v4701_v50 = vmul.f32 %v4700_v61, %v7689_v40 }
0x1129   :  { %4653 = vrot.lane.b32.xlu1 %v4651_v59, %s6122_s12  ;;  %4633 = vrot.lane.b32.xlu0 %v4631_v27, %s6120_s9  ;;  %v4831_v60 = vmul.f32 %v4830_v33, %v7737_v36  ;;  %v4885_v59 = vstv %s5825_s3  ;;  %v4850_v27 = vstv %s5821_s1  ;;  %v4956_v57 = vmul.f32 %v4955_v2, %v7751_v28  ;;  %s7786_s3 = sld [smem:[#allocation5 + $0x166]]  ;;  %s7790_s1 = sld [smem:[#allocation5 + $0x14d]] }
0x112a   :  { %v4886_v58 = vmul.f32 %v4885_v59, %v7751_v28  ;;  %v4851_v14 = vmul.f32 %v4850_v27, %v7737_v36  ;;  %v5000_v61 = vstv %s5837_s19  ;;  %v4905_v29 = vstv %s5827_s26  ;;  %s7851_s19 = sld [smem:[#allocation5 + $0x179]]  ;;  %s7901_s26 = sld [smem:[#allocation5 + $0x17d]] }
0x112b   :  { %v4925_v45 = vstv %s7782_s27  ;;  %s7907_s27 = sld [smem:[#allocation5 + $0x182]] }
0x112d   :  { %4673 = vrot.lane.b32.xlu1 %v4671_v10, %s6124_s15  ;;  %4643 = vrot.lane.b32.xlu0 %v4641_v46, %s6119_s8  ;;  %v4895_v10 = vstv %s5826_s7  ;;  %v4870_v46 = vstv %s5823_s28  ;;  %s7795_s7 = sld [smem:[#allocation5 + $0x169]]  ;;  %s7810_s28 = sld [smem:[#allocation5 + $0x16d]] }
0x112e   :  { %v4896_v52 = vmul.f32 %v4895_v10, %v7751_v28  ;;  %v4871_v41 = vmul.f32 %v4870_v46, %v7737_v36  ;;  %v4926_v10 = vmul.f32 %v4925_v45, %v7751_v28 }
0x1131   :  { %4693 = vrot.lane.b32.xlu1 %v4691_v51, %s6126_s18  ;;  %4663 = vrot.lane.b32.xlu0 %v4661_v9, %s6121_s11  ;;  %v4916_v51 = vmul.f32 %v4915_v56, %v7751_v28  ;;  %v4935_v9 = vstv %s5830_s0  ;;  %s7833_s0 = sld [smem:[#allocation5 + $0x172]] }
0x1132   :  { %v4936_v32 = vmul.f32 %v4935_v9, %v7751_v28  ;;  %v4711_v9 = vstv %s7790_s1  ;;  %s5858_s1 = sld [smem:[#allocation5 + $0x181]] }
0x1135   :  { %4718 = vrot.lane.b32.xlu1 %v4716_v4, %s6120_s9  ;;  %4683 = vrot.lane.b32.xlu0 %v4681_v30, %s6123_s14  ;;  %v7768_v4 = vld [vmem:[#allocation4 + $0x18] sm:$0x3f]  ;;  %v4980_v30 = vstv %s5835_s13  ;;  %s7845_s13 = sld [smem:[#allocation5 + $0x174]] }
0x1136   :  { %v4981_v13 = vmul.f32 %v4980_v30, %v7768_v4  ;;  %v5001_v38 = vmul.f32 %v5000_v61, %v7768_v4  ;;  %v5041_v26 = vmul.f32 %v5040_v54, %v7768_v4  ;;  %v4712_v61 = vmul.f32 %v4711_v9, %v7708_v35 }
0x1139   :  { %4728 = vrot.lane.b32.xlu1 %v4726_v5, %s6119_s8  ;;  %4703 = vrot.lane.b32.xlu0 %v4701_v50, %s6125_s17  ;;  %v5020_v5 = vstv %s5839_s20  ;;  %s7859_s20 = sld [smem:[#allocation5 + $0x176]] }
0x113a   :  { %v5021_v50 = vmul.f32 %v5020_v5, %v7768_v4 }
0x113d   :  { %4748 = vrot.lane.b32.xlu1 %v4746_v15, %s6121_s11  ;;  %4425 = vrot.lane.b32.xlu0 %v4423_v55, %s6104_s30  ;;  %v4626_v15 = vstv %s5797_s6  ;;  %s7885_s6 = sld [smem:[#allocation5 + $0x17b]] }
0x1141   :  { %4768 = vrot.lane.b32.xlu1 %v4766_v7, %s6123_s14  ;;  %4738 = vrot.lane.b32.xlu0 %v4736_v11, %s6122_s12  ;;  %v4627_v11 = vmul.f32 %v4626_v15, %v7689_v40 }
0x1145   :  { %4788 = vrot.lane.b32.xlu1 %v4786_v1, %s6125_s17  ;;  %4758 = vrot.lane.b32.xlu0 %v4756_v25, %s6124_s15 }
0x1149   :  { %4521 = vrot.lane.b32.xlu1 %v4519_v34, %s6104_s30  ;;  %4778 = vrot.lane.b32.xlu0 %v4776_v17, %s6126_s18 }
0x114d   :  { %4823 = vrot.lane.b32.xlu1 %v4821_v12, %s6122_s12  ;;  %4803 = vrot.lane.b32.xlu0 %v4801_v42, %s6120_s9 }
0x1151   :  { %4843 = vrot.lane.b32.xlu1 %v4841_v22, %s6124_s15  ;;  %4813 = vrot.lane.b32.xlu0 %v4811_v21, %s6119_s8 }
0x1155   :  { %s5944_s2 = spop %5943  ;;  %4863 = vrot.lane.b32.xlu1 %v4861_v39, %s6126_s18  ;;  %4833 = vrot.lane.b32.xlu0 %v4831_v60, %s6121_s11 }
0x1156   :  { %s4602_s24 = smul.f32 0.001953125, %s5944_s2  ;;  %s7820_s2 = sld [smem:[#allocation5 + $0x16f]] }
0x1158   :  { %s4605_s5 = sadd.f32 1e-05, %s4602_s24  ;;  %s7825_s24 = sld [smem:[#allocation5 + $0x175]] }
0x1159   :  { %4888 = vrot.lane.b32.xlu1 %v4886_v58, %s6120_s9  ;;  %4853 = vrot.lane.b32.xlu0 %v4851_v14, %s6123_s14 }
0x115a   :  { %v4606_v18 = vstv %s4605_s5  ;;  %s7831_s5 = sld [smem:[#allocation5 + $0x156]] }
0x115b   :  { %6015 = vrsqrt.f32 %v4606_v18  ;;  %v4945_v18 = vstv %s7786_s3  ;;  %s5856_s3 = sld [smem:[#allocation5 + $0x17f]] }
0x115d   :  { %4898 = vrot.lane.b32.xlu1 %v4896_v52, %s6119_s8  ;;  %4873 = vrot.lane.b32.xlu0 %v4871_v41, %s6125_s17 }
0x1161   :  { %4918 = vrot.lane.b32.xlu1 %v4916_v51, %s6121_s11 }
0x1165   :  { %v6016_v48 = vpop.eup %6015  ;;  %4938 = vrot.lane.b32.xlu1 %v4936_v32, %s6123_s14 }
0x1166   :  { %5945 = vpush %v6016_v48  ;;  %v4946_v48 = vmul.f32 %v4945_v18, %v7751_v28 }
0x1169   :  { %4958 = vrot.lane.b32.xlu1 %v4956_v57, %s6125_s17 }
0x116d   :  { %4983 = vrot.lane.b32.xlu1 %v4981_v13, %s6119_s8  ;;  %v4970_v13 = vstv %s7795_s7  ;;  %s7935_s7 = sld [smem:[#allocation5 + $0x185]] }
0x1171   :  { %5003 = vrot.lane.b32.xlu1 %v5001_v38, %s6121_s11 }
0x1175   :  { %5023 = vrot.lane.b32.xlu1 %v5021_v50, %s6123_s14 }
0x1179   :  { %5043 = vrot.lane.b32.xlu1 %v5041_v26, %s6125_s17 }
0x1197   :  { %s5946_s23 = spop %5945 }
0x1198   :  { %s4609_s25 = smul.f32 %s5946_s23, %s5795_s29  ;;  %s7873_s29 = sld [smem:[#allocation5 + $0x178]] }
0x1199   :  { %s7889_s23 = sld [smem:[#allocation5 + $0x15f]] }
0x119a   :  { %v4610_v55 = vstv %s4609_s25  ;;  %s7895_s25 = sld [smem:[#allocation5 + $0x180]] }
0x119b   :  { %v4611_v3 = vmul.f32 %v4610_v55, %v7672_v53  ;;  %v4654_v20 = vpop.permute.xlu1 %4653  ;;  %v4634_v24 = vpop.permute.xlu0 %4633 }
0x119c   :  { %v4635_v62 = vrot.slane %v4634_v24, 2  ;;  %v4655_v31 = vrot.slane %v4654_v20, 2 }
0x119d   :  { %v4613_v7 = vadd.f32 %v4612_v47, %v4611_v3  ;;  %v4971_v47 = vmul.f32 %v4970_v13, %v7768_v4 }
0x119e   :  { %v4636_v16 = vsel %vm433_vm15, %v4634_v24, %v4635_v62  ;;  %v4656_v42 = vsel %vm515_vm3, %v4654_v20, %v4655_v31 }
0x119f   :  { %v4614_v43 = vmax.f32 %v4613_v7, 0.0  ;;  %v4638_v23 = vadd.f32 %v4636_v16, %v4627_v11  ;;  %v4674_v1 = vpop.permute.xlu1 %4673  ;;  %v4644_v25 = vpop.permute.xlu0 %4643 }
0x11a0   :  { %v4645_v34 = vrot.slane %v4644_v25, 2  ;;  %v4675_v63 = vrot.slane %v4674_v1, 2 }
0x11a1   :  { %v4615_v17 = vmul.f32 %v4614_v43, %v6394_v8  ;;  %v4906_v8 = vmul.f32 %v4905_v29, %v7751_v28 }
0x11a2   :  { %v4646_v53 = vsel %vm474_vm2, %v4644_v25, %v4645_v34  ;;  %v4676_v59 = vsel %vm597_vm6, %v4674_v1, %v4675_v63  ;;  %v5010_v25 = vstv %s7810_s28  ;;  %s7943_s28 = sld [smem:[#allocation5 + $0x187]] }
0x11a3   :  { %v4648_v19 = vadd.f32 %v4646_v53, %v4638_v23  ;;  %v4694_v40 = vpop.permute.xlu1 %4693  ;;  %4617 = vrot.lane.b32.xlu0 %v4615_v17, %s6104_s30  ;;  %v4664_v12 = vpop.permute.xlu0 %4663  ;;  %s7802_s30 = sld [smem:[#allocation5 + $0x16b]] }
0x11a4   :  { %v4665_v37 = vrot.slane %v4664_v12, 2  ;;  %v4695_v27 = vrot.slane %v4694_v40, 2 }
0x11a5   :  { %v4658_v22 = vadd.f32 %v4656_v42, %v4648_v19  ;;  %v5011_v42 = vmul.f32 %v5010_v25, %v7768_v4  ;;  %v5150_v25 = vstv %s7867_s21  ;;  %s6133_s21 = smov 116  }
0x11a6   :  { %v4666_v21 = vsel %vm556_vm5, %v4664_v12, %v4665_v37  ;;  %v4696_v51 = vsel %vm679_vm8, %v4694_v40, %v4695_v27  ;;  %v5065_v40 = vstv %s7814_s16  ;;  %s7946_s16 = sld [smem:[#allocation5 + $0x186]] }
0x11a7   :  { %v4668_v33 = vadd.f32 %v4666_v21, %v4658_v22  ;;  %v4719_v39 = vpop.permute.xlu1 %4718  ;;  %4908 = vrot.lane.b32.xlu0 %v4906_v8, %s6122_s12  ;;  %v4684_v60 = vpop.permute.xlu0 %4683  ;;  %v5030_v22 = vstv %s7820_s2  ;;  %s7949_s2 = sld [smem:[#allocation5 + $0x168]] }
0x11a8   :  { %v4685_v58 = vrot.slane %v4684_v60, 2  ;;  %v4720_v57 = vrot.slane %v4719_v39, 2 }
0x11a9   :  { %v4678_v14 = vadd.f32 %v4676_v59, %v4668_v33  ;;  %v4990_v20 = vstv %s7802_s30  ;;  %s5861_s30 = sld [smem:[#allocation5 + $0x184]] }
0x11aa   :  { %v4686_v46 = vsel %vm638_vm7, %v4684_v60, %v4685_v58  ;;  %v4721_v15 = vsel %vm433_vm15, %v4719_v39, %v4720_v57  ;;  %v4991_v23 = vmul.f32 %v4990_v20, %v7768_v4  ;;  %v5085_v39 = vstv %s7825_s24  ;;  %s7953_s24 = sld [smem:[#allocation5 + $0x189]] }
0x11ab   :  { %v4688_v52 = vadd.f32 %v4686_v46, %v4678_v14  ;;  %v4729_v41 = vpop.permute.xlu1 %4728  ;;  %4928 = vrot.lane.b32.xlu0 %v4926_v10, %s6124_s15  ;;  %v4704_v56 = vpop.permute.xlu0 %4703  ;;  %v5031_v10 = vmul.f32 %v5030_v22, %v7768_v4  ;;  %v5105_v57 = vstv %s7838_s10  ;;  %s7967_s10 = sld [smem:[#allocation5 + $0x18a]] }
0x11ac   :  { %v4705_v32 = vrot.slane %v4704_v56, 2  ;;  %v4730_v54 = vrot.slane %v4729_v41, 2 }
0x11ad   :  { %v4698_v2 = vadd.f32 %v4696_v51, %v4688_v52  ;;  %v4796_v52 = vstv %s7831_s5  ;;  %s7955_s5 = sld [smem:[#allocation5 + $0x188]] }
0x11ae   :  { %v4706_v30 = vsel %vm720_vm9, %v4704_v56, %v4705_v32  ;;  %v4731_v7 = vsel %vm474_vm2, %v4729_v41, %v4730_v54  ;;  %v5055_v41 = vstv %s7833_s0  ;;  %v4797_v13 = vmul.f32 %v4796_v52, %v7737_v36  ;;  %s7965_s0 = sld [smem:[#allocation5 + $0x18b]] }
0x11af   :  { %v4708_v38 = vadd.f32 %v4706_v30, %v4698_v2  ;;  %v4749_v5 = vpop.permute.xlu1 %4748  ;;  %4948 = vrot.lane.b32.xlu0 %v4946_v48, %s6126_s18  ;;  %v4426_v50 = vpop.permute.xlu0 %4425  ;;  %v5125_v36 = vstv %s7851_s19  ;;  %s6131_s19 = smov 120  }
0x11b0   :  { %v4427_v26 = vrot.slane %v4426_v50, 6  ;;  %v4750_v11 = vrot.slane %v4749_v5, 2 }
0x11b1   :  { %v4713_v55 = vadd.f32 %v4712_v61, %v4708_v38  ;;  %v5075_v38 = vstv %s7845_s13  ;;  %s6130_s13 = smov 114  }
0x11b2   :  { %v4428_v3 = vsel %vm868_vm1, %v4427_v26, %v4426_v50  ;;  %v4751_v53 = vsel %vm556_vm5, %v4749_v5, %v4750_v11 }
0x11b3   :  { %4431 = vst.msk [vmem:[#allocation4 + $0x1e] sm:$0x3f] %vm6533_vm4, %v4428_v3  ;;  %v4769_v35 = vpop.permute.xlu1 %4768  ;;  %4973 = vrot.lane.b32.xlu0 %v4971_v47, %s6120_s9  ;;  %v4739_v24 = vpop.permute.xlu0 %4738  ;;  %v4723_v62 = vadd.f32 %v4721_v15, %v4713_v55 }
0x11b4   :  { %v4740_v16 = vrot.slane %v4739_v24, 2  ;;  %v4770_v29 = vrot.slane %v4769_v35, 2 }
0x11b5   :  { %v4733_v43 = vadd.f32 %v4731_v7, %v4723_v62 }
0x11b6   :  { %v4741_v1 = vsel %vm515_vm3, %v4739_v24, %v4740_v16  ;;  %v4771_v60 = vsel %vm638_vm7, %v4769_v35, %v4770_v29  ;;  %v5095_v24 = vstv %s7859_s20  ;;  %v5115_v29 = vstv %s7873_s29  ;;  %s6132_s20 = smov 118   ;;  %s6134_s29 = smov 106  }
0x11b7   :  { %v4743_v31 = vadd.f32 %v4741_v1, %v4733_v43  ;;  %v4789_v34 = vpop.permute.xlu1 %4788  ;;  %4993 = vrot.lane.b32.xlu0 %v4991_v23, %s6122_s12  ;;  %v4759_v17 = vpop.permute.xlu0 %4758 }
0x11b8   :  { %v4760_v19 = vrot.slane %v4759_v17, 2  ;;  %v4790_v59 = vrot.slane %v4789_v34, 2 }
0x11b9   :  { %v4753_v12 = vadd.f32 %v4751_v53, %v4743_v31 }
0x11ba   :  { %v4761_v63 = vsel %vm597_vm6, %v4759_v17, %v4760_v19  ;;  %v7842_v37 = vld [vmem:[#allocation4 + $0x1e] sm:$0x3f]  ;;  %v4791_v2 = vsel %vm720_vm9, %v4789_v34, %v4790_v59 }
0x11bb   :  { %v4763_v8 = vadd.f32 %v4761_v63, %v4753_v12  ;;  %v4522_v21 = vpop.permute.xlu1 %4521  ;;  %5013 = vrot.lane.b32.xlu0 %v5011_v42, %s6124_s15  ;;  %v4779_v45 = vpop.permute.xlu0 %4778  ;;  %v5066_v33 = vmul.f32 %v5065_v40, %v7842_v37  ;;  %v5086_v32 = vmul.f32 %v5085_v39, %v7842_v37  ;;  %v5056_v61 = vmul.f32 %v5055_v41, %v7842_v37 }
0x11bc   :  { %v4523_v27 = vrot.slane %v4522_v21, 6  ;;  %v4780_v58 = vrot.slane %v4779_v45, 2  ;;  %v5106_v26 = vmul.f32 %v5105_v57, %v7842_v37  ;;  %v5076_v20 = vmul.f32 %v5075_v38, %v7842_v37 }
0x11bd   :  { %v4773_v14 = vadd.f32 %v4771_v60, %v4763_v8  ;;  %5068 = vrot.lane.b32.xlu1 %v5066_v33, %s6119_s8  ;;  %v5126_v11 = vmul.f32 %v5125_v36, %v7842_v37  ;;  %v5096_v17 = vmul.f32 %v5095_v24, %v7842_v37  ;;  %v5170_v8 = vstv %s7879_s22  ;;  %s6135_s22 = smov 104  }
0x11be   :  { %v4524_v46 = vsel %vm868_vm1, %v4523_v27, %v4522_v21  ;;  %v4781_v18 = vsel %vm679_vm8, %v4779_v45, %v4780_v58  ;;  %v5116_v45 = vmul.f32 %v5115_v29, %v7842_v37  ;;  %v5140_v39 = vstv %s7885_s6  ;;  %s6137_s6 = smov 102  }
0x11bf   :  { %4527 = vst.msk [vmem:[#allocation4 + $0x24] sm:$0x3f] %vm6533_vm4, %v4524_v46  ;;  %v4783_v56 = vadd.f32 %v4781_v18, %v4773_v14  ;;  %v4824_v51 = vpop.permute.xlu1 %4823  ;;  %5033 = vrot.lane.b32.xlu0 %v5031_v10, %s6126_s18  ;;  %v4804_v9 = vpop.permute.xlu0 %4803  ;;  %v4881_v14 = vstv %s7889_s23  ;;  %v5190_v46 = vstv %s7895_s25  ;;  %s6138_s23 = smov 100  }
0x11c0   :  { %v4805_v48 = vrot.slane %v4804_v9, 2  ;;  %v4825_v55 = vrot.slane %v4824_v51, 2 }
0x11c1   :  { %v4793_v30 = vadd.f32 %v4791_v2, %v4783_v56  ;;  %5088 = vrot.lane.b32.xlu1 %v5086_v32, %s6121_s11  ;;  %v5160_v56 = vstv %s7901_s26  ;;  %v5210_v2 = vstv %s7907_s27 }
0x11c2   :  { %v4806_v47 = vsel %vm433_vm15, %v4804_v9, %v4805_v48  ;;  %v4826_v16 = vsel %vm515_vm3, %v4824_v51, %v4825_v55  ;;  %v4882_v51 = vmul.f32 %v4881_v14, %v7751_v28 }
0x11c3   :  { %v4798_v5 = vadd.f32 %v4797_v13, %v4793_v30  ;;  %v4844_v50 = vpop.permute.xlu1 %4843  ;;  %5058 = vrot.lane.b32.xlu0 %v5056_v61, %s6120_s9  ;;  %v4814_v54 = vpop.permute.xlu0 %4813  ;;  %v5180_v30 = vstv %s5856_s3  ;;  %v5200_v61 = vstv %s5858_s1 }
0x11c4   :  { %v4815_v15 = vrot.slane %v4814_v54, 2  ;;  %v4845_v43 = vrot.slane %v4844_v50, 2 }
0x11c5   :  { %v4808_v3 = vadd.f32 %v4806_v47, %v4798_v5  ;;  %5108 = vrot.lane.b32.xlu1 %v5106_v26, %s6123_s14 }
0x11c6   :  { %v4816_v35 = vsel %vm474_vm2, %v4814_v54, %v4815_v15  ;;  %v7892_v1 = vld [vmem:[#allocation4 + $0x24] sm:$0x3f]  ;;  %v4846_v42 = vsel %vm597_vm6, %v4844_v50, %v4845_v43 }
0x11c7   :  { %v4818_v62 = vadd.f32 %v4816_v35, %v4808_v3  ;;  %5078 = vrot.lane.b32.xlu0 %v5076_v20, %s6122_s12  ;;  %v4834_v7 = vpop.permute.xlu0 %4833  ;;  %v4864_v31 = vpop.permute.xlu1 %4863  ;;  %v5151_v12 = vmul.f32 %v5150_v25, %v7892_v1  ;;  %v5171_v27 = vmul.f32 %v5170_v8, %v7892_v1  ;;  %v5141_v52 = vmul.f32 %v5140_v39, %v7892_v1 }
0x11c8   :  { %v4835_v23 = vrot.slane %v4834_v7, 2  ;;  %v4865_v63 = vrot.slane %v4864_v31, 2  ;;  %v5191_v32 = vmul.f32 %v5190_v46, %v7892_v1  ;;  %v5161_v57 = vmul.f32 %v5160_v56, %v7892_v1 }
0x11c9   :  { %v4828_v34 = vadd.f32 %v4826_v16, %v4818_v62  ;;  %5128 = vrot.lane.b32.xlu1 %v5126_v11, %s6125_s17  ;;  %v5211_v13 = vmul.f32 %v5210_v2, %v7892_v1  ;;  %v5181_v28 = vmul.f32 %v5180_v30, %v7892_v1  ;;  %v5201_v38 = vmul.f32 %v5200_v61, %v7892_v1 }
0x11ca   :  { %v4836_v53 = vsel %vm556_vm5, %v4834_v7, %v4835_v23  ;;  %v4866_v58 = vsel %vm679_vm8, %v4864_v31, %v4865_v63  ;;  %v5265_v2 = vstv %s7955_s5 }
0x11cb   :  { %v4838_v19 = vadd.f32 %v4836_v53, %v4828_v34  ;;  %5098 = vrot.lane.b32.xlu0 %v5096_v17, %s6124_s15  ;;  %v4854_v40 = vpop.permute.xlu0 %4853  ;;  %v4889_v5 = vpop.permute.xlu1 %4888  ;;  %v5235_v17 = vstv %s7935_s7 }
0x11cc   :  { %v4855_v22 = vrot.slane %v4854_v40, 2  ;;  %v4890_v55 = vrot.slane %v4889_v5, 2 }
0x11cd   :  { %v4848_v21 = vadd.f32 %v4846_v42, %v4838_v19  ;;  %5153 = vrot.lane.b32.xlu1 %v5151_v12, %s6119_s8  ;;  %v5225_v19 = vstv %s5861_s30 }
0x11ce   :  { %v4856_v33 = vsel %vm638_vm7, %v4854_v40, %v4855_v22  ;;  %v4891_v36 = vsel %vm433_vm15, %v4889_v5, %v4890_v55 }
0x11cf   :  { %v4858_v60 = vadd.f32 %v4856_v33, %v4848_v21  ;;  %5118 = vrot.lane.b32.xlu0 %v5116_v45, %s6126_s18  ;;  %v4874_v59 = vpop.permute.xlu0 %4873  ;;  %v4899_v50 = vpop.permute.xlu1 %4898  ;;  %v5255_v33 = vstv %s7943_s28 }
0x11d0   :  { %v4875_v10 = vrot.slane %v4874_v59, 2  ;;  %v4900_v3 = vrot.slane %v4899_v50, 2 }
0x11d1   :  { %v4868_v18 = vadd.f32 %v4866_v58, %v4858_v60  ;;  %5173 = vrot.lane.b32.xlu1 %v5171_v27, %s6121_s11  ;;  %v5245_v27 = vstv %s7946_s16 }
0x11d2   :  { %v4876_v41 = vsel %vm720_vm9, %v4874_v59, %v4875_v10  ;;  %v4901_v11 = vsel %vm474_vm2, %v4899_v50, %v4900_v3  ;;  %v4966_v10 = vstv %s7949_s2 }
0x11d3   :  { %v4878_v9 = vadd.f32 %v4876_v41, %v4868_v18  ;;  %5143 = vrot.lane.b32.xlu0 %v5141_v52, %s6120_s9  ;;  %v4919_v54 = vpop.permute.xlu1 %4918 }
0x11d4   :  { %v4920_v16 = vrot.slane %v4919_v54, 2 }
0x11d5   :  { %v4883_v48 = vadd.f32 %v4882_v51, %v4878_v9  ;;  %5193 = vrot.lane.b32.xlu1 %v5191_v32, %s6123_s14  ;;  %v5275_v32 = vstv %s7953_s24 }
0x11d6   :  { %v4921_v44 = vsel %vm556_vm5, %v4919_v54, %v4920_v16  ;;  %v5295_v54 = vstv %s7965_s0 }
0x11d7   :  { %5163 = vrot.lane.b32.xlu0 %v5161_v57, %s6122_s12  ;;  %v4939_v26 = vpop.permute.xlu1 %4938  ;;  %v4893_v35 = vadd.f32 %v4891_v36, %v4883_v48  ;;  %v4967_v57 = vmul.f32 %v4966_v10, %v7768_v4 }
0x11d8   :  { %v4940_v53 = vrot.slane %v4939_v26, 2 }
0x11d9   :  { %5213 = vrot.lane.b32.xlu1 %v5211_v13, %s6125_s17  ;;  %v4903_v23 = vadd.f32 %v4901_v11, %v4893_v35 }
0x11da   :  { %v4941_v39 = vsel %vm638_vm7, %v4939_v26, %v4940_v53  ;;  %v5285_v26 = vstv %s7967_s10 }
0x11db   :  { %5183 = vrot.lane.b32.xlu0 %v5181_v28, %s6124_s15  ;;  %v4959_v47 = vpop.permute.xlu1 %4958 }
0x11dc   :  { %v4960_v60 = vrot.slane %v4959_v47, 2 }
0x11de   :  { %v4961_v51 = vsel %vm720_vm9, %v4959_v47, %v4960_v60 }
0x11df   :  { %5203 = vrot.lane.b32.xlu0 %v5201_v38, %s6126_s18  ;;  %v7939_v62 = vpop.permute.xlu1 %4983 }
0x11e0   :  { %v4985_v30 = vrot.slane %v7939_v62, 2 }
0x11e2   :  { %v4986_v4 = vsel %vm474_vm2, %v7939_v62, %v4985_v30 }
0x11e3   :  { %v5004_v40 = vpop.permute.xlu1 %5003 }
0x11e7   :  { %v5024_v46 = vpop.permute.xlu1 %5023 }
0x11e8   :  { %v5025_v62 = vrot.slane %v5024_v46, 2 }
0x11ea   :  { %v5026_v53 = vsel %vm638_vm7, %v5024_v46, %v5025_v62 }
0x11eb   :  { %v5044_v55 = vpop.permute.xlu1 %5043 }
0x1215   :  { %v4618_v15 = vpop.permute.xlu0 %4617 }
0x1216   :  { %v4619_v20 = vrot.slane %v4618_v15, 6 }
0x1218   :  { %v4620_v24 = vsel %vm868_vm1, %v4619_v20, %v4618_v15  ;;  %v5005_v15 = vrot.slane %v5004_v40, 2 }
0x1219   :  { %4623 = vst.msk [vmem:[#allocation4 + $0x2a] sm:$0x3f] %vm6533_vm4, %v4620_v24  ;;  %v4909_v7 = vpop.permute.xlu0 %4908 }
0x121a   :  { %v4910_v43 = vrot.slane %v4909_v7, 2 }
0x121c   :  { %v4911_v25 = vsel %vm515_vm3, %v4909_v7, %v4910_v43  ;;  %v5006_v43 = vsel %vm556_vm5, %v5004_v40, %v5005_v15 }
0x121d   :  { %v4913_v31 = vadd.f32 %v4911_v25, %v4903_v23  ;;  %v4929_v34 = vpop.permute.xlu0 %4928 }
0x121e   :  { %v4930_v29 = vrot.slane %v4929_v34, 2 }
0x121f   :  { %v4923_v12 = vadd.f32 %v4921_v44, %v4913_v31 }
0x1220   :  { %v4931_v42 = vsel %vm597_vm6, %v4929_v34, %v4930_v29  ;;  %v7958_v63 = vld [vmem:[#allocation4 + $0x2a] sm:$0x3f]  ;;  %v5045_v29 = vrot.slane %v5044_v55, 2 }
0x1221   :  { %v4933_v22 = vadd.f32 %v4931_v42, %v4923_v12  ;;  %v4949_v8 = vpop.permute.xlu0 %4948  ;;  %v5236_v21 = vmul.f32 %v5235_v17, %v7958_v63  ;;  %v5226_v45 = vmul.f32 %v5225_v19, %v7958_v63  ;;  %v5256_v41 = vmul.f32 %v5255_v33, %v7958_v63 }
0x1222   :  { %v4950_v59 = vrot.slane %v4949_v8, 2  ;;  %v5246_v56 = vmul.f32 %v5245_v27, %v7958_v63  ;;  %v5276_v61 = vmul.f32 %v5275_v32, %v7958_v63  ;;  %v5266_v38 = vmul.f32 %v5265_v2, %v7958_v63 }
0x1223   :  { %v4943_v58 = vadd.f32 %v4941_v39, %v4933_v22  ;;  %5238 = vrot.lane.b32.xlu1 %v5236_v21, %s6119_s8  ;;  %5228 = vrot.lane.b32.xlu0 %v5226_v45, %s6120_s9  ;;  %v5296_v20 = vmul.f32 %v5295_v54, %v7958_v63  ;;  %v5286_v35 = vmul.f32 %v5285_v26, %v7958_v63  ;;  %s5842_s9 = sld [smem:[#allocation5 + $0x171]] }
0x1224   :  { %v4951_v14 = vsel %vm679_vm8, %v4949_v8, %v4950_v59  ;;  %v5046_v40 = vsel %vm720_vm9, %v5044_v55, %v5045_v29 }
0x1225   :  { %v4953_v18 = vadd.f32 %v4951_v14, %v4943_v58  ;;  %v4974_v52 = vpop.permute.xlu0 %4973 }
0x1226   :  { %v4975_v9 = vrot.slane %v4974_v52, 2 }
0x1227   :  { %v4963_v48 = vadd.f32 %v4961_v51, %v4953_v18  ;;  %5258 = vrot.lane.b32.xlu1 %v5256_v41, %s6121_s11  ;;  %5248 = vrot.lane.b32.xlu0 %v5246_v56, %s6122_s12  ;;  %s5851_s11 = sld [smem:[#allocation5 + $0x17a]] }
0x1228   :  { %v4976_v5 = vsel %vm433_vm15, %v4974_v52, %v4975_v9 }
0x1229   :  { %v4968_v13 = vadd.f32 %v4967_v57, %v4963_v48  ;;  %v4994_v28 = vpop.permute.xlu0 %4993  ;;  %v5051_v22 = vstv %s5842_s9 }
0x122a   :  { %v4995_v50 = vrot.slane %v4994_v28, 2  ;;  %v5052_v39 = vmul.f32 %v5051_v22, %v7842_v37 }
0x122b   :  { %v4978_v47 = vadd.f32 %v4976_v5, %v4968_v13  ;;  %5278 = vrot.lane.b32.xlu1 %v5276_v61, %s6123_s14  ;;  %5268 = vrot.lane.b32.xlu0 %v5266_v38, %s6124_s15  ;;  %s5860_s14 = sld [smem:[#allocation5 + $0x183]] }
0x122c   :  { %v4996_v24 = vsel %vm515_vm3, %v4994_v28, %v4995_v50 }
0x122d   :  { %v4988_v36 = vadd.f32 %v4986_v4, %v4978_v47  ;;  %v5014_v3 = vpop.permute.xlu0 %5013  ;;  %v5136_v55 = vstv %s5851_s11 }
0x122e   :  { %v5015_v7 = vrot.slane %v5014_v3, 2 }
0x122f   :  { %v4998_v11 = vadd.f32 %v4996_v24, %v4988_v36  ;;  %v5069_v16 = vpop.permute.xlu1 %5068  ;;  %5298 = vrot.lane.b32.xlu1 %v5296_v20, %s6125_s17  ;;  %5288 = vrot.lane.b32.xlu0 %v5286_v35, %s6126_s18  ;;  %v5137_v35 = vmul.f32 %v5136_v55, %v7892_v1  ;;  %s6128_s17 = smov 124   ;;  %s6129_s18 = smov 122  }
0x1230   :  { %v5016_v31 = vsel %vm597_vm6, %v5014_v3, %v5015_v7  ;;  %v5070_v59 = vrot.slane %v5069_v16, 2 }
0x1231   :  { %v5008_v23 = vadd.f32 %v5006_v43, %v4998_v11  ;;  %v5034_v25 = vpop.permute.xlu0 %5033 }
0x1232   :  { %v5035_v34 = vrot.slane %v5034_v25, 2  ;;  %v5071_v52 = vsel %vm474_vm2, %v5069_v16, %v5070_v59 }
0x1233   :  { %v5018_v17 = vadd.f32 %v5016_v31, %v5008_v23  ;;  %v5089_v44 = vpop.permute.xlu1 %5088 }
0x1234   :  { %v5036_v42 = vsel %vm679_vm8, %v5034_v25, %v5035_v34  ;;  %v5090_v41 = vrot.slane %v5089_v44, 2 }
0x1235   :  { %v5028_v19 = vadd.f32 %v5026_v53, %v5018_v17  ;;  %v5059_v12 = vpop.permute.xlu0 %5058 }
0x1236   :  { %v5060_v45 = vrot.slane %v5059_v12, 2  ;;  %v5091_v37 = vsel %vm556_vm5, %v5089_v44, %v5090_v41 }
0x1237   :  { %v5038_v8 = vadd.f32 %v5036_v42, %v5028_v19  ;;  %v5109_v21 = vpop.permute.xlu1 %5108 }
0x1238   :  { %v5061_v58 = vsel %vm433_vm15, %v5059_v12, %v5060_v45  ;;  %v5110_v48 = vrot.slane %v5109_v21, 2 }
0x1239   :  { %v5048_v33 = vadd.f32 %v5046_v40, %v5038_v8  ;;  %v5079_v60 = vpop.permute.xlu0 %5078 }
0x123a   :  { %v5080_v14 = vrot.slane %v5079_v60, 2  ;;  %v5111_v5 = vsel %vm638_vm7, %v5109_v21, %v5110_v48 }
0x123b   :  { %v5053_v27 = vadd.f32 %v5052_v39, %v5048_v33  ;;  %v5129_v46 = vpop.permute.xlu1 %5128 }
0x123c   :  { %v5081_v51 = vsel %vm515_vm3, %v5079_v60, %v5080_v14  ;;  %v5130_v50 = vrot.slane %v5129_v46, 2  ;;  %v5221_v60 = vstv %s5860_s14 }
0x123d   :  { %v5063_v10 = vadd.f32 %v5061_v58, %v5053_v27  ;;  %v5099_v18 = vpop.permute.xlu0 %5098  ;;  %v5222_v14 = vmul.f32 %v5221_v60, %v7958_v63 }
0x123e   :  { %v5100_v9 = vrot.slane %v5099_v18, 2  ;;  %v5131_v36 = vsel %vm720_vm9, %v5129_v46, %v5130_v50 }
0x123f   :  { %v5073_v56 = vadd.f32 %v5071_v52, %v5063_v10  ;;  %v5154_v30 = vpop.permute.xlu1 %5153 }
0x1240   :  { %v5101_v13 = vsel %vm597_vm6, %v5099_v18, %v5100_v9  ;;  %v5155_v24 = vrot.slane %v5154_v30, 2 }
0x1241   :  { %v5083_v32 = vadd.f32 %v5081_v51, %v5073_v56  ;;  %v5119_v2 = vpop.permute.xlu0 %5118 }
0x1242   :  { %v5120_v28 = vrot.slane %v5119_v2, 2  ;;  %v5156_v25 = vsel %vm474_vm2, %v5154_v30, %v5155_v24 }
0x1243   :  { %v5093_v57 = vadd.f32 %v5091_v37, %v5083_v32  ;;  %v5174_v4 = vpop.permute.xlu1 %5173 }
0x1244   :  { %v5121_v26 = vsel %vm679_vm8, %v5119_v2, %v5120_v28  ;;  %v5175_v31 = vrot.slane %v5174_v4, 2 }
0x1245   :  { %v5103_v61 = vadd.f32 %v5101_v13, %v5093_v57  ;;  %v5144_v38 = vpop.permute.xlu0 %5143 }
0x1246   :  { %v5145_v3 = vrot.slane %v5144_v38, 2  ;;  %v5176_v1 = vsel %vm556_vm5, %v5174_v4, %v5175_v31 }
0x1247   :  { %v5113_v54 = vadd.f32 %v5111_v5, %v5103_v61  ;;  %v5194_v23 = vpop.permute.xlu1 %5193 }
0x1248   :  { %v5146_v16 = vsel %vm433_vm15, %v5144_v38, %v5145_v3  ;;  %v5195_v19 = vrot.slane %v5194_v23, 2 }
0x1249   :  { %v5123_v47 = vadd.f32 %v5121_v26, %v5113_v54  ;;  %v5164_v15 = vpop.permute.xlu0 %5163 }
0x124a   :  { %v5165_v43 = vrot.slane %v5164_v15, 2  ;;  %v5196_v40 = vsel %vm638_vm7, %v5194_v23, %v5195_v19 }
0x124b   :  { %v5133_v20 = vadd.f32 %v5131_v36, %v5123_v47  ;;  %v5214_v12 = vpop.permute.xlu1 %5213 }
0x124c   :  { %v5166_v17 = vsel %vm515_vm3, %v5164_v15, %v5165_v43  ;;  %v5215_v45 = vrot.slane %v5214_v12, 2 }
0x124d   :  { %v5138_v7 = vadd.f32 %v5137_v35, %v5133_v20  ;;  %v5184_v11 = vpop.permute.xlu0 %5183 }
0x124e   :  { %v5185_v44 = vrot.slane %v5184_v11, 2  ;;  %v5216_v27 = vsel %vm720_vm9, %v5214_v12, %v5215_v45 }
0x124f   :  { %v5148_v62 = vadd.f32 %v5146_v16, %v5138_v7 }
0x1250   :  { %v5186_v22 = vsel %vm597_vm6, %v5184_v11, %v5185_v44 }
0x1251   :  { %v5158_v34 = vadd.f32 %v5156_v25, %v5148_v62  ;;  %v5204_v29 = vpop.permute.xlu0 %5203 }
0x1252   :  { %v5205_v8 = vrot.slane %v5204_v29, 2 }
0x1253   :  { %v5168_v53 = vadd.f32 %v5166_v17, %v5158_v34 }
0x1254   :  { %v5206_v39 = vsel %vm679_vm8, %v5204_v29, %v5205_v8 }
0x1255   :  { %v5178_v42 = vadd.f32 %v5176_v1, %v5168_v53 }
0x1257   :  { %v5188_v21 = vadd.f32 %v5186_v22, %v5178_v42 }
0x1259   :  { %v5198_v33 = vadd.f32 %v5196_v40, %v5188_v21 }
0x125b   :  { %v5208_v59 = vadd.f32 %v5206_v39, %v5198_v33 }
0x125d   :  { %v5218_v58 = vadd.f32 %v5216_v27, %v5208_v59 }
0x125f   :  { %v5223_v10 = vadd.f32 %v5222_v14, %v5218_v58 }
0x1295   :  { %v5239_v46 = vpop.permute.xlu1 %5238  ;;  %v5229_v18 = vpop.permute.xlu0 %5228 }
0x1296   :  { %v5240_v52 = vrot.slane %v5239_v46, 2  ;;  %v5230_v41 = vrot.slane %v5229_v18, 2 }
0x1298   :  { %v5231_v56 = vsel %vm433_vm15, %v5229_v18, %v5230_v41  ;;  %v5241_v2 = vsel %vm474_vm2, %v5239_v46, %v5240_v52  ;;  %vm5374_vm15 = vcmask 130048   ;;  %vm5376_vm2 = vcmask 261120  }
0x1299   :  { %v5233_v51 = vadd.f32 %v5231_v56, %v5223_v10  ;;  %v5259_v9 = vpop.permute.xlu1 %5258  ;;  %v5249_v32 = vpop.permute.xlu0 %5248 }
0x129a   :  { %v5260_v37 = vrot.slane %v5259_v9, 2  ;;  %v5250_v48 = vrot.slane %v5249_v32, 2 }
0x129b   :  { %v5243_v57 = vadd.f32 %v5241_v2, %v5233_v51 }
0x129c   :  { %v5251_v30 = vsel %vm515_vm3, %v5249_v32, %v5250_v48  ;;  %v5261_v61 = vsel %vm556_vm5, %v5259_v9, %v5260_v37  ;;  %vm5378_vm3 = vcmask 392192   ;;  %vm5380_vm5 = vcmask 523264  }
0x129d   :  { %v5253_v13 = vadd.f32 %v5251_v30, %v5243_v57  ;;  %v5279_v28 = vpop.permute.xlu1 %5278  ;;  %v5269_v63 = vpop.permute.xlu0 %5268  ;;  %v6140_v32 = vmov 1966171168  }
0x129e   :  { %v5280_v38 = vrot.slane %v5279_v28, 2  ;;  %v5270_v5 = vrot.slane %v5269_v63, 2  ;;  %v5401_v2 = vunpack.c.l.s4 %v6140_v32 }
0x129f   :  { %v5263_v50 = vadd.f32 %v5261_v61, %v5253_v13 }
0x12a0   :  { %v5271_v54 = vsel %vm597_vm6, %v5269_v63, %v5270_v5  ;;  %v5281_v4 = vsel %vm638_vm7, %v5279_v28, %v5280_v38  ;;  %vm5382_vm6 = vcmask 654336   ;;  %vm5384_vm7 = vcmask 785408  }
0x12a1   :  { %v5273_v26 = vadd.f32 %v5271_v54, %v5263_v50  ;;  %v5299_v55 = vpop.permute.xlu1 %5298  ;;  %v5289_v47 = vpop.permute.xlu0 %5288  ;;  %v5402_v37 = vunpack.c.0.s8 %v5401_v2 }
0x12a2   :  { %v5300_v15 = vrot.slane %v5299_v55, 2  ;;  %v5290_v36 = vrot.slane %v5289_v47, 2 }
0x12a3   :  { %v5283_v3 = vadd.f32 %v5281_v4, %v5273_v26  ;;  %v5405_v57 = vsub.s32 %v5402_v37, %v6197_v6 }
0x12a4   :  { %v5291_v20 = vsel %vm679_vm8, %v5289_v47, %v5290_v36  ;;  %v5301_v24 = vsel %vm720_vm9, %v5299_v55, %v5300_v15  ;;  %vm5368_vm8 = vcmask 818176   ;;  %vm5335_vm9 = vcmask 932864  }
0x12a5   :  { %v5293_v35 = vadd.f32 %v5291_v20, %v5283_v3 }
0x12a7   :  { %v5303_v7 = vadd.f32 %v5301_v24, %v5293_v35 }
0x12a9   :  { %v5311_v11 = vrot.slane %v5303_v7, %v6385_v49  ;;  %v5356_v43 = vcombine.high %v5303_v7, %v5303_v7 }
0x12ab   :  { %5315 = vrot.lane.b32.xlu1 %v5311_v11, %s6128_s17  ;;  %5312 = vrot.lane.b32.xlu0 %v5311_v11, %s6119_s8  ;;  %v5330_v16 = vcombine.high %v5311_v11, %v5311_v11  ;;  %s6136_s8 = smov 112   ;;  %v5363_v62 = vrot.slane %v5356_v43, %v6385_v49 }
0x12af   :  { %5318 = vrot.lane.b32.xlu1 %v5311_v11, %s6129_s18  ;;  %5331 = vrot.lane.b32.xlu0 %v5311_v11, %s6130_s13 }
0x12b3   :  { %5321 = vrot.lane.b32.xlu1 %v5311_v11, %s6131_s19  ;;  %5341 = vrot.lane.b32.xlu0 %v5330_v16, %s6122_s12  ;;  %s6139_s12 = smov 98  }
0x12b7   :  { %5324 = vrot.lane.b32.xlu1 %v5311_v11, %s6132_s20  ;;  %5344 = vrot.lane.b32.xlu0 %v5330_v16, %s6124_s15  ;;  %s6141_s15 = smov [#allocation12]  }
0x12b8   :  { %s5435_s25 = sshll.u32 %s6141_s15, 4  ;;  %s5436_s25 = int_to_ptr.vmem [resolvable:$true] %s5435_s25 }
0x12b9   :  { %s6068_s26 = scalar_lea.vmem %s5436_s25, 64  ;;  %p6073_p0 = scmp.lt.s32.totalorder %s5436_s25, %s5436_s25 }
0x12ba   :  { %p6069_p13 = scmp.ne.s32.totalorder %s5436_s25, %s6068_s26  ;;  %p6074_p1 = scmp.lt.s32.totalorder %s6068_s26, %s6068_s26 }
0x12bb   :  { %5327 = vrot.lane.b32.xlu1 %v5311_v11, %s6133_s21  ;;  %5347 = vrot.lane.b32.xlu0 %v5330_v16, %s6134_s29 }
0x12bc   :  { %p6075_p2 = por %p6074_p1, %p6073_p0 }
0x12be   :  { %p6076_p3 = pnand %p6075_p2, %p6069_p13 }
0x12bf   :  { %5350 = vrot.lane.b32.xlu0 %v5330_v16, %s6135_s22  ;;  %5338 = vrot.lane.b32.xlu1 %v5330_v16, %s6136_s8 }
0x12c3   :  { %5353 = vrot.lane.b32.xlu0 %v5330_v16, %s6137_s6  ;;  %5364 = vrot.lane.b32.xlu1 %v5330_v16, %s6138_s23 }
0x12c7   :  { %5366 = vrot.lane.b32.xlu0 %v5363_v62, %s6138_s23  ;;  %5333 = vrot.lane.b32.xlu1 %v5330_v16, %s6130_s13 }
0x12cb   :  { %5371 = vrot.lane.b32.xlu0 %v5363_v62, %s6139_s12 }
0x131d   :  { %v5316_v23 = vpop.permute.xlu1 %5315  ;;  %v5313_v25 = vpop.permute.xlu0 %5312 }
0x131e   :  { %v5375_v49 = vsel %vm5374_vm15, %v5303_v7, %v5313_v25 }
0x131f   :  { %v5377_v45 = vsel %vm5376_vm2, %v5375_v49, %v5316_v23 }
0x1321   :  { %v5319_v31 = vpop.permute.xlu1 %5318  ;;  %v5332_v34 = vpop.permute.xlu0 %5331 }
0x1322   :  { %v5379_v39 = vsel %vm5378_vm3, %v5377_v45, %v5319_v31 }
0x1325   :  { %v5322_v17 = vpop.permute.xlu1 %5321  ;;  %v5342_v44 = vpop.permute.xlu0 %5341 }
0x1326   :  { %v5381_v60 = vsel %vm5380_vm5, %v5379_v39, %v5322_v17 }
0x1329   :  { %v5325_v53 = vpop.permute.xlu1 %5324  ;;  %v5345_v29 = vpop.permute.xlu0 %5344 }
0x132a   :  { %v5383_v59 = vsel %vm5382_vm6, %v5381_v60, %v5325_v53 }
0x132d   :  { %v5328_v1 = vpop.permute.xlu1 %5327  ;;  %v5348_v19 = vpop.permute.xlu0 %5347 }
0x132e   :  { %v5385_v10 = vsel %vm5384_vm7, %v5383_v59, %v5328_v1 }
0x1331   :  { %v5351_v12 = vpop.permute.xlu0 %5350  ;;  %v5339_v42 = vpop.permute.xlu1 %5338 }
0x1332   :  { %v5388_v22 = vsel %vm5374_vm15, %v5339_v42, %v5342_v44 }
0x1333   :  { %v5389_v8 = vsel %vm5376_vm2, %v5388_v22, %v5345_v29 }
0x1334   :  { %v5390_v33 = vsel %vm5378_vm3, %v5389_v8, %v5348_v19 }
0x1335   :  { %v5354_v21 = vpop.permute.xlu0 %5353  ;;  %v5365_v40 = vpop.permute.xlu1 %5364  ;;  %v5391_v27 = vsel %vm5380_vm5, %v5390_v33, %v5351_v12 }
0x1336   :  { %v5392_v41 = vsel %vm5382_vm6, %v5391_v27, %v5354_v21 }
0x1339   :  { %v5367_v58 = vpop.permute.xlu0 %5366  ;;  %v5334_v14 = vpop.permute.xlu1 %5333 }
0x133a   :  { %v5369_v46 = vsel %vm5368_vm8, %v5365_v40, %v5367_v58  ;;  %v5336_v18 = vsel %vm5335_vm9, %v5332_v34, %v5334_v14 }
0x133b   :  { %v5387_v52 = vsel %vm5386_vm10, %v5385_v10, %v5336_v18  ;;  %v5393_v51 = vsel %vm5384_vm7, %v5392_v41, %v5369_v46 }
0x133c   :  { %6017 = vtanh.f32 %v5387_v52 }
0x133d   :  { %v5372_v56 = vpop.permute.xlu0 %5371 }
0x133e   :  { %v5394_v9 = vsel %vm5386_vm10, %v5393_v51, %v5372_v56 }
0x133f   :  { %6019 = vtanh.f32 %v5394_v9 }
0x1346   :  { %v6018_v48 = vpop.eup %6017 }
0x1349   :  { %v6020_v30 = vpop.eup %6019 }
0x134a   :  { %v5399_v13 = vcombine.low %v6018_v48, %v6020_v30 }
0x134c   :  { %v5406_v28 = vrot.slane %v5399_v13, %v5405_v57 }
0x134e   :  { %v5407_v63 = vcombine.high %v5406_v28, %v5406_v28  ;;  %v5414_v61 = vrot.slane %v5406_v28, %v5405_v57 }
0x1350   :  { %v5421_v38 = vrot.slane %v5407_v63, %v5405_v57  ;;  %5428 = vst.msk [vmem:[#allocation12] sm:$0x3] %vm5426_vm11, %v5414_v61 }
0x1352   :  { %5429 = vst.msk [vmem:[#allocation12 + $0x2] sm:$0x3] %vm5426_vm11, %v5421_v38 }
0x1353   :  { %6079 = shalt.err (!%p6076_p3)
}
0x1354   :  { %s6080_s1 = scalar_lea.hbm %s8053_s4, 64 }
0x1355   :  { %p6081_p4 = scmp.ne.s32.totalorder %s8053_s4, %s6080_s1  ;;  %p6084_p5 = scmp.lt.u32.totalorder %s6080_s1, %s8053_s4 }
0x1357   :  { %p6086_p6 = pnand %p6084_p5, %p6081_p4 }
0x1359   :  { %6089 = shalt.err (!%p6086_p6)
}
0x135a   :  { %s6142_s2 = smov 32   ;;  %s6143_s24 = smov 2  }
0x135b   :  { %5441 = dma.vmem_to_hbm [thread:$0]  %s5436_s25, 64, %s8053_s4, [#allocation6], %s6142_s2, %s6142_s2, %s6143_s24  }
0x135c   :  { %6096 = dma.done.wait [#allocation6], 64  }
0x135d   :  { %6097 = vsyncadd [#allocation6], 4294967232 }
0x135e   :  { %5445 = vsyncpa [#allocation6], 1 }
0x135f   :  { %5446 = vsyncpa [#allocation7], 1 }
0x1360   :  { %5447 = vsyncpa [#allocation8], 1 }
0x1361   :  { %5448 = vsyncpa [#allocation11], 1 }

</bundles_post_ra>
